<compile_context>
chip_gen: v5e
topology: v5e:2x2
jax: 0.10.0
libtpu: 0.0.40
codegen_flags: <defaults>
</compile_context>

<pallas_src>
import jax
import jax.numpy as jnp
import numpy as np
from jax import lax
from jax.experimental import pallas as pl
from jax.experimental.pallas import tpu as pltpu


# --------------------------------------------------------------------------
# Parameter construction (raw PyTorch-layout params)
# --------------------------------------------------------------------------
def make_gnconv1_params(key, dim, dim_out, kernel, order=5):
    dims = [dim // 2 ** i for i in range(order)]
    dims.reverse()
    cg = sum(dims)
    assert dims[0] + cg == 2 * dim, "dim must be divisible by 2**(order-1)"
    ks = iter(jax.random.split(key, 19))
    f32 = jnp.float32

    def rnd(k, shape, scale):
        return scale * jax.random.normal(k, shape, dtype=f32)

    p = {}
    p["w_proj_in"] = rnd(next(ks), (2 * dim, dim, 1, 1), 1.0 / np.sqrt(dim))
    p["b_proj_in"] = rnd(next(ks), (2 * dim,), 0.1)
    p["w_dw"] = rnd(next(ks), (cg, 1, 7, 7), 1.0 / 7.0)
    p["b_dw"] = rnd(next(ks), (cg,), 0.1)
    p["w_pw"], p["b_pw"] = [], []
    for j in range(order - 1):
        p["w_pw"].append(rnd(next(ks), (dims[j + 1], dims[j], 1, 1),
                             1.0 / np.sqrt(dims[j])))
        p["b_pw"].append(rnd(next(ks), (dims[j + 1],), 0.1))
    p["w_proj_out"] = rnd(next(ks), (dim, dim, 1, 1), 1.0 / np.sqrt(dim))
    p["b_proj_out"] = rnd(next(ks), (dim,), 0.1)
    p["w_out"] = rnd(next(ks), (dim_out, dim, kernel, kernel),
                     1.0 / np.sqrt(dim * kernel * kernel))
    p["bn_gamma"] = jax.random.uniform(next(ks), (dim_out,), dtype=f32, minval=0.5, maxval=1.5)
    p["bn_beta"] = rnd(next(ks), (dim_out,), 0.1)
    p["bn_mean"] = rnd(next(ks), (dim_out,), 0.1)
    p["bn_var"] = jax.random.uniform(next(ks), (dim_out,), dtype=f32, minval=0.5, maxval=1.5)
    return p


# --------------------------------------------------------------------------
# Pallas forward: one fused kernel, grid over batch (sequential)
# --------------------------------------------------------------------------
def gnconv1_forward(x_nchw, p, *, dim, dim_out, kernel, stride=1, order=5, s=1.0):
    dims = [dim // 2 ** i for i in range(order)]
    dims.reverse()
    d0, cg = dims[0], sum(dims)
    B, C, H, W = x_nchw.shape
    assert C == dim
    k = kernel
    pad = k // 2
    Ho = (H + 2 * pad - k) // stride + 1
    Wo = (W + 2 * pad - k) // stride + 1

    f32, bf16 = jnp.float32, jnp.bfloat16
    Cp = 2 * dim                                  # dw scratch channels = all proj_in channels
    CO = ((dim_out + 127) // 128) * 128           # lane-dense padded output channels
    LPW = 8                                       # left halo -> sublane-aligned interior store
    LPW2 = max(8, pad)
    Hp, Wp = H + 6, LPW + W + 3                   # dw halo scratch (7x7, pad=3)
    Hp2, Wp2 = H + 2 * pad, LPW2 + W + pad        # out-conv halo scratch
    CB = LPW2 - pad                               # column base for out-conv tap reads

    # ---- fold raw PyTorch-layout params into kernel-friendly matrices ----
    perm = np.concatenate([np.arange(d0, 2 * dim), np.arange(d0)])   # [abc | pwa]
    w_in = p["w_proj_in"][:, :, 0, 0].T[:, perm].astype(bf16)         # (dim, 2*dim)
    b_in = p["b_proj_in"][perm][None, :].astype(f32)                  # (1, 2*dim)

    # depthwise: fold bias and scale s, zero-pad channels cg -> Cp
    w_dw = jnp.transpose(p["w_dw"][:, 0], (1, 2, 0)).reshape(49, cg) * s
    w_dw = jnp.pad(w_dw, ((0, 0), (0, Cp - cg))).astype(f32)          # (49, Cp)
    b_dw = jnp.pad(p["b_dw"][None, :] * s, ((0, 0), (0, Cp - cg))).astype(f32)

    pw_flat = []
    for i in range(order - 1):
        pw_flat.append(p["w_pw"][i][:, :, 0, 0].T.astype(bf16))       # (dims[i], dims[i+1])
        pw_flat.append(p["b_pw"][i][None, :].astype(f32))

    w_po = p["w_proj_out"][:, :, 0, 0].T.astype(bf16)                 # (dim, dim)
    b_po = p["b_proj_out"][None, :].astype(f32)

    # out conv as one wide matmul weight (dim, k*k*CO), tap-major, zero-padded to CO
    w_out = jnp.transpose(p["w_out"], (2, 3, 1, 0))                   # (k, k, dim, dim_out)
    w_out = jnp.pad(w_out, ((0, 0), (0, 0), (0, 0), (0, CO - dim_out)))
    w_out_wide = jnp.transpose(w_out, (2, 0, 1, 3)).reshape(dim, k * k * CO).astype(bf16)
    bn_scale = p["bn_gamma"] / jnp.sqrt(p["bn_var"] + 1e-5)
    bn_bias = p["bn_beta"] - p["bn_mean"] * bn_scale
    bn_scale = jnp.pad(bn_scale, (0, CO - dim_out))[None, :].astype(f32)
    bn_bias = jnp.pad(bn_bias, (0, CO - dim_out))[None, :].astype(f32)

    weights = [w_in, b_in, w_dw, b_dw, *pw_flat, w_po, b_po, w_out_wide, bn_scale, bn_bias]

    # NHWC, flattened pixels, bf16 at the call boundary (halves input DMA bytes)
    x = jnp.transpose(x_nchw, (0, 2, 3, 1)).reshape(B, H * W, dim).astype(bf16)

    def kernel_fn(x_ref, *refs):
        it = iter(refs)
        w_in_r = next(it); b_in_r = next(it); w_dw_r = next(it); b_dw_r = next(it)
        pw_r = [(next(it), next(it)) for _ in range(order - 1)]
        w_po_r = next(it); b_po_r = next(it)
        w_out_r = next(it); bn_s_r = next(it); bn_b_r = next(it)
        o_ref = next(it)
        abc_pad = next(it); dw_s = next(it)
        yw_pads = [next(it) for _ in range(k)]

        # one-time halo zeroing: scratch persists across the sequential batch grid and
        # the interiors are fully overwritten every step, so the zero halo survives.
        @pl.when(pl.program_id(0) == 0)
        def _init():
            abc_pad[...] = jnp.zeros_like(abc_pad)
            for r in yw_pads:
                r[...] = jnp.zeros_like(r)

        # ---- proj_in (1x1) : one MXU matmul over all pixels (bf16 operands, f32 acc) ----
        fused = jnp.dot(x_ref[...], w_in_r[...],
                        preferred_element_type=jnp.float32) + b_in_r[...]   # (HW, 2*dim) f32
        pwa = fused[:, cg:]                                                 # (HW, d0)

        # store the full fused block (abc in lanes [0,cg), pwa in the zero-weight tail)
        # into the dw halo scratch; interior store starts at sublane offset LPW=8.
        abc_pad[3:3 + H, LPW:LPW + W, :] = fused.reshape(H, W, Cp)

        # ---- depthwise 7x7 (*s and bias folded): row-strip accumulation ----
        w_dw_all = w_dw_r[...]                                  # (49, Cp)
        bias_tile = jnp.broadcast_to(b_dw_r[...], (W, Cp))      # hoisted, accumulator init

        def dw_row(h, carry):
            acc = bias_tile
            for kh in range(7):
                row = abc_pad[h + kh]                           # (Wp, Cp)
                for kw in range(7):
                    t = kh * 7 + kw
                    acc = acc + row[LPW - 3 + kw: LPW - 3 + kw + W, :] * w_dw_all[t:t + 1, :]
            dw_s[h] = acc
            return carry

        lax.fori_loop(0, H, dw_row, 0)
        dwf = dw_s[...].reshape(H * W, Cp)

        # ---- recursive gating (tiny 1x1 convs): bf16 MXU operands, f32 elementwise ----
        cur = pwa * dwf[:, :d0]
        off = d0
        for i in range(order - 1):
            wi, bi = pw_r[i]
            cur = jnp.dot(cur.astype(jnp.bfloat16), wi[...],
                          preferred_element_type=jnp.float32) + bi[...]
            cur = cur * dwf[:, off:off + dims[i + 1]]
            off += dims[i + 1]

        # ---- proj_out (1x1) ----
        y = jnp.dot(cur.astype(jnp.bfloat16), w_po_r[...],
                    preferred_element_type=jnp.float32) + b_po_r[...]       # (HW, dim) f32

        # ---- out conv as ONE wide matmul, then k*k shifted adds + BN + Hardswish ----
        yw = jnp.dot(y.astype(jnp.bfloat16), w_out_r[...],
                     preferred_element_type=jnp.float32)                    # (HW, k*k*CO) f32
        for kh in range(k):
            yw_pads[kh][pad:pad + H, LPW2:LPW2 + W, :] = (
                yw[:, kh * k * CO:(kh + 1) * k * CO].reshape(H, W, k * CO))

        bn_sc = bn_s_r[...]
        bn_bi = bn_b_r[...]

        def out_row(i, carry):
            acc = None
            for kh in range(k):
                blk = yw_pads[kh][i * stride + kh]                          # (Wp2, k*CO)
                for kw in range(k):
                    c0 = CB + kw
                    if stride == 1:
                        win = blk[c0:c0 + Wo, kw * CO:(kw + 1) * CO]
                    else:
                        # TODO(synk): strided out-conv path not exercised by this test.
                        win = blk[c0:c0 + (Wo - 1) * stride + 1:stride, kw * CO:(kw + 1) * CO]
                    acc = win if acc is None else acc + win
            z = acc * bn_sc + bn_bi                                          # folded BN
            z = z * jnp.clip(z + 3.0, 0.0, 6.0) * (1.0 / 6.0)                # hardswish
            o_ref[i] = z.astype(o_ref.dtype)                                 # lane-dense row store
            return carry

        lax.fori_loop(0, Ho, out_row, 0)

    # ---- specs / grid ----
    def _bspec(w):
        nd = w.ndim
        return pl.BlockSpec(w.shape, lambda b, _nd=nd: (0,) * _nd)

    in_specs = [pl.BlockSpec((None, H * W, dim), lambda b: (b, 0, 0))]
    in_specs += [_bspec(w) for w in weights]
    out_spec = pl.BlockSpec((None, Ho, Wo, CO), lambda b: (b, 0, 0, 0))

    scratch_shapes = [
        pltpu.VMEM((Hp, Wp, Cp), jnp.float32),                 # dw halo buffer
        pltpu.VMEM((H, W, Cp), jnp.float32),                   # dw result
    ] + [pltpu.VMEM((Hp2, Wp2, k * CO), jnp.float32) for _ in range(k)]   # out-conv halo bufs

    # explicit scoped-VMEM budget (working set + double-buffered IO/weights + headroom)
    scratch_bytes = 4 * (Hp * Wp * Cp + H * W * Cp + k * Hp2 * Wp2 * k * CO)
    io_bytes = 2 * (H * W * dim * 2 + Ho * Wo * CO * 4)
    w_bytes = 2 * sum(int(w.size) * w.dtype.itemsize for w in weights)
    live_bytes = 4 * H * W * (k * k * CO + 2 * Cp) + 4 * Ho * Wo * CO
    vmem_limit = int(1.5 * (scratch_bytes + io_bytes + w_bytes + live_bytes)) + (4 << 20)
    vmem_limit = max(min(vmem_limit, 56 << 20), 16 << 20)

    out = pl.pallas_call(
        kernel_fn,
        out_shape=jax.ShapeDtypeStruct((B, Ho, Wo, CO), jnp.float32),
        grid=(B,),
        in_specs=in_specs,
        out_specs=out_spec,
        scratch_shapes=scratch_shapes,
        compiler_params=pltpu.CompilerParams(
            # "arbitrary": grid runs sequentially on one core so the one-time halo
            # zeroing of the persistent scratch is valid (near-zero cost vs "parallel"
            # on single-TC chips).  TODO(synk): v7x megacore -> parallel H-block axis.
            dimension_semantics=("arbitrary",),
            vmem_limit_bytes=vmem_limit,
        ),
    )(x, *weights)

    out = out[..., :dim_out]                     # drop lane padding
    return jnp.transpose(out, (0, 3, 1, 2))      # back to NCHW


# --------------------------------------------------------------------------
# Independent pure-JAX reference (XLA convs, f32 HIGHEST precision)
# --------------------------------------------------------------------------
def gnconv1_reference(x_nchw, p, *, dim, dim_out, kernel, stride=1, order=5, s=1.0):
    dims = [dim // 2 ** i for i in range(order)]
    dims.reverse()
    d0, cg = dims[0], sum(dims)
    hp = lax.Precision.HIGHEST

    def conv(x, w, b=None, strd=1, padv=0, groups=1):
        y = lax.conv_general_dilated(
            x, w, window_strides=(strd, strd),
            padding=((padv, padv), (padv, padv)),
            dimension_numbers=("NCHW", "OIHW", "NCHW"),
            feature_group_count=groups, precision=hp)
        if b is not None:
            y = y + b.reshape(1, -1, 1, 1)
        return y

    fused = conv(x_nchw, p["w_proj_in"], p["b_proj_in"])
    pwa, abc = fused[:, :d0], fused[:, d0:]
    dw_abc = conv(abc, p["w_dw"], p["b_dw"], padv=3, groups=cg) * s
    dw_list, off = [], 0
    for d in dims:
        dw_list.append(dw_abc[:, off:off + d])
        off += d
    xx = pwa * dw_list[0]
    for i in range(order - 1):
        xx = conv(xx, p["w_pw"][i], p["b_pw"][i]) * dw_list[i + 1]
    xx = conv(xx, p["w_proj_out"], p["b_proj_out"])
    z = conv(xx, p["w_out"], None, strd=stride, padv=kernel // 2)
    scale = p["bn_gamma"] / jnp.sqrt(p["bn_var"] + 1e-5)
    z = z * scale.reshape(1, -1, 1, 1) + (p["bn_beta"] - p["bn_mean"] * scale).reshape(1, -1, 1, 1)
    return z * jnp.clip(z + 3.0, 0.0, 6.0) / 6.0


# --------------------------------------------------------------------------
if __name__ == "__main__":
    key = jax.random.PRNGKey(0)
    k_x, k_p = jax.random.split(key)

    # gnconv1(dim=64, dim_out=64, kernel=3, stride=1, order=5, s=1.0)
    B, H, W = 2, 16, 16
    dim, dim_out, kernel, strd, order, s = 64, 64, 3, 1, 5, 1.0

    x = jax.random.normal(k_x, (B, dim, H, W), dtype=jnp.float32)
    p = make_gnconv1_params(k_p, dim, dim_out, kernel, order=order)

    out = jax.block_until_ready(
        gnconv1_forward(x, p, dim=dim, dim_out=dim_out, kernel=kernel,
                        stride=strd, order=order, s=s))
    ref = jax.block_until_ready(
        gnconv1_reference(x, p, dim=dim, dim_out=dim_out, kernel=kernel,
                          stride=strd, order=order, s=s))

    assert out.shape == (B, dim_out, H, W), out.shape
    assert ref.shape == out.shape
    # Tolerance loosened vs the all-f32 version: the kernel now feeds bf16 operands to
    # the MXU (f32 accumulation) through a 7-matmul-deep chain; the reference is f32.
    np.testing.assert_allclose(np.asarray(out), np.asarray(ref), rtol=5e-2, atol=1e-1)
    print("KERNEL_OK")
</pallas_src>

<mosaic_0001>
module attributes {stable_mosaic.version = 11 : i64} {
  func.func @kernel_fn(%arg0: i32, %arg1: memref<1x256x64xbf16, #tpu.memory_space<vmem>>, %arg2: memref<64x128xbf16, #tpu.memory_space<vmem>>, %arg3: memref<1x128xf32, #tpu.memory_space<vmem>>, %arg4: memref<49x128xf32, #tpu.memory_space<vmem>>, %arg5: memref<1x128xf32, #tpu.memory_space<vmem>>, %arg6: memref<4x8xbf16, #tpu.memory_space<vmem>>, %arg7: memref<1x8xf32, #tpu.memory_space<vmem>>, %arg8: memref<8x16xbf16, #tpu.memory_space<vmem>>, %arg9: memref<1x16xf32, #tpu.memory_space<vmem>>, %arg10: memref<16x32xbf16, #tpu.memory_space<vmem>>, %arg11: memref<1x32xf32, #tpu.memory_space<vmem>>, %arg12: memref<32x64xbf16, #tpu.memory_space<vmem>>, %arg13: memref<1x64xf32, #tpu.memory_space<vmem>>, %arg14: memref<64x64xbf16, #tpu.memory_space<vmem>>, %arg15: memref<1x64xf32, #tpu.memory_space<vmem>>, %arg16: memref<64x1152xbf16, #tpu.memory_space<vmem>>, %arg17: memref<1x128xf32, #tpu.memory_space<vmem>>, %arg18: memref<1x128xf32, #tpu.memory_space<vmem>>, %arg19: memref<1x16x16x128xf32, #tpu.memory_space<vmem>>, %arg20: memref<22x27x128xf32, #tpu.memory_space<vmem>>, %arg21: memref<16x16x128xf32, #tpu.memory_space<vmem>>, %arg22: memref<18x25x384xf32, #tpu.memory_space<vmem>>, %arg23: memref<18x25x384xf32, #tpu.memory_space<vmem>>, %arg24: memref<18x25x384xf32, #tpu.memory_space<vmem>>) attributes {dimension_semantics = [#tpu.dimension_semantics<arbitrary>], iteration_bounds = array<i64: 2>, scalar_prefetch = 0 : i64, scratch_operands = 5 : i64, tpu.core_type = #tpu.core_type<tc>, window_params = [{transform_indices = @transform_0, window_bounds = array<i64: 1, 256, 64>}, {pipeline_mode = #tpu.pipeline_mode<synchronous>, transform_indices = @transform_1, window_bounds = array<i64: 64, 128>}, {pipeline_mode = #tpu.pipeline_mode<synchronous>, transform_indices = @transform_2, window_bounds = array<i64: 1, 128>}, {pipeline_mode = #tpu.pipeline_mode<synchronous>, transform_indices = @transform_3, window_bounds = array<i64: 49, 128>}, {pipeline_mode = #tpu.pipeline_mode<synchronous>, transform_indices = @transform_4, window_bounds = array<i64: 1, 128>}, {pipeline_mode = #tpu.pipeline_mode<synchronous>, transform_indices = @transform_5, window_bounds = array<i64: 4, 8>}, {pipeline_mode = #tpu.pipeline_mode<synchronous>, transform_indices = @transform_6, window_bounds = array<i64: 1, 8>}, {pipeline_mode = #tpu.pipeline_mode<synchronous>, transform_indices = @transform_7, window_bounds = array<i64: 8, 16>}, {pipeline_mode = #tpu.pipeline_mode<synchronous>, transform_indices = @transform_8, window_bounds = array<i64: 1, 16>}, {pipeline_mode = #tpu.pipeline_mode<synchronous>, transform_indices = @transform_9, window_bounds = array<i64: 16, 32>}, {pipeline_mode = #tpu.pipeline_mode<synchronous>, transform_indices = @transform_10, window_bounds = array<i64: 1, 32>}, {pipeline_mode = #tpu.pipeline_mode<synchronous>, transform_indices = @transform_11, window_bounds = array<i64: 32, 64>}, {pipeline_mode = #tpu.pipeline_mode<synchronous>, transform_indices = @transform_12, window_bounds = array<i64: 1, 64>}, {pipeline_mode = #tpu.pipeline_mode<synchronous>, transform_indices = @transform_13, window_bounds = array<i64: 64, 64>}, {pipeline_mode = #tpu.pipeline_mode<synchronous>, transform_indices = @transform_14, window_bounds = array<i64: 1, 64>}, {pipeline_mode = #tpu.pipeline_mode<synchronous>, transform_indices = @transform_15, window_bounds = array<i64: 64, 1152>}, {pipeline_mode = #tpu.pipeline_mode<synchronous>, transform_indices = @transform_16, window_bounds = array<i64: 1, 128>}, {pipeline_mode = #tpu.pipeline_mode<synchronous>, transform_indices = @transform_17, window_bounds = array<i64: 1, 128>}, {transform_indices = @transform_18, window_bounds = array<i64: 1, 16, 16, 128>}]} {
    %c0_i32 = arith.constant 0 : i32
    %0 = arith.cmpi eq, %arg0, %c0_i32 : i32
    %1 = arith.extui %0 : i1 to i32
    %c0_i32_0 = arith.constant 0 : i32
    %2 = arith.cmpi ne, %1, %c0_i32_0 : i32
    scf.if %2 {
      %cst_61 = arith.constant 0.000000e+00 : f32
      %75 = vector.broadcast %cst_61 : f32 to vector<22x27x128xf32>
      %c0_62 = arith.constant 0 : index
      %c0_63 = arith.constant 0 : index
      %c0_64 = arith.constant 0 : index
      %76 = vector.load %arg20[%c0_62, %c0_63, %c0_64] : memref<22x27x128xf32, #tpu.memory_space<vmem>>, vector<22x27x128xf32>
      tpu.vector_store %arg20[%c0_62, %c0_63, %c0_64], %75 {strides = array<i32>} : memref<22x27x128xf32, #tpu.memory_space<vmem>>, vector<22x27x128xf32>,
      %cst_65 = arith.constant 0.000000e+00 : f32
      %77 = vector.broadcast %cst_65 : f32 to vector<18x25x384xf32>
      %c0_66 = arith.constant 0 : index
      %c0_67 = arith.constant 0 : index
      %c0_68 = arith.constant 0 : index
      %78 = vector.load %arg22[%c0_66, %c0_67, %c0_68] : memref<18x25x384xf32, #tpu.memory_space<vmem>>, vector<18x25x384xf32>
      tpu.vector_store %arg22[%c0_66, %c0_67, %c0_68], %77 {strides = array<i32>} : memref<18x25x384xf32, #tpu.memory_space<vmem>>, vector<18x25x384xf32>,
      %cst_69 = arith.constant 0.000000e+00 : f32
      %79 = vector.broadcast %cst_69 : f32 to vector<18x25x384xf32>
      %c0_70 = arith.constant 0 : index
      %c0_71 = arith.constant 0 : index
      %c0_72 = arith.constant 0 : index
      %80 = vector.load %arg23[%c0_70, %c0_71, %c0_72] : memref<18x25x384xf32, #tpu.memory_space<vmem>>, vector<18x25x384xf32>
      tpu.vector_store %arg23[%c0_70, %c0_71, %c0_72], %79 {strides = array<i32>} : memref<18x25x384xf32, #tpu.memory_space<vmem>>, vector<18x25x384xf32>,
      %cst_73 = arith.constant 0.000000e+00 : f32
      %81 = vector.broadcast %cst_73 : f32 to vector<18x25x384xf32>
      %c0_74 = arith.constant 0 : index
      %c0_75 = arith.constant 0 : index
      %c0_76 = arith.constant 0 : index
      %82 = vector.load %arg24[%c0_74, %c0_75, %c0_76] : memref<18x25x384xf32, #tpu.memory_space<vmem>>, vector<18x25x384xf32>
      tpu.vector_store %arg24[%c0_74, %c0_75, %c0_76], %81 {strides = array<i32>} : memref<18x25x384xf32, #tpu.memory_space<vmem>>, vector<18x25x384xf32>,
    } else {
    }
    %c0 = arith.constant 0 : index
    %c0_1 = arith.constant 0 : index
    %c0_2 = arith.constant 0 : index
    %3 = vector.load %arg1[%c0, %c0_1, %c0_2] : memref<1x256x64xbf16, #tpu.memory_space<vmem>>, vector<1x256x64xbf16>
    %4 = vector.shape_cast %3 : vector<1x256x64xbf16> to vector<256x64xbf16>
    %c0_3 = arith.constant 0 : index
    %c0_4 = arith.constant 0 : index
    %5 = vector.load %arg2[%c0_3, %c0_4] : memref<64x128xbf16, #tpu.memory_space<vmem>>, vector<64x128xbf16>
    %cst = arith.constant dense<0.000000e+00> : vector<256x128xf32>
    %6 = tpu.matmul %4, %5, %cst {dimension_numbers = #tpu.dot_dimension_numbers<[1], [0], [0], [1], [0, 0, 1, 1], [], []>} : vector<256x64xbf16>, vector<64x128xbf16>, vector<256x128xf32> -> vector<256x128xf32>
    %c0_5 = arith.constant 0 : index
    %c0_6 = arith.constant 0 : index
    %7 = vector.load %arg3[%c0_5, %c0_6] : memref<1x128xf32, #tpu.memory_space<vmem>>, vector<1x128xf32>
    %8 = vector.broadcast %7 : vector<1x128xf32> to vector<256x128xf32>
    %9 = arith.addf %6, %8 : vector<256x128xf32>
    %10 = vector.extract_strided_slice %9 {offsets = [0, 124], sizes = [256, 4], strides = [1, 1]} : vector<256x128xf32> to vector<256x4xf32>
    %11 = vector.shape_cast %9 : vector<256x128xf32> to vector<16x16x128xf32>
    %c3 = arith.constant 3 : index
    %c8 = arith.constant 8 : index
    %c0_7 = arith.constant 0 : index
    %12 = vector.load %arg20[%c3, %c8, %c0_7] : memref<22x27x128xf32, #tpu.memory_space<vmem>>, vector<16x16x128xf32>
    tpu.vector_store %arg20[%c3, %c8, %c0_7], %11 {strides = array<i32>} : memref<22x27x128xf32, #tpu.memory_space<vmem>>, vector<16x16x128xf32>,
    %c0_8 = arith.constant 0 : index
    %c0_9 = arith.constant 0 : index
    %13 = vector.load %arg4[%c0_8, %c0_9] : memref<49x128xf32, #tpu.memory_space<vmem>>, vector<49x128xf32>
    %c0_10 = arith.constant 0 : index
    %c0_11 = arith.constant 0 : index
    %14 = vector.load %arg5[%c0_10, %c0_11] : memref<1x128xf32, #tpu.memory_space<vmem>>, vector<1x128xf32>
    %15 = vector.shape_cast %14 : vector<1x128xf32> to vector<1x128xf32>
    %16 = vector.broadcast %15 : vector<1x128xf32> to vector<16x128xf32>
    %c0_i32_12 = arith.constant 0 : i32
    %c16_i32 = arith.constant 16 : i32
    %17 = arith.addi %c0_i32_12, %c16_i32 : i32
    %c1_i32 = arith.constant 1 : i32
    scf.for %arg25 = %c0_i32_12 to %17 step %c1_i32  : i32 {
      %c0_i32_61 = arith.constant 0 : i32
      %75 = arith.addi %arg25, %c0_i32_61 : i32
      %76 = arith.index_cast %75 : i32 to index
      %c0_62 = arith.constant 0 : index
      %c0_63 = arith.constant 0 : index
      %77 = vector.load %arg20[%76, %c0_62, %c0_63] : memref<22x27x128xf32, #tpu.memory_space<vmem>>, vector<1x27x128xf32>
      %78 = vector.shape_cast %77 : vector<1x27x128xf32> to vector<27x128xf32>
      %79 = vector.extract_strided_slice %78 {offsets = [5, 0], sizes = [16, 128], strides = [1, 1]} : vector<27x128xf32> to vector<16x128xf32>
      %80 = vector.extract_strided_slice %13 {offsets = [0, 0], sizes = [1, 128], strides = [1, 1]} : vector<49x128xf32> to vector<1x128xf32>
      %81 = vector.broadcast %80 : vector<1x128xf32> to vector<16x128xf32>
      %82 = arith.mulf %79, %81 : vector<16x128xf32>
      %83 = arith.addf %16, %82 : vector<16x128xf32>
      %84 = vector.extract_strided_slice %78 {offsets = [6, 0], sizes = [16, 128], strides = [1, 1]} : vector<27x128xf32> to vector<16x128xf32>
      %85 = vector.extract_strided_slice %13 {offsets = [1, 0], sizes = [1, 128], strides = [1, 1]} : vector<49x128xf32> to vector<1x128xf32>
      %86 = vector.broadcast %85 : vector<1x128xf32> to vector<16x128xf32>
      %87 = arith.mulf %84, %86 : vector<16x128xf32>
      %88 = arith.addf %83, %87 : vector<16x128xf32>
      %89 = vector.extract_strided_slice %78 {offsets = [7, 0], sizes = [16, 128], strides = [1, 1]} : vector<27x128xf32> to vector<16x128xf32>
      %90 = vector.extract_strided_slice %13 {offsets = [2, 0], sizes = [1, 128], strides = [1, 1]} : vector<49x128xf32> to vector<1x128xf32>
      %91 = vector.broadcast %90 : vector<1x128xf32> to vector<16x128xf32>
      %92 = arith.mulf %89, %91 : vector<16x128xf32>
      %93 = arith.addf %88, %92 : vector<16x128xf32>
      %94 = vector.extract_strided_slice %78 {offsets = [8, 0], sizes = [16, 128], strides = [1, 1]} : vector<27x128xf32> to vector<16x128xf32>
      %95 = vector.extract_strided_slice %13 {offsets = [3, 0], sizes = [1, 128], strides = [1, 1]} : vector<49x128xf32> to vector<1x128xf32>
      %96 = vector.broadcast %95 : vector<1x128xf32> to vector<16x128xf32>
      %97 = arith.mulf %94, %96 : vector<16x128xf32>
      %98 = arith.addf %93, %97 : vector<16x128xf32>
      %99 = vector.extract_strided_slice %78 {offsets = [9, 0], sizes = [16, 128], strides = [1, 1]} : vector<27x128xf32> to vector<16x128xf32>
      %100 = vector.extract_strided_slice %13 {offsets = [4, 0], sizes = [1, 128], strides = [1, 1]} : vector<49x128xf32> to vector<1x128xf32>
      %101 = vector.broadcast %100 : vector<1x128xf32> to vector<16x128xf32>
      %102 = arith.mulf %99, %101 : vector<16x128xf32>
      %103 = arith.addf %98, %102 : vector<16x128xf32>
      %104 = vector.extract_strided_slice %78 {offsets = [10, 0], sizes = [16, 128], strides = [1, 1]} : vector<27x128xf32> to vector<16x128xf32>
      %105 = vector.extract_strided_slice %13 {offsets = [5, 0], sizes = [1, 128], strides = [1, 1]} : vector<49x128xf32> to vector<1x128xf32>
      %106 = vector.broadcast %105 : vector<1x128xf32> to vector<16x128xf32>
      %107 = arith.mulf %104, %106 : vector<16x128xf32>
      %108 = arith.addf %103, %107 : vector<16x128xf32>
      %109 = vector.extract_strided_slice %78 {offsets = [11, 0], sizes = [16, 128], strides = [1, 1]} : vector<27x128xf32> to vector<16x128xf32>
      %110 = vector.extract_strided_slice %13 {offsets = [6, 0], sizes = [1, 128], strides = [1, 1]} : vector<49x128xf32> to vector<1x128xf32>
      %111 = vector.broadcast %110 : vector<1x128xf32> to vector<16x128xf32>
      %112 = arith.mulf %109, %111 : vector<16x128xf32>
      %113 = arith.addf %108, %112 : vector<16x128xf32>
      %c1_i32_64 = arith.constant 1 : i32
      %114 = arith.addi %arg25, %c1_i32_64 : i32
      %115 = arith.index_cast %114 : i32 to index
      %c0_65 = arith.constant 0 : index
      %c0_66 = arith.constant 0 : index
      %116 = vector.load %arg20[%115, %c0_65, %c0_66] : memref<22x27x128xf32, #tpu.memory_space<vmem>>, vector<1x27x128xf32>
      %117 = vector.shape_cast %116 : vector<1x27x128xf32> to vector<27x128xf32>
      %118 = vector.extract_strided_slice %117 {offsets = [5, 0], sizes = [16, 128], strides = [1, 1]} : vector<27x128xf32> to vector<16x128xf32>
      %119 = vector.extract_strided_slice %13 {offsets = [7, 0], sizes = [1, 128], strides = [1, 1]} : vector<49x128xf32> to vector<1x128xf32>
      %120 = vector.broadcast %119 : vector<1x128xf32> to vector<16x128xf32>
      %121 = arith.mulf %118, %120 : vector<16x128xf32>
      %122 = arith.addf %113, %121 : vector<16x128xf32>
      %123 = vector.extract_strided_slice %117 {offsets = [6, 0], sizes = [16, 128], strides = [1, 1]} : vector<27x128xf32> to vector<16x128xf32>
      %124 = vector.extract_strided_slice %13 {offsets = [8, 0], sizes = [1, 128], strides = [1, 1]} : vector<49x128xf32> to vector<1x128xf32>
      %125 = vector.broadcast %124 : vector<1x128xf32> to vector<16x128xf32>
      %126 = arith.mulf %123, %125 : vector<16x128xf32>
      %127 = arith.addf %122, %126 : vector<16x128xf32>
      %128 = vector.extract_strided_slice %117 {offsets = [7, 0], sizes = [16, 128], strides = [1, 1]} : vector<27x128xf32> to vector<16x128xf32>
      %129 = vector.extract_strided_slice %13 {offsets = [9, 0], sizes = [1, 128], strides = [1, 1]} : vector<49x128xf32> to vector<1x128xf32>
      %130 = vector.broadcast %129 : vector<1x128xf32> to vector<16x128xf32>
      %131 = arith.mulf %128, %130 : vector<16x128xf32>
      %132 = arith.addf %127, %131 : vector<16x128xf32>
      %133 = vector.extract_strided_slice %117 {offsets = [8, 0], sizes = [16, 128], strides = [1, 1]} : vector<27x128xf32> to vector<16x128xf32>
      %134 = vector.extract_strided_slice %13 {offsets = [10, 0], sizes = [1, 128], strides = [1, 1]} : vector<49x128xf32> to vector<1x128xf32>
      %135 = vector.broadcast %134 : vector<1x128xf32> to vector<16x128xf32>
      %136 = arith.mulf %133, %135 : vector<16x128xf32>
      %137 = arith.addf %132, %136 : vector<16x128xf32>
      %138 = vector.extract_strided_slice %117 {offsets = [9, 0], sizes = [16, 128], strides = [1, 1]} : vector<27x128xf32> to vector<16x128xf32>
      %139 = vector.extract_strided_slice %13 {offsets = [11, 0], sizes = [1, 128], strides = [1, 1]} : vector<49x128xf32> to vector<1x128xf32>
      %140 = vector.broadcast %139 : vector<1x128xf32> to vector<16x128xf32>
      %141 = arith.mulf %138, %140 : vector<16x128xf32>
      %142 = arith.addf %137, %141 : vector<16x128xf32>
      %143 = vector.extract_strided_slice %117 {offsets = [10, 0], sizes = [16, 128], strides = [1, 1]} : vector<27x128xf32> to vector<16x128xf32>
      %144 = vector.extract_strided_slice %13 {offsets = [12, 0], sizes = [1, 128], strides = [1, 1]} : vector<49x128xf32> to vector<1x128xf32>
      %145 = vector.broadcast %144 : vector<1x128xf32> to vector<16x128xf32>
      %146 = arith.mulf %143, %145 : vector<16x128xf32>
      %147 = arith.addf %142, %146 : vector<16x128xf32>
      %148 = vector.extract_strided_slice %117 {offsets = [11, 0], sizes = [16, 128], strides = [1, 1]} : vector<27x128xf32> to vector<16x128xf32>
      %149 = vector.extract_strided_slice %13 {offsets = [13, 0], sizes = [1, 128], strides = [1, 1]} : vector<49x128xf32> to vector<1x128xf32>
      %150 = vector.broadcast %149 : vector<1x128xf32> to vector<16x128xf32>
      %151 = arith.mulf %148, %150 : vector<16x128xf32>
      %152 = arith.addf %147, %151 : vector<16x128xf32>
      %c2_i32 = arith.constant 2 : i32
      %153 = arith.addi %arg25, %c2_i32 : i32
      %154 = arith.index_cast %153 : i32 to index
      %c0_67 = arith.constant 0 : index
      %c0_68 = arith.constant 0 : index
      %155 = vector.load %arg20[%154, %c0_67, %c0_68] : memref<22x27x128xf32, #tpu.memory_space<vmem>>, vector<1x27x128xf32>
      %156 = vector.shape_cast %155 : vector<1x27x128xf32> to vector<27x128xf32>
      %157 = vector.extract_strided_slice %156 {offsets = [5, 0], sizes = [16, 128], strides = [1, 1]} : vector<27x128xf32> to vector<16x128xf32>
      %158 = vector.extract_strided_slice %13 {offsets = [14, 0], sizes = [1, 128], strides = [1, 1]} : vector<49x128xf32> to vector<1x128xf32>
      %159 = vector.broadcast %158 : vector<1x128xf32> to vector<16x128xf32>
      %160 = arith.mulf %157, %159 : vector<16x128xf32>
      %161 = arith.addf %152, %160 : vector<16x128xf32>
      %162 = vector.extract_strided_slice %156 {offsets = [6, 0], sizes = [16, 128], strides = [1, 1]} : vector<27x128xf32> to vector<16x128xf32>
      %163 = vector.extract_strided_slice %13 {offsets = [15, 0], sizes = [1, 128], strides = [1, 1]} : vector<49x128xf32> to vector<1x128xf32>
      %164 = vector.broadcast %163 : vector<1x128xf32> to vector<16x128xf32>
      %165 = arith.mulf %162, %164 : vector<16x128xf32>
      %166 = arith.addf %161, %165 : vector<16x128xf32>
      %167 = vector.extract_strided_slice %156 {offsets = [7, 0], sizes = [16, 128], strides = [1, 1]} : vector<27x128xf32> to vector<16x128xf32>
      %168 = vector.extract_strided_slice %13 {offsets = [16, 0], sizes = [1, 128], strides = [1, 1]} : vector<49x128xf32> to vector<1x128xf32>
      %169 = vector.broadcast %168 : vector<1x128xf32> to vector<16x128xf32>
      %170 = arith.mulf %167, %169 : vector<16x128xf32>
      %171 = arith.addf %166, %170 : vector<16x128xf32>
      %172 = vector.extract_strided_slice %156 {offsets = [8, 0], sizes = [16, 128], strides = [1, 1]} : vector<27x128xf32> to vector<16x128xf32>
      %173 = vector.extract_strided_slice %13 {offsets = [17, 0], sizes = [1, 128], strides = [1, 1]} : vector<49x128xf32> to vector<1x128xf32>
      %174 = vector.broadcast %173 : vector<1x128xf32> to vector<16x128xf32>
      %175 = arith.mulf %172, %174 : vector<16x128xf32>
      %176 = arith.addf %171, %175 : vector<16x128xf32>
      %177 = vector.extract_strided_slice %156 {offsets = [9, 0], sizes = [16, 128], strides = [1, 1]} : vector<27x128xf32> to vector<16x128xf32>
      %178 = vector.extract_strided_slice %13 {offsets = [18, 0], sizes = [1, 128], strides = [1, 1]} : vector<49x128xf32> to vector<1x128xf32>
      %179 = vector.broadcast %178 : vector<1x128xf32> to vector<16x128xf32>
      %180 = arith.mulf %177, %179 : vector<16x128xf32>
      %181 = arith.addf %176, %180 : vector<16x128xf32>
      %182 = vector.extract_strided_slice %156 {offsets = [10, 0], sizes = [16, 128], strides = [1, 1]} : vector<27x128xf32> to vector<16x128xf32>
      %183 = vector.extract_strided_slice %13 {offsets = [19, 0], sizes = [1, 128], strides = [1, 1]} : vector<49x128xf32> to vector<1x128xf32>
      %184 = vector.broadcast %183 : vector<1x128xf32> to vector<16x128xf32>
      %185 = arith.mulf %182, %184 : vector<16x128xf32>
      %186 = arith.addf %181, %185 : vector<16x128xf32>
      %187 = vector.extract_strided_slice %156 {offsets = [11, 0], sizes = [16, 128], strides = [1, 1]} : vector<27x128xf32> to vector<16x128xf32>
      %188 = vector.extract_strided_slice %13 {offsets = [20, 0], sizes = [1, 128], strides = [1, 1]} : vector<49x128xf32> to vector<1x128xf32>
      %189 = vector.broadcast %188 : vector<1x128xf32> to vector<16x128xf32>
      %190 = arith.mulf %187, %189 : vector<16x128xf32>
      %191 = arith.addf %186, %190 : vector<16x128xf32>
      %c3_i32 = arith.constant 3 : i32
      %192 = arith.addi %arg25, %c3_i32 : i32
      %193 = arith.index_cast %192 : i32 to index
      %c0_69 = arith.constant 0 : index
      %c0_70 = arith.constant 0 : index
      %194 = vector.load %arg20[%193, %c0_69, %c0_70] : memref<22x27x128xf32, #tpu.memory_space<vmem>>, vector<1x27x128xf32>
      %195 = vector.shape_cast %194 : vector<1x27x128xf32> to vector<27x128xf32>
      %196 = vector.extract_strided_slice %195 {offsets = [5, 0], sizes = [16, 128], strides = [1, 1]} : vector<27x128xf32> to vector<16x128xf32>
      %197 = vector.extract_strided_slice %13 {offsets = [21, 0], sizes = [1, 128], strides = [1, 1]} : vector<49x128xf32> to vector<1x128xf32>
      %198 = vector.broadcast %197 : vector<1x128xf32> to vector<16x128xf32>
      %199 = arith.mulf %196, %198 : vector<16x128xf32>
      %200 = arith.addf %191, %199 : vector<16x128xf32>
      %201 = vector.extract_strided_slice %195 {offsets = [6, 0], sizes = [16, 128], strides = [1, 1]} : vector<27x128xf32> to vector<16x128xf32>
      %202 = vector.extract_strided_slice %13 {offsets = [22, 0], sizes = [1, 128], strides = [1, 1]} : vector<49x128xf32> to vector<1x128xf32>
      %203 = vector.broadcast %202 : vector<1x128xf32> to vector<16x128xf32>
      %204 = arith.mulf %201, %203 : vector<16x128xf32>
      %205 = arith.addf %200, %204 : vector<16x128xf32>
      %206 = vector.extract_strided_slice %195 {offsets = [7, 0], sizes = [16, 128], strides = [1, 1]} : vector<27x128xf32> to vector<16x128xf32>
      %207 = vector.extract_strided_slice %13 {offsets = [23, 0], sizes = [1, 128], strides = [1, 1]} : vector<49x128xf32> to vector<1x128xf32>
      %208 = vector.broadcast %207 : vector<1x128xf32> to vector<16x128xf32>
      %209 = arith.mulf %206, %208 : vector<16x128xf32>
      %210 = arith.addf %205, %209 : vector<16x128xf32>
      %211 = vector.extract_strided_slice %195 {offsets = [8, 0], sizes = [16, 128], strides = [1, 1]} : vector<27x128xf32> to vector<16x128xf32>
      %212 = vector.extract_strided_slice %13 {offsets = [24, 0], sizes = [1, 128], strides = [1, 1]} : vector<49x128xf32> to vector<1x128xf32>
      %213 = vector.broadcast %212 : vector<1x128xf32> to vector<16x128xf32>
      %214 = arith.mulf %211, %213 : vector<16x128xf32>
      %215 = arith.addf %210, %214 : vector<16x128xf32>
      %216 = vector.extract_strided_slice %195 {offsets = [9, 0], sizes = [16, 128], strides = [1, 1]} : vector<27x128xf32> to vector<16x128xf32>
      %217 = vector.extract_strided_slice %13 {offsets = [25, 0], sizes = [1, 128], strides = [1, 1]} : vector<49x128xf32> to vector<1x128xf32>
      %218 = vector.broadcast %217 : vector<1x128xf32> to vector<16x128xf32>
      %219 = arith.mulf %216, %218 : vector<16x128xf32>
      %220 = arith.addf %215, %219 : vector<16x128xf32>
      %221 = vector.extract_strided_slice %195 {offsets = [10, 0], sizes = [16, 128], strides = [1, 1]} : vector<27x128xf32> to vector<16x128xf32>
      %222 = vector.extract_strided_slice %13 {offsets = [26, 0], sizes = [1, 128], strides = [1, 1]} : vector<49x128xf32> to vector<1x128xf32>
      %223 = vector.broadcast %222 : vector<1x128xf32> to vector<16x128xf32>
      %224 = arith.mulf %221, %223 : vector<16x128xf32>
      %225 = arith.addf %220, %224 : vector<16x128xf32>
      %226 = vector.extract_strided_slice %195 {offsets = [11, 0], sizes = [16, 128], strides = [1, 1]} : vector<27x128xf32> to vector<16x128xf32>
      %227 = vector.extract_strided_slice %13 {offsets = [27, 0], sizes = [1, 128], strides = [1, 1]} : vector<49x128xf32> to vector<1x128xf32>
      %228 = vector.broadcast %227 : vector<1x128xf32> to vector<16x128xf32>
      %229 = arith.mulf %226, %228 : vector<16x128xf32>
      %230 = arith.addf %225, %229 : vector<16x128xf32>
      %c4_i32 = arith.constant 4 : i32
      %231 = arith.addi %arg25, %c4_i32 : i32
      %232 = arith.index_cast %231 : i32 to index
      %c0_71 = arith.constant 0 : index
      %c0_72 = arith.constant 0 : index
      %233 = vector.load %arg20[%232, %c0_71, %c0_72] : memref<22x27x128xf32, #tpu.memory_space<vmem>>, vector<1x27x128xf32>
      %234 = vector.shape_cast %233 : vector<1x27x128xf32> to vector<27x128xf32>
      %235 = vector.extract_strided_slice %234 {offsets = [5, 0], sizes = [16, 128], strides = [1, 1]} : vector<27x128xf32> to vector<16x128xf32>
      %236 = vector.extract_strided_slice %13 {offsets = [28, 0], sizes = [1, 128], strides = [1, 1]} : vector<49x128xf32> to vector<1x128xf32>
      %237 = vector.broadcast %236 : vector<1x128xf32> to vector<16x128xf32>
      %238 = arith.mulf %235, %237 : vector<16x128xf32>
      %239 = arith.addf %230, %238 : vector<16x128xf32>
      %240 = vector.extract_strided_slice %234 {offsets = [6, 0], sizes = [16, 128], strides = [1, 1]} : vector<27x128xf32> to vector<16x128xf32>
      %241 = vector.extract_strided_slice %13 {offsets = [29, 0], sizes = [1, 128], strides = [1, 1]} : vector<49x128xf32> to vector<1x128xf32>
      %242 = vector.broadcast %241 : vector<1x128xf32> to vector<16x128xf32>
      %243 = arith.mulf %240, %242 : vector<16x128xf32>
      %244 = arith.addf %239, %243 : vector<16x128xf32>
      %245 = vector.extract_strided_slice %234 {offsets = [7, 0], sizes = [16, 128], strides = [1, 1]} : vector<27x128xf32> to vector<16x128xf32>
      %246 = vector.extract_strided_slice %13 {offsets = [30, 0], sizes = [1, 128], strides = [1, 1]} : vector<49x128xf32> to vector<1x128xf32>
      %247 = vector.broadcast %246 : vector<1x128xf32> to vector<16x128xf32>
      %248 = arith.mulf %245, %247 : vector<16x128xf32>
      %249 = arith.addf %244, %248 : vector<16x128xf32>
      %250 = vector.extract_strided_slice %234 {offsets = [8, 0], sizes = [16, 128], strides = [1, 1]} : vector<27x128xf32> to vector<16x128xf32>
      %251 = vector.extract_strided_slice %13 {offsets = [31, 0], sizes = [1, 128], strides = [1, 1]} : vector<49x128xf32> to vector<1x128xf32>
      %252 = vector.broadcast %251 : vector<1x128xf32> to vector<16x128xf32>
      %253 = arith.mulf %250, %252 : vector<16x128xf32>
      %254 = arith.addf %249, %253 : vector<16x128xf32>
      %255 = vector.extract_strided_slice %234 {offsets = [9, 0], sizes = [16, 128], strides = [1, 1]} : vector<27x128xf32> to vector<16x128xf32>
      %256 = vector.extract_strided_slice %13 {offsets = [32, 0], sizes = [1, 128], strides = [1, 1]} : vector<49x128xf32> to vector<1x128xf32>
      %257 = vector.broadcast %256 : vector<1x128xf32> to vector<16x128xf32>
      %258 = arith.mulf %255, %257 : vector<16x128xf32>
      %259 = arith.addf %254, %258 : vector<16x128xf32>
      %260 = vector.extract_strided_slice %234 {offsets = [10, 0], sizes = [16, 128], strides = [1, 1]} : vector<27x128xf32> to vector<16x128xf32>
      %261 = vector.extract_strided_slice %13 {offsets = [33, 0], sizes = [1, 128], strides = [1, 1]} : vector<49x128xf32> to vector<1x128xf32>
      %262 = vector.broadcast %261 : vector<1x128xf32> to vector<16x128xf32>
      %263 = arith.mulf %260, %262 : vector<16x128xf32>
      %264 = arith.addf %259, %263 : vector<16x128xf32>
      %265 = vector.extract_strided_slice %234 {offsets = [11, 0], sizes = [16, 128], strides = [1, 1]} : vector<27x128xf32> to vector<16x128xf32>
      %266 = vector.extract_strided_slice %13 {offsets = [34, 0], sizes = [1, 128], strides = [1, 1]} : vector<49x128xf32> to vector<1x128xf32>
      %267 = vector.broadcast %266 : vector<1x128xf32> to vector<16x128xf32>
      %268 = arith.mulf %265, %267 : vector<16x128xf32>
      %269 = arith.addf %264, %268 : vector<16x128xf32>
      %c5_i32 = arith.constant 5 : i32
      %270 = arith.addi %arg25, %c5_i32 : i32
      %271 = arith.index_cast %270 : i32 to index
      %c0_73 = arith.constant 0 : index
      %c0_74 = arith.constant 0 : index
      %272 = vector.load %arg20[%271, %c0_73, %c0_74] : memref<22x27x128xf32, #tpu.memory_space<vmem>>, vector<1x27x128xf32>
      %273 = vector.shape_cast %272 : vector<1x27x128xf32> to vector<27x128xf32>
      %274 = vector.extract_strided_slice %273 {offsets = [5, 0], sizes = [16, 128], strides = [1, 1]} : vector<27x128xf32> to vector<16x128xf32>
      %275 = vector.extract_strided_slice %13 {offsets = [35, 0], sizes = [1, 128], strides = [1, 1]} : vector<49x128xf32> to vector<1x128xf32>
      %276 = vector.broadcast %275 : vector<1x128xf32> to vector<16x128xf32>
      %277 = arith.mulf %274, %276 : vector<16x128xf32>
      %278 = arith.addf %269, %277 : vector<16x128xf32>
      %279 = vector.extract_strided_slice %273 {offsets = [6, 0], sizes = [16, 128], strides = [1, 1]} : vector<27x128xf32> to vector<16x128xf32>
      %280 = vector.extract_strided_slice %13 {offsets = [36, 0], sizes = [1, 128], strides = [1, 1]} : vector<49x128xf32> to vector<1x128xf32>
      %281 = vector.broadcast %280 : vector<1x128xf32> to vector<16x128xf32>
      %282 = arith.mulf %279, %281 : vector<16x128xf32>
      %283 = arith.addf %278, %282 : vector<16x128xf32>
      %284 = vector.extract_strided_slice %273 {offsets = [7, 0], sizes = [16, 128], strides = [1, 1]} : vector<27x128xf32> to vector<16x128xf32>
      %285 = vector.extract_strided_slice %13 {offsets = [37, 0], sizes = [1, 128], strides = [1, 1]} : vector<49x128xf32> to vector<1x128xf32>
      %286 = vector.broadcast %285 : vector<1x128xf32> to vector<16x128xf32>
      %287 = arith.mulf %284, %286 : vector<16x128xf32>
      %288 = arith.addf %283, %287 : vector<16x128xf32>
      %289 = vector.extract_strided_slice %273 {offsets = [8, 0], sizes = [16, 128], strides = [1, 1]} : vector<27x128xf32> to vector<16x128xf32>
      %290 = vector.extract_strided_slice %13 {offsets = [38, 0], sizes = [1, 128], strides = [1, 1]} : vector<49x128xf32> to vector<1x128xf32>
      %291 = vector.broadcast %290 : vector<1x128xf32> to vector<16x128xf32>
      %292 = arith.mulf %289, %291 : vector<16x128xf32>
      %293 = arith.addf %288, %292 : vector<16x128xf32>
      %294 = vector.extract_strided_slice %273 {offsets = [9, 0], sizes = [16, 128], strides = [1, 1]} : vector<27x128xf32> to vector<16x128xf32>
      %295 = vector.extract_strided_slice %13 {offsets = [39, 0], sizes = [1, 128], strides = [1, 1]} : vector<49x128xf32> to vector<1x128xf32>
      %296 = vector.broadcast %295 : vector<1x128xf32> to vector<16x128xf32>
      %297 = arith.mulf %294, %296 : vector<16x128xf32>
      %298 = arith.addf %293, %297 : vector<16x128xf32>
      %299 = vector.extract_strided_slice %273 {offsets = [10, 0], sizes = [16, 128], strides = [1, 1]} : vector<27x128xf32> to vector<16x128xf32>
      %300 = vector.extract_strided_slice %13 {offsets = [40, 0], sizes = [1, 128], strides = [1, 1]} : vector<49x128xf32> to vector<1x128xf32>
      %301 = vector.broadcast %300 : vector<1x128xf32> to vector<16x128xf32>
      %302 = arith.mulf %299, %301 : vector<16x128xf32>
      %303 = arith.addf %298, %302 : vector<16x128xf32>
      %304 = vector.extract_strided_slice %273 {offsets = [11, 0], sizes = [16, 128], strides = [1, 1]} : vector<27x128xf32> to vector<16x128xf32>
      %305 = vector.extract_strided_slice %13 {offsets = [41, 0], sizes = [1, 128], strides = [1, 1]} : vector<49x128xf32> to vector<1x128xf32>
      %306 = vector.broadcast %305 : vector<1x128xf32> to vector<16x128xf32>
      %307 = arith.mulf %304, %306 : vector<16x128xf32>
      %308 = arith.addf %303, %307 : vector<16x128xf32>
      %c6_i32 = arith.constant 6 : i32
      %309 = arith.addi %arg25, %c6_i32 : i32
      %310 = arith.index_cast %309 : i32 to index
      %c0_75 = arith.constant 0 : index
      %c0_76 = arith.constant 0 : index
      %311 = vector.load %arg20[%310, %c0_75, %c0_76] : memref<22x27x128xf32, #tpu.memory_space<vmem>>, vector<1x27x128xf32>
      %312 = vector.shape_cast %311 : vector<1x27x128xf32> to vector<27x128xf32>
      %313 = vector.extract_strided_slice %312 {offsets = [5, 0], sizes = [16, 128], strides = [1, 1]} : vector<27x128xf32> to vector<16x128xf32>
      %314 = vector.extract_strided_slice %13 {offsets = [42, 0], sizes = [1, 128], strides = [1, 1]} : vector<49x128xf32> to vector<1x128xf32>
      %315 = vector.broadcast %314 : vector<1x128xf32> to vector<16x128xf32>
      %316 = arith.mulf %313, %315 : vector<16x128xf32>
      %317 = arith.addf %308, %316 : vector<16x128xf32>
      %318 = vector.extract_strided_slice %312 {offsets = [6, 0], sizes = [16, 128], strides = [1, 1]} : vector<27x128xf32> to vector<16x128xf32>
      %319 = vector.extract_strided_slice %13 {offsets = [43, 0], sizes = [1, 128], strides = [1, 1]} : vector<49x128xf32> to vector<1x128xf32>
      %320 = vector.broadcast %319 : vector<1x128xf32> to vector<16x128xf32>
      %321 = arith.mulf %318, %320 : vector<16x128xf32>
      %322 = arith.addf %317, %321 : vector<16x128xf32>
      %323 = vector.extract_strided_slice %312 {offsets = [7, 0], sizes = [16, 128], strides = [1, 1]} : vector<27x128xf32> to vector<16x128xf32>
      %324 = vector.extract_strided_slice %13 {offsets = [44, 0], sizes = [1, 128], strides = [1, 1]} : vector<49x128xf32> to vector<1x128xf32>
      %325 = vector.broadcast %324 : vector<1x128xf32> to vector<16x128xf32>
      %326 = arith.mulf %323, %325 : vector<16x128xf32>
      %327 = arith.addf %322, %326 : vector<16x128xf32>
      %328 = vector.extract_strided_slice %312 {offsets = [8, 0], sizes = [16, 128], strides = [1, 1]} : vector<27x128xf32> to vector<16x128xf32>
      %329 = vector.extract_strided_slice %13 {offsets = [45, 0], sizes = [1, 128], strides = [1, 1]} : vector<49x128xf32> to vector<1x128xf32>
      %330 = vector.broadcast %329 : vector<1x128xf32> to vector<16x128xf32>
      %331 = arith.mulf %328, %330 : vector<16x128xf32>
      %332 = arith.addf %327, %331 : vector<16x128xf32>
      %333 = vector.extract_strided_slice %312 {offsets = [9, 0], sizes = [16, 128], strides = [1, 1]} : vector<27x128xf32> to vector<16x128xf32>
      %334 = vector.extract_strided_slice %13 {offsets = [46, 0], sizes = [1, 128], strides = [1, 1]} : vector<49x128xf32> to vector<1x128xf32>
      %335 = vector.broadcast %334 : vector<1x128xf32> to vector<16x128xf32>
      %336 = arith.mulf %333, %335 : vector<16x128xf32>
      %337 = arith.addf %332, %336 : vector<16x128xf32>
      %338 = vector.extract_strided_slice %312 {offsets = [10, 0], sizes = [16, 128], strides = [1, 1]} : vector<27x128xf32> to vector<16x128xf32>
      %339 = vector.extract_strided_slice %13 {offsets = [47, 0], sizes = [1, 128], strides = [1, 1]} : vector<49x128xf32> to vector<1x128xf32>
      %340 = vector.broadcast %339 : vector<1x128xf32> to vector<16x128xf32>
      %341 = arith.mulf %338, %340 : vector<16x128xf32>
      %342 = arith.addf %337, %341 : vector<16x128xf32>
      %343 = vector.extract_strided_slice %312 {offsets = [11, 0], sizes = [16, 128], strides = [1, 1]} : vector<27x128xf32> to vector<16x128xf32>
      %344 = vector.extract_strided_slice %13 {offsets = [48, 0], sizes = [1, 128], strides = [1, 1]} : vector<49x128xf32> to vector<1x128xf32>
      %345 = vector.broadcast %344 : vector<1x128xf32> to vector<16x128xf32>
      %346 = arith.mulf %343, %345 : vector<16x128xf32>
      %347 = arith.addf %342, %346 : vector<16x128xf32>
      %348 = arith.index_cast %arg25 : i32 to index
      %c0_77 = arith.constant 0 : index
      %c0_78 = arith.constant 0 : index
      %349 = vector.load %arg21[%348, %c0_77, %c0_78] : memref<16x16x128xf32, #tpu.memory_space<vmem>>, vector<1x16x128xf32>
      %350 = vector.shape_cast %349 : vector<1x16x128xf32> to vector<16x128xf32>
      %351 = vector.shape_cast %347 : vector<16x128xf32> to vector<1x16x128xf32>
      tpu.vector_store %arg21[%348, %c0_77, %c0_78], %351 {strides = array<i32>} : memref<16x16x128xf32, #tpu.memory_space<vmem>>, vector<1x16x128xf32>,
    }
    %c16_i32_13 = arith.constant 16 : i32
    %c0_14 = arith.constant 0 : index
    %c0_15 = arith.constant 0 : index
    %c0_16 = arith.constant 0 : index
    %18 = vector.load %arg21[%c0_14, %c0_15, %c0_16] : memref<16x16x128xf32, #tpu.memory_space<vmem>>, vector<16x16x128xf32>
    %19 = vector.shape_cast %18 : vector<16x16x128xf32> to vector<256x128xf32>
    %20 = vector.extract_strided_slice %19 {offsets = [0, 0], sizes = [256, 4], strides = [1, 1]} : vector<256x128xf32> to vector<256x4xf32>
    %21 = arith.mulf %10, %20 : vector<256x4xf32>
    %22 = arith.truncf %21 : vector<256x4xf32> to vector<256x4xbf16>
    %c0_17 = arith.constant 0 : index
    %c0_18 = arith.constant 0 : index
    %23 = vector.load %arg6[%c0_17, %c0_18] : memref<4x8xbf16, #tpu.memory_space<vmem>>, vector<4x8xbf16>
    %cst_19 = arith.constant dense<0.000000e+00> : vector<256x8xf32>
    %24 = tpu.matmul %22, %23, %cst_19 {dimension_numbers = #tpu.dot_dimension_numbers<[1], [0], [0], [1], [0, 0, 1, 1], [], []>} : vector<256x4xbf16>, vector<4x8xbf16>, vector<256x8xf32> -> vector<256x8xf32>
    %c0_20 = arith.constant 0 : index
    %c0_21 = arith.constant 0 : index
    %25 = vector.load %arg7[%c0_20, %c0_21] : memref<1x8xf32, #tpu.memory_space<vmem>>, vector<1x8xf32>
    %26 = vector.broadcast %25 : vector<1x8xf32> to vector<256x8xf32>
    %27 = arith.addf %24, %26 : vector<256x8xf32>
    %28 = vector.extract_strided_slice %19 {offsets = [0, 4], sizes = [256, 8], strides = [1, 1]} : vector<256x128xf32> to vector<256x8xf32>
    %29 = arith.mulf %27, %28 : vector<256x8xf32>
    %30 = arith.truncf %29 : vector<256x8xf32> to vector<256x8xbf16>
    %c0_22 = arith.constant 0 : index
    %c0_23 = arith.constant 0 : index
    %31 = vector.load %arg8[%c0_22, %c0_23] : memref<8x16xbf16, #tpu.memory_space<vmem>>, vector<8x16xbf16>
    %cst_24 = arith.constant dense<0.000000e+00> : vector<256x16xf32>
    %32 = tpu.matmul %30, %31, %cst_24 {dimension_numbers = #tpu.dot_dimension_numbers<[1], [0], [0], [1], [0, 0, 1, 1], [], []>} : vector<256x8xbf16>, vector<8x16xbf16>, vector<256x16xf32> -> vector<256x16xf32>
    %c0_25 = arith.constant 0 : index
    %c0_26 = arith.constant 0 : index
    %33 = vector.load %arg9[%c0_25, %c0_26] : memref<1x16xf32, #tpu.memory_space<vmem>>, vector<1x16xf32>
    %34 = vector.broadcast %33 : vector<1x16xf32> to vector<256x16xf32>
    %35 = arith.addf %32, %34 : vector<256x16xf32>
    %36 = vector.extract_strided_slice %19 {offsets = [0, 12], sizes = [256, 16], strides = [1, 1]} : vector<256x128xf32> to vector<256x16xf32>
    %37 = arith.mulf %35, %36 : vector<256x16xf32>
    %38 = arith.truncf %37 : vector<256x16xf32> to vector<256x16xbf16>
    %c0_27 = arith.constant 0 : index
    %c0_28 = arith.constant 0 : index
    %39 = vector.load %arg10[%c0_27, %c0_28] : memref<16x32xbf16, #tpu.memory_space<vmem>>, vector<16x32xbf16>
    %cst_29 = arith.constant dense<0.000000e+00> : vector<256x32xf32>
    %40 = tpu.matmul %38, %39, %cst_29 {dimension_numbers = #tpu.dot_dimension_numbers<[1], [0], [0], [1], [0, 0, 1, 1], [], []>} : vector<256x16xbf16>, vector<16x32xbf16>, vector<256x32xf32> -> vector<256x32xf32>
    %c0_30 = arith.constant 0 : index
    %c0_31 = arith.constant 0 : index
    %41 = vector.load %arg11[%c0_30, %c0_31] : memref<1x32xf32, #tpu.memory_space<vmem>>, vector<1x32xf32>
    %42 = vector.broadcast %41 : vector<1x32xf32> to vector<256x32xf32>
    %43 = arith.addf %40, %42 : vector<256x32xf32>
    %44 = vector.extract_strided_slice %19 {offsets = [0, 28], sizes = [256, 32], strides = [1, 1]} : vector<256x128xf32> to vector<256x32xf32>
    %45 = arith.mulf %43, %44 : vector<256x32xf32>
    %46 = arith.truncf %45 : vector<256x32xf32> to vector<256x32xbf16>
    %c0_32 = arith.constant 0 : index
    %c0_33 = arith.constant 0 : index
    %47 = vector.load %arg12[%c0_32, %c0_33] : memref<32x64xbf16, #tpu.memory_space<vmem>>, vector<32x64xbf16>
    %cst_34 = arith.constant dense<0.000000e+00> : vector<256x64xf32>
    %48 = tpu.matmul %46, %47, %cst_34 {dimension_numbers = #tpu.dot_dimension_numbers<[1], [0], [0], [1], [0, 0, 1, 1], [], []>} : vector<256x32xbf16>, vector<32x64xbf16>, vector<256x64xf32> -> vector<256x64xf32>
    %c0_35 = arith.constant 0 : index
    %c0_36 = arith.constant 0 : index
    %49 = vector.load %arg13[%c0_35, %c0_36] : memref<1x64xf32, #tpu.memory_space<vmem>>, vector<1x64xf32>
    %50 = vector.broadcast %49 : vector<1x64xf32> to vector<256x64xf32>
    %51 = arith.addf %48, %50 : vector<256x64xf32>
    %52 = vector.extract_strided_slice %19 {offsets = [0, 60], sizes = [256, 64], strides = [1, 1]} : vector<256x128xf32> to vector<256x64xf32>
    %53 = arith.mulf %51, %52 : vector<256x64xf32>
    %54 = arith.truncf %53 : vector<256x64xf32> to vector<256x64xbf16>
    %c0_37 = arith.constant 0 : index
    %c0_38 = arith.constant 0 : index
    %55 = vector.load %arg14[%c0_37, %c0_38] : memref<64x64xbf16, #tpu.memory_space<vmem>>, vector<64x64xbf16>
    %cst_39 = arith.constant dense<0.000000e+00> : vector<256x64xf32>
    %56 = tpu.matmul %54, %55, %cst_39 {dimension_numbers = #tpu.dot_dimension_numbers<[1], [0], [0], [1], [0, 0, 1, 1], [], []>} : vector<256x64xbf16>, vector<64x64xbf16>, vector<256x64xf32> -> vector<256x64xf32>
    %c0_40 = arith.constant 0 : index
    %c0_41 = arith.constant 0 : index
    %57 = vector.load %arg15[%c0_40, %c0_41] : memref<1x64xf32, #tpu.memory_space<vmem>>, vector<1x64xf32>
    %58 = vector.broadcast %57 : vector<1x64xf32> to vector<256x64xf32>
    %59 = arith.addf %56, %58 : vector<256x64xf32>
    %60 = arith.truncf %59 : vector<256x64xf32> to vector<256x64xbf16>
    %c0_42 = arith.constant 0 : index
    %c0_43 = arith.constant 0 : index
    %61 = vector.load %arg16[%c0_42, %c0_43] : memref<64x1152xbf16, #tpu.memory_space<vmem>>, vector<64x1152xbf16>
    %cst_44 = arith.constant dense<0.000000e+00> : vector<256x1152xf32>
    %62 = tpu.matmul %60, %61, %cst_44 {dimension_numbers = #tpu.dot_dimension_numbers<[1], [0], [0], [1], [0, 0, 1, 1], [], []>} : vector<256x64xbf16>, vector<64x1152xbf16>, vector<256x1152xf32> -> vector<256x1152xf32>
    %63 = vector.extract_strided_slice %62 {offsets = [0, 0], sizes = [256, 384], strides = [1, 1]} : vector<256x1152xf32> to vector<256x384xf32>
    %64 = vector.shape_cast %63 : vector<256x384xf32> to vector<16x16x384xf32>
    %c1 = arith.constant 1 : index
    %c8_45 = arith.constant 8 : index
    %c0_46 = arith.constant 0 : index
    %65 = vector.load %arg22[%c1, %c8_45, %c0_46] : memref<18x25x384xf32, #tpu.memory_space<vmem>>, vector<16x16x384xf32>
    tpu.vector_store %arg22[%c1, %c8_45, %c0_46], %64 {strides = array<i32>} : memref<18x25x384xf32, #tpu.memory_space<vmem>>, vector<16x16x384xf32>,
    %66 = vector.extract_strided_slice %62 {offsets = [0, 384], sizes = [256, 384], strides = [1, 1]} : vector<256x1152xf32> to vector<256x384xf32>
    %67 = vector.shape_cast %66 : vector<256x384xf32> to vector<16x16x384xf32>
    %c1_47 = arith.constant 1 : index
    %c8_48 = arith.constant 8 : index
    %c0_49 = arith.constant 0 : index
    %68 = vector.load %arg23[%c1_47, %c8_48, %c0_49] : memref<18x25x384xf32, #tpu.memory_space<vmem>>, vector<16x16x384xf32>
    tpu.vector_store %arg23[%c1_47, %c8_48, %c0_49], %67 {strides = array<i32>} : memref<18x25x384xf32, #tpu.memory_space<vmem>>, vector<16x16x384xf32>,
    %69 = vector.extract_strided_slice %62 {offsets = [0, 768], sizes = [256, 384], strides = [1, 1]} : vector<256x1152xf32> to vector<256x384xf32>
    %70 = vector.shape_cast %69 : vector<256x384xf32> to vector<16x16x384xf32>
    %c1_50 = arith.constant 1 : index
    %c8_51 = arith.constant 8 : index
    %c0_52 = arith.constant 0 : index
    %71 = vector.load %arg24[%c1_50, %c8_51, %c0_52] : memref<18x25x384xf32, #tpu.memory_space<vmem>>, vector<16x16x384xf32>
    tpu.vector_store %arg24[%c1_50, %c8_51, %c0_52], %70 {strides = array<i32>} : memref<18x25x384xf32, #tpu.memory_space<vmem>>, vector<16x16x384xf32>,
    %c0_53 = arith.constant 0 : index
    %c0_54 = arith.constant 0 : index
    %72 = vector.load %arg17[%c0_53, %c0_54] : memref<1x128xf32, #tpu.memory_space<vmem>>, vector<1x128xf32>
    %c0_55 = arith.constant 0 : index
    %c0_56 = arith.constant 0 : index
    %73 = vector.load %arg18[%c0_55, %c0_56] : memref<1x128xf32, #tpu.memory_space<vmem>>, vector<1x128xf32>
    %c0_i32_57 = arith.constant 0 : i32
    %c16_i32_58 = arith.constant 16 : i32
    %74 = arith.addi %c0_i32_57, %c16_i32_58 : i32
    %c1_i32_59 = arith.constant 1 : i32
    scf.for %arg25 = %c0_i32_57 to %74 step %c1_i32_59  : i32 {
      %c1_i32_61 = arith.constant 1 : i32
      %75 = arith.muli %arg25, %c1_i32_61 : i32
      %c0_i32_62 = arith.constant 0 : i32
      %76 = arith.addi %75, %c0_i32_62 : i32
      %77 = arith.index_cast %76 : i32 to index
      %c0_63 = arith.constant 0 : index
      %c0_64 = arith.constant 0 : index
      %78 = vector.load %arg22[%77, %c0_63, %c0_64] : memref<18x25x384xf32, #tpu.memory_space<vmem>>, vector<1x25x384xf32>
      %79 = vector.shape_cast %78 : vector<1x25x384xf32> to vector<25x384xf32>
      %80 = vector.extract_strided_slice %79 {offsets = [7, 0], sizes = [16, 128], strides = [1, 1]} : vector<25x384xf32> to vector<16x128xf32>
      %81 = vector.extract_strided_slice %79 {offsets = [8, 128], sizes = [16, 128], strides = [1, 1]} : vector<25x384xf32> to vector<16x128xf32>
      %82 = arith.addf %80, %81 : vector<16x128xf32>
      %83 = vector.extract_strided_slice %79 {offsets = [9, 256], sizes = [16, 128], strides = [1, 1]} : vector<25x384xf32> to vector<16x128xf32>
      %84 = arith.addf %82, %83 : vector<16x128xf32>
      %c1_i32_65 = arith.constant 1 : i32
      %85 = arith.muli %arg25, %c1_i32_65 : i32
      %c1_i32_66 = arith.constant 1 : i32
      %86 = arith.addi %85, %c1_i32_66 : i32
      %87 = arith.index_cast %86 : i32 to index
      %c0_67 = arith.constant 0 : index
      %c0_68 = arith.constant 0 : index
      %88 = vector.load %arg23[%87, %c0_67, %c0_68] : memref<18x25x384xf32, #tpu.memory_space<vmem>>, vector<1x25x384xf32>
      %89 = vector.shape_cast %88 : vector<1x25x384xf32> to vector<25x384xf32>
      %90 = vector.extract_strided_slice %89 {offsets = [7, 0], sizes = [16, 128], strides = [1, 1]} : vector<25x384xf32> to vector<16x128xf32>
      %91 = arith.addf %84, %90 : vector<16x128xf32>
      %92 = vector.extract_strided_slice %89 {offsets = [8, 128], sizes = [16, 128], strides = [1, 1]} : vector<25x384xf32> to vector<16x128xf32>
      %93 = arith.addf %91, %92 : vector<16x128xf32>
      %94 = vector.extract_strided_slice %89 {offsets = [9, 256], sizes = [16, 128], strides = [1, 1]} : vector<25x384xf32> to vector<16x128xf32>
      %95 = arith.addf %93, %94 : vector<16x128xf32>
      %c1_i32_69 = arith.constant 1 : i32
      %96 = arith.muli %arg25, %c1_i32_69 : i32
      %c2_i32 = arith.constant 2 : i32
      %97 = arith.addi %96, %c2_i32 : i32
      %98 = arith.index_cast %97 : i32 to index
      %c0_70 = arith.constant 0 : index
      %c0_71 = arith.constant 0 : index
      %99 = vector.load %arg24[%98, %c0_70, %c0_71] : memref<18x25x384xf32, #tpu.memory_space<vmem>>, vector<1x25x384xf32>
      %100 = vector.shape_cast %99 : vector<1x25x384xf32> to vector<25x384xf32>
      %101 = vector.extract_strided_slice %100 {offsets = [7, 0], sizes = [16, 128], strides = [1, 1]} : vector<25x384xf32> to vector<16x128xf32>
      %102 = arith.addf %95, %101 : vector<16x128xf32>
      %103 = vector.extract_strided_slice %100 {offsets = [8, 128], sizes = [16, 128], strides = [1, 1]} : vector<25x384xf32> to vector<16x128xf32>
      %104 = arith.addf %102, %103 : vector<16x128xf32>
      %105 = vector.extract_strided_slice %100 {offsets = [9, 256], sizes = [16, 128], strides = [1, 1]} : vector<25x384xf32> to vector<16x128xf32>
      %106 = arith.addf %104, %105 : vector<16x128xf32>
      %107 = vector.broadcast %72 : vector<1x128xf32> to vector<16x128xf32>
      %108 = arith.mulf %106, %107 : vector<16x128xf32>
      %109 = vector.broadcast %73 : vector<1x128xf32> to vector<16x128xf32>
      %110 = arith.addf %108, %109 : vector<16x128xf32>
      %cst_72 = arith.constant 3.000000e+00 : f32
      %111 = vector.broadcast %cst_72 : f32 to vector<16x128xf32>
      %112 = arith.addf %110, %111 : vector<16x128xf32>
      %cst_73 = arith.constant 0.000000e+00 : f32
      %cst_74 = arith.constant 6.000000e+00 : f32
      %113 = vector.broadcast %cst_73 : f32 to vector<16x128xf32>
      %114 = arith.maximumf %113, %112 : vector<16x128xf32>
      %115 = vector.broadcast %cst_74 : f32 to vector<16x128xf32>
      %116 = arith.minimumf %115, %114 : vector<16x128xf32>
      %117 = arith.mulf %110, %116 : vector<16x128xf32>
      %cst_75 = arith.constant 0.166666672 : f32
      %118 = vector.broadcast %cst_75 : f32 to vector<16x128xf32>
      %119 = arith.mulf %117, %118 : vector<16x128xf32>
      %c0_76 = arith.constant 0 : index
      %120 = arith.index_cast %arg25 : i32 to index
      %c0_77 = arith.constant 0 : index
      %c0_78 = arith.constant 0 : index
      %121 = vector.load %arg19[%c0_76, %120, %c0_77, %c0_78] : memref<1x16x16x128xf32, #tpu.memory_space<vmem>>, vector<1x1x16x128xf32>
      %122 = vector.shape_cast %121 : vector<1x1x16x128xf32> to vector<16x128xf32>
      %123 = vector.shape_cast %119 : vector<16x128xf32> to vector<1x1x16x128xf32>
      tpu.vector_store %arg19[%c0_76, %120, %c0_77, %c0_78], %123 {strides = array<i32>} : memref<1x16x16x128xf32, #tpu.memory_space<vmem>>, vector<1x1x16x128xf32>,
    }
    %c16_i32_60 = arith.constant 16 : i32
    return
  }
  func.func @transform_0(%arg0: i32) -> (i32, i32, i32) {
    %c0_i32 = arith.constant 0 : i32
    %c0_i32_0 = arith.constant 0 : i32
    %c0_i32_1 = arith.constant 0 : i32
    return %arg0, %c0_i32, %c0_i32_0 : i32, i32, i32
  }
  func.func @transform_1(%arg0: i32) -> (i32, i32) {
    %c0_i32 = arith.constant 0 : i32
    %c0_i32_0 = arith.constant 0 : i32
    %c0_i32_1 = arith.constant 0 : i32
    return %c0_i32, %c0_i32_0 : i32, i32
  }
  func.func @transform_2(%arg0: i32) -> (i32, i32) {
    %c0_i32 = arith.constant 0 : i32
    %c0_i32_0 = arith.constant 0 : i32
    %c0_i32_1 = arith.constant 0 : i32
    return %c0_i32, %c0_i32_0 : i32, i32
  }
  func.func @transform_3(%arg0: i32) -> (i32, i32) {
    %c0_i32 = arith.constant 0 : i32
    %c0_i32_0 = arith.constant 0 : i32
    %c0_i32_1 = arith.constant 0 : i32
    return %c0_i32, %c0_i32_0 : i32, i32
  }
  func.func @transform_4(%arg0: i32) -> (i32, i32) {
    %c0_i32 = arith.constant 0 : i32
    %c0_i32_0 = arith.constant 0 : i32
    %c0_i32_1 = arith.constant 0 : i32
    return %c0_i32, %c0_i32_0 : i32, i32
  }
  func.func @transform_5(%arg0: i32) -> (i32, i32) {
    %c0_i32 = arith.constant 0 : i32
    %c0_i32_0 = arith.constant 0 : i32
    %c0_i32_1 = arith.constant 0 : i32
    return %c0_i32, %c0_i32_0 : i32, i32
  }
  func.func @transform_6(%arg0: i32) -> (i32, i32) {
    %c0_i32 = arith.constant 0 : i32
    %c0_i32_0 = arith.constant 0 : i32
    %c0_i32_1 = arith.constant 0 : i32
    return %c0_i32, %c0_i32_0 : i32, i32
  }
  func.func @transform_7(%arg0: i32) -> (i32, i32) {
    %c0_i32 = arith.constant 0 : i32
    %c0_i32_0 = arith.constant 0 : i32
    %c0_i32_1 = arith.constant 0 : i32
    return %c0_i32, %c0_i32_0 : i32, i32
  }
  func.func @transform_8(%arg0: i32) -> (i32, i32) {
    %c0_i32 = arith.constant 0 : i32
    %c0_i32_0 = arith.constant 0 : i32
    %c0_i32_1 = arith.constant 0 : i32
    return %c0_i32, %c0_i32_0 : i32, i32
  }
  func.func @transform_9(%arg0: i32) -> (i32, i32) {
    %c0_i32 = arith.constant 0 : i32
    %c0_i32_0 = arith.constant 0 : i32
    %c0_i32_1 = arith.constant 0 : i32
    return %c0_i32, %c0_i32_0 : i32, i32
  }
  func.func @transform_10(%arg0: i32) -> (i32, i32) {
    %c0_i32 = arith.constant 0 : i32
    %c0_i32_0 = arith.constant 0 : i32
    %c0_i32_1 = arith.constant 0 : i32
    return %c0_i32, %c0_i32_0 : i32, i32
  }
  func.func @transform_11(%arg0: i32) -> (i32, i32) {
    %c0_i32 = arith.constant 0 : i32
    %c0_i32_0 = arith.constant 0 : i32
    %c0_i32_1 = arith.constant 0 : i32
    return %c0_i32, %c0_i32_0 : i32, i32
  }
  func.func @transform_12(%arg0: i32) -> (i32, i32) {
    %c0_i32 = arith.constant 0 : i32
    %c0_i32_0 = arith.constant 0 : i32
    %c0_i32_1 = arith.constant 0 : i32
    return %c0_i32, %c0_i32_0 : i32, i32
  }
  func.func @transform_13(%arg0: i32) -> (i32, i32) {
    %c0_i32 = arith.constant 0 : i32
    %c0_i32_0 = arith.constant 0 : i32
    %c0_i32_1 = arith.constant 0 : i32
    return %c0_i32, %c0_i32_0 : i32, i32
  }
  func.func @transform_14(%arg0: i32) -> (i32, i32) {
    %c0_i32 = arith.constant 0 : i32
    %c0_i32_0 = arith.constant 0 : i32
    %c0_i32_1 = arith.constant 0 : i32
    return %c0_i32, %c0_i32_0 : i32, i32
  }
  func.func @transform_15(%arg0: i32) -> (i32, i32) {
    %c0_i32 = arith.constant 0 : i32
    %c0_i32_0 = arith.constant 0 : i32
    %c0_i32_1 = arith.constant 0 : i32
    return %c0_i32, %c0_i32_0 : i32, i32
  }
  func.func @transform_16(%arg0: i32) -> (i32, i32) {
    %c0_i32 = arith.constant 0 : i32
    %c0_i32_0 = arith.constant 0 : i32
    %c0_i32_1 = arith.constant 0 : i32
    return %c0_i32, %c0_i32_0 : i32, i32
  }
  func.func @transform_17(%arg0: i32) -> (i32, i32) {
    %c0_i32 = arith.constant 0 : i32
    %c0_i32_0 = arith.constant 0 : i32
    %c0_i32_1 = arith.constant 0 : i32
    return %c0_i32, %c0_i32_0 : i32, i32
  }
  func.func @transform_18(%arg0: i32) -> (i32, i32, i32, i32) {
    %c0_i32 = arith.constant 0 : i32
    %c0_i32_0 = arith.constant 0 : i32
    %c0_i32_1 = arith.constant 0 : i32
    %c0_i32_2 = arith.constant 0 : i32
    return %arg0, %c0_i32, %c0_i32_0, %c0_i32_1 : i32, i32, i32, i32
  }
}

</mosaic_0001>

<bundles_post_ra>
// kernel: tpu_custom_call.1
= control target key start
LH: loop header
LB: loop body
LE: loop exit
PB: predicated region body
PF: predicated region fallthrough
CT: control target
= control target key end

     0   :  { %s10201_s0 = inlined_call_operand.vmem [shape: bf16[2,256,64], index: 0, kind: input, shape index: {}]   ;;  %s10202_s1 = inlined_call_operand.vmem [shape: bf16[64,128], index: 1, kind: input, shape index: {}]   ;;  %s10203_s2 = inlined_call_operand.hbm [shape: f32[1,128], index: 2, kind: input, shape index: {}]   ;;  %s10204_s3 = inlined_call_operand.vmem [shape: f32[49,128], index: 3, kind: input, shape index: {}]   ;;  %s10205_s4 = inlined_call_operand.hbm [shape: f32[1,128], index: 4, kind: input, shape index: {}]   ;;  %s10206_s5 = inlined_call_operand.vmem [shape: bf16[4,8], index: 5, kind: input, shape index: {}]   ;;  %s10207_s6 = inlined_call_operand.hbm [shape: f32[1,8], index: 6, kind: input, shape index: {}]   ;;  %s10208_s7 = inlined_call_operand.vmem [shape: bf16[8,16], index: 7, kind: input, shape index: {}]   ;;  %s10209_s8 = inlined_call_operand.hbm [shape: f32[1,16], index: 8, kind: input, shape index: {}]   ;;  %s10210_s9 = inlined_call_operand.hbm [shape: bf16[16,32], index: 9, kind: input, shape index: {}]   ;;  %s10211_s10 = inlined_call_operand.hbm [shape: f32[1,32], index: 10, kind: input, shape index: {}]   ;;  %s10212_s11 = inlined_call_operand.vmem [shape: bf16[32,64], index: 11, kind: input, shape index: {}]   ;;  %s10213_s12 = inlined_call_operand.hbm [shape: f32[1,64], index: 12, kind: input, shape index: {}]   ;;  %s10214_s13 = inlined_call_operand.hbm [shape: bf16[64,64], index: 13, kind: input, shape index: {}]   ;;  %s10215_s14 = inlined_call_operand.hbm [shape: f32[1,64], index: 14, kind: input, shape index: {}]   ;;  %s10216_s15 = inlined_call_operand.vmem [shape: bf16[64,1152], index: 15, kind: input, shape index: {}]   ;;  %s10217_s16 = inlined_call_operand.hbm [shape: f32[1,128], index: 16, kind: input, shape index: {}]   ;;  %s10218_s17 = inlined_call_operand.hbm [shape: f32[1,128], index: 17, kind: input, shape index: {}]   ;;  %s10219_s18 = inlined_call_operand.hbm [shape: f32[2,16,16,128], index: 18, kind: output, shape index: {}]  }
   0x1   :  { %10253 = sst [smem:[#allocation54_spill]] %s10201_s0 }
   0x2   :  { %10254 = sst [smem:[#allocation55_spill]] %s10202_s1 }
   0x3   :  { %10255 = sst [smem:[#allocation56_spill]] %s10203_s2 }
   0x4   :  { %10256 = sst [smem:[#allocation57_spill]] %s10205_s4 }
   0x5   :  { %10257 = sst [smem:[#allocation58_spill]] %s10209_s8 }
   0x6   :  { %10258 = sst [smem:[#allocation59_spill]] %s10211_s10 }
   0x7   :  { %10259 = sst [smem:[#allocation60_spill]] %s10214_s13 }
   0x8   :  { %10260 = sst [smem:[#allocation61_spill]] %s10217_s16 }
   0x9   :  { %10261 = sst [smem:[#allocation62_spill]] %s10219_s18 }
   0xa   :  { %23 = vsyncpa [#allocation8], 0 }
   0xb   :  { %24 = vsyncpa [#allocation11], 0 }
   0xc   :  { %25 = vsyncpa [#allocation14], 0 }
   0xd   :  { %26 = vsyncpa [#allocation17], 0 }
   0xe   :  { %27 = vsyncpa [#allocation20], 0 }
   0xf   :  { %28 = vsyncpa [#allocation23], 0 }
  0x10   :  { %29 = vsyncpa [#allocation9], 0 }
  0x11   :  { %31 = vsyncpa [#allocation9 + $0x1], 0  ;;  %s7307_s27 = smov 0   ;;  %s7309_s28 = smov 0  }
  0x12   :  { %s7311_s29 = smov 0   ;;  %s7313_s30 = smov 0  }
  0x13 LB: > { %10262 = sst [smem:[#allocation33_spill]] %s7169_s27  ;;  %s7328_s0 = sadd.s32 4294967295, %s7181_s30   ;;  %s7181_s30 = sphi %s7313_s30, %s10336_s30   ;;  %s7177_s29 = sphi %s7311_s29, %s10338_s29   ;;  %s7173_s28 = sphi %s7309_s28, %s10340_s28   ;;  %s7169_s27 = sphi %s7307_s27, %s10339_s27  }
  0x14   : > { %10263 = sst [smem:[#allocation34_spill]] %s7177_s29  ;;  %s5927_s19 = sadd.s32 4294967294, %s7181_s30  }
  0x15   : > { %10264 = sst [smem:[#allocation35_spill]] %s7181_s30  ;;  %s7332_s1 = sadd.s32 1, %s7181_s30  }
  0x16   : > { %10265 = sst [smem:[#allocation36_spill]] %s7332_s1  ;;  %s427_s20 = sadd.s32 1, %s7177_s29 }
  0x17   : > { %s424_s21 = ssub.s32 %s7181_s30, %s7332_s1  ;;  %p437_p0 = scmp.ne.s32.totalorder %s7177_s29, %s7173_s28 }
  0x18   : > { %p425_p1 = scmp.eq.s32.totalorder %s424_s21, 0  ;;  %p438_p2 = scmp.eq.s32.totalorder %s7328_s0, 1 }
  0x19   : > { %p443_p3 = scmp.ne.s32.totalorder %s7173_s28, %s7169_s27  ;;  %p444_p4 = scmp.eq.s32.totalorder %s5927_s19, 1 }
  0x1a   : > { %s7343_s22 = scalar_select %p425_p1, %s7177_s29, %s427_s20  }
  0x1b   : > { %p7345_p5 = por %p438_p2, %p437_p0  ;;  %p7349_p6 = por %p444_p4, %p443_p3 }
  0x1c   : > { %10266 = sst [smem:[#allocation37_spill]] %s7343_s22  ;;  %p5928_p7 = scmp.ge.s32.totalorder %s7181_s30, 1 }
  0x1d   : > { %s10268_s23 = scalar_select %p7349_p6, 1, 0 }
  0x1e   : > { %p451_p8 = scmp.lt.s32.totalorder %s7181_s30, 3  ;;  %p5929_p9 = scmp.ne.s32.totalorder %s7328_s0, 0 }
  0x1f   : > { %10269 = sst [smem:[#allocation38_spill]] %s10268_s23  ;;  %p6657_p10 = scmp.eq.s32.totalorder %s7328_s0, 0 }
  0x20   : > { %p7357_p11 = pnand %p5928_p7, %p451_p8  ;;  %s10271_s4 = sld [smem:[#allocation57_spill]] }
  0x21   : > { %s7191_s20 = smov [#allocation10]   ;;  %s10272_s8 = sld [smem:[#allocation58_spill]] }
  0x22   : > { %p6619_p12 = pneg %p7357_p11  ;;  %s483_s21 = sshll.u32 %s7191_s20, 4  ;;  %s484_s21 = int_to_ptr.vmem [resolvable:$true] %s483_s21 }
  0x23   : > { %s10274_s10 = sld [smem:[#allocation59_spill]]  ;;  %s7192_s27 = smov [#allocation13]  }
  0x24   : > { %p7371_p13 = pnand %p6657_p10, %p6619_p12  ;;  %s513_s20 = sshll.u32 %s7192_s27, 4  ;;  %s514_s20 = int_to_ptr.vmem [resolvable:$true] %s513_s20 }
  0x25   : > { %s7193_s29 = smov [#allocation16]   ;;  %s10275_s13 = sld [smem:[#allocation60_spill]] }
  0x26   : > { %s481_s19 = sshll.u32 %s10271_s4, 4  ;;  %s539_s22 = sshll.u32 %s7193_s29, 4  ;;  %s482_s19 = int_to_ptr.hbm [resolvable:$true] %s481_s19  ;;  %s540_s22 = int_to_ptr.vmem [resolvable:$true] %s539_s22 }
  0x27   : > { %s511_s1 = sshll.u32 %s10272_s8, 4  ;;  %s7194_s25 = smov [#allocation19]   ;;  %s512_s1 = int_to_ptr.hbm [resolvable:$true] %s511_s1 }
  0x28   : > { %6625 = dma.hbm_to_vmem [thread:$0]  (!%p7371_p13), %s482_s19, 16, %s484_s21, [#allocation11]  }
  0x29   : > { %s537_s4 = sshll.u32 %s10274_s10, 4  ;;  %s565_s27 = sshll.u32 %s7194_s25, 4  ;;  %s538_s4 = int_to_ptr.hbm [resolvable:$true] %s537_s4  ;;  %s566_s27 = int_to_ptr.vmem [resolvable:$true] %s565_s27 }
  0x2a   : > { %6631 = dma.hbm_to_vmem [thread:$0]  (!%p7371_p13), %s512_s1, 16, %s514_s20, [#allocation14]  }
  0x2b   : > { %s563_s18 = sshll.u32 %s10275_s13, 4  ;;  %s10276_s16 = sld [smem:[#allocation61_spill]]  ;;  %s564_s18 = int_to_ptr.hbm [resolvable:$true] %s563_s18 }
  0x2c   : > { %6637 = dma.hbm_to_vmem [thread:$0]  (!%p7371_p13), %s538_s4, 16, %s540_s22, [#allocation17]  }
  0x2d   : > { %s7195_s1 = smov 64   ;;  %s7196_s20 = smov 4  }
  0x2e   : > { %6643 = dma.hbm_to_vmem [thread:$0]  (!%p7371_p13), %s564_s18, 512, %s566_s27, [#allocation20], %s7195_s1, %s7195_s1, %s7196_s20  }
  0x2f   : > { %s10277_s30 = sld [smem:[#allocation56_spill]]  ;;  %s7197_s13 = smov [#allocation22]  }
  0x30   : > { %s595_s4 = sshll.u32 %s7197_s13, 4  ;;  %s7198_s22 = smov [#allocation7]   ;;  %s596_s4 = int_to_ptr.vmem [resolvable:$true] %s595_s4 }
  0x31   : > { %s593_s21 = sshll.u32 %s10276_s16, 4  ;;  %s468_s25 = sshll.u32 %s7198_s22, 4  ;;  %s594_s21 = int_to_ptr.hbm [resolvable:$true] %s593_s21  ;;  %s469_s25 = int_to_ptr.vmem [resolvable:$true] %s468_s25 }
  0x32   : > { %6649 = dma.hbm_to_vmem [thread:$0]  (!%p7371_p13), %s594_s21, 16, %s596_s4, [#allocation23]  }
  0x33   : > { %s496_s16 = sshll.u32 %s10207_s6, 4  ;;  %s522_s29 = sshll.u32 %s10210_s9, 4  ;;  %s497_s16 = int_to_ptr.hbm [resolvable:$true] %s496_s16  ;;  %s523_s29 = int_to_ptr.hbm [resolvable:$true] %s522_s29 }
  0x34   : > { %s7199_s13 = smov [#allocation12]   ;;  %s7200_s21 = smov [#allocation15]  }
  0x35   : > { %s466_s10 = sshll.u32 %s10277_s30, 4  ;;  %s498_s8 = sshll.u32 %s7199_s13, 4  ;;  %s467_s10 = int_to_ptr.hbm [resolvable:$true] %s466_s10  ;;  %s499_s8 = int_to_ptr.vmem [resolvable:$true] %s498_s8 }
  0x36   : > { %6622 = dma.hbm_to_vmem [thread:$0]  (!%p7371_p13), %s467_s10, 16, %s469_s25, [#allocation8]  }
  0x37   : > { %6628 = dma.hbm_to_vmem [thread:$0]  (!%p7371_p13), %s497_s16, 16, %s499_s8, [#allocation11]  }
  0x38   : > { %s524_s30 = sshll.u32 %s7200_s21, 4  ;;  %s552_s26 = sshll.u32 %s10213_s12, 4  ;;  %s525_s30 = int_to_ptr.vmem [resolvable:$true] %s524_s30  ;;  %s553_s26 = int_to_ptr.hbm [resolvable:$true] %s552_s26 }
  0x39   : > { %6634 = dma.hbm_to_vmem [thread:$0]  (!%p7371_p13), %s523_s29, 128, %s525_s30, [#allocation14], %s7195_s1, %s7195_s1, %s7196_s20  }
  0x3a   : > { %s578_s19 = sshll.u32 %s10215_s14, 4  ;;  %s7201_s18 = smov [#allocation18]   ;;  %s579_s19 = int_to_ptr.hbm [resolvable:$true] %s578_s19 }
  0x3b   : > { %s554_s27 = sshll.u32 %s7201_s18, 4  ;;  %s7202_s16 = smov [#allocation21]   ;;  %s555_s27 = int_to_ptr.vmem [resolvable:$true] %s554_s27 }
  0x3c   : > { %6640 = dma.hbm_to_vmem [thread:$0]  (!%p7371_p13), %s553_s26, 16, %s555_s27, [#allocation17]  }
  0x3d   : > { %s580_s13 = sshll.u32 %s7202_s16, 4  ;;  %s605_s4 = sshll.u32 %s10218_s17, 4  ;;  %s581_s13 = int_to_ptr.vmem [resolvable:$true] %s580_s13  ;;  %s606_s4 = int_to_ptr.hbm [resolvable:$true] %s605_s4 }
  0x3e   : > { %6646 = dma.hbm_to_vmem [thread:$0]  (!%p7371_p13), %s579_s19, 16, %s581_s13, [#allocation20]  }
  0x3f   : > { %s7203_s1 = smov [#allocation24]   ;;  %628 = sbr.rel (%p7357_p11) target bundleno = 3290 (0xcda), region = 92 }
  0x40   : > { %s607_s20 = sshll.u32 %s7203_s1, 4  ;;  %s608_s20 = int_to_ptr.vmem [resolvable:$true] %s607_s20 }
  0x41   : > { %6652 = dma.hbm_to_vmem [thread:$0]  (!%p7371_p13), %s606_s4, 16, %s608_s20, [#allocation23]  }
  0x44   : > { %7140 = dma.done.wait (%p6657_p10), [#allocation8], 16  }
  0x45   : > { %7142 = vsyncadd (%p6657_p10), [#allocation8], 4294967280 }
  0x46   : > { %7144 = dma.done.wait (%p6657_p10), [#allocation11], 32  }
  0x47   : > { %7146 = vsyncadd (%p6657_p10), [#allocation11], 4294967264 }
  0x48   : > { %7148 = dma.done.wait (%p6657_p10), [#allocation14], 144  }
  0x49   : > { %7150 = vsyncadd (%p6657_p10), [#allocation14], 4294967152 }
  0x4a   : > { %7152 = dma.done.wait (%p6657_p10), [#allocation17], 32  }
  0x4b   : > { %7154 = vsyncadd (%p6657_p10), [#allocation17], 4294967264 }
  0x4c   : > { %7156 = dma.done.wait (%p6657_p10), [#allocation20], 528  }
  0x4d   : > { %7158 = vsyncadd (%p6657_p10), [#allocation20], 4294966768 }
  0x4e   : > { %7160 = dma.done.wait (%p6657_p10), [#allocation23], 32  }
  0x4f   : > { %7162 = vsyncadd (%p6657_p10), [#allocation23], 4294967264  ;;  %s730_s23 = sand.u32 1, %s7173_s28   ;;  %p733_p0 = scmp.lt.s32.totalorder %s7328_s0, 1 }
  0x50   : > { %s7454_s24 = sshll.u32 %s730_s23, 8  ;;  %s10278_s10 = sld [smem:[#allocation54_spill]] }
  0x51   : > { %s734_s29 = scalar_select %p733_p0, %s7328_s0, 1 }
  0x52   : > { %s732_s19 = scalar_lea.vmem [#allocation25], %s7454_s24  ;;  %742 = sbr.rel (%p5929_p9) target bundleno = 824 (0x338), region = 140 }
  0x53   : > { %s6504_s30 = sshll.u32 %s734_s29, 7 }
  0x56   : > { %s7460_s25 = scalar_lea.vmem %s10278_s10, %s6504_s30 }
  0x57   : > { %v7204_v0 = vmov 0.0  }
  0x58   : > { %743 = vst [vmem:[#allocation2] sm:$0xff] %v7204_v0 }
  0x59   : > { %744 = vst [vmem:[#allocation2 + $0x8] sm:$0xff] %v7204_v0 }
  0x5a   : > { %745 = vst [vmem:[#allocation2 + $0x10] sm:$0xff] %v7204_v0 }
  0x5b   : > { %746 = vst [vmem:[#allocation2 + $0x18] sm:$0x7] %v7204_v0 }
  0x5c   : > { %747 = vst [vmem:[#allocation2 + $0x20] sm:$0xff] %v7204_v0 }
  0x5d   : > { %748 = vst [vmem:[#allocation2 + $0x28] sm:$0xff] %v7204_v0 }
  0x5e   : > { %749 = vst [vmem:[#allocation2 + $0x30] sm:$0xff] %v7204_v0 }
  0x5f   : > { %750 = vst [vmem:[#allocation2 + $0x38] sm:$0x7] %v7204_v0  ;;  %v7977_v1 = vld [vmem:[#allocation2] sm:$0xff] }
  0x60   : > { %751 = vst [vmem:[#allocation2 + $0x40] sm:$0xff] %v7204_v0 }
  0x61   : > { %752 = vst [vmem:[#allocation2 + $0x48] sm:$0xff] %v7204_v0 }
  0x62   : > { %753 = vst [vmem:[#allocation2 + $0x50] sm:$0xff] %v7204_v0 }
  0x63   : > { %754 = vst [vmem:[#allocation2 + $0x58] sm:$0x7] %v7204_v0 }
  0x64   : > { %755 = vst [vmem:[#allocation2 + $0x60] sm:$0xff] %v7204_v0 }
  0x65   : > { %756 = vst [vmem:[#allocation2 + $0x68] sm:$0xff] %v7204_v0 }
  0x66   : > { %757 = vst [vmem:[#allocation2 + $0x70] sm:$0xff] %v7204_v0 }
  0x67   : > { %758 = vst [vmem:[#allocation2 + $0x78] sm:$0x7] %v7204_v0 }
  0x68   : > { %759 = vst [vmem:[#allocation2 + $0x80] sm:$0xff] %v7204_v0 }
  0x69   : > { %760 = vst [vmem:[#allocation2 + $0x88] sm:$0xff] %v7204_v0 }
  0x6a   : > { %761 = vst [vmem:[#allocation2 + $0x90] sm:$0xff] %v7204_v0 }
  0x6b   : > { %762 = vst [vmem:[#allocation2 + $0x98] sm:$0x7] %v7204_v0 }
  0x6c   : > { %763 = vst [vmem:[#allocation2 + $0xa0] sm:$0xff] %v7204_v0 }
  0x6d   : > { %764 = vst [vmem:[#allocation2 + $0xa8] sm:$0xff] %v7204_v0 }
  0x6e   : > { %765 = vst [vmem:[#allocation2 + $0xb0] sm:$0xff] %v7204_v0 }
  0x6f   : > { %766 = vst [vmem:[#allocation2 + $0xb8] sm:$0x7] %v7204_v0 }
  0x70   : > { %767 = vst [vmem:[#allocation2 + $0xc0] sm:$0xff] %v7204_v0 }
  0x71   : > { %768 = vst [vmem:[#allocation2 + $0xc8] sm:$0xff] %v7204_v0 }
  0x72   : > { %769 = vst [vmem:[#allocation2 + $0xd0] sm:$0xff] %v7204_v0 }
  0x73   : > { %770 = vst [vmem:[#allocation2 + $0xd8] sm:$0x7] %v7204_v0 }
  0x74   : > { %771 = vst [vmem:[#allocation2 + $0xe0] sm:$0xff] %v7204_v0 }
  0x75   : > { %772 = vst [vmem:[#allocation2 + $0xe8] sm:$0xff] %v7204_v0 }
  0x76   : > { %773 = vst [vmem:[#allocation2 + $0xf0] sm:$0xff] %v7204_v0 }
  0x77   : > { %774 = vst [vmem:[#allocation2 + $0xf8] sm:$0x7] %v7204_v0 }
  0x78   : > { %775 = vst [vmem:[#allocation2 + $0x100] sm:$0xff] %v7204_v0 }
  0x79   : > { %776 = vst [vmem:[#allocation2 + $0x108] sm:$0xff] %v7204_v0 }
  0x7a   : > { %777 = vst [vmem:[#allocation2 + $0x110] sm:$0xff] %v7204_v0 }
  0x7b   : > { %778 = vst [vmem:[#allocation2 + $0x118] sm:$0x7] %v7204_v0 }
  0x7c   : > { %779 = vst [vmem:[#allocation2 + $0x120] sm:$0xff] %v7204_v0 }
  0x7d   : > { %780 = vst [vmem:[#allocation2 + $0x128] sm:$0xff] %v7204_v0 }
  0x7e   : > { %781 = vst [vmem:[#allocation2 + $0x130] sm:$0xff] %v7204_v0 }
  0x7f   : > { %782 = vst [vmem:[#allocation2 + $0x138] sm:$0x7] %v7204_v0 }
  0x80   : > { %783 = vst [vmem:[#allocation2 + $0x140] sm:$0xff] %v7204_v0 }
  0x81   : > { %784 = vst [vmem:[#allocation2 + $0x148] sm:$0xff] %v7204_v0 }
  0x82   : > { %785 = vst [vmem:[#allocation2 + $0x150] sm:$0xff] %v7204_v0 }
  0x83   : > { %786 = vst [vmem:[#allocation2 + $0x158] sm:$0x7] %v7204_v0 }
  0x84   : > { %787 = vst [vmem:[#allocation2 + $0x160] sm:$0xff] %v7204_v0 }
  0x85   : > { %788 = vst [vmem:[#allocation2 + $0x168] sm:$0xff] %v7204_v0 }
  0x86   : > { %789 = vst [vmem:[#allocation2 + $0x170] sm:$0xff] %v7204_v0 }
  0x87   : > { %790 = vst [vmem:[#allocation2 + $0x178] sm:$0x7] %v7204_v0 }
  0x88   : > { %791 = vst [vmem:[#allocation2 + $0x180] sm:$0xff] %v7204_v0 }
  0x89   : > { %792 = vst [vmem:[#allocation2 + $0x188] sm:$0xff] %v7204_v0 }
  0x8a   : > { %793 = vst [vmem:[#allocation2 + $0x190] sm:$0xff] %v7204_v0 }
  0x8b   : > { %794 = vst [vmem:[#allocation2 + $0x198] sm:$0x7] %v7204_v0 }
  0x8c   : > { %795 = vst [vmem:[#allocation2 + $0x1a0] sm:$0xff] %v7204_v0 }
  0x8d   : > { %796 = vst [vmem:[#allocation2 + $0x1a8] sm:$0xff] %v7204_v0 }
  0x8e   : > { %797 = vst [vmem:[#allocation2 + $0x1b0] sm:$0xff] %v7204_v0 }
  0x8f   : > { %798 = vst [vmem:[#allocation2 + $0x1b8] sm:$0x7] %v7204_v0 }
  0x90   : > { %799 = vst [vmem:[#allocation2 + $0x1c0] sm:$0xff] %v7204_v0 }
  0x91   : > { %800 = vst [vmem:[#allocation2 + $0x1c8] sm:$0xff] %v7204_v0 }
  0x92   : > { %801 = vst [vmem:[#allocation2 + $0x1d0] sm:$0xff] %v7204_v0 }
  0x93   : > { %802 = vst [vmem:[#allocation2 + $0x1d8] sm:$0x7] %v7204_v0 }
  0x94   : > { %803 = vst [vmem:[#allocation2 + $0x1e0] sm:$0xff] %v7204_v0 }
  0x95   : > { %804 = vst [vmem:[#allocation2 + $0x1e8] sm:$0xff] %v7204_v0 }
  0x96   : > { %805 = vst [vmem:[#allocation2 + $0x1f0] sm:$0xff] %v7204_v0 }
  0x97   : > { %806 = vst [vmem:[#allocation2 + $0x1f8] sm:$0x7] %v7204_v0 }
  0x98   : > { %807 = vst [vmem:[#allocation2 + $0x200] sm:$0xff] %v7204_v0 }
  0x99   : > { %808 = vst [vmem:[#allocation2 + $0x208] sm:$0xff] %v7204_v0 }
  0x9a   : > { %809 = vst [vmem:[#allocation2 + $0x210] sm:$0xff] %v7204_v0 }
  0x9b   : > { %810 = vst [vmem:[#allocation2 + $0x218] sm:$0x7] %v7204_v0 }
  0x9c   : > { %811 = vst [vmem:[#allocation2 + $0x220] sm:$0xff] %v7204_v0 }
  0x9d   : > { %812 = vst [vmem:[#allocation2 + $0x228] sm:$0xff] %v7204_v0 }
  0x9e   : > { %813 = vst [vmem:[#allocation2 + $0x230] sm:$0xff] %v7204_v0 }
  0x9f   : > { %814 = vst [vmem:[#allocation2 + $0x238] sm:$0x7] %v7204_v0 }
  0xa0   : > { %815 = vst [vmem:[#allocation2 + $0x240] sm:$0xff] %v7204_v0 }
  0xa1   : > { %816 = vst [vmem:[#allocation2 + $0x248] sm:$0xff] %v7204_v0 }
  0xa2   : > { %817 = vst [vmem:[#allocation2 + $0x250] sm:$0xff] %v7204_v0 }
  0xa3   : > { %818 = vst [vmem:[#allocation2 + $0x258] sm:$0x7] %v7204_v0 }
  0xa4   : > { %819 = vst [vmem:[#allocation2 + $0x260] sm:$0xff] %v7204_v0 }
  0xa5   : > { %820 = vst [vmem:[#allocation2 + $0x268] sm:$0xff] %v7204_v0 }
  0xa6   : > { %821 = vst [vmem:[#allocation2 + $0x270] sm:$0xff] %v7204_v0 }
  0xa7   : > { %822 = vst [vmem:[#allocation2 + $0x278] sm:$0x7] %v7204_v0 }
  0xa8   : > { %823 = vst [vmem:[#allocation2 + $0x280] sm:$0xff] %v7204_v0 }
  0xa9   : > { %824 = vst [vmem:[#allocation2 + $0x288] sm:$0xff] %v7204_v0 }
  0xaa   : > { %825 = vst [vmem:[#allocation2 + $0x290] sm:$0xff] %v7204_v0 }
  0xab   : > { %826 = vst [vmem:[#allocation2 + $0x298] sm:$0x7] %v7204_v0 }
  0xac   : > { %827 = vst [vmem:[#allocation2 + $0x2a0] sm:$0xff] %v7204_v0 }
  0xad   : > { %828 = vst [vmem:[#allocation2 + $0x2a8] sm:$0xff] %v7204_v0 }
  0xae   : > { %829 = vst [vmem:[#allocation2 + $0x2b0] sm:$0xff] %v7204_v0 }
  0xaf   : > { %830 = vst [vmem:[#allocation2 + $0x2b8] sm:$0x7] %v7204_v0 }
  0xb0   : > { %831 = vst [vmem:[#allocation4] sm:$0xff] %v7204_v0 }
  0xb1   : > { %832 = vst [vmem:[#allocation4 + $0x8] sm:$0xff] %v7204_v0 }
  0xb2   : > { %833 = vst [vmem:[#allocation4 + $0x10] sm:$0xff] %v7204_v0 }
  0xb3   : > { %834 = vst [vmem:[#allocation4 + $0x18] sm:$0xff] %v7204_v0 }
  0xb4   : > { %835 = vst [vmem:[#allocation4 + $0x20] sm:$0xff] %v7204_v0 }
  0xb5   : > { %836 = vst [vmem:[#allocation4 + $0x28] sm:$0xff] %v7204_v0 }
  0xb6   : > { %837 = vst [vmem:[#allocation4 + $0x30] sm:$0xff] %v7204_v0 }
  0xb7   : > { %838 = vst [vmem:[#allocation4 + $0x38] sm:$0xff] %v7204_v0 }
  0xb8   : > { %839 = vst [vmem:[#allocation4 + $0x40] sm:$0xff] %v7204_v0 }
  0xb9   : > { %840 = vst [vmem:[#allocation4 + $0x48] sm:$0x1] %v7204_v0 }
  0xba   : > { %841 = vst [vmem:[#allocation4 + $0x50] sm:$0x1] %v7204_v0 }
  0xbb   : > { %842 = vst [vmem:[#allocation4 + $0x58] sm:$0x1] %v7204_v0 }
  0xbc   : > { %843 = vst [vmem:[#allocation4 + $0x60] sm:$0xff] %v7204_v0 }
  0xbd   : > { %844 = vst [vmem:[#allocation4 + $0x68] sm:$0xff] %v7204_v0 }
  0xbe   : > { %845 = vst [vmem:[#allocation4 + $0x70] sm:$0xff] %v7204_v0 }
  0xbf   : > { %846 = vst [vmem:[#allocation4 + $0x78] sm:$0xff] %v7204_v0 }
  0xc0   : > { %847 = vst [vmem:[#allocation4 + $0x80] sm:$0xff] %v7204_v0 }
  0xc1   : > { %848 = vst [vmem:[#allocation4 + $0x88] sm:$0xff] %v7204_v0 }
  0xc2   : > { %849 = vst [vmem:[#allocation4 + $0x90] sm:$0xff] %v7204_v0 }
  0xc3   : > { %850 = vst [vmem:[#allocation4 + $0x98] sm:$0xff] %v7204_v0 }
  0xc4   : > { %851 = vst [vmem:[#allocation4 + $0xa0] sm:$0xff] %v7204_v0 }
  0xc5   : > { %852 = vst [vmem:[#allocation4 + $0xa8] sm:$0x1] %v7204_v0 }
  0xc6   : > { %853 = vst [vmem:[#allocation4 + $0xb0] sm:$0x1] %v7204_v0 }
  0xc7   : > { %854 = vst [vmem:[#allocation4 + $0xb8] sm:$0x1] %v7204_v0 }
  0xc8   : > { %855 = vst [vmem:[#allocation4 + $0xc0] sm:$0xff] %v7204_v0 }
  0xc9   : > { %856 = vst [vmem:[#allocation4 + $0xc8] sm:$0xff] %v7204_v0 }
  0xca   : > { %857 = vst [vmem:[#allocation4 + $0xd0] sm:$0xff] %v7204_v0 }
  0xcb   : > { %858 = vst [vmem:[#allocation4 + $0xd8] sm:$0xff] %v7204_v0 }
  0xcc   : > { %859 = vst [vmem:[#allocation4 + $0xe0] sm:$0xff] %v7204_v0 }
  0xcd   : > { %860 = vst [vmem:[#allocation4 + $0xe8] sm:$0xff] %v7204_v0 }
  0xce   : > { %861 = vst [vmem:[#allocation4 + $0xf0] sm:$0xff] %v7204_v0 }
  0xcf   : > { %862 = vst [vmem:[#allocation4 + $0xf8] sm:$0xff] %v7204_v0 }
  0xd0   : > { %863 = vst [vmem:[#allocation4 + $0x100] sm:$0xff] %v7204_v0 }
  0xd1   : > { %864 = vst [vmem:[#allocation4 + $0x108] sm:$0x1] %v7204_v0 }
  0xd2   : > { %865 = vst [vmem:[#allocation4 + $0x110] sm:$0x1] %v7204_v0 }
  0xd3   : > { %866 = vst [vmem:[#allocation4 + $0x118] sm:$0x1] %v7204_v0 }
  0xd4   : > { %867 = vst [vmem:[#allocation4 + $0x120] sm:$0xff] %v7204_v0 }
  0xd5   : > { %868 = vst [vmem:[#allocation4 + $0x128] sm:$0xff] %v7204_v0 }
  0xd6   : > { %869 = vst [vmem:[#allocation4 + $0x130] sm:$0xff] %v7204_v0 }
  0xd7   : > { %870 = vst [vmem:[#allocation4 + $0x138] sm:$0xff] %v7204_v0 }
  0xd8   : > { %871 = vst [vmem:[#allocation4 + $0x140] sm:$0xff] %v7204_v0 }
  0xd9   : > { %872 = vst [vmem:[#allocation4 + $0x148] sm:$0xff] %v7204_v0 }
  0xda   : > { %873 = vst [vmem:[#allocation4 + $0x150] sm:$0xff] %v7204_v0 }
  0xdb   : > { %874 = vst [vmem:[#allocation4 + $0x158] sm:$0xff] %v7204_v0 }
  0xdc   : > { %875 = vst [vmem:[#allocation4 + $0x160] sm:$0xff] %v7204_v0 }
  0xdd   : > { %876 = vst [vmem:[#allocation4 + $0x168] sm:$0x1] %v7204_v0 }
  0xde   : > { %877 = vst [vmem:[#allocation4 + $0x170] sm:$0x1] %v7204_v0 }
  0xdf   : > { %878 = vst [vmem:[#allocation4 + $0x178] sm:$0x1] %v7204_v0 }
  0xe0   : > { %879 = vst [vmem:[#allocation4 + $0x180] sm:$0xff] %v7204_v0 }
  0xe1   : > { %880 = vst [vmem:[#allocation4 + $0x188] sm:$0xff] %v7204_v0 }
  0xe2   : > { %881 = vst [vmem:[#allocation4 + $0x190] sm:$0xff] %v7204_v0 }
  0xe3   : > { %882 = vst [vmem:[#allocation4 + $0x198] sm:$0xff] %v7204_v0 }
  0xe4   : > { %883 = vst [vmem:[#allocation4 + $0x1a0] sm:$0xff] %v7204_v0 }
  0xe5   : > { %884 = vst [vmem:[#allocation4 + $0x1a8] sm:$0xff] %v7204_v0 }
  0xe6   : > { %885 = vst [vmem:[#allocation4 + $0x1b0] sm:$0xff] %v7204_v0 }
  0xe7   : > { %886 = vst [vmem:[#allocation4 + $0x1b8] sm:$0xff] %v7204_v0 }
  0xe8   : > { %887 = vst [vmem:[#allocation4 + $0x1c0] sm:$0xff] %v7204_v0 }
  0xe9   : > { %888 = vst [vmem:[#allocation4 + $0x1c8] sm:$0x1] %v7204_v0 }
  0xea   : > { %889 = vst [vmem:[#allocation4 + $0x1d0] sm:$0x1] %v7204_v0 }
  0xeb   : > { %890 = vst [vmem:[#allocation4 + $0x1d8] sm:$0x1] %v7204_v0 }
  0xec   : > { %891 = vst [vmem:[#allocation4 + $0x1e0] sm:$0xff] %v7204_v0 }
  0xed   : > { %892 = vst [vmem:[#allocation4 + $0x1e8] sm:$0xff] %v7204_v0 }
  0xee   : > { %893 = vst [vmem:[#allocation4 + $0x1f0] sm:$0xff] %v7204_v0 }
  0xef   : > { %894 = vst [vmem:[#allocation4 + $0x1f8] sm:$0xff] %v7204_v0 }
  0xf0   : > { %895 = vst [vmem:[#allocation4 + $0x200] sm:$0xff] %v7204_v0 }
  0xf1   : > { %896 = vst [vmem:[#allocation4 + $0x208] sm:$0xff] %v7204_v0 }
  0xf2   : > { %897 = vst [vmem:[#allocation4 + $0x210] sm:$0xff] %v7204_v0 }
  0xf3   : > { %898 = vst [vmem:[#allocation4 + $0x218] sm:$0xff] %v7204_v0 }
  0xf4   : > { %899 = vst [vmem:[#allocation4 + $0x220] sm:$0xff] %v7204_v0 }
  0xf5   : > { %900 = vst [vmem:[#allocation4 + $0x228] sm:$0x1] %v7204_v0 }
  0xf6   : > { %901 = vst [vmem:[#allocation4 + $0x230] sm:$0x1] %v7204_v0 }
  0xf7   : > { %902 = vst [vmem:[#allocation4 + $0x238] sm:$0x1] %v7204_v0 }
  0xf8   : > { %903 = vst [vmem:[#allocation4 + $0x240] sm:$0xff] %v7204_v0 }
  0xf9   : > { %904 = vst [vmem:[#allocation4 + $0x248] sm:$0xff] %v7204_v0 }
  0xfa   : > { %905 = vst [vmem:[#allocation4 + $0x250] sm:$0xff] %v7204_v0 }
  0xfb   : > { %906 = vst [vmem:[#allocation4 + $0x258] sm:$0xff] %v7204_v0 }
  0xfc   : > { %907 = vst [vmem:[#allocation4 + $0x260] sm:$0xff] %v7204_v0 }
  0xfd   : > { %908 = vst [vmem:[#allocation4 + $0x268] sm:$0xff] %v7204_v0 }
  0xfe   : > { %909 = vst [vmem:[#allocation4 + $0x270] sm:$0xff] %v7204_v0 }
  0xff   : > { %910 = vst [vmem:[#allocation4 + $0x278] sm:$0xff] %v7204_v0 }
 0x100   : > { %911 = vst [vmem:[#allocation4 + $0x280] sm:$0xff] %v7204_v0 }
 0x101   : > { %912 = vst [vmem:[#allocation4 + $0x288] sm:$0x1] %v7204_v0 }
 0x102   : > { %913 = vst [vmem:[#allocation4 + $0x290] sm:$0x1] %v7204_v0 }
 0x103   : > { %914 = vst [vmem:[#allocation4 + $0x298] sm:$0x1] %v7204_v0 }
 0x104   : > { %915 = vst [vmem:[#allocation4 + $0x2a0] sm:$0xff] %v7204_v0 }
 0x105   : > { %916 = vst [vmem:[#allocation4 + $0x2a8] sm:$0xff] %v7204_v0 }
 0x106   : > { %917 = vst [vmem:[#allocation4 + $0x2b0] sm:$0xff] %v7204_v0 }
 0x107   : > { %918 = vst [vmem:[#allocation4 + $0x2b8] sm:$0xff] %v7204_v0 }
 0x108   : > { %919 = vst [vmem:[#allocation4 + $0x2c0] sm:$0xff] %v7204_v0 }
 0x109   : > { %920 = vst [vmem:[#allocation4 + $0x2c8] sm:$0xff] %v7204_v0 }
 0x10a   : > { %921 = vst [vmem:[#allocation4 + $0x2d0] sm:$0xff] %v7204_v0 }
 0x10b   : > { %922 = vst [vmem:[#allocation4 + $0x2d8] sm:$0xff] %v7204_v0 }
 0x10c   : > { %923 = vst [vmem:[#allocation4 + $0x2e0] sm:$0xff] %v7204_v0 }
 0x10d   : > { %924 = vst [vmem:[#allocation4 + $0x2e8] sm:$0x1] %v7204_v0 }
 0x10e   : > { %925 = vst [vmem:[#allocation4 + $0x2f0] sm:$0x1] %v7204_v0 }
 0x10f   : > { %926 = vst [vmem:[#allocation4 + $0x2f8] sm:$0x1] %v7204_v0 }
 0x110   : > { %927 = vst [vmem:[#allocation4 + $0x300] sm:$0xff] %v7204_v0 }
 0x111   : > { %928 = vst [vmem:[#allocation4 + $0x308] sm:$0xff] %v7204_v0 }
 0x112   : > { %929 = vst [vmem:[#allocation4 + $0x310] sm:$0xff] %v7204_v0 }
 0x113   : > { %930 = vst [vmem:[#allocation4 + $0x318] sm:$0xff] %v7204_v0 }
 0x114   : > { %931 = vst [vmem:[#allocation4 + $0x320] sm:$0xff] %v7204_v0 }
 0x115   : > { %932 = vst [vmem:[#allocation4 + $0x328] sm:$0xff] %v7204_v0 }
 0x116   : > { %933 = vst [vmem:[#allocation4 + $0x330] sm:$0xff] %v7204_v0 }
 0x117   : > { %934 = vst [vmem:[#allocation4 + $0x338] sm:$0xff] %v7204_v0 }
 0x118   : > { %935 = vst [vmem:[#allocation4 + $0x340] sm:$0xff] %v7204_v0 }
 0x119   : > { %936 = vst [vmem:[#allocation4 + $0x348] sm:$0x1] %v7204_v0 }
 0x11a   : > { %937 = vst [vmem:[#allocation4 + $0x350] sm:$0x1] %v7204_v0 }
 0x11b   : > { %938 = vst [vmem:[#allocation4 + $0x358] sm:$0x1] %v7204_v0 }
 0x11c   : > { %939 = vst [vmem:[#allocation4 + $0x360] sm:$0xff] %v7204_v0 }
 0x11d   : > { %940 = vst [vmem:[#allocation4 + $0x368] sm:$0xff] %v7204_v0 }
 0x11e   : > { %941 = vst [vmem:[#allocation4 + $0x370] sm:$0xff] %v7204_v0 }
 0x11f   : > { %942 = vst [vmem:[#allocation4 + $0x378] sm:$0xff] %v7204_v0 }
 0x120   : > { %943 = vst [vmem:[#allocation4 + $0x380] sm:$0xff] %v7204_v0 }
 0x121   : > { %944 = vst [vmem:[#allocation4 + $0x388] sm:$0xff] %v7204_v0 }
 0x122   : > { %945 = vst [vmem:[#allocation4 + $0x390] sm:$0xff] %v7204_v0 }
 0x123   : > { %946 = vst [vmem:[#allocation4 + $0x398] sm:$0xff] %v7204_v0 }
 0x124   : > { %947 = vst [vmem:[#allocation4 + $0x3a0] sm:$0xff] %v7204_v0 }
 0x125   : > { %948 = vst [vmem:[#allocation4 + $0x3a8] sm:$0x1] %v7204_v0 }
 0x126   : > { %949 = vst [vmem:[#allocation4 + $0x3b0] sm:$0x1] %v7204_v0 }
 0x127   : > { %950 = vst [vmem:[#allocation4 + $0x3b8] sm:$0x1] %v7204_v0 }
 0x128   : > { %951 = vst [vmem:[#allocation4 + $0x3c0] sm:$0xff] %v7204_v0 }
 0x129   : > { %952 = vst [vmem:[#allocation4 + $0x3c8] sm:$0xff] %v7204_v0 }
 0x12a   : > { %953 = vst [vmem:[#allocation4 + $0x3d0] sm:$0xff] %v7204_v0 }
 0x12b   : > { %954 = vst [vmem:[#allocation4 + $0x3d8] sm:$0xff] %v7204_v0 }
 0x12c   : > { %955 = vst [vmem:[#allocation4 + $0x3e0] sm:$0xff] %v7204_v0 }
 0x12d   : > { %956 = vst [vmem:[#allocation4 + $0x3e8] sm:$0xff] %v7204_v0 }
 0x12e   : > { %957 = vst [vmem:[#allocation4 + $0x3f0] sm:$0xff] %v7204_v0 }
 0x12f   : > { %958 = vst [vmem:[#allocation4 + $0x3f8] sm:$0xff] %v7204_v0 }
 0x130   : > { %959 = vst [vmem:[#allocation4 + $0x400] sm:$0xff] %v7204_v0 }
 0x131   : > { %960 = vst [vmem:[#allocation4 + $0x408] sm:$0x1] %v7204_v0 }
 0x132   : > { %961 = vst [vmem:[#allocation4 + $0x410] sm:$0x1] %v7204_v0 }
 0x133   : > { %962 = vst [vmem:[#allocation4 + $0x418] sm:$0x1] %v7204_v0 }
 0x134   : > { %963 = vst [vmem:[#allocation4 + $0x420] sm:$0xff] %v7204_v0 }
 0x135   : > { %964 = vst [vmem:[#allocation4 + $0x428] sm:$0xff] %v7204_v0 }
 0x136   : > { %965 = vst [vmem:[#allocation4 + $0x430] sm:$0xff] %v7204_v0 }
 0x137   : > { %966 = vst [vmem:[#allocation4 + $0x438] sm:$0xff] %v7204_v0 }
 0x138   : > { %967 = vst [vmem:[#allocation4 + $0x440] sm:$0xff] %v7204_v0 }
 0x139   : > { %968 = vst [vmem:[#allocation4 + $0x448] sm:$0xff] %v7204_v0 }
 0x13a   : > { %969 = vst [vmem:[#allocation4 + $0x450] sm:$0xff] %v7204_v0 }
 0x13b   : > { %970 = vst [vmem:[#allocation4 + $0x458] sm:$0xff] %v7204_v0 }
 0x13c   : > { %971 = vst [vmem:[#allocation4 + $0x460] sm:$0xff] %v7204_v0 }
 0x13d   : > { %972 = vst [vmem:[#allocation4 + $0x468] sm:$0x1] %v7204_v0 }
 0x13e   : > { %973 = vst [vmem:[#allocation4 + $0x470] sm:$0x1] %v7204_v0 }
 0x13f   : > { %974 = vst [vmem:[#allocation4 + $0x478] sm:$0x1] %v7204_v0 }
 0x140   : > { %975 = vst [vmem:[#allocation4 + $0x480] sm:$0xff] %v7204_v0 }
 0x141   : > { %976 = vst [vmem:[#allocation4 + $0x488] sm:$0xff] %v7204_v0 }
 0x142   : > { %977 = vst [vmem:[#allocation4 + $0x490] sm:$0xff] %v7204_v0 }
 0x143   : > { %978 = vst [vmem:[#allocation4 + $0x498] sm:$0xff] %v7204_v0 }
 0x144   : > { %979 = vst [vmem:[#allocation4 + $0x4a0] sm:$0xff] %v7204_v0 }
 0x145   : > { %980 = vst [vmem:[#allocation4 + $0x4a8] sm:$0xff] %v7204_v0 }
 0x146   : > { %981 = vst [vmem:[#allocation4 + $0x4b0] sm:$0xff] %v7204_v0 }
 0x147   : > { %982 = vst [vmem:[#allocation4 + $0x4b8] sm:$0xff] %v7204_v0 }
 0x148   : > { %983 = vst [vmem:[#allocation4 + $0x4c0] sm:$0xff] %v7204_v0 }
 0x149   : > { %984 = vst [vmem:[#allocation4 + $0x4c8] sm:$0x1] %v7204_v0 }
 0x14a   : > { %985 = vst [vmem:[#allocation4 + $0x4d0] sm:$0x1] %v7204_v0 }
 0x14b   : > { %986 = vst [vmem:[#allocation4 + $0x4d8] sm:$0x1] %v7204_v0 }
 0x14c   : > { %987 = vst [vmem:[#allocation4 + $0x4e0] sm:$0xff] %v7204_v0 }
 0x14d   : > { %988 = vst [vmem:[#allocation4 + $0x4e8] sm:$0xff] %v7204_v0 }
 0x14e   : > { %989 = vst [vmem:[#allocation4 + $0x4f0] sm:$0xff] %v7204_v0 }
 0x14f   : > { %990 = vst [vmem:[#allocation4 + $0x4f8] sm:$0xff] %v7204_v0 }
 0x150   : > { %991 = vst [vmem:[#allocation4 + $0x500] sm:$0xff] %v7204_v0 }
 0x151   : > { %992 = vst [vmem:[#allocation4 + $0x508] sm:$0xff] %v7204_v0 }
 0x152   : > { %993 = vst [vmem:[#allocation4 + $0x510] sm:$0xff] %v7204_v0 }
 0x153   : > { %994 = vst [vmem:[#allocation4 + $0x518] sm:$0xff] %v7204_v0 }
 0x154   : > { %995 = vst [vmem:[#allocation4 + $0x520] sm:$0xff] %v7204_v0 }
 0x155   : > { %996 = vst [vmem:[#allocation4 + $0x528] sm:$0x1] %v7204_v0 }
 0x156   : > { %997 = vst [vmem:[#allocation4 + $0x530] sm:$0x1] %v7204_v0 }
 0x157   : > { %998 = vst [vmem:[#allocation4 + $0x538] sm:$0x1] %v7204_v0 }
 0x158   : > { %999 = vst [vmem:[#allocation4 + $0x540] sm:$0xff] %v7204_v0 }
 0x159   : > { %1000 = vst [vmem:[#allocation4 + $0x548] sm:$0xff] %v7204_v0 }
 0x15a   : > { %1001 = vst [vmem:[#allocation4 + $0x550] sm:$0xff] %v7204_v0 }
 0x15b   : > { %1002 = vst [vmem:[#allocation4 + $0x558] sm:$0xff] %v7204_v0 }
 0x15c   : > { %1003 = vst [vmem:[#allocation4 + $0x560] sm:$0xff] %v7204_v0 }
 0x15d   : > { %1004 = vst [vmem:[#allocation4 + $0x568] sm:$0xff] %v7204_v0 }
 0x15e   : > { %1005 = vst [vmem:[#allocation4 + $0x570] sm:$0xff] %v7204_v0 }
 0x15f   : > { %1006 = vst [vmem:[#allocation4 + $0x578] sm:$0xff] %v7204_v0 }
 0x160   : > { %1007 = vst [vmem:[#allocation4 + $0x580] sm:$0xff] %v7204_v0 }
 0x161   : > { %1008 = vst [vmem:[#allocation4 + $0x588] sm:$0x1] %v7204_v0 }
 0x162   : > { %1009 = vst [vmem:[#allocation4 + $0x590] sm:$0x1] %v7204_v0 }
 0x163   : > { %1010 = vst [vmem:[#allocation4 + $0x598] sm:$0x1] %v7204_v0 }
 0x164   : > { %1011 = vst [vmem:[#allocation4 + $0x5a0] sm:$0xff] %v7204_v0 }
 0x165   : > { %1012 = vst [vmem:[#allocation4 + $0x5a8] sm:$0xff] %v7204_v0 }
 0x166   : > { %1013 = vst [vmem:[#allocation4 + $0x5b0] sm:$0xff] %v7204_v0 }
 0x167   : > { %1014 = vst [vmem:[#allocation4 + $0x5b8] sm:$0xff] %v7204_v0 }
 0x168   : > { %1015 = vst [vmem:[#allocation4 + $0x5c0] sm:$0xff] %v7204_v0 }
 0x169   : > { %1016 = vst [vmem:[#allocation4 + $0x5c8] sm:$0xff] %v7204_v0 }
 0x16a   : > { %1017 = vst [vmem:[#allocation4 + $0x5d0] sm:$0xff] %v7204_v0 }
 0x16b   : > { %1018 = vst [vmem:[#allocation4 + $0x5d8] sm:$0xff] %v7204_v0 }
 0x16c   : > { %1019 = vst [vmem:[#allocation4 + $0x5e0] sm:$0xff] %v7204_v0 }
 0x16d   : > { %1020 = vst [vmem:[#allocation4 + $0x5e8] sm:$0x1] %v7204_v0 }
 0x16e   : > { %1021 = vst [vmem:[#allocation4 + $0x5f0] sm:$0x1] %v7204_v0 }
 0x16f   : > { %1022 = vst [vmem:[#allocation4 + $0x5f8] sm:$0x1] %v7204_v0 }
 0x170   : > { %1023 = vst [vmem:[#allocation4 + $0x600] sm:$0xff] %v7204_v0 }
 0x171   : > { %1024 = vst [vmem:[#allocation4 + $0x608] sm:$0xff] %v7204_v0 }
 0x172   : > { %1025 = vst [vmem:[#allocation4 + $0x610] sm:$0xff] %v7204_v0 }
 0x173   : > { %1026 = vst [vmem:[#allocation4 + $0x618] sm:$0xff] %v7204_v0 }
 0x174   : > { %1027 = vst [vmem:[#allocation4 + $0x620] sm:$0xff] %v7204_v0 }
 0x175   : > { %1028 = vst [vmem:[#allocation4 + $0x628] sm:$0xff] %v7204_v0 }
 0x176   : > { %1029 = vst [vmem:[#allocation4 + $0x630] sm:$0xff] %v7204_v0 }
 0x177   : > { %1030 = vst [vmem:[#allocation4 + $0x638] sm:$0xff] %v7204_v0 }
 0x178   : > { %1031 = vst [vmem:[#allocation4 + $0x640] sm:$0xff] %v7204_v0 }
 0x179   : > { %1032 = vst [vmem:[#allocation4 + $0x648] sm:$0x1] %v7204_v0 }
 0x17a   : > { %1033 = vst [vmem:[#allocation4 + $0x650] sm:$0x1] %v7204_v0 }
 0x17b   : > { %1034 = vst [vmem:[#allocation4 + $0x658] sm:$0x1] %v7204_v0 }
 0x17c   : > { %1035 = vst [vmem:[#allocation4 + $0x660] sm:$0xff] %v7204_v0 }
 0x17d   : > { %1036 = vst [vmem:[#allocation4 + $0x668] sm:$0xff] %v7204_v0 }
 0x17e   : > { %1037 = vst [vmem:[#allocation4 + $0x670] sm:$0xff] %v7204_v0 }
 0x17f   : > { %1038 = vst [vmem:[#allocation4 + $0x678] sm:$0xff] %v7204_v0 }
 0x180   : > { %1039 = vst [vmem:[#allocation4 + $0x680] sm:$0xff] %v7204_v0 }
 0x181   : > { %1040 = vst [vmem:[#allocation4 + $0x688] sm:$0xff] %v7204_v0 }
 0x182   : > { %1041 = vst [vmem:[#allocation4 + $0x690] sm:$0xff] %v7204_v0 }
 0x183   : > { %1042 = vst [vmem:[#allocation4 + $0x698] sm:$0xff] %v7204_v0 }
 0x184   : > { %1043 = vst [vmem:[#allocation4 + $0x6a0] sm:$0xff] %v7204_v0 }
 0x185   : > { %1044 = vst [vmem:[#allocation4 + $0x6a8] sm:$0x1] %v7204_v0 }
 0x186   : > { %1045 = vst [vmem:[#allocation4 + $0x6b0] sm:$0x1] %v7204_v0 }
 0x187   : > { %1046 = vst [vmem:[#allocation4 + $0x6b8] sm:$0x1] %v7204_v0 }
 0x188   : > { %1047 = vst [vmem:[#allocation5] sm:$0xff] %v7204_v0 }
 0x189   : > { %1048 = vst [vmem:[#allocation5 + $0x8] sm:$0xff] %v7204_v0 }
 0x18a   : > { %1049 = vst [vmem:[#allocation5 + $0x10] sm:$0xff] %v7204_v0 }
 0x18b   : > { %1050 = vst [vmem:[#allocation5 + $0x18] sm:$0xff] %v7204_v0 }
 0x18c   : > { %1051 = vst [vmem:[#allocation5 + $0x20] sm:$0xff] %v7204_v0 }
 0x18d   : > { %1052 = vst [vmem:[#allocation5 + $0x28] sm:$0xff] %v7204_v0 }
 0x18e   : > { %1053 = vst [vmem:[#allocation5 + $0x30] sm:$0xff] %v7204_v0 }
 0x18f   : > { %1054 = vst [vmem:[#allocation5 + $0x38] sm:$0xff] %v7204_v0 }
 0x190   : > { %1055 = vst [vmem:[#allocation5 + $0x40] sm:$0xff] %v7204_v0 }
 0x191   : > { %1056 = vst [vmem:[#allocation5 + $0x48] sm:$0x1] %v7204_v0 }
 0x192   : > { %1057 = vst [vmem:[#allocation5 + $0x50] sm:$0x1] %v7204_v0 }
 0x193   : > { %1058 = vst [vmem:[#allocation5 + $0x58] sm:$0x1] %v7204_v0 }
 0x194   : > { %1059 = vst [vmem:[#allocation5 + $0x60] sm:$0xff] %v7204_v0 }
 0x195   : > { %1060 = vst [vmem:[#allocation5 + $0x68] sm:$0xff] %v7204_v0 }
 0x196   : > { %1061 = vst [vmem:[#allocation5 + $0x70] sm:$0xff] %v7204_v0 }
 0x197   : > { %1062 = vst [vmem:[#allocation5 + $0x78] sm:$0xff] %v7204_v0 }
 0x198   : > { %1063 = vst [vmem:[#allocation5 + $0x80] sm:$0xff] %v7204_v0 }
 0x199   : > { %1064 = vst [vmem:[#allocation5 + $0x88] sm:$0xff] %v7204_v0 }
 0x19a   : > { %1065 = vst [vmem:[#allocation5 + $0x90] sm:$0xff] %v7204_v0 }
 0x19b   : > { %1066 = vst [vmem:[#allocation5 + $0x98] sm:$0xff] %v7204_v0 }
 0x19c   : > { %1067 = vst [vmem:[#allocation5 + $0xa0] sm:$0xff] %v7204_v0 }
 0x19d   : > { %1068 = vst [vmem:[#allocation5 + $0xa8] sm:$0x1] %v7204_v0 }
 0x19e   : > { %1069 = vst [vmem:[#allocation5 + $0xb0] sm:$0x1] %v7204_v0 }
 0x19f   : > { %1070 = vst [vmem:[#allocation5 + $0xb8] sm:$0x1] %v7204_v0 }
 0x1a0   : > { %1071 = vst [vmem:[#allocation5 + $0xc0] sm:$0xff] %v7204_v0 }
 0x1a1   : > { %1072 = vst [vmem:[#allocation5 + $0xc8] sm:$0xff] %v7204_v0 }
 0x1a2   : > { %1073 = vst [vmem:[#allocation5 + $0xd0] sm:$0xff] %v7204_v0 }
 0x1a3   : > { %1074 = vst [vmem:[#allocation5 + $0xd8] sm:$0xff] %v7204_v0 }
 0x1a4   : > { %1075 = vst [vmem:[#allocation5 + $0xe0] sm:$0xff] %v7204_v0 }
 0x1a5   : > { %1076 = vst [vmem:[#allocation5 + $0xe8] sm:$0xff] %v7204_v0 }
 0x1a6   : > { %1077 = vst [vmem:[#allocation5 + $0xf0] sm:$0xff] %v7204_v0 }
 0x1a7   : > { %1078 = vst [vmem:[#allocation5 + $0xf8] sm:$0xff] %v7204_v0 }
 0x1a8   : > { %1079 = vst [vmem:[#allocation5 + $0x100] sm:$0xff] %v7204_v0 }
 0x1a9   : > { %1080 = vst [vmem:[#allocation5 + $0x108] sm:$0x1] %v7204_v0 }
 0x1aa   : > { %1081 = vst [vmem:[#allocation5 + $0x110] sm:$0x1] %v7204_v0 }
 0x1ab   : > { %1082 = vst [vmem:[#allocation5 + $0x118] sm:$0x1] %v7204_v0 }
 0x1ac   : > { %1083 = vst [vmem:[#allocation5 + $0x120] sm:$0xff] %v7204_v0 }
 0x1ad   : > { %1084 = vst [vmem:[#allocation5 + $0x128] sm:$0xff] %v7204_v0 }
 0x1ae   : > { %1085 = vst [vmem:[#allocation5 + $0x130] sm:$0xff] %v7204_v0 }
 0x1af   : > { %1086 = vst [vmem:[#allocation5 + $0x138] sm:$0xff] %v7204_v0 }
 0x1b0   : > { %1087 = vst [vmem:[#allocation5 + $0x140] sm:$0xff] %v7204_v0 }
 0x1b1   : > { %1088 = vst [vmem:[#allocation5 + $0x148] sm:$0xff] %v7204_v0 }
 0x1b2   : > { %1089 = vst [vmem:[#allocation5 + $0x150] sm:$0xff] %v7204_v0 }
 0x1b3   : > { %1090 = vst [vmem:[#allocation5 + $0x158] sm:$0xff] %v7204_v0 }
 0x1b4   : > { %1091 = vst [vmem:[#allocation5 + $0x160] sm:$0xff] %v7204_v0 }
 0x1b5   : > { %1092 = vst [vmem:[#allocation5 + $0x168] sm:$0x1] %v7204_v0 }
 0x1b6   : > { %1093 = vst [vmem:[#allocation5 + $0x170] sm:$0x1] %v7204_v0 }
 0x1b7   : > { %1094 = vst [vmem:[#allocation5 + $0x178] sm:$0x1] %v7204_v0 }
 0x1b8   : > { %1095 = vst [vmem:[#allocation5 + $0x180] sm:$0xff] %v7204_v0 }
 0x1b9   : > { %1096 = vst [vmem:[#allocation5 + $0x188] sm:$0xff] %v7204_v0 }
 0x1ba   : > { %1097 = vst [vmem:[#allocation5 + $0x190] sm:$0xff] %v7204_v0 }
 0x1bb   : > { %1098 = vst [vmem:[#allocation5 + $0x198] sm:$0xff] %v7204_v0 }
 0x1bc   : > { %1099 = vst [vmem:[#allocation5 + $0x1a0] sm:$0xff] %v7204_v0 }
 0x1bd   : > { %1100 = vst [vmem:[#allocation5 + $0x1a8] sm:$0xff] %v7204_v0 }
 0x1be   : > { %1101 = vst [vmem:[#allocation5 + $0x1b0] sm:$0xff] %v7204_v0 }
 0x1bf   : > { %1102 = vst [vmem:[#allocation5 + $0x1b8] sm:$0xff] %v7204_v0 }
 0x1c0   : > { %1103 = vst [vmem:[#allocation5 + $0x1c0] sm:$0xff] %v7204_v0 }
 0x1c1   : > { %1104 = vst [vmem:[#allocation5 + $0x1c8] sm:$0x1] %v7204_v0 }
 0x1c2   : > { %1105 = vst [vmem:[#allocation5 + $0x1d0] sm:$0x1] %v7204_v0 }
 0x1c3   : > { %1106 = vst [vmem:[#allocation5 + $0x1d8] sm:$0x1] %v7204_v0 }
 0x1c4   : > { %1107 = vst [vmem:[#allocation5 + $0x1e0] sm:$0xff] %v7204_v0 }
 0x1c5   : > { %1108 = vst [vmem:[#allocation5 + $0x1e8] sm:$0xff] %v7204_v0 }
 0x1c6   : > { %1109 = vst [vmem:[#allocation5 + $0x1f0] sm:$0xff] %v7204_v0 }
 0x1c7   : > { %1110 = vst [vmem:[#allocation5 + $0x1f8] sm:$0xff] %v7204_v0 }
 0x1c8   : > { %1111 = vst [vmem:[#allocation5 + $0x200] sm:$0xff] %v7204_v0 }
 0x1c9   : > { %1112 = vst [vmem:[#allocation5 + $0x208] sm:$0xff] %v7204_v0 }
 0x1ca   : > { %1113 = vst [vmem:[#allocation5 + $0x210] sm:$0xff] %v7204_v0 }
 0x1cb   : > { %1114 = vst [vmem:[#allocation5 + $0x218] sm:$0xff] %v7204_v0 }
 0x1cc   : > { %1115 = vst [vmem:[#allocation5 + $0x220] sm:$0xff] %v7204_v0 }
 0x1cd   : > { %1116 = vst [vmem:[#allocation5 + $0x228] sm:$0x1] %v7204_v0 }
 0x1ce   : > { %1117 = vst [vmem:[#allocation5 + $0x230] sm:$0x1] %v7204_v0 }
 0x1cf   : > { %1118 = vst [vmem:[#allocation5 + $0x238] sm:$0x1] %v7204_v0 }
 0x1d0   : > { %1119 = vst [vmem:[#allocation5 + $0x240] sm:$0xff] %v7204_v0 }
 0x1d1   : > { %1120 = vst [vmem:[#allocation5 + $0x248] sm:$0xff] %v7204_v0 }
 0x1d2   : > { %1121 = vst [vmem:[#allocation5 + $0x250] sm:$0xff] %v7204_v0 }
 0x1d3   : > { %1122 = vst [vmem:[#allocation5 + $0x258] sm:$0xff] %v7204_v0 }
 0x1d4   : > { %1123 = vst [vmem:[#allocation5 + $0x260] sm:$0xff] %v7204_v0 }
 0x1d5   : > { %1124 = vst [vmem:[#allocation5 + $0x268] sm:$0xff] %v7204_v0 }
 0x1d6   : > { %1125 = vst [vmem:[#allocation5 + $0x270] sm:$0xff] %v7204_v0 }
 0x1d7   : > { %1126 = vst [vmem:[#allocation5 + $0x278] sm:$0xff] %v7204_v0 }
 0x1d8   : > { %1127 = vst [vmem:[#allocation5 + $0x280] sm:$0xff] %v7204_v0 }
 0x1d9   : > { %1128 = vst [vmem:[#allocation5 + $0x288] sm:$0x1] %v7204_v0 }
 0x1da   : > { %1129 = vst [vmem:[#allocation5 + $0x290] sm:$0x1] %v7204_v0 }
 0x1db   : > { %1130 = vst [vmem:[#allocation5 + $0x298] sm:$0x1] %v7204_v0 }
 0x1dc   : > { %1131 = vst [vmem:[#allocation5 + $0x2a0] sm:$0xff] %v7204_v0 }
 0x1dd   : > { %1132 = vst [vmem:[#allocation5 + $0x2a8] sm:$0xff] %v7204_v0 }
 0x1de   : > { %1133 = vst [vmem:[#allocation5 + $0x2b0] sm:$0xff] %v7204_v0 }
 0x1df   : > { %1134 = vst [vmem:[#allocation5 + $0x2b8] sm:$0xff] %v7204_v0 }
 0x1e0   : > { %1135 = vst [vmem:[#allocation5 + $0x2c0] sm:$0xff] %v7204_v0 }
 0x1e1   : > { %1136 = vst [vmem:[#allocation5 + $0x2c8] sm:$0xff] %v7204_v0 }
 0x1e2   : > { %1137 = vst [vmem:[#allocation5 + $0x2d0] sm:$0xff] %v7204_v0 }
 0x1e3   : > { %1138 = vst [vmem:[#allocation5 + $0x2d8] sm:$0xff] %v7204_v0 }
 0x1e4   : > { %1139 = vst [vmem:[#allocation5 + $0x2e0] sm:$0xff] %v7204_v0 }
 0x1e5   : > { %1140 = vst [vmem:[#allocation5 + $0x2e8] sm:$0x1] %v7204_v0 }
 0x1e6   : > { %1141 = vst [vmem:[#allocation5 + $0x2f0] sm:$0x1] %v7204_v0 }
 0x1e7   : > { %1142 = vst [vmem:[#allocation5 + $0x2f8] sm:$0x1] %v7204_v0 }
 0x1e8   : > { %1143 = vst [vmem:[#allocation5 + $0x300] sm:$0xff] %v7204_v0 }
 0x1e9   : > { %1144 = vst [vmem:[#allocation5 + $0x308] sm:$0xff] %v7204_v0 }
 0x1ea   : > { %1145 = vst [vmem:[#allocation5 + $0x310] sm:$0xff] %v7204_v0 }
 0x1eb   : > { %1146 = vst [vmem:[#allocation5 + $0x318] sm:$0xff] %v7204_v0 }
 0x1ec   : > { %1147 = vst [vmem:[#allocation5 + $0x320] sm:$0xff] %v7204_v0 }
 0x1ed   : > { %1148 = vst [vmem:[#allocation5 + $0x328] sm:$0xff] %v7204_v0 }
 0x1ee   : > { %1149 = vst [vmem:[#allocation5 + $0x330] sm:$0xff] %v7204_v0 }
 0x1ef   : > { %1150 = vst [vmem:[#allocation5 + $0x338] sm:$0xff] %v7204_v0 }
 0x1f0   : > { %1151 = vst [vmem:[#allocation5 + $0x340] sm:$0xff] %v7204_v0 }
 0x1f1   : > { %1152 = vst [vmem:[#allocation5 + $0x348] sm:$0x1] %v7204_v0 }
 0x1f2   : > { %1153 = vst [vmem:[#allocation5 + $0x350] sm:$0x1] %v7204_v0 }
 0x1f3   : > { %1154 = vst [vmem:[#allocation5 + $0x358] sm:$0x1] %v7204_v0 }
 0x1f4   : > { %1155 = vst [vmem:[#allocation5 + $0x360] sm:$0xff] %v7204_v0 }
 0x1f5   : > { %1156 = vst [vmem:[#allocation5 + $0x368] sm:$0xff] %v7204_v0 }
 0x1f6   : > { %1157 = vst [vmem:[#allocation5 + $0x370] sm:$0xff] %v7204_v0 }
 0x1f7   : > { %1158 = vst [vmem:[#allocation5 + $0x378] sm:$0xff] %v7204_v0 }
 0x1f8   : > { %1159 = vst [vmem:[#allocation5 + $0x380] sm:$0xff] %v7204_v0 }
 0x1f9   : > { %1160 = vst [vmem:[#allocation5 + $0x388] sm:$0xff] %v7204_v0 }
 0x1fa   : > { %1161 = vst [vmem:[#allocation5 + $0x390] sm:$0xff] %v7204_v0 }
 0x1fb   : > { %1162 = vst [vmem:[#allocation5 + $0x398] sm:$0xff] %v7204_v0 }
 0x1fc   : > { %1163 = vst [vmem:[#allocation5 + $0x3a0] sm:$0xff] %v7204_v0 }
 0x1fd   : > { %1164 = vst [vmem:[#allocation5 + $0x3a8] sm:$0x1] %v7204_v0 }
 0x1fe   : > { %1165 = vst [vmem:[#allocation5 + $0x3b0] sm:$0x1] %v7204_v0 }
 0x1ff   : > { %1166 = vst [vmem:[#allocation5 + $0x3b8] sm:$0x1] %v7204_v0 }
 0x200   : > { %1167 = vst [vmem:[#allocation5 + $0x3c0] sm:$0xff] %v7204_v0 }
 0x201   : > { %1168 = vst [vmem:[#allocation5 + $0x3c8] sm:$0xff] %v7204_v0 }
 0x202   : > { %1169 = vst [vmem:[#allocation5 + $0x3d0] sm:$0xff] %v7204_v0 }
 0x203   : > { %1170 = vst [vmem:[#allocation5 + $0x3d8] sm:$0xff] %v7204_v0 }
 0x204   : > { %1171 = vst [vmem:[#allocation5 + $0x3e0] sm:$0xff] %v7204_v0 }
 0x205   : > { %1172 = vst [vmem:[#allocation5 + $0x3e8] sm:$0xff] %v7204_v0 }
 0x206   : > { %1173 = vst [vmem:[#allocation5 + $0x3f0] sm:$0xff] %v7204_v0 }
 0x207   : > { %1174 = vst [vmem:[#allocation5 + $0x3f8] sm:$0xff] %v7204_v0 }
 0x208   : > { %1175 = vst [vmem:[#allocation5 + $0x400] sm:$0xff] %v7204_v0 }
 0x209   : > { %1176 = vst [vmem:[#allocation5 + $0x408] sm:$0x1] %v7204_v0 }
 0x20a   : > { %1177 = vst [vmem:[#allocation5 + $0x410] sm:$0x1] %v7204_v0 }
 0x20b   : > { %1178 = vst [vmem:[#allocation5 + $0x418] sm:$0x1] %v7204_v0 }
 0x20c   : > { %1179 = vst [vmem:[#allocation5 + $0x420] sm:$0xff] %v7204_v0 }
 0x20d   : > { %1180 = vst [vmem:[#allocation5 + $0x428] sm:$0xff] %v7204_v0 }
 0x20e   : > { %1181 = vst [vmem:[#allocation5 + $0x430] sm:$0xff] %v7204_v0 }
 0x20f   : > { %1182 = vst [vmem:[#allocation5 + $0x438] sm:$0xff] %v7204_v0 }
 0x210   : > { %1183 = vst [vmem:[#allocation5 + $0x440] sm:$0xff] %v7204_v0 }
 0x211   : > { %1184 = vst [vmem:[#allocation5 + $0x448] sm:$0xff] %v7204_v0 }
 0x212   : > { %1185 = vst [vmem:[#allocation5 + $0x450] sm:$0xff] %v7204_v0 }
 0x213   : > { %1186 = vst [vmem:[#allocation5 + $0x458] sm:$0xff] %v7204_v0 }
 0x214   : > { %1187 = vst [vmem:[#allocation5 + $0x460] sm:$0xff] %v7204_v0 }
 0x215   : > { %1188 = vst [vmem:[#allocation5 + $0x468] sm:$0x1] %v7204_v0 }
 0x216   : > { %1189 = vst [vmem:[#allocation5 + $0x470] sm:$0x1] %v7204_v0 }
 0x217   : > { %1190 = vst [vmem:[#allocation5 + $0x478] sm:$0x1] %v7204_v0 }
 0x218   : > { %1191 = vst [vmem:[#allocation5 + $0x480] sm:$0xff] %v7204_v0 }
 0x219   : > { %1192 = vst [vmem:[#allocation5 + $0x488] sm:$0xff] %v7204_v0 }
 0x21a   : > { %1193 = vst [vmem:[#allocation5 + $0x490] sm:$0xff] %v7204_v0 }
 0x21b   : > { %1194 = vst [vmem:[#allocation5 + $0x498] sm:$0xff] %v7204_v0 }
 0x21c   : > { %1195 = vst [vmem:[#allocation5 + $0x4a0] sm:$0xff] %v7204_v0 }
 0x21d   : > { %1196 = vst [vmem:[#allocation5 + $0x4a8] sm:$0xff] %v7204_v0 }
 0x21e   : > { %1197 = vst [vmem:[#allocation5 + $0x4b0] sm:$0xff] %v7204_v0 }
 0x21f   : > { %1198 = vst [vmem:[#allocation5 + $0x4b8] sm:$0xff] %v7204_v0 }
 0x220   : > { %1199 = vst [vmem:[#allocation5 + $0x4c0] sm:$0xff] %v7204_v0 }
 0x221   : > { %1200 = vst [vmem:[#allocation5 + $0x4c8] sm:$0x1] %v7204_v0 }
 0x222   : > { %1201 = vst [vmem:[#allocation5 + $0x4d0] sm:$0x1] %v7204_v0 }
 0x223   : > { %1202 = vst [vmem:[#allocation5 + $0x4d8] sm:$0x1] %v7204_v0 }
 0x224   : > { %1203 = vst [vmem:[#allocation5 + $0x4e0] sm:$0xff] %v7204_v0 }
 0x225   : > { %1204 = vst [vmem:[#allocation5 + $0x4e8] sm:$0xff] %v7204_v0 }
 0x226   : > { %1205 = vst [vmem:[#allocation5 + $0x4f0] sm:$0xff] %v7204_v0 }
 0x227   : > { %1206 = vst [vmem:[#allocation5 + $0x4f8] sm:$0xff] %v7204_v0 }
 0x228   : > { %1207 = vst [vmem:[#allocation5 + $0x500] sm:$0xff] %v7204_v0 }
 0x229   : > { %1208 = vst [vmem:[#allocation5 + $0x508] sm:$0xff] %v7204_v0 }
 0x22a   : > { %1209 = vst [vmem:[#allocation5 + $0x510] sm:$0xff] %v7204_v0 }
 0x22b   : > { %1210 = vst [vmem:[#allocation5 + $0x518] sm:$0xff] %v7204_v0 }
 0x22c   : > { %1211 = vst [vmem:[#allocation5 + $0x520] sm:$0xff] %v7204_v0 }
 0x22d   : > { %1212 = vst [vmem:[#allocation5 + $0x528] sm:$0x1] %v7204_v0 }
 0x22e   : > { %1213 = vst [vmem:[#allocation5 + $0x530] sm:$0x1] %v7204_v0 }
 0x22f   : > { %1214 = vst [vmem:[#allocation5 + $0x538] sm:$0x1] %v7204_v0 }
 0x230   : > { %1215 = vst [vmem:[#allocation5 + $0x540] sm:$0xff] %v7204_v0 }
 0x231   : > { %1216 = vst [vmem:[#allocation5 + $0x548] sm:$0xff] %v7204_v0 }
 0x232   : > { %1217 = vst [vmem:[#allocation5 + $0x550] sm:$0xff] %v7204_v0 }
 0x233   : > { %1218 = vst [vmem:[#allocation5 + $0x558] sm:$0xff] %v7204_v0 }
 0x234   : > { %1219 = vst [vmem:[#allocation5 + $0x560] sm:$0xff] %v7204_v0 }
 0x235   : > { %1220 = vst [vmem:[#allocation5 + $0x568] sm:$0xff] %v7204_v0 }
 0x236   : > { %1221 = vst [vmem:[#allocation5 + $0x570] sm:$0xff] %v7204_v0 }
 0x237   : > { %1222 = vst [vmem:[#allocation5 + $0x578] sm:$0xff] %v7204_v0 }
 0x238   : > { %1223 = vst [vmem:[#allocation5 + $0x580] sm:$0xff] %v7204_v0 }
 0x239   : > { %1224 = vst [vmem:[#allocation5 + $0x588] sm:$0x1] %v7204_v0 }
 0x23a   : > { %1225 = vst [vmem:[#allocation5 + $0x590] sm:$0x1] %v7204_v0 }
 0x23b   : > { %1226 = vst [vmem:[#allocation5 + $0x598] sm:$0x1] %v7204_v0 }
 0x23c   : > { %1227 = vst [vmem:[#allocation5 + $0x5a0] sm:$0xff] %v7204_v0 }
 0x23d   : > { %1228 = vst [vmem:[#allocation5 + $0x5a8] sm:$0xff] %v7204_v0 }
 0x23e   : > { %1229 = vst [vmem:[#allocation5 + $0x5b0] sm:$0xff] %v7204_v0 }
 0x23f   : > { %1230 = vst [vmem:[#allocation5 + $0x5b8] sm:$0xff] %v7204_v0 }
 0x240   : > { %1231 = vst [vmem:[#allocation5 + $0x5c0] sm:$0xff] %v7204_v0 }
 0x241   : > { %1232 = vst [vmem:[#allocation5 + $0x5c8] sm:$0xff] %v7204_v0 }
 0x242   : > { %1233 = vst [vmem:[#allocation5 + $0x5d0] sm:$0xff] %v7204_v0 }
 0x243   : > { %1234 = vst [vmem:[#allocation5 + $0x5d8] sm:$0xff] %v7204_v0 }
 0x244   : > { %1235 = vst [vmem:[#allocation5 + $0x5e0] sm:$0xff] %v7204_v0 }
 0x245   : > { %1236 = vst [vmem:[#allocation5 + $0x5e8] sm:$0x1] %v7204_v0 }
 0x246   : > { %1237 = vst [vmem:[#allocation5 + $0x5f0] sm:$0x1] %v7204_v0 }
 0x247   : > { %1238 = vst [vmem:[#allocation5 + $0x5f8] sm:$0x1] %v7204_v0 }
 0x248   : > { %1239 = vst [vmem:[#allocation5 + $0x600] sm:$0xff] %v7204_v0 }
 0x249   : > { %1240 = vst [vmem:[#allocation5 + $0x608] sm:$0xff] %v7204_v0 }
 0x24a   : > { %1241 = vst [vmem:[#allocation5 + $0x610] sm:$0xff] %v7204_v0 }
 0x24b   : > { %1242 = vst [vmem:[#allocation5 + $0x618] sm:$0xff] %v7204_v0 }
 0x24c   : > { %1243 = vst [vmem:[#allocation5 + $0x620] sm:$0xff] %v7204_v0 }
 0x24d   : > { %1244 = vst [vmem:[#allocation5 + $0x628] sm:$0xff] %v7204_v0 }
 0x24e   : > { %1245 = vst [vmem:[#allocation5 + $0x630] sm:$0xff] %v7204_v0 }
 0x24f   : > { %1246 = vst [vmem:[#allocation5 + $0x638] sm:$0xff] %v7204_v0 }
 0x250   : > { %1247 = vst [vmem:[#allocation5 + $0x640] sm:$0xff] %v7204_v0 }
 0x251   : > { %1248 = vst [vmem:[#allocation5 + $0x648] sm:$0x1] %v7204_v0 }
 0x252   : > { %1249 = vst [vmem:[#allocation5 + $0x650] sm:$0x1] %v7204_v0 }
 0x253   : > { %1250 = vst [vmem:[#allocation5 + $0x658] sm:$0x1] %v7204_v0 }
 0x254   : > { %1251 = vst [vmem:[#allocation5 + $0x660] sm:$0xff] %v7204_v0 }
 0x255   : > { %1252 = vst [vmem:[#allocation5 + $0x668] sm:$0xff] %v7204_v0 }
 0x256   : > { %1253 = vst [vmem:[#allocation5 + $0x670] sm:$0xff] %v7204_v0 }
 0x257   : > { %1254 = vst [vmem:[#allocation5 + $0x678] sm:$0xff] %v7204_v0 }
 0x258   : > { %1255 = vst [vmem:[#allocation5 + $0x680] sm:$0xff] %v7977_v1 }
 0x259   : > { %1256 = vst [vmem:[#allocation5 + $0x688] sm:$0xff] %v7977_v1 }
 0x25a   : > { %1257 = vst [vmem:[#allocation5 + $0x690] sm:$0xff] %v7977_v1 }
 0x25b   : > { %1258 = vst [vmem:[#allocation5 + $0x698] sm:$0xff] %v7977_v1 }
 0x25c   : > { %1259 = vst [vmem:[#allocation5 + $0x6a0] sm:$0xff] %v7977_v1 }
 0x25d   : > { %1260 = vst [vmem:[#allocation5 + $0x6a8] sm:$0x1] %v7977_v1 }
 0x25e   : > { %1261 = vst [vmem:[#allocation5 + $0x6b0] sm:$0x1] %v7977_v1 }
 0x25f   : > { %1262 = vst [vmem:[#allocation5 + $0x6b8] sm:$0x1] %v7977_v1 }
 0x260   : > { %1263 = vst [vmem:[#allocation6] sm:$0xff] %v7977_v1 }
 0x261   : > { %1264 = vst [vmem:[#allocation6 + $0x8] sm:$0xff] %v7977_v1 }
 0x262   : > { %1265 = vst [vmem:[#allocation6 + $0x10] sm:$0xff] %v7977_v1 }
 0x263   : > { %1266 = vst [vmem:[#allocation6 + $0x18] sm:$0xff] %v7977_v1 }
 0x264   : > { %1267 = vst [vmem:[#allocation6 + $0x20] sm:$0xff] %v7977_v1 }
 0x265   : > { %1268 = vst [vmem:[#allocation6 + $0x28] sm:$0xff] %v7977_v1 }
 0x266   : > { %1269 = vst [vmem:[#allocation6 + $0x30] sm:$0xff] %v7977_v1 }
 0x267   : > { %1270 = vst [vmem:[#allocation6 + $0x38] sm:$0xff] %v7977_v1 }
 0x268   : > { %1271 = vst [vmem:[#allocation6 + $0x40] sm:$0xff] %v7977_v1 }
 0x269   : > { %1272 = vst [vmem:[#allocation6 + $0x48] sm:$0x1] %v7977_v1 }
 0x26a   : > { %1273 = vst [vmem:[#allocation6 + $0x50] sm:$0x1] %v7977_v1 }
 0x26b   : > { %1274 = vst [vmem:[#allocation6 + $0x58] sm:$0x1] %v7977_v1 }
 0x26c   : > { %1275 = vst [vmem:[#allocation6 + $0x60] sm:$0xff] %v7977_v1 }
 0x26d   : > { %1276 = vst [vmem:[#allocation6 + $0x68] sm:$0xff] %v7977_v1 }
 0x26e   : > { %1277 = vst [vmem:[#allocation6 + $0x70] sm:$0xff] %v7977_v1 }
 0x26f   : > { %1278 = vst [vmem:[#allocation6 + $0x78] sm:$0xff] %v7977_v1 }
 0x270   : > { %1279 = vst [vmem:[#allocation6 + $0x80] sm:$0xff] %v7977_v1 }
 0x271   : > { %1280 = vst [vmem:[#allocation6 + $0x88] sm:$0xff] %v7977_v1 }
 0x272   : > { %1281 = vst [vmem:[#allocation6 + $0x90] sm:$0xff] %v7977_v1 }
 0x273   : > { %1282 = vst [vmem:[#allocation6 + $0x98] sm:$0xff] %v7977_v1 }
 0x274   : > { %1283 = vst [vmem:[#allocation6 + $0xa0] sm:$0xff] %v7977_v1 }
 0x275   : > { %1284 = vst [vmem:[#allocation6 + $0xa8] sm:$0x1] %v7977_v1 }
 0x276   : > { %1285 = vst [vmem:[#allocation6 + $0xb0] sm:$0x1] %v7977_v1 }
 0x277   : > { %1286 = vst [vmem:[#allocation6 + $0xb8] sm:$0x1] %v7977_v1 }
 0x278   : > { %1287 = vst [vmem:[#allocation6 + $0xc0] sm:$0xff] %v7977_v1 }
 0x279   : > { %1288 = vst [vmem:[#allocation6 + $0xc8] sm:$0xff] %v7977_v1 }
 0x27a   : > { %1289 = vst [vmem:[#allocation6 + $0xd0] sm:$0xff] %v7977_v1 }
 0x27b   : > { %1290 = vst [vmem:[#allocation6 + $0xd8] sm:$0xff] %v7977_v1 }
 0x27c   : > { %1291 = vst [vmem:[#allocation6 + $0xe0] sm:$0xff] %v7977_v1 }
 0x27d   : > { %1292 = vst [vmem:[#allocation6 + $0xe8] sm:$0xff] %v7977_v1 }
 0x27e   : > { %1293 = vst [vmem:[#allocation6 + $0xf0] sm:$0xff] %v7977_v1 }
 0x27f   : > { %1294 = vst [vmem:[#allocation6 + $0xf8] sm:$0xff] %v7977_v1 }
 0x280   : > { %1295 = vst [vmem:[#allocation6 + $0x100] sm:$0xff] %v7977_v1 }
 0x281   : > { %1296 = vst [vmem:[#allocation6 + $0x108] sm:$0x1] %v7977_v1 }
 0x282   : > { %1297 = vst [vmem:[#allocation6 + $0x110] sm:$0x1] %v7977_v1 }
 0x283   : > { %1298 = vst [vmem:[#allocation6 + $0x118] sm:$0x1] %v7977_v1 }
 0x284   : > { %1299 = vst [vmem:[#allocation6 + $0x120] sm:$0xff] %v7977_v1 }
 0x285   : > { %1300 = vst [vmem:[#allocation6 + $0x128] sm:$0xff] %v7977_v1 }
 0x286   : > { %1301 = vst [vmem:[#allocation6 + $0x130] sm:$0xff] %v7977_v1 }
 0x287   : > { %1302 = vst [vmem:[#allocation6 + $0x138] sm:$0xff] %v7977_v1 }
 0x288   : > { %1303 = vst [vmem:[#allocation6 + $0x140] sm:$0xff] %v7977_v1 }
 0x289   : > { %1304 = vst [vmem:[#allocation6 + $0x148] sm:$0xff] %v7977_v1 }
 0x28a   : > { %1305 = vst [vmem:[#allocation6 + $0x150] sm:$0xff] %v7977_v1 }
 0x28b   : > { %1306 = vst [vmem:[#allocation6 + $0x158] sm:$0xff] %v7977_v1 }
 0x28c   : > { %1307 = vst [vmem:[#allocation6 + $0x160] sm:$0xff] %v7977_v1 }
 0x28d   : > { %1308 = vst [vmem:[#allocation6 + $0x168] sm:$0x1] %v7977_v1 }
 0x28e   : > { %1309 = vst [vmem:[#allocation6 + $0x170] sm:$0x1] %v7977_v1 }
 0x28f   : > { %1310 = vst [vmem:[#allocation6 + $0x178] sm:$0x1] %v7977_v1 }
 0x290   : > { %1311 = vst [vmem:[#allocation6 + $0x180] sm:$0xff] %v7977_v1 }
 0x291   : > { %1312 = vst [vmem:[#allocation6 + $0x188] sm:$0xff] %v7977_v1 }
 0x292   : > { %1313 = vst [vmem:[#allocation6 + $0x190] sm:$0xff] %v7977_v1 }
 0x293   : > { %1314 = vst [vmem:[#allocation6 + $0x198] sm:$0xff] %v7977_v1 }
 0x294   : > { %1315 = vst [vmem:[#allocation6 + $0x1a0] sm:$0xff] %v7977_v1 }
 0x295   : > { %1316 = vst [vmem:[#allocation6 + $0x1a8] sm:$0xff] %v7977_v1 }
 0x296   : > { %1317 = vst [vmem:[#allocation6 + $0x1b0] sm:$0xff] %v7977_v1 }
 0x297   : > { %1318 = vst [vmem:[#allocation6 + $0x1b8] sm:$0xff] %v7977_v1 }
 0x298   : > { %1319 = vst [vmem:[#allocation6 + $0x1c0] sm:$0xff] %v7977_v1 }
 0x299   : > { %1320 = vst [vmem:[#allocation6 + $0x1c8] sm:$0x1] %v7977_v1 }
 0x29a   : > { %1321 = vst [vmem:[#allocation6 + $0x1d0] sm:$0x1] %v7977_v1 }
 0x29b   : > { %1322 = vst [vmem:[#allocation6 + $0x1d8] sm:$0x1] %v7977_v1 }
 0x29c   : > { %1323 = vst [vmem:[#allocation6 + $0x1e0] sm:$0xff] %v7977_v1 }
 0x29d   : > { %1324 = vst [vmem:[#allocation6 + $0x1e8] sm:$0xff] %v7977_v1 }
 0x29e   : > { %1325 = vst [vmem:[#allocation6 + $0x1f0] sm:$0xff] %v7977_v1 }
 0x29f   : > { %1326 = vst [vmem:[#allocation6 + $0x1f8] sm:$0xff] %v7977_v1 }
 0x2a0   : > { %1327 = vst [vmem:[#allocation6 + $0x200] sm:$0xff] %v7977_v1 }
 0x2a1   : > { %1328 = vst [vmem:[#allocation6 + $0x208] sm:$0xff] %v7977_v1 }
 0x2a2   : > { %1329 = vst [vmem:[#allocation6 + $0x210] sm:$0xff] %v7977_v1 }
 0x2a3   : > { %1330 = vst [vmem:[#allocation6 + $0x218] sm:$0xff] %v7977_v1 }
 0x2a4   : > { %1331 = vst [vmem:[#allocation6 + $0x220] sm:$0xff] %v7977_v1 }
 0x2a5   : > { %1332 = vst [vmem:[#allocation6 + $0x228] sm:$0x1] %v7977_v1 }
 0x2a6   : > { %1333 = vst [vmem:[#allocation6 + $0x230] sm:$0x1] %v7977_v1 }
 0x2a7   : > { %1334 = vst [vmem:[#allocation6 + $0x238] sm:$0x1] %v7977_v1 }
 0x2a8   : > { %1335 = vst [vmem:[#allocation6 + $0x240] sm:$0xff] %v7977_v1 }
 0x2a9   : > { %1336 = vst [vmem:[#allocation6 + $0x248] sm:$0xff] %v7977_v1 }
 0x2aa   : > { %1337 = vst [vmem:[#allocation6 + $0x250] sm:$0xff] %v7977_v1 }
 0x2ab   : > { %1338 = vst [vmem:[#allocation6 + $0x258] sm:$0xff] %v7977_v1 }
 0x2ac   : > { %1339 = vst [vmem:[#allocation6 + $0x260] sm:$0xff] %v7977_v1 }
 0x2ad   : > { %1340 = vst [vmem:[#allocation6 + $0x268] sm:$0xff] %v7977_v1 }
 0x2ae   : > { %1341 = vst [vmem:[#allocation6 + $0x270] sm:$0xff] %v7977_v1 }
 0x2af   : > { %1342 = vst [vmem:[#allocation6 + $0x278] sm:$0xff] %v7977_v1 }
 0x2b0   : > { %1343 = vst [vmem:[#allocation6 + $0x280] sm:$0xff] %v7977_v1 }
 0x2b1   : > { %1344 = vst [vmem:[#allocation6 + $0x288] sm:$0x1] %v7977_v1 }
 0x2b2   : > { %1345 = vst [vmem:[#allocation6 + $0x290] sm:$0x1] %v7977_v1 }
 0x2b3   : > { %1346 = vst [vmem:[#allocation6 + $0x298] sm:$0x1] %v7977_v1 }
 0x2b4   : > { %1347 = vst [vmem:[#allocation6 + $0x2a0] sm:$0xff] %v7977_v1 }
 0x2b5   : > { %1348 = vst [vmem:[#allocation6 + $0x2a8] sm:$0xff] %v7977_v1 }
 0x2b6   : > { %1349 = vst [vmem:[#allocation6 + $0x2b0] sm:$0xff] %v7977_v1 }
 0x2b7   : > { %1350 = vst [vmem:[#allocation6 + $0x2b8] sm:$0xff] %v7977_v1 }
 0x2b8   : > { %1351 = vst [vmem:[#allocation6 + $0x2c0] sm:$0xff] %v7977_v1 }
 0x2b9   : > { %1352 = vst [vmem:[#allocation6 + $0x2c8] sm:$0xff] %v7977_v1 }
 0x2ba   : > { %1353 = vst [vmem:[#allocation6 + $0x2d0] sm:$0xff] %v7977_v1 }
 0x2bb   : > { %1354 = vst [vmem:[#allocation6 + $0x2d8] sm:$0xff] %v7977_v1 }
 0x2bc   : > { %1355 = vst [vmem:[#allocation6 + $0x2e0] sm:$0xff] %v7977_v1 }
 0x2bd   : > { %1356 = vst [vmem:[#allocation6 + $0x2e8] sm:$0x1] %v7977_v1 }
 0x2be   : > { %1357 = vst [vmem:[#allocation6 + $0x2f0] sm:$0x1] %v7977_v1 }
 0x2bf   : > { %1358 = vst [vmem:[#allocation6 + $0x2f8] sm:$0x1] %v7977_v1 }
 0x2c0   : > { %1359 = vst [vmem:[#allocation6 + $0x300] sm:$0xff] %v7977_v1 }
 0x2c1   : > { %1360 = vst [vmem:[#allocation6 + $0x308] sm:$0xff] %v7977_v1 }
 0x2c2   : > { %1361 = vst [vmem:[#allocation6 + $0x310] sm:$0xff] %v7977_v1 }
 0x2c3   : > { %1362 = vst [vmem:[#allocation6 + $0x318] sm:$0xff] %v7977_v1 }
 0x2c4   : > { %1363 = vst [vmem:[#allocation6 + $0x320] sm:$0xff] %v7977_v1 }
 0x2c5   : > { %1364 = vst [vmem:[#allocation6 + $0x328] sm:$0xff] %v7977_v1 }
 0x2c6   : > { %1365 = vst [vmem:[#allocation6 + $0x330] sm:$0xff] %v7977_v1 }
 0x2c7   : > { %1366 = vst [vmem:[#allocation6 + $0x338] sm:$0xff] %v7977_v1 }
 0x2c8   : > { %1367 = vst [vmem:[#allocation6 + $0x340] sm:$0xff] %v7977_v1 }
 0x2c9   : > { %1368 = vst [vmem:[#allocation6 + $0x348] sm:$0x1] %v7977_v1 }
 0x2ca   : > { %1369 = vst [vmem:[#allocation6 + $0x350] sm:$0x1] %v7977_v1 }
 0x2cb   : > { %1370 = vst [vmem:[#allocation6 + $0x358] sm:$0x1] %v7977_v1 }
 0x2cc   : > { %1371 = vst [vmem:[#allocation6 + $0x360] sm:$0xff] %v7977_v1 }
 0x2cd   : > { %1372 = vst [vmem:[#allocation6 + $0x368] sm:$0xff] %v7977_v1 }
 0x2ce   : > { %1373 = vst [vmem:[#allocation6 + $0x370] sm:$0xff] %v7977_v1 }
 0x2cf   : > { %1374 = vst [vmem:[#allocation6 + $0x378] sm:$0xff] %v7977_v1 }
 0x2d0   : > { %1375 = vst [vmem:[#allocation6 + $0x380] sm:$0xff] %v7977_v1 }
 0x2d1   : > { %1376 = vst [vmem:[#allocation6 + $0x388] sm:$0xff] %v7977_v1 }
 0x2d2   : > { %1377 = vst [vmem:[#allocation6 + $0x390] sm:$0xff] %v7977_v1 }
 0x2d3   : > { %1378 = vst [vmem:[#allocation6 + $0x398] sm:$0xff] %v7977_v1 }
 0x2d4   : > { %1379 = vst [vmem:[#allocation6 + $0x3a0] sm:$0xff] %v7977_v1 }
 0x2d5   : > { %1380 = vst [vmem:[#allocation6 + $0x3a8] sm:$0x1] %v7977_v1 }
 0x2d6   : > { %1381 = vst [vmem:[#allocation6 + $0x3b0] sm:$0x1] %v7977_v1 }
 0x2d7   : > { %1382 = vst [vmem:[#allocation6 + $0x3b8] sm:$0x1] %v7977_v1 }
 0x2d8   : > { %1383 = vst [vmem:[#allocation6 + $0x3c0] sm:$0xff] %v7977_v1 }
 0x2d9   : > { %1384 = vst [vmem:[#allocation6 + $0x3c8] sm:$0xff] %v7977_v1 }
 0x2da   : > { %1385 = vst [vmem:[#allocation6 + $0x3d0] sm:$0xff] %v7977_v1 }
 0x2db   : > { %1386 = vst [vmem:[#allocation6 + $0x3d8] sm:$0xff] %v7977_v1 }
 0x2dc   : > { %1387 = vst [vmem:[#allocation6 + $0x3e0] sm:$0xff] %v7977_v1 }
 0x2dd   : > { %1388 = vst [vmem:[#allocation6 + $0x3e8] sm:$0xff] %v7977_v1 }
 0x2de   : > { %1389 = vst [vmem:[#allocation6 + $0x3f0] sm:$0xff] %v7977_v1 }
 0x2df   : > { %1390 = vst [vmem:[#allocation6 + $0x3f8] sm:$0xff] %v7977_v1 }
 0x2e0   : > { %1391 = vst [vmem:[#allocation6 + $0x400] sm:$0xff] %v7977_v1 }
 0x2e1   : > { %1392 = vst [vmem:[#allocation6 + $0x408] sm:$0x1] %v7977_v1 }
 0x2e2   : > { %1393 = vst [vmem:[#allocation6 + $0x410] sm:$0x1] %v7977_v1 }
 0x2e3   : > { %1394 = vst [vmem:[#allocation6 + $0x418] sm:$0x1] %v7977_v1 }
 0x2e4   : > { %1395 = vst [vmem:[#allocation6 + $0x420] sm:$0xff] %v7977_v1 }
 0x2e5   : > { %1396 = vst [vmem:[#allocation6 + $0x428] sm:$0xff] %v7977_v1 }
 0x2e6   : > { %1397 = vst [vmem:[#allocation6 + $0x430] sm:$0xff] %v7977_v1 }
 0x2e7   : > { %1398 = vst [vmem:[#allocation6 + $0x438] sm:$0xff] %v7977_v1 }
 0x2e8   : > { %1399 = vst [vmem:[#allocation6 + $0x440] sm:$0xff] %v7977_v1 }
 0x2e9   : > { %1400 = vst [vmem:[#allocation6 + $0x448] sm:$0xff] %v7977_v1 }
 0x2ea   : > { %1401 = vst [vmem:[#allocation6 + $0x450] sm:$0xff] %v7977_v1 }
 0x2eb   : > { %1402 = vst [vmem:[#allocation6 + $0x458] sm:$0xff] %v7977_v1 }
 0x2ec   : > { %1403 = vst [vmem:[#allocation6 + $0x460] sm:$0xff] %v7977_v1 }
 0x2ed   : > { %1404 = vst [vmem:[#allocation6 + $0x468] sm:$0x1] %v7977_v1 }
 0x2ee   : > { %1405 = vst [vmem:[#allocation6 + $0x470] sm:$0x1] %v7977_v1 }
 0x2ef   : > { %1406 = vst [vmem:[#allocation6 + $0x478] sm:$0x1] %v7977_v1 }
 0x2f0   : > { %1407 = vst [vmem:[#allocation6 + $0x480] sm:$0xff] %v7977_v1 }
 0x2f1   : > { %1408 = vst [vmem:[#allocation6 + $0x488] sm:$0xff] %v7977_v1 }
 0x2f2   : > { %1409 = vst [vmem:[#allocation6 + $0x490] sm:$0xff] %v7977_v1 }
 0x2f3   : > { %1410 = vst [vmem:[#allocation6 + $0x498] sm:$0xff] %v7977_v1 }
 0x2f4   : > { %1411 = vst [vmem:[#allocation6 + $0x4a0] sm:$0xff] %v7977_v1 }
 0x2f5   : > { %1412 = vst [vmem:[#allocation6 + $0x4a8] sm:$0xff] %v7977_v1 }
 0x2f6   : > { %1413 = vst [vmem:[#allocation6 + $0x4b0] sm:$0xff] %v7977_v1 }
 0x2f7   : > { %1414 = vst [vmem:[#allocation6 + $0x4b8] sm:$0xff] %v7977_v1 }
 0x2f8   : > { %1415 = vst [vmem:[#allocation6 + $0x4c0] sm:$0xff] %v7977_v1 }
 0x2f9   : > { %1416 = vst [vmem:[#allocation6 + $0x4c8] sm:$0x1] %v7977_v1 }
 0x2fa   : > { %1417 = vst [vmem:[#allocation6 + $0x4d0] sm:$0x1] %v7977_v1 }
 0x2fb   : > { %1418 = vst [vmem:[#allocation6 + $0x4d8] sm:$0x1] %v7977_v1 }
 0x2fc   : > { %1419 = vst [vmem:[#allocation6 + $0x4e0] sm:$0xff] %v7977_v1 }
 0x2fd   : > { %1420 = vst [vmem:[#allocation6 + $0x4e8] sm:$0xff] %v7977_v1 }
 0x2fe   : > { %1421 = vst [vmem:[#allocation6 + $0x4f0] sm:$0xff] %v7977_v1 }
 0x2ff   : > { %1422 = vst [vmem:[#allocation6 + $0x4f8] sm:$0xff] %v7977_v1 }
 0x300   : > { %1423 = vst [vmem:[#allocation6 + $0x500] sm:$0xff] %v7977_v1 }
 0x301   : > { %1424 = vst [vmem:[#allocation6 + $0x508] sm:$0xff] %v7977_v1 }
 0x302   : > { %1425 = vst [vmem:[#allocation6 + $0x510] sm:$0xff] %v7977_v1 }
 0x303   : > { %1426 = vst [vmem:[#allocation6 + $0x518] sm:$0xff] %v7977_v1 }
 0x304   : > { %1427 = vst [vmem:[#allocation6 + $0x520] sm:$0xff] %v7977_v1 }
 0x305   : > { %1428 = vst [vmem:[#allocation6 + $0x528] sm:$0x1] %v7977_v1 }
 0x306   : > { %1429 = vst [vmem:[#allocation6 + $0x530] sm:$0x1] %v7977_v1 }
 0x307   : > { %1430 = vst [vmem:[#allocation6 + $0x538] sm:$0x1] %v7977_v1 }
 0x308   : > { %1431 = vst [vmem:[#allocation6 + $0x540] sm:$0xff] %v7977_v1 }
 0x309   : > { %1432 = vst [vmem:[#allocation6 + $0x548] sm:$0xff] %v7977_v1 }
 0x30a   : > { %1433 = vst [vmem:[#allocation6 + $0x550] sm:$0xff] %v7977_v1 }
 0x30b   : > { %1434 = vst [vmem:[#allocation6 + $0x558] sm:$0xff] %v7977_v1 }
 0x30c   : > { %1435 = vst [vmem:[#allocation6 + $0x560] sm:$0xff] %v7977_v1 }
 0x30d   : > { %1436 = vst [vmem:[#allocation6 + $0x568] sm:$0xff] %v7977_v1 }
 0x30e   : > { %1437 = vst [vmem:[#allocation6 + $0x570] sm:$0xff] %v7977_v1 }
 0x30f   : > { %1438 = vst [vmem:[#allocation6 + $0x578] sm:$0xff] %v7977_v1 }
 0x310   : > { %1439 = vst [vmem:[#allocation6 + $0x580] sm:$0xff] %v7977_v1 }
 0x311   : > { %1440 = vst [vmem:[#allocation6 + $0x588] sm:$0x1] %v7977_v1 }
 0x312   : > { %1441 = vst [vmem:[#allocation6 + $0x590] sm:$0x1] %v7977_v1 }
 0x313   : > { %1442 = vst [vmem:[#allocation6 + $0x598] sm:$0x1] %v7977_v1 }
 0x314   : > { %1443 = vst [vmem:[#allocation6 + $0x5a0] sm:$0xff] %v7977_v1 }
 0x315   : > { %1444 = vst [vmem:[#allocation6 + $0x5a8] sm:$0xff] %v7977_v1 }
 0x316   : > { %1445 = vst [vmem:[#allocation6 + $0x5b0] sm:$0xff] %v7977_v1 }
 0x317   : > { %1446 = vst [vmem:[#allocation6 + $0x5b8] sm:$0xff] %v7977_v1 }
 0x318   : > { %1447 = vst [vmem:[#allocation6 + $0x5c0] sm:$0xff] %v7977_v1 }
 0x319   : > { %1448 = vst [vmem:[#allocation6 + $0x5c8] sm:$0xff] %v7977_v1 }
 0x31a   : > { %1449 = vst [vmem:[#allocation6 + $0x5d0] sm:$0xff] %v7977_v1 }
 0x31b   : > { %1450 = vst [vmem:[#allocation6 + $0x5d8] sm:$0xff] %v7977_v1 }
 0x31c   : > { %1451 = vst [vmem:[#allocation6 + $0x5e0] sm:$0xff] %v7977_v1 }
 0x31d   : > { %1452 = vst [vmem:[#allocation6 + $0x5e8] sm:$0x1] %v7977_v1 }
 0x31e   : > { %1453 = vst [vmem:[#allocation6 + $0x5f0] sm:$0x1] %v7977_v1 }
 0x31f   : > { %1454 = vst [vmem:[#allocation6 + $0x5f8] sm:$0x1] %v7977_v1 }
 0x320   : > { %1455 = vst [vmem:[#allocation6 + $0x600] sm:$0xff] %v7977_v1 }
 0x321   : > { %1456 = vst [vmem:[#allocation6 + $0x608] sm:$0xff] %v7977_v1 }
 0x322   : > { %1457 = vst [vmem:[#allocation6 + $0x610] sm:$0xff] %v7977_v1 }
 0x323   : > { %1458 = vst [vmem:[#allocation6 + $0x618] sm:$0xff] %v7977_v1 }
 0x324   : > { %1459 = vst [vmem:[#allocation6 + $0x620] sm:$0xff] %v7977_v1 }
 0x325   : > { %1460 = vst [vmem:[#allocation6 + $0x628] sm:$0xff] %v7977_v1 }
 0x326   : > { %1461 = vst [vmem:[#allocation6 + $0x630] sm:$0xff] %v7977_v1 }
 0x327   : > { %1462 = vst [vmem:[#allocation6 + $0x638] sm:$0xff] %v7977_v1 }
 0x328   : > { %1463 = vst [vmem:[#allocation6 + $0x640] sm:$0xff] %v7977_v1 }
 0x329   : > { %1464 = vst [vmem:[#allocation6 + $0x648] sm:$0x1] %v7977_v1 }
 0x32a   : > { %1465 = vst [vmem:[#allocation6 + $0x650] sm:$0x1] %v7977_v1 }
 0x32b   : > { %1466 = vst [vmem:[#allocation6 + $0x658] sm:$0x1] %v7977_v1 }
 0x32c   : > { %1467 = vst [vmem:[#allocation6 + $0x660] sm:$0xff] %v7977_v1 }
 0x32d   : > { %1468 = vst [vmem:[#allocation6 + $0x668] sm:$0xff] %v7977_v1 }
 0x32e   : > { %1469 = vst [vmem:[#allocation6 + $0x670] sm:$0xff] %v7977_v1 }
 0x32f   : > { %1470 = vst [vmem:[#allocation6 + $0x678] sm:$0xff] %v7977_v1 }
 0x330   : > { %1471 = vst [vmem:[#allocation6 + $0x680] sm:$0xff] %v7977_v1 }
 0x331   : > { %1472 = vst [vmem:[#allocation6 + $0x688] sm:$0xff] %v7977_v1 }
 0x332   : > { %1473 = vst [vmem:[#allocation6 + $0x690] sm:$0xff] %v7977_v1 }
 0x333   : > { %1474 = vst [vmem:[#allocation6 + $0x698] sm:$0xff] %v7977_v1 }
 0x334   : > { %1475 = vst [vmem:[#allocation6 + $0x6a0] sm:$0xff] %v7977_v1 }
 0x335   : > { %1476 = vst [vmem:[#allocation6 + $0x6a8] sm:$0x1] %v7977_v1 }
 0x336   : > { %1477 = vst [vmem:[#allocation6 + $0x6b0] sm:$0x1] %v7977_v1 }
 0x337   : > { %1478 = vst [vmem:[#allocation6 + $0x6b8] sm:$0x1] %v7977_v1 }
 0x338 PF: > { %s10279_s16 = sld [smem:[#allocation55_spill]]  ;;  %v6505_v6 = vld [vmem:[%s7460_s25] sm:$0xff]  ;;  %vm1627_vm0 = vcmask 523264   ;;  %v6506_v7 = vld [vmem:[%s7460_s25 + $0x8] sm:$0xff]  ;;  %v6507_v8 = vld [vmem:[%s7460_s25 + $0x10] sm:$0xff]  ;;  %s8414_s29 = smov 0  }
 0x339   : > { %v6508_v9 = vld [vmem:[%s7460_s25 + $0x18] sm:$0xff]  ;;  %v6509_v10 = vld [vmem:[%s7460_s25 + $0x20] sm:$0xff]  ;;  %v6510_v11 = vld [vmem:[%s7460_s25 + $0x28] sm:$0xff] }
 0x33a   : > { %v6511_v12 = vld [vmem:[%s7460_s25 + $0x30] sm:$0xff]  ;;  %v6512_v13 = vld [vmem:[%s7460_s25 + $0x38] sm:$0xff]  ;;  %v8231_v14 = vld [vmem:[#allocation7] ss:$0 sm:$0xff] }
 0x33b   : > { %v6513_v15 = vld [vmem:[%s7460_s25 + $0x40] sm:$0xff]  ;;  %v6514_v20 = vld [vmem:[%s7460_s25 + $0x48] sm:$0xff]  ;;  %v6515_v25 = vld [vmem:[%s7460_s25 + $0x50] sm:$0xff] }
 0x33c   : > { %v6516_v30 = vld [vmem:[%s7460_s25 + $0x58] sm:$0xff]  ;;  %v6517_v35 = vld [vmem:[%s7460_s25 + $0x60] sm:$0xff]  ;;  %v6518_v40 = vld [vmem:[%s7460_s25 + $0x68] sm:$0xff] }
 0x33d   : > { %v6519_v45 = vld [vmem:[%s7460_s25 + $0x70] sm:$0xff]  ;;  %v6520_v50 = vld [vmem:[%s7460_s25 + $0x78] sm:$0xff] }
 0x33e   : > { %v6524_v2 = vld [vmem:[%s10279_s16 + $0x18] sm:$0xff]  ;;  %v6523_v3 = vld [vmem:[%s10279_s16 + $0x10] sm:$0xff]  ;;  %v6522_v4 = vld [vmem:[%s10279_s16 + $0x8] sm:$0xff] }
 0x33f   : > { %1680 = vmatpush.bf16.msra.mxu0 %v6524_v2  ;;  %v6521_v5 = vld [vmem:[%s10279_s16] sm:$0xff] }
 0x343   : > { %1681 = vmatpush.bf16.msra.mxu0 %v6523_v3 }
 0x347   : > { %1682 = vmatpush.bf16.msra.mxu0 %v6522_v4 }
 0x34b   : > { %1683 = vmatpush.bf16.msra.mxu0 %v6521_v5 }
 0x34e   : > { %6037 = vmatmul.msk.bf16.vlgmr.msra.gmra.mxu0 %vm1627_vm0, %v6505_v6 }
 0x35e   : > { %6038 = vmatmul.msk.bf16.gmra.mxu0 %vm1627_vm0, %v6506_v7 }
 0x36e   : > { %6039 = vmatmul.msk.bf16.gmra.mxu0 %vm1627_vm0, %v6507_v8 }
 0x37e   : > { %6040 = vmatmul.msk.bf16.gmra.mxu0 %vm1627_vm0, %v6508_v9 }
 0x38e   : > { %6041 = vmatmul.msk.bf16.gmra.mxu0 %vm1627_vm0, %v6509_v10 }
 0x39e   : > { %6042 = vmatmul.msk.bf16.gmra.mxu0 %vm1627_vm0, %v6510_v11 }
 0x3ae   : > { %6043 = vmatmul.msk.bf16.gmra.mxu0 %vm1627_vm0, %v6511_v12 }
 0x3be   : > { %6044 = vmatmul.msk.bf16.gmra.mxu0 %vm1627_vm0, %v6512_v13 }
 0x3cb   : > { %v1685_v16 = vpop.f32.mrf.mxu0 }
 0x3cc   : > { %v8235_v17 = vadd.f32 %v8231_v14, %v1685_v16  ;;  %v8364_v16 = vld [vmem:[%s10204_s3] sm:$0xff] }
 0x3cd   : > { %10288 = vst [vmem:[#allocation47_spill] sm:$0xff] %v8364_v16 }
 0x3ce   : > { %1766 = vst [vmem:[#allocation2 + $0x68] sm:$0xff] %v8235_v17  ;;  %6045 = vmatmul.msk.bf16.gmra.mxu0 %vm1627_vm0, %v6513_v15 }
 0x3d3   : > { %v1687_v18 = vpop.f32.mrf.mxu0 }
 0x3d4   : > { %v8240_v19 = vadd.f32 %v8231_v14, %v1687_v18  ;;  %v8369_v18 = vld [vmem:[%s10204_s3 + $0x8] sm:$0xff] }
 0x3d6   : > { %1767 = vst [vmem:[#allocation2 + $0x70] sm:$0xff] %v8240_v19 }
 0x3db   : > { %v1690_v21 = vpop.f32.mrf.mxu0 }
 0x3dc   : > { %v8245_v22 = vadd.f32 %v8231_v14, %v1690_v21  ;;  %v8379_v21 = vld [vmem:[%s10204_s3 + $0x18] sm:$0xff] }
 0x3de   : > { %1768 = vst [vmem:[#allocation2 + $0x88] sm:$0xff] %v8245_v22  ;;  %6046 = vmatmul.msk.bf16.gmra.mxu0 %vm1627_vm0, %v6514_v20  ;;  %v8374_v20 = vld [vmem:[%s10204_s3 + $0x10] sm:$0xff] }
 0x3e3   : > { %v1692_v23 = vpop.f32.mrf.mxu0 }
 0x3e4   : > { %v8250_v24 = vadd.f32 %v8231_v14, %v1692_v23  ;;  %v8384_v23 = vld [vmem:[%s10204_s3 + $0x20] sm:$0xff] }
 0x3e6   : > { %1769 = vst [vmem:[#allocation2 + $0x90] sm:$0xff] %v8250_v24 }
 0x3eb   : > { %v1695_v26 = vpop.f32.mrf.mxu0 }
 0x3ec   : > { %v8255_v27 = vadd.f32 %v8231_v14, %v1695_v26  ;;  %v8394_v26 = vld [vmem:[%s10204_s3 + $0x30] sm:$0x1] }
 0x3ee   : > { %1770 = vst [vmem:[#allocation2 + $0xa8] sm:$0xff] %v8255_v27  ;;  %6047 = vmatmul.msk.bf16.gmra.mxu0 %vm1627_vm0, %v6515_v25  ;;  %v8389_v25 = vld [vmem:[%s10204_s3 + $0x28] sm:$0xff] }
 0x3f3   : > { %v1697_v28 = vpop.f32.mrf.mxu0 }
 0x3f4   : > { %v8260_v29 = vadd.f32 %v8231_v14, %v1697_v28  ;;  %v8396_v28 = vld [vmem:[#allocation10] ss:$0 sm:$0xff] }
 0x3f5   : > { %10289 = vst [vmem:[#allocation48_spill] sm:$0xff] %v8396_v28 }
 0x3f6   : > { %1771 = vst [vmem:[#allocation2 + $0xb0] sm:$0xff] %v8260_v29 }
 0x3fb   : > { %v1700_v31 = vpop.f32.mrf.mxu0 }
 0x3fc   : > { %v8265_v32 = vadd.f32 %v8231_v14, %v1700_v31 }
 0x3fe   : > { %1772 = vst [vmem:[#allocation2 + $0xc8] sm:$0xff] %v8265_v32  ;;  %6048 = vmatmul.msk.bf16.gmra.mxu0 %vm1627_vm0, %v6516_v30 }
 0x403   : > { %v1702_v33 = vpop.f32.mrf.mxu0 }
 0x404   : > { %v8270_v34 = vadd.f32 %v8231_v14, %v1702_v33 }
 0x406   : > { %1773 = vst [vmem:[#allocation2 + $0xd0] sm:$0xff] %v8270_v34 }
 0x40b   : > { %v1705_v36 = vpop.f32.mrf.mxu0 }
 0x40c   : > { %v8275_v37 = vadd.f32 %v8231_v14, %v1705_v36 }
 0x40e   : > { %1774 = vst [vmem:[#allocation2 + $0xe8] sm:$0xff] %v8275_v37  ;;  %6049 = vmatmul.msk.bf16.gmra.mxu0 %vm1627_vm0, %v6517_v35 }
 0x413   : > { %v1707_v38 = vpop.f32.mrf.mxu0 }
 0x414   : > { %v8280_v39 = vadd.f32 %v8231_v14, %v1707_v38 }
 0x416   : > { %1775 = vst [vmem:[#allocation2 + $0xf0] sm:$0xff] %v8280_v39 }
 0x41b   : > { %v1710_v41 = vpop.f32.mrf.mxu0 }
 0x41c   : > { %v8285_v42 = vadd.f32 %v8231_v14, %v1710_v41 }
 0x41e   : > { %1776 = vst [vmem:[#allocation2 + $0x108] sm:$0xff] %v8285_v42  ;;  %6050 = vmatmul.msk.bf16.gmra.mxu0 %vm1627_vm0, %v6518_v40 }
 0x423   : > { %v1712_v43 = vpop.f32.mrf.mxu0 }
 0x424   : > { %v8290_v44 = vadd.f32 %v8231_v14, %v1712_v43 }
 0x426   : > { %1777 = vst [vmem:[#allocation2 + $0x110] sm:$0xff] %v8290_v44 }
 0x42b   : > { %v1715_v46 = vpop.f32.mrf.mxu0 }
 0x42c   : > { %v8295_v47 = vadd.f32 %v8231_v14, %v1715_v46 }
 0x42e   : > { %1778 = vst [vmem:[#allocation2 + $0x128] sm:$0xff] %v8295_v47  ;;  %6051 = vmatmul.msk.bf16.gmra.mxu0 %vm1627_vm0, %v6519_v45 }
 0x433   : > { %v1717_v48 = vpop.f32.mrf.mxu0 }
 0x434   : > { %v8300_v49 = vadd.f32 %v8231_v14, %v1717_v48 }
 0x436   : > { %1779 = vst [vmem:[#allocation2 + $0x130] sm:$0xff] %v8300_v49 }
 0x43b   : > { %v1720_v51 = vpop.f32.mrf.mxu0 }
 0x43c   : > { %v8305_v52 = vadd.f32 %v8231_v14, %v1720_v51 }
 0x43e   : > { %1780 = vst [vmem:[#allocation2 + $0x148] sm:$0xff] %v8305_v52  ;;  %6052 = vmatmul.msk.bf16.gmra.mxu0 %vm1627_vm0, %v6520_v50 }
 0x443   : > { %v1722_v53 = vpop.f32.mrf.mxu0 }
 0x444   : > { %v8310_v54 = vadd.f32 %v8231_v14, %v1722_v53 }
 0x446   : > { %1781 = vst [vmem:[#allocation2 + $0x150] sm:$0xff] %v8310_v54 }
 0x44b   : > { %v1725_v55 = vpop.f32.mrf.mxu0 }
 0x44c   : > { %v8314_v56 = vadd.f32 %v8231_v14, %v1725_v55 }
 0x44e   : > { %1782 = vst [vmem:[#allocation2 + $0x168] sm:$0xff] %v8314_v56 }
 0x453   : > { %v1727_v57 = vpop.f32.mrf.mxu0 }
 0x454   : > { %v8318_v58 = vadd.f32 %v8231_v14, %v1727_v57 }
 0x456   : > { %1783 = vst [vmem:[#allocation2 + $0x170] sm:$0xff] %v8318_v58 }
 0x45b   : > { %v1730_v59 = vpop.f32.mrf.mxu0 }
 0x45c   : > { %v8322_v60 = vadd.f32 %v8231_v14, %v1730_v59 }
 0x45e   : > { %1784 = vst [vmem:[#allocation2 + $0x188] sm:$0xff] %v8322_v60 }
 0x463   : > { %v1732_v61 = vpop.f32.mrf.mxu0 }
 0x464   : > { %v8326_v62 = vadd.f32 %v8231_v14, %v1732_v61 }
 0x466   : > { %1785 = vst [vmem:[#allocation2 + $0x190] sm:$0xff] %v8326_v62 }
 0x46b   : > { %v1735_v63 = vpop.f32.mrf.mxu0 }
 0x46c   : > { %v8330_v0 = vadd.f32 %v8231_v14, %v1735_v63 }
 0x46e   : > { %10280 = vst [vmem:[#allocation39_spill] sm:$0xff] %v8330_v0 }
 0x46f   : > { %1786 = vst [vmem:[#allocation2 + $0x1a8] sm:$0xff] %v8330_v0 }
 0x473   : > { %v1737_v1 = vpop.f32.mrf.mxu0 }
 0x474   : > { %v8334_v2 = vadd.f32 %v8231_v14, %v1737_v1 }
 0x476   : > { %10281 = vst [vmem:[#allocation40_spill] sm:$0xff] %v8334_v2 }
 0x477   : > { %1787 = vst [vmem:[#allocation2 + $0x1b0] sm:$0xff] %v8334_v2 }
 0x47b   : > { %v1740_v3 = vpop.f32.mrf.mxu0 }
 0x47c   : > { %v8338_v4 = vadd.f32 %v8231_v14, %v1740_v3 }
 0x47e   : > { %10282 = vst [vmem:[#allocation41_spill] sm:$0xff] %v8338_v4 }
 0x47f   : > { %1788 = vst [vmem:[#allocation2 + $0x1c8] sm:$0xff] %v8338_v4 }
 0x483   : > { %v1742_v5 = vpop.f32.mrf.mxu0 }
 0x484   : > { %v8342_v6 = vadd.f32 %v8231_v14, %v1742_v5 }
 0x486   : > { %10283 = vst [vmem:[#allocation42_spill] sm:$0xff] %v8342_v6 }
 0x487   : > { %1789 = vst [vmem:[#allocation2 + $0x1d0] sm:$0xff] %v8342_v6 }
 0x48b   : > { %v1745_v7 = vpop.f32.mrf.mxu0 }
 0x48c   : > { %v8346_v8 = vadd.f32 %v8231_v14, %v1745_v7 }
 0x48e   : > { %10284 = vst [vmem:[#allocation43_spill] sm:$0xff] %v8346_v8 }
 0x48f   : > { %1790 = vst [vmem:[#allocation2 + $0x1e8] sm:$0xff] %v8346_v8 }
 0x493   : > { %v1747_v9 = vpop.f32.mrf.mxu0 }
 0x494   : > { %v8350_v10 = vadd.f32 %v8231_v14, %v1747_v9 }
 0x496   : > { %10285 = vst [vmem:[#allocation44_spill] sm:$0xff] %v8350_v10 }
 0x497   : > { %1791 = vst [vmem:[#allocation2 + $0x1f0] sm:$0xff] %v8350_v10 }
 0x49b   : > { %v1750_v11 = vpop.f32.mrf.mxu0 }
 0x49c   : > { %v8354_v12 = vadd.f32 %v8231_v14, %v1750_v11 }
 0x49e   : > { %10286 = vst [vmem:[#allocation45_spill] sm:$0xff] %v8354_v12 }
 0x49f   : > { %1792 = vst [vmem:[#allocation2 + $0x208] sm:$0xff] %v8354_v12 }
 0x4a3   : > { %v1752_v13 = vpop.f32.mrf.mxu0 }
 0x4a4   : > { %v8358_v15 = vadd.f32 %v8231_v14, %v1752_v13 }
 0x4a6   : > { %10287 = vst [vmem:[#allocation46_spill] sm:$0xff] %v8358_v15 }
 0x4a7   : > { %1793 = vst [vmem:[#allocation2 + $0x210] sm:$0xff] %v8358_v15 }
 0x4ab   : > { %v1755_v30 = vpop.f32.mrf.mxu0 }
 0x4ac   : > { %v8399_v31 = vadd.f32 %v8231_v14, %v1755_v30 }
 0x4ae   : > { %10290 = vst [vmem:[#allocation49_spill] sm:$0xff] %v8399_v31 }
 0x4af   : > { %1794 = vst [vmem:[#allocation2 + $0x228] sm:$0xff] %v8399_v31 }
 0x4b3   : > { %v1757_v33 = vpop.f32.mrf.mxu0 }
 0x4b4   : > { %v8403_v35 = vadd.f32 %v8231_v14, %v1757_v33 }
 0x4b6   : > { %10291 = vst [vmem:[#allocation50_spill] sm:$0xff] %v8403_v35 }
 0x4b7   : > { %1795 = vst [vmem:[#allocation2 + $0x230] sm:$0xff] %v8403_v35 }
 0x4bb   : > { %v1760_v36 = vpop.f32.mrf.mxu0 }
 0x4bc   : > { %v8407_v38 = vadd.f32 %v8231_v14, %v1760_v36 }
 0x4be   : > { %10292 = vst [vmem:[#allocation51_spill] sm:$0xff] %v8407_v38 }
 0x4bf   : > { %1796 = vst [vmem:[#allocation2 + $0x248] sm:$0xff] %v8407_v38 }
 0x4c3   : > { %v1762_v40 = vpop.f32.mrf.mxu0 }
 0x4c4   : > { %v8411_v41 = vadd.f32 %v8231_v14, %v1762_v40 }
 0x4c6   : > { %10293 = vst [vmem:[#allocation52_spill] sm:$0xff] %v8411_v41 }
 0x4c7   : > { %1797 = vst [vmem:[#allocation2 + $0x250] sm:$0xff] %v8411_v41 }
 0x4c8 LB: >> { %v10294_v28 = vld [vmem:[#allocation48_spill] sm:$0xff]  ;;  %v10295_v16 = vld [vmem:[#allocation47_spill] sm:$0xff]  ;;  %vm1835_vm1 = vcmask 1046528   ;;  %s6053_s30 = sshll.u32 %s7185_s29, 5  ;;  %vm1854_vm2 = vcmask 1045504   ;;  %vm1871_vm3 = vcmask 1044480   ;;  %s7185_s29 = sphi %s8414_s29, %s1814_s29  }
 0x4c9   : >> { %v1821_v43 = vperm.slane %v10295_v16, 0  ;;  %v1828_v45 = vperm.slane %v10295_v16, 1  ;;  %v1847_v46 = vperm.slane %v10295_v16, 2  ;;  %v1866_v14 = vperm.slane %v10295_v16, 3  ;;  %s8440_s22 = scalar_lea.vmem [#allocation2], %s6053_s30  ;;  %s6084_s26 = sshll.u32 %s7185_s29, 4 }
 0x4ca   : >> { %v1881_v48 = vperm.slane %v10295_v16, 4  ;;  %v8426_v50 = vperm.slane %v10295_v16, 5  ;;  %v8429_v51 = vperm.slane %v10295_v16, 6  ;;  %v8432_v53 = vperm.slane %v10295_v16, 7  ;;  %s2647_s10 = scalar_lea.vmem [#allocation3], %s6084_s26  ;;  %s1814_s29 = sadd.s32 1, %s7185_s29  }
 0x4cb   : >> { %v8435_v55 = vperm.slane %v8369_v18, 0  ;;  %v8438_v57 = vperm.slane %v8369_v18, 1  ;;  %v8449_v3 = vperm.slane %v8369_v18, 3  ;;  %v8452_v5 = vperm.slane %v8369_v18, 4  ;;  %p1811_p1 = scmp.ge.s32.totalorder %s1814_s29, 16  }
 0x4cc   : >> { %vm1888_vm4 = vcmask 1043456   ;;  %vm1907_vm5 = vcmask 1042432   ;;  %vm1926_vm6 = vcmask 1041408   ;;  %s7205_s25 = smov (%p1811_p1), 124   ;;  %s7206_s18 = smov (%p1811_p1), 4   ;;  %vm2912_vm7 = vcmask (%p1811_p1), 31744  }
 0x4cd   : > { %s7207_s4 = smov (%p1811_p1), 116   ;;  %vm3107_vm8 = vcmask (%p1811_p1), 64512   ;;  %s7208_s1 = smov (%p1811_p1), 100   ;;  %vm3405_vm9 = vcmask (%p1811_p1), 130048   ;;  %vm3707_vm10 = vcmask (%p1811_p1), 261120  }
 0x4ce   : >> { %v1817_v59 = vld [vmem:[%s8440_s22] sm:$0xff]  ;;  %v1818_v61 = vld [vmem:[%s8440_s22 + $0x8] sm:$0xff]  ;;  %v8445_v63 = vld [vmem:[%s8440_s22 + $0x10] sm:$0xff]  ;;  %s7209_s30 = smov (%p1811_p1), 68   ;;  %s10123_s13 = smov (%p1811_p1), 0  }
 0x4cf   : >> { %v1822_v7 = vmul.f32 %v1821_v43, %v1817_v59  ;;  %v1823_v9 = vmul.f32 %v1821_v43, %v1818_v61  ;;  %v1824_v11 = vmul.f32 %v1821_v43, %v8445_v63  ;;  %v1829_v13 = vmul.f32 %v1828_v45, %v1817_v59 }
 0x4d0   : >> { %v1830_v30 = vmul.f32 %v1828_v45, %v1818_v61  ;;  %v1831_v33 = vmul.f32 %v1828_v45, %v8445_v63  ;;  %v1848_v36 = vmul.f32 %v1847_v46, %v1817_v59  ;;  %v1849_v40 = vmul.f32 %v1847_v46, %v1818_v61  ;;  %v1820_v59 = vld [vmem:[%s8440_s22 + $0x18] sm:$0x7] }
 0x4d1   : >> { %v1825_v1 = vadd.f32 %v10294_v28, %v1822_v7  ;;  %v1826_v16 = vadd.f32 %v10294_v28, %v1823_v9  ;;  %v1827_v38 = vadd.f32 %v10294_v28, %v1824_v11  ;;  %v1836_v41 = vrot.slane %v1829_v13, 1 }
 0x4d2   : >> { %v1837_v31 = vrot.slane %v1830_v30, 1  ;;  %v1839_v35 = vrot.slane %v1831_v33, 1  ;;  %v1850_v15 = vmul.f32 %v1847_v46, %v8445_v63  ;;  %v1855_v43 = vrot.slane %v1848_v36, 2 }
 0x4d3   : >> { %v1856_v12 = vrot.slane %v1849_v40, 2  ;;  %v1867_v10 = vmul.f32 %v1866_v14, %v1818_v61  ;;  %v1868_v45 = vmul.f32 %v1866_v14, %v8445_v63  ;;  %v1882_v8 = vmul.f32 %v1881_v48, %v1818_v61 }
 0x4d4   : >> { %v1838_v6 = vsel %vm1835_vm1, %v1836_v41, %v1837_v31  ;;  %v1840_v7 = vsel %vm1835_vm1, %v1837_v31, %v1839_v35  ;;  %v1846_v9 = vadd.f32 %v1839_v35, %v1827_v38  ;;  %v1858_v4 = vrot.slane %v1850_v15, 2 }
 0x4d5   : >> { %v1844_v11 = vadd.f32 %v1838_v6, %v1825_v1  ;;  %v1845_v13 = vadd.f32 %v1840_v7, %v1826_v16  ;;  %v1857_v30 = vsel %vm1854_vm2, %v1855_v43, %v1856_v12  ;;  %v1872_v33 = vrot.slane %v1867_v10, 3  ;;  %v6055_v43 = vld [vmem:[%s8440_s22 + $0x20] sm:$0xff] }
 0x4d6   : >> { %v1859_v46 = vsel %vm1854_vm2, %v1856_v12, %v1858_v4  ;;  %v1865_v36 = vadd.f32 %v1858_v4, %v1846_v9  ;;  %v1873_v40 = vrot.slane %v1868_v45, 3  ;;  %v1883_v14 = vmul.f32 %v1881_v48, %v8445_v63 }
 0x4d7   : >> { %v1863_v28 = vadd.f32 %v1857_v30, %v1844_v11  ;;  %v1864_v2 = vadd.f32 %v1859_v46, %v1845_v13  ;;  %v1884_v41 = vmul.f32 %v1881_v48, %v1820_v59  ;;  %v1889_v0 = vrot.slane %v1882_v8, 4  ;;  %v8483_v46 = vld [vmem:[%s8440_s22 + $0x30] sm:$0xff] }
 0x4d8   : >> { %v1874_v31 = vsel %vm1871_vm3, %v1872_v33, %v1873_v40  ;;  %v1880_v15 = vadd.f32 %v1873_v40, %v1865_v36  ;;  %v1890_v6 = vrot.slane %v1883_v14, 4  ;;  %v1901_v16 = vmul.f32 %v8426_v50, %v1818_v61 }
 0x4d9   : >> { %v1878_v35 = vadd.f32 %v1872_v33, %v1863_v28  ;;  %v1879_v10 = vadd.f32 %v1874_v31, %v1864_v2  ;;  %v1892_v38 = vrot.slane %v1884_v41, 4  ;;  %v1902_v4 = vmul.f32 %v8426_v50, %v8445_v63  ;;  %v8480_v33 = vld [vmem:[%s8440_s22 + $0x28] sm:$0xff] }
 0x4da   : >> { %v1891_v12 = vsel %vm1888_vm4, %v1889_v0, %v1890_v6  ;;  %v1903_v1 = vmul.f32 %v8426_v50, %v1820_v59  ;;  %v1908_v48 = vrot.slane %v1901_v16, 5  ;;  %v1920_v8 = vmul.f32 %v8429_v51, %v1818_v61 }
 0x4db   : >> { %v1893_v45 = vsel %vm1888_vm4, %v1890_v6, %v1892_v38  ;;  %v1897_v7 = vadd.f32 %v1889_v0, %v1878_v35  ;;  %v1898_v9 = vadd.f32 %v1891_v12, %v1879_v10  ;;  %v1909_v28 = vrot.slane %v1902_v4, 5 }
 0x4dc   : >> { %v1899_v2 = vadd.f32 %v1893_v45, %v1880_v15  ;;  %v1911_v11 = vrot.slane %v1903_v1, 5  ;;  %v1921_v13 = vmul.f32 %v8429_v51, %v8445_v63  ;;  %v1922_v30 = vmul.f32 %v8429_v51, %v1820_v59 }
 0x4dd   : >> { %v1910_v50 = vsel %vm1907_vm5, %v1908_v48, %v1909_v28  ;;  %v1916_v61 = vadd.f32 %v1908_v48, %v1897_v7  ;;  %v1927_v36 = vrot.slane %v1920_v8, 6  ;;  %v1946_v40 = vmul.f32 %v6055_v43, %v8432_v53 }
 0x4de   : >> { %v1912_v0 = vsel %vm1907_vm5, %v1909_v28, %v1911_v11  ;;  %v1917_v14 = vadd.f32 %v1910_v50, %v1898_v9  ;;  %v1928_v41 = vrot.slane %v1921_v13, 6  ;;  %v1930_v31 = vrot.slane %v1922_v30, 6 }
 0x4df   : >> { %v1918_v15 = vadd.f32 %v1912_v0, %v1899_v2  ;;  %v1935_v6 = vadd.f32 %v1927_v36, %v1916_v61  ;;  %v1947_v51 = vmul.f32 %v8480_v33, %v8432_v53  ;;  %v1948_v63 = vmul.f32 %v8483_v46, %v8432_v53  ;;  %v6058_v61 = vld [vmem:[%s8440_s22 + $0x38] sm:$0x7] }
 0x4e0   : >> { %v1929_v59 = vsel %vm1926_vm6, %v1927_v36, %v1928_v41  ;;  %v1931_v16 = vsel %vm1926_vm6, %v1928_v41, %v1930_v31  ;;  %v1953_v35 = vmul.f32 %v6055_v43, %v8435_v55  ;;  %v1954_v10 = vmul.f32 %v8480_v33, %v8435_v55 }
 0x4e1   : >> { %v1936_v38 = vadd.f32 %v1929_v59, %v1917_v14  ;;  %v1937_v4 = vadd.f32 %v1931_v16, %v1918_v15  ;;  %v1949_v12 = vadd.f32 %v1946_v40, %v1935_v6  ;;  %v1955_v1 = vmul.f32 %v8483_v46, %v8435_v55 }
 0x4e2   : >> { %v1959_v48 = vrot.slane %v1953_v35, 1  ;;  %v1960_v8 = vrot.slane %v1954_v10, 1  ;;  %v1971_v53 = vmul.f32 %v6055_v43, %v8438_v57  ;;  %v1972_v45 = vmul.f32 %v8480_v33, %v8438_v57 }
 0x4e3   : >> { %v1950_v7 = vadd.f32 %v1947_v51, %v1936_v38  ;;  %v1951_v9 = vadd.f32 %v1948_v63, %v1937_v4  ;;  %v1962_v28 = vrot.slane %v1955_v1, 1  ;;  %v1973_v2 = vmul.f32 %v8483_v46, %v8438_v57 }
 0x4e4   : >> { %v1961_v11 = vsel %vm1835_vm1, %v1959_v48, %v1960_v8  ;;  %v1977_v13 = vrot.slane %v1971_v53, 2  ;;  %v1978_v30 = vrot.slane %v1972_v45, 2  ;;  %v10296_v50 = vperm.slane %v8369_v18, 2 }
 0x4e5   : >> { %v1963_v43 = vsel %vm1835_vm1, %v1960_v8, %v1962_v28  ;;  %v1967_v36 = vadd.f32 %v1961_v11, %v1949_v12  ;;  %v1969_v40 = vadd.f32 %v1962_v28, %v1951_v9  ;;  %v1980_v0 = vrot.slane %v1973_v2, 2 }
 0x4e6   : >> { %v1989_v55 = vmul.f32 %v8480_v33, %v10296_v50  ;;  %v1968_v14 = vadd.f32 %v1963_v43, %v1950_v7  ;;  %v1979_v41 = vsel %vm1854_vm2, %v1977_v13, %v1978_v30  ;;  %v10297_v31 = vmov %v10296_v50 }
 0x4e7   : >> { %v1990_v57 = vmul.f32 %v8483_v46, %v10297_v31  ;;  %v1981_v6 = vsel %vm1854_vm2, %v1978_v30, %v1980_v0  ;;  %v1985_v51 = vadd.f32 %v1979_v41, %v1967_v36  ;;  %v1987_v63 = vadd.f32 %v1980_v0, %v1969_v40  ;;  %v6060_v31 = vld [vmem:[%s8440_s22 + $0x40] sm:$0xff] }
 0x4e8   : >> { %v1993_v15 = vrot.slane %v1989_v55, 3  ;;  %v2003_v59 = vmul.f32 %v8480_v33, %v8449_v3  ;;  %v1986_v16 = vadd.f32 %v1981_v6, %v1968_v14  ;;  %v2004_v10 = vmul.f32 %v8483_v46, %v8449_v3 }
 0x4e9   : >> { %v1994_v35 = vrot.slane %v1990_v57, 3  ;;  %v2005_v38 = vmul.f32 %v6058_v61, %v8449_v3  ;;  %v2021_v1 = vmul.f32 %v8480_v33, %v8452_v5  ;;  %v2022_v48 = vmul.f32 %v8483_v46, %v8452_v5  ;;  %v8534_v57 = vld [vmem:[%s8440_s22 + $0x48] sm:$0xff] }
 0x4ea   : >> { %v1999_v4 = vadd.f32 %v1993_v15, %v1985_v51  ;;  %v2009_v12 = vrot.slane %v2003_v59, 4  ;;  %v2010_v45 = vrot.slane %v2004_v10, 4  ;;  %v2023_v2 = vmul.f32 %v6058_v61, %v8452_v5 }
 0x4eb   : >> { %v1995_v8 = vsel %vm1871_vm3, %v1993_v15, %v1994_v35  ;;  %v2001_v53 = vadd.f32 %v1994_v35, %v1987_v63  ;;  %v2012_v7 = vrot.slane %v2005_v38, 4  ;;  %v2027_v3 = vrot.slane %v2021_v1, 5  ;;  %v8537_v15 = vld [vmem:[%s8440_s22 + $0x50] sm:$0xff] }
 0x4ec   : >> { %v2000_v9 = vadd.f32 %v1995_v8, %v1986_v16  ;;  %v2017_v28 = vadd.f32 %v2009_v12, %v1999_v4  ;;  %v2011_v11 = vsel %vm1888_vm4, %v2009_v12, %v2010_v45  ;;  %v2028_v30 = vrot.slane %v2022_v48, 5 }
 0x4ed   : >> { %v2013_v13 = vsel %vm1888_vm4, %v2010_v45, %v2012_v7  ;;  %v2038_v50 = vperm.slane %v8369_v18, 5  ;;  %v2030_v36 = vrot.slane %v2023_v2, 5  ;;  %v2063_v63 = vperm.slane %v8369_v18, 6 }
 0x4ee   : >> { %v2018_v55 = vadd.f32 %v2011_v11, %v2000_v9  ;;  %v2019_v43 = vadd.f32 %v2013_v13, %v2001_v53  ;;  %v2035_v40 = vadd.f32 %v2027_v3, %v2017_v28  ;;  %v2029_v0 = vsel %vm1907_vm5, %v2027_v3, %v2028_v30 }
 0x4ef   : >> { %v2039_v14 = vmul.f32 %v8480_v33, %v2038_v50  ;;  %v2040_v41 = vmul.f32 %v8483_v46, %v2038_v50  ;;  %v2041_v5 = vmul.f32 %v6058_v61, %v2038_v50  ;;  %v2031_v6 = vsel %vm1907_vm5, %v2028_v30, %v2030_v36 }
 0x4f0   : >> { %v2036_v51 = vadd.f32 %v2029_v0, %v2018_v55  ;;  %v2070_v59 = vperm.slane %v8369_v18, 7  ;;  %v2037_v16 = vadd.f32 %v2031_v6, %v2019_v43  ;;  %v2064_v33 = vmul.f32 %v6060_v31, %v2063_v63 }
 0x4f1   : >> { %v2045_v35 = vrot.slane %v2039_v14, 6  ;;  %v2046_v10 = vrot.slane %v2040_v41, 6  ;;  %v2048_v38 = vrot.slane %v2041_v5, 6  ;;  %v2065_v46 = vmul.f32 %v8534_v57, %v2063_v63  ;;  %v6063_v14 = vld [vmem:[%s8440_s22 + $0x58] sm:$0x7] }
 0x4f2   : >> { %v2066_v61 = vmul.f32 %v8537_v15, %v2063_v63  ;;  %v2071_v4 = vmul.f32 %v6060_v31, %v2070_v59  ;;  %v2072_v8 = vmul.f32 %v8534_v57, %v2070_v59  ;;  %v2073_v7 = vmul.f32 %v8537_v15, %v2070_v59 }
 0x4f3   : >> { %v2047_v12 = vsel %vm1926_vm6, %v2045_v35, %v2046_v10  ;;  %v2049_v1 = vsel %vm1926_vm6, %v2046_v10, %v2048_v38  ;;  %v2053_v48 = vadd.f32 %v2045_v35, %v2035_v40  ;;  %v2088_v3 = vperm.slane %v8374_v20, 0 }
 0x4f4   : >> { %v2054_v53 = vadd.f32 %v2047_v12, %v2036_v51  ;;  %v2055_v45 = vadd.f32 %v2049_v1, %v2037_v16  ;;  %v2077_v9 = vrot.slane %v2071_v4, 1  ;;  %v2078_v2 = vrot.slane %v2072_v8, 1 }
 0x4f5   : >> { %v2067_v28 = vadd.f32 %v2064_v33, %v2053_v48  ;;  %v2106_v11 = vperm.slane %v8374_v20, 1  ;;  %v2080_v50 = vrot.slane %v2073_v7, 1  ;;  %v2120_v55 = vperm.slane %v8374_v20, 2 }
 0x4f6   : >> { %v2068_v13 = vadd.f32 %v2065_v46, %v2054_v53  ;;  %v2069_v30 = vadd.f32 %v2066_v61, %v2055_v45  ;;  %v2079_v43 = vsel %vm1835_vm1, %v2077_v9, %v2078_v2  ;;  %v2089_v36 = vmul.f32 %v6060_v31, %v2088_v3 }
 0x4f7   : >> { %v2090_v40 = vmul.f32 %v8534_v57, %v2088_v3  ;;  %v2091_v0 = vmul.f32 %v8537_v15, %v2088_v3  ;;  %v2081_v41 = vsel %vm1835_vm1, %v2078_v2, %v2080_v50  ;;  %v2085_v5 = vadd.f32 %v2079_v43, %v2067_v28 }
 0x4f8   : >> { %v2087_v6 = vadd.f32 %v2080_v50, %v2069_v30  ;;  %v2107_v51 = vmul.f32 %v8534_v57, %v2106_v11  ;;  %v2086_v63 = vadd.f32 %v2081_v41, %v2068_v13  ;;  %v2095_v59 = vrot.slane %v2089_v36, 2  ;;  %v6065_v36 = vld [vmem:[%s8440_s22 + $0x60] sm:$0xff] }
 0x4f9   : >> { %v2096_v16 = vrot.slane %v2090_v40, 2  ;;  %v2098_v35 = vrot.slane %v2091_v0, 2  ;;  %v2108_v10 = vmul.f32 %v8537_v15, %v2106_v11  ;;  %v2121_v31 = vmul.f32 %v8534_v57, %v2120_v55 }
 0x4fa   : >> { %v2111_v38 = vrot.slane %v2107_v51, 3  ;;  %v2122_v33 = vmul.f32 %v8537_v15, %v2120_v55  ;;  %v2123_v12 = vmul.f32 %v6063_v14, %v2120_v55  ;;  %v2138_v9 = vperm.slane %v8374_v20, 3 }
 0x4fb   : >> { %v2097_v46 = vsel %vm1854_vm2, %v2095_v59, %v2096_v16  ;;  %v2099_v61 = vsel %vm1854_vm2, %v2096_v16, %v2098_v35  ;;  %v2105_v4 = vadd.f32 %v2098_v35, %v2087_v6  ;;  %v2112_v8 = vrot.slane %v2108_v10, 3  ;;  %v8572_v6 = vld [vmem:[%s8440_s22 + $0x68] sm:$0xff]  ;;  %v8577_v35 = vld [vmem:[%s8440_s22 + $0x70] sm:$0xff] }
 0x4fc   : >> { %v2103_v1 = vadd.f32 %v2097_v46, %v2085_v5  ;;  %v2104_v48 = vadd.f32 %v2099_v61, %v2086_v63  ;;  %v2127_v53 = vrot.slane %v2121_v31, 4  ;;  %v2128_v45 = vrot.slane %v2122_v33, 4 }
 0x4fd   : >> { %v2130_v7 = vrot.slane %v2123_v12, 4  ;;  %v2156_v28 = vperm.slane %v8374_v20, 4  ;;  %v2113_v2 = vsel %vm1871_vm3, %v2111_v38, %v2112_v8  ;;  %v2119_v11 = vadd.f32 %v2112_v8, %v2105_v4 }
 0x4fe   : >> { %v2117_v3 = vadd.f32 %v2111_v38, %v2103_v1  ;;  %v2181_v13 = vperm.slane %v8374_v20, 5  ;;  %v2118_v30 = vadd.f32 %v2113_v2, %v2104_v48  ;;  %v2129_v50 = vsel %vm1888_vm4, %v2127_v53, %v2128_v45 }
 0x4ff   : >> { %v2131_v55 = vsel %vm1888_vm4, %v2128_v45, %v2130_v7  ;;  %v2139_v43 = vmul.f32 %v8534_v57, %v2138_v9  ;;  %v2140_v41 = vmul.f32 %v8537_v15, %v2138_v9  ;;  %v2141_v5 = vmul.f32 %v6063_v14, %v2138_v9 }
 0x500   : >> { %v2135_v40 = vadd.f32 %v2127_v53, %v2117_v3  ;;  %v2137_v0 = vadd.f32 %v2131_v55, %v2119_v11  ;;  %v2136_v51 = vadd.f32 %v2129_v50, %v2118_v30  ;;  %v2157_v59 = vmul.f32 %v8534_v57, %v2156_v28 }
 0x501   : >> { %v2145_v63 = vrot.slane %v2139_v43, 5  ;;  %v2158_v16 = vmul.f32 %v8537_v15, %v2156_v28  ;;  %v2146_v10 = vrot.slane %v2140_v41, 5  ;;  %v2148_v38 = vrot.slane %v2141_v5, 5 }
 0x502   : >> { %v2159_v31 = vmul.f32 %v6063_v14, %v2156_v28  ;;  %v2182_v33 = vmul.f32 %v6065_v36, %v2181_v13  ;;  %v2163_v61 = vrot.slane %v2157_v59, 6  ;;  %v2183_v12 = vmul.f32 %v8572_v6, %v2181_v13 }
 0x503   : >> { %v2153_v46 = vadd.f32 %v2145_v63, %v2135_v40  ;;  %v2164_v4 = vrot.slane %v2158_v16, 6  ;;  %v2147_v1 = vsel %vm1907_vm5, %v2145_v63, %v2146_v10  ;;  %v2149_v48 = vsel %vm1907_vm5, %v2146_v10, %v2148_v38 }
 0x504   : >> { %v2166_v8 = vrot.slane %v2159_v31, 6  ;;  %v2184_v57 = vmul.f32 %v8577_v35, %v2181_v13  ;;  %v2154_v53 = vadd.f32 %v2147_v1, %v2136_v51  ;;  %v2155_v15 = vadd.f32 %v2149_v48, %v2137_v0 }
 0x505   : >> { %v2165_v45 = vsel %vm1926_vm6, %v2163_v61, %v2164_v4  ;;  %v2171_v7 = vadd.f32 %v2163_v61, %v2153_v46  ;;  %v2188_v9 = vperm.slane %v8374_v20, 6  ;;  %v2206_v28 = vperm.slane %v8374_v20, 7  ;;  %v6068_v61 = vld [vmem:[%s8440_s22 + $0x78] sm:$0x7] }
 0x506   : >> { %v2167_v14 = vsel %vm1926_vm6, %v2164_v4, %v2166_v8  ;;  %v2224_v2 = vperm.slane %v8379_v21, 0  ;;  %v2172_v3 = vadd.f32 %v2165_v45, %v2154_v53  ;;  %v2238_v50 = vperm.slane %v8379_v21, 1 }
 0x507   : >> { %v2173_v11 = vadd.f32 %v2167_v14, %v2155_v15  ;;  %v2185_v30 = vadd.f32 %v2182_v33, %v2171_v7  ;;  %v2189_v55 = vmul.f32 %v6065_v36, %v2188_v9  ;;  %v2190_v13 = vmul.f32 %v8572_v6, %v2188_v9 }
 0x508   : >> { %v2191_v43 = vmul.f32 %v8577_v35, %v2188_v9  ;;  %v2207_v40 = vmul.f32 %v6065_v36, %v2206_v28  ;;  %v2186_v0 = vadd.f32 %v2183_v12, %v2172_v3  ;;  %v2208_v5 = vmul.f32 %v8572_v6, %v2206_v28 }
 0x509   : >> { %v2187_v41 = vadd.f32 %v2184_v57, %v2173_v11  ;;  %v2209_v51 = vmul.f32 %v8577_v35, %v2206_v28  ;;  %v2195_v63 = vrot.slane %v2189_v55, 1  ;;  %v2196_v59 = vrot.slane %v2190_v13, 1 }
 0x50a   : >> { %v2198_v16 = vrot.slane %v2191_v43, 1  ;;  %v2213_v10 = vrot.slane %v2207_v40, 2  ;;  %v2214_v38 = vrot.slane %v2208_v5, 2  ;;  %v2225_v33 = vmul.f32 %v8572_v6, %v2224_v2 }
 0x50b   : >> { %v2216_v31 = vrot.slane %v2209_v51, 2  ;;  %v2226_v46 = vmul.f32 %v8577_v35, %v2224_v2  ;;  %v2197_v4 = vsel %vm1835_vm1, %v2195_v63, %v2196_v59  ;;  %v2239_v1 = vmul.f32 %v8572_v6, %v2238_v50 }
 0x50c   : >> { %v2199_v36 = vsel %vm1835_vm1, %v2196_v59, %v2198_v16  ;;  %v2205_v12 = vadd.f32 %v2198_v16, %v2187_v41  ;;  %v2203_v48 = vadd.f32 %v2197_v4, %v2185_v30  ;;  %v2215_v57 = vsel %vm1854_vm2, %v2213_v10, %v2214_v38 }
 0x50d   : >> { %v2204_v8 = vadd.f32 %v2199_v36, %v2186_v0  ;;  %v2217_v53 = vsel %vm1854_vm2, %v2214_v38, %v2216_v31  ;;  %v2229_v45 = vrot.slane %v2225_v33, 3  ;;  %v2230_v7 = vrot.slane %v2226_v46, 3 }
 0x50e   : >> { %v2223_v15 = vadd.f32 %v2216_v31, %v2205_v12  ;;  %v2240_v14 = vmul.f32 %v8577_v35, %v2238_v50  ;;  %v2221_v9 = vadd.f32 %v2215_v57, %v2203_v48  ;;  %v2241_v2 = vmul.f32 %v6068_v61, %v2238_v50  ;;  %v6070_v48 = vld [vmem:[%s8440_s22 + $0x80] sm:$0xff]  ;;  %v8616_v57 = vld [vmem:[%s8440_s22 + $0x90] sm:$0xff] }
 0x50f   : >> { %v2222_v28 = vadd.f32 %v2217_v53, %v2204_v8  ;;  %v2245_v3 = vrot.slane %v2239_v1, 4  ;;  %v2231_v11 = vsel %vm1871_vm3, %v2229_v45, %v2230_v7  ;;  %v2256_v30 = vperm.slane %v8379_v21, 2  ;;  %v8613_v8 = vld [vmem:[%s8440_s22 + $0x88] sm:$0xff] }
 0x510   : >> { %v2237_v55 = vadd.f32 %v2230_v7, %v2223_v15  ;;  %v2246_v13 = vrot.slane %v2240_v14, 4  ;;  %v2235_v43 = vadd.f32 %v2229_v45, %v2221_v9  ;;  %v2248_v0 = vrot.slane %v2241_v2, 4 }
 0x511   : >> { %v2236_v40 = vadd.f32 %v2231_v11, %v2222_v28  ;;  %v2274_v41 = vperm.slane %v8379_v21, 3  ;;  %v2257_v51 = vmul.f32 %v8572_v6, %v2256_v30  ;;  %v2258_v50 = vmul.f32 %v8577_v35, %v2256_v30 }
 0x512   : >> { %v2247_v5 = vsel %vm1888_vm4, %v2245_v3, %v2246_v13  ;;  %v2259_v63 = vmul.f32 %v6068_v61, %v2256_v30  ;;  %v2249_v59 = vsel %vm1888_vm4, %v2246_v13, %v2248_v0  ;;  %v2253_v16 = vadd.f32 %v2245_v3, %v2235_v43 }
 0x513   : >> { %v2254_v10 = vadd.f32 %v2247_v5, %v2236_v40  ;;  %v2275_v38 = vmul.f32 %v8572_v6, %v2274_v41  ;;  %v2255_v31 = vadd.f32 %v2249_v59, %v2237_v55  ;;  %v2263_v33 = vrot.slane %v2257_v51, 5 }
 0x514   : >> { %v2264_v46 = vrot.slane %v2258_v50, 5  ;;  %v2266_v4 = vrot.slane %v2259_v63, 5  ;;  %v2276_v36 = vmul.f32 %v8577_v35, %v2274_v41  ;;  %v2277_v12 = vmul.f32 %v6068_v61, %v2274_v41 }
 0x515   : >> { %v2281_v1 = vrot.slane %v2275_v38, 6  ;;  %v2299_v53 = vperm.slane %v8379_v21, 4  ;;  %v2271_v6 = vadd.f32 %v2263_v33, %v2253_v16  ;;  %v2306_v7 = vperm.slane %v8379_v21, 5 }
 0x516   : >> { %v2265_v15 = vsel %vm1907_vm5, %v2263_v33, %v2264_v46  ;;  %v2267_v45 = vsel %vm1907_vm5, %v2264_v46, %v2266_v4  ;;  %v2282_v28 = vrot.slane %v2276_v36, 6  ;;  %v2284_v35 = vrot.slane %v2277_v12, 6  ;;  %v6073_v12 = vld [vmem:[%s8440_s22 + $0x98] sm:$0x7] }
 0x517   : >> { %v2272_v14 = vadd.f32 %v2265_v15, %v2254_v10  ;;  %v2273_v9 = vadd.f32 %v2267_v45, %v2255_v31  ;;  %v2289_v61 = vadd.f32 %v2281_v1, %v2271_v6  ;;  %v2300_v2 = vmul.f32 %v6070_v48, %v2299_v53 }
 0x518   : >> { %v2301_v3 = vmul.f32 %v8613_v8, %v2299_v53  ;;  %v2302_v11 = vmul.f32 %v8616_v57, %v2299_v53  ;;  %v2283_v55 = vsel %vm1926_vm6, %v2281_v1, %v2282_v28  ;;  %v2285_v13 = vsel %vm1926_vm6, %v2282_v28, %v2284_v35 }
 0x519   : >> { %v2307_v30 = vmul.f32 %v6070_v48, %v2306_v7  ;;  %v2308_v43 = vmul.f32 %v8613_v8, %v2306_v7  ;;  %v2290_v40 = vadd.f32 %v2283_v55, %v2272_v14  ;;  %v2291_v0 = vadd.f32 %v2285_v13, %v2273_v9 }
 0x51a   : >> { %v2303_v41 = vadd.f32 %v2300_v2, %v2289_v61  ;;  %v2309_v5 = vmul.f32 %v8616_v57, %v2306_v7  ;;  %v2324_v63 = vperm.slane %v8379_v21, 6  ;;  %v2342_v59 = vperm.slane %v8379_v21, 7 }
 0x51b   : >> { %v2313_v51 = vrot.slane %v2307_v30, 1  ;;  %v2314_v50 = vrot.slane %v2308_v43, 1  ;;  %v2304_v16 = vadd.f32 %v2301_v3, %v2290_v40  ;;  %v2305_v10 = vadd.f32 %v2302_v11, %v2291_v0 }
 0x51c   : >> { %v2316_v38 = vrot.slane %v2309_v5, 1  ;;  %v2356_v31 = vperm.slane %v8384_v23, 0  ;;  %v2325_v46 = vmul.f32 %v6070_v48, %v2324_v63  ;;  %v2326_v4 = vmul.f32 %v8613_v8, %v2324_v63 }
 0x51d   : >> { %v2315_v33 = vsel %vm1835_vm1, %v2313_v51, %v2314_v50  ;;  %v2327_v36 = vmul.f32 %v8616_v57, %v2324_v63  ;;  %v2343_v45 = vmul.f32 %v8613_v8, %v2342_v59  ;;  %v2344_v28 = vmul.f32 %v8616_v57, %v2342_v59 }
 0x51e   : >> { %v2317_v1 = vsel %vm1835_vm1, %v2314_v50, %v2316_v38  ;;  %v2321_v53 = vadd.f32 %v2315_v33, %v2303_v41  ;;  %v2323_v15 = vadd.f32 %v2316_v38, %v2305_v10  ;;  %v2331_v7 = vrot.slane %v2325_v46, 2  ;;  %v6075_v46 = vld [vmem:[%s8440_s22 + $0xa0] sm:$0xff] }
 0x51f   : >> { %v2322_v6 = vadd.f32 %v2317_v1, %v2304_v16  ;;  %v2332_v14 = vrot.slane %v2326_v4, 2  ;;  %v2334_v9 = vrot.slane %v2327_v36, 2  ;;  %v2347_v35 = vrot.slane %v2343_v45, 3 }
 0x520   : >> { %v2357_v48 = vmul.f32 %v8613_v8, %v2356_v31  ;;  %v2358_v61 = vmul.f32 %v8616_v57, %v2356_v31  ;;  %v2359_v55 = vmul.f32 %v6073_v12, %v2356_v31  ;;  %v2348_v43 = vrot.slane %v2344_v28, 3 }
 0x521   : >> { %v2333_v2 = vsel %vm1854_vm2, %v2331_v7, %v2332_v14  ;;  %v2335_v3 = vsel %vm1854_vm2, %v2332_v14, %v2334_v9  ;;  %v2341_v11 = vadd.f32 %v2334_v9, %v2323_v15  ;;  %v2374_v5 = vperm.slane %v8384_v23, 1  ;;  %v8652_v15 = vld [vmem:[%s8440_s22 + $0xa8] sm:$0xff]  ;;  %v8657_v9 = vld [vmem:[%s8440_s22 + $0xb0] sm:$0xff] }
 0x522   : >> { %v2339_v13 = vadd.f32 %v2333_v2, %v2321_v53  ;;  %v2340_v30 = vadd.f32 %v2335_v3, %v2322_v6  ;;  %v2363_v40 = vrot.slane %v2357_v48, 4  ;;  %v2364_v0 = vrot.slane %v2358_v61, 4 }
 0x523   : >> { %v2366_v41 = vrot.slane %v2359_v55, 4  ;;  %v2392_v51 = vperm.slane %v8384_v23, 2  ;;  %v2349_v50 = vsel %vm1871_vm3, %v2347_v35, %v2348_v43  ;;  %v2355_v59 = vadd.f32 %v2348_v43, %v2341_v11 }
 0x524   : >> { %v2353_v63 = vadd.f32 %v2347_v35, %v2339_v13  ;;  %v2417_v16 = vperm.slane %v8384_v23, 3  ;;  %v2354_v10 = vadd.f32 %v2349_v50, %v2340_v30  ;;  %v2365_v38 = vsel %vm1888_vm4, %v2363_v40, %v2364_v0 }
 0x525   : >> { %v2367_v31 = vsel %vm1888_vm4, %v2364_v0, %v2366_v41  ;;  %v2375_v33 = vmul.f32 %v8613_v8, %v2374_v5  ;;  %v2376_v1 = vmul.f32 %v8616_v57, %v2374_v5  ;;  %v2377_v53 = vmul.f32 %v6073_v12, %v2374_v5 }
 0x526   : >> { %v2371_v4 = vadd.f32 %v2363_v40, %v2353_v63  ;;  %v2373_v36 = vadd.f32 %v2367_v31, %v2355_v59  ;;  %v2372_v45 = vadd.f32 %v2365_v38, %v2354_v10  ;;  %v2393_v7 = vmul.f32 %v8613_v8, %v2392_v51 }
 0x527   : >> { %v2381_v6 = vrot.slane %v2375_v33, 5  ;;  %v2394_v14 = vmul.f32 %v8616_v57, %v2392_v51  ;;  %v2382_v28 = vrot.slane %v2376_v1, 5  ;;  %v2384_v35 = vrot.slane %v2377_v53, 5 }
 0x528   : >> { %v2395_v48 = vmul.f32 %v6073_v12, %v2392_v51  ;;  %v2418_v61 = vmul.f32 %v6075_v46, %v2417_v16  ;;  %v2399_v3 = vrot.slane %v2393_v7, 6  ;;  %v2419_v55 = vmul.f32 %v8652_v15, %v2417_v16 }
 0x529   : >> { %v2389_v2 = vadd.f32 %v2381_v6, %v2371_v4  ;;  %v2400_v11 = vrot.slane %v2394_v14, 6  ;;  %v2383_v13 = vsel %vm1907_vm5, %v2381_v6, %v2382_v28  ;;  %v2385_v30 = vsel %vm1907_vm5, %v2382_v28, %v2384_v35 }
 0x52a   : >> { %v2402_v43 = vrot.slane %v2395_v48, 6  ;;  %v2420_v8 = vmul.f32 %v8657_v9, %v2417_v16  ;;  %v2390_v40 = vadd.f32 %v2383_v13, %v2372_v45  ;;  %v2391_v57 = vadd.f32 %v2385_v30, %v2373_v36 }
 0x52b   : >> { %v2401_v0 = vsel %vm1926_vm6, %v2399_v3, %v2400_v11  ;;  %v2407_v41 = vadd.f32 %v2399_v3, %v2389_v2  ;;  %v2424_v5 = vperm.slane %v8384_v23, 4  ;;  %v2442_v51 = vperm.slane %v8384_v23, 5  ;;  %v6078_v3 = vld [vmem:[%s8440_s22 + $0xb8] sm:$0x7] }
 0x52c   : >> { %v2403_v12 = vsel %vm1926_vm6, %v2400_v11, %v2402_v43  ;;  %v2460_v50 = vperm.slane %v8384_v23, 6  ;;  %v2408_v63 = vadd.f32 %v2401_v0, %v2390_v40  ;;  %v2474_v38 = vperm.slane %v8384_v23, 7 }
 0x52d   : >> { %v2409_v59 = vadd.f32 %v2403_v12, %v2391_v57  ;;  %v2421_v10 = vadd.f32 %v2418_v61, %v2407_v41  ;;  %v2425_v31 = vmul.f32 %v6075_v46, %v2424_v5  ;;  %v2426_v16 = vmul.f32 %v8652_v15, %v2424_v5 }
 0x52e   : >> { %v2427_v33 = vmul.f32 %v8657_v9, %v2424_v5  ;;  %v2443_v4 = vmul.f32 %v6075_v46, %v2442_v51  ;;  %v2422_v36 = vadd.f32 %v2419_v55, %v2408_v63  ;;  %v2444_v53 = vmul.f32 %v8652_v15, %v2442_v51 }
 0x52f   : >> { %v2423_v1 = vadd.f32 %v2420_v8, %v2409_v59  ;;  %v2445_v45 = vmul.f32 %v8657_v9, %v2442_v51  ;;  %v2431_v6 = vrot.slane %v2425_v31, 1  ;;  %v2432_v7 = vrot.slane %v2426_v16, 1 }
 0x530   : >> { %v2434_v14 = vrot.slane %v2427_v33, 1  ;;  %v2449_v28 = vrot.slane %v2443_v4, 2  ;;  %v2450_v35 = vrot.slane %v2444_v53, 2  ;;  %v2461_v61 = vmul.f32 %v8652_v15, %v2460_v50 }
 0x531   : >> { %v2452_v48 = vrot.slane %v2445_v45, 2  ;;  %v2462_v2 = vmul.f32 %v8657_v9, %v2460_v50  ;;  %v2433_v11 = vsel %vm1835_vm1, %v2431_v6, %v2432_v7  ;;  %v2475_v13 = vmul.f32 %v8652_v15, %v2474_v38 }
 0x532   : >> { %v2435_v46 = vsel %vm1835_vm1, %v2432_v7, %v2434_v14  ;;  %v2441_v55 = vadd.f32 %v2434_v14, %v2423_v1  ;;  %v2439_v30 = vadd.f32 %v2433_v11, %v2421_v10  ;;  %v2451_v8 = vsel %vm1854_vm2, %v2449_v28, %v2450_v35 }
 0x533   : >> { %v2440_v43 = vadd.f32 %v2435_v46, %v2422_v36  ;;  %v2453_v40 = vsel %vm1854_vm2, %v2450_v35, %v2452_v48  ;;  %v2465_v0 = vrot.slane %v2461_v61, 3  ;;  %v2466_v41 = vrot.slane %v2462_v2, 3 }
 0x534   : >> { %v2459_v57 = vadd.f32 %v2452_v48, %v2441_v55  ;;  %v2476_v12 = vmul.f32 %v8657_v9, %v2474_v38  ;;  %v2457_v5 = vadd.f32 %v2451_v8, %v2439_v30  ;;  %v2477_v50 = vmul.f32 %v6078_v3, %v2474_v38  ;;  %v6080_v30 = vld [vmem:[%s8440_s22 + $0xc0] sm:$0xff]  ;;  %v8696_v8 = vld [vmem:[%s8440_s22 + $0xd0] sm:$0xff] }
 0x535   : >> { %v2458_v51 = vadd.f32 %v2453_v40, %v2440_v43  ;;  %v2481_v63 = vrot.slane %v2475_v13, 4  ;;  %v2467_v59 = vsel %vm1871_vm3, %v2465_v0, %v2466_v41  ;;  %v2492_v10 = vperm.slane %v8389_v25, 0  ;;  %v8693_v43 = vld [vmem:[%s8440_s22 + $0xc8] sm:$0xff] }
 0x536   : >> { %v2473_v31 = vadd.f32 %v2466_v41, %v2459_v57  ;;  %v2482_v16 = vrot.slane %v2476_v12, 4  ;;  %v2471_v33 = vadd.f32 %v2465_v0, %v2457_v5  ;;  %v2484_v36 = vrot.slane %v2477_v50, 4 }
 0x537   : >> { %v2472_v4 = vadd.f32 %v2467_v59, %v2458_v51  ;;  %v2510_v1 = vperm.slane %v8389_v25, 1  ;;  %v2493_v45 = vmul.f32 %v8652_v15, %v2492_v10  ;;  %v2494_v38 = vmul.f32 %v8657_v9, %v2492_v10 }
 0x538   : >> { %v2483_v53 = vsel %vm1888_vm4, %v2481_v63, %v2482_v16  ;;  %v2495_v6 = vmul.f32 %v6078_v3, %v2492_v10  ;;  %v2485_v7 = vsel %vm1888_vm4, %v2482_v16, %v2484_v36  ;;  %v2489_v14 = vadd.f32 %v2481_v63, %v2471_v33 }
 0x539   : >> { %v2490_v28 = vadd.f32 %v2483_v53, %v2472_v4  ;;  %v2511_v35 = vmul.f32 %v8652_v15, %v2510_v1  ;;  %v2491_v48 = vadd.f32 %v2485_v7, %v2473_v31  ;;  %v2499_v61 = vrot.slane %v2493_v45, 5 }
 0x53a   : >> { %v2500_v2 = vrot.slane %v2494_v38, 5  ;;  %v2502_v11 = vrot.slane %v2495_v6, 5  ;;  %v2512_v46 = vmul.f32 %v8657_v9, %v2510_v1  ;;  %v2513_v55 = vmul.f32 %v6078_v3, %v2510_v1 }
 0x53b   : >> { %v2517_v13 = vrot.slane %v2511_v35, 6  ;;  %v2535_v40 = vperm.slane %v8389_v25, 2  ;;  %v2507_v15 = vadd.f32 %v2499_v61, %v2489_v14  ;;  %v2542_v41 = vperm.slane %v8389_v25, 3 }
 0x53c   : >> { %v2501_v57 = vsel %vm1907_vm5, %v2499_v61, %v2500_v2  ;;  %v2503_v0 = vsel %vm1907_vm5, %v2500_v2, %v2502_v11  ;;  %v2518_v51 = vrot.slane %v2512_v46, 6  ;;  %v2520_v9 = vrot.slane %v2513_v55, 6  ;;  %v6083_v55 = vld [vmem:[%s8440_s22 + $0xd8] sm:$0x7] }
 0x53d   : >> { %v2508_v12 = vadd.f32 %v2501_v57, %v2490_v28  ;;  %v2509_v5 = vadd.f32 %v2503_v0, %v2491_v48  ;;  %v2525_v3 = vadd.f32 %v2517_v13, %v2507_v15  ;;  %v2536_v50 = vmul.f32 %v6080_v30, %v2535_v40 }
 0x53e   : >> { %v2537_v63 = vmul.f32 %v8693_v43, %v2535_v40  ;;  %v2538_v59 = vmul.f32 %v8696_v8, %v2535_v40  ;;  %v2519_v31 = vsel %vm1926_vm6, %v2517_v13, %v2518_v51  ;;  %v2521_v16 = vsel %vm1926_vm6, %v2518_v51, %v2520_v9 }
 0x53f   : >> { %v2543_v10 = vmul.f32 %v6080_v30, %v2542_v41  ;;  %v2544_v33 = vmul.f32 %v8693_v43, %v2542_v41  ;;  %v2526_v4 = vadd.f32 %v2519_v31, %v2508_v12  ;;  %v2527_v36 = vadd.f32 %v2521_v16, %v2509_v5 }
 0x540   : >> { %v2539_v1 = vadd.f32 %v2536_v50, %v2525_v3  ;;  %v2545_v53 = vmul.f32 %v8696_v8, %v2542_v41  ;;  %v2560_v6 = vperm.slane %v8389_v25, 4  ;;  %v2578_v7 = vperm.slane %v8389_v25, 5 }
 0x541   : >> { %v2549_v45 = vrot.slane %v2543_v10, 1  ;;  %v2550_v38 = vrot.slane %v2544_v33, 1  ;;  %v2540_v14 = vadd.f32 %v2537_v63, %v2526_v4  ;;  %v2541_v28 = vadd.f32 %v2538_v59, %v2527_v36 }
 0x542   : >> { %v2552_v35 = vrot.slane %v2545_v53, 1  ;;  %v2592_v48 = vperm.slane %v8389_v25, 6  ;;  %v2561_v2 = vmul.f32 %v6080_v30, %v2560_v6  ;;  %v2562_v11 = vmul.f32 %v8693_v43, %v2560_v6 }
 0x543   : >> { %v2551_v61 = vsel %vm1835_vm1, %v2549_v45, %v2550_v38  ;;  %v2563_v46 = vmul.f32 %v8696_v8, %v2560_v6  ;;  %v2579_v0 = vmul.f32 %v8693_v43, %v2578_v7  ;;  %v2580_v51 = vmul.f32 %v8696_v8, %v2578_v7 }
 0x544   : >> { %v2553_v13 = vsel %vm1835_vm1, %v2550_v38, %v2552_v35  ;;  %v2557_v40 = vadd.f32 %v2551_v61, %v2539_v1  ;;  %v2559_v57 = vadd.f32 %v2552_v35, %v2541_v28  ;;  %v2567_v41 = vrot.slane %v2561_v2, 2 }
 0x545   : >> { %v2558_v15 = vadd.f32 %v2553_v13, %v2540_v14  ;;  %v2568_v12 = vrot.slane %v2562_v11, 2  ;;  %v2570_v5 = vrot.slane %v2563_v46, 2  ;;  %v2583_v9 = vrot.slane %v2579_v0, 3 }
 0x546   : >> { %v2593_v30 = vmul.f32 %v8693_v43, %v2592_v48  ;;  %v2594_v3 = vmul.f32 %v8696_v8, %v2592_v48  ;;  %v2595_v31 = vmul.f32 %v6083_v55, %v2592_v48  ;;  %v2584_v33 = vrot.slane %v2580_v51, 3 }
 0x547   : >> { %v2569_v50 = vsel %vm1854_vm2, %v2567_v41, %v2568_v12  ;;  %v2571_v63 = vsel %vm1854_vm2, %v2568_v12, %v2570_v5  ;;  %v2577_v59 = vadd.f32 %v2570_v5, %v2559_v57  ;;  %v2610_v53 = vperm.slane %v8389_v25, 7 }
 0x548   : >> { %v2575_v16 = vadd.f32 %v2569_v50, %v2557_v40  ;;  %v2576_v10 = vadd.f32 %v2571_v63, %v2558_v15  ;;  %v2599_v4 = vrot.slane %v2593_v30, 4  ;;  %v2600_v36 = vrot.slane %v2594_v3, 4 }
 0x549   : >> { %v2602_v1 = vrot.slane %v2595_v31, 4  ;;  %v2628_v45 = vperm.slane %v8394_v26, 0  ;;  %v2585_v38 = vsel %vm1871_vm3, %v2583_v9, %v2584_v33  ;;  %v2591_v7 = vadd.f32 %v2584_v33, %v2577_v59 }
 0x54a   : >> { %v2589_v6 = vadd.f32 %v2583_v9, %v2575_v16  ;;  %v2590_v14 = vadd.f32 %v2585_v38, %v2576_v10  ;;  %v2601_v28 = vsel %vm1888_vm4, %v2599_v4, %v2600_v36  ;;  %v2611_v48 = vmul.f32 %v8693_v43, %v2610_v53 }
 0x54b   : >> { %v2603_v35 = vsel %vm1888_vm4, %v2600_v36, %v2602_v1  ;;  %v2612_v11 = vmul.f32 %v8696_v8, %v2610_v53  ;;  %v2613_v46 = vmul.f32 %v6083_v55, %v2610_v53  ;;  %v2629_v57 = vmul.f32 %v8693_v43, %v2628_v45 }
 0x54c   : >> { %v2607_v61 = vadd.f32 %v2599_v4, %v2589_v6  ;;  %v2609_v2 = vadd.f32 %v2603_v35, %v2591_v7  ;;  %v2608_v13 = vadd.f32 %v2601_v28, %v2590_v14  ;;  %v2617_v40 = vrot.slane %v2611_v48, 5 }
 0x54d   : >> { %v2630_v0 = vmul.f32 %v8696_v8, %v2628_v45  ;;  %v2618_v15 = vrot.slane %v2612_v11, 5  ;;  %v2620_v41 = vrot.slane %v2613_v46, 5  ;;  %v2631_v12 = vmul.f32 %v6083_v55, %v2628_v45 }
 0x54e   : >> { %v2625_v5 = vadd.f32 %v2617_v40, %v2607_v61  ;;  %v2635_v51 = vrot.slane %v2629_v57, 6 }
 0x54f   : >> { %v2636_v9 = vrot.slane %v2630_v0, 6  ;;  %v2619_v30 = vsel %vm1907_vm5, %v2617_v40, %v2618_v15  ;;  %v2621_v3 = vsel %vm1907_vm5, %v2618_v15, %v2620_v41  ;;  %v2638_v50 = vrot.slane %v2631_v12, 6 }
 0x550   : >> { %v2626_v63 = vadd.f32 %v2619_v30, %v2608_v13  ;;  %v2627_v59 = vadd.f32 %v2621_v3, %v2609_v2  ;;  %v2643_v16 = vadd.f32 %v2635_v51, %v2625_v5 }
 0x551   : >> { %v2637_v31 = vsel %vm1926_vm6, %v2635_v51, %v2636_v9  ;;  %v2639_v43 = vsel %vm1926_vm6, %v2636_v9, %v2638_v50  ;;  %1813 = sbr.rel (!%p1811_p1) target bundleno = 1224 (0x4c8), region = 206 }
 0x552   : >> { %v2644_v8 = vadd.f32 %v2637_v31, %v2626_v63  ;;  %v2645_v10 = vadd.f32 %v2639_v43, %v2627_v59  ;;  %2648 = vst [vmem:[%s2647_s10 - $0x5] sm:$0xe0] %v2643_v16 }
 0x554   : >> { %2649 = vst [vmem:[%s2647_s10 + $0x3] sm:$0xff] %v2644_v8 }
 0x555   : >> { %2650 = vst [vmem:[%s2647_s10 + $0xb] sm:$0x1f] %v2645_v10 }
 0x55c   : > { %v8739_v55 = vld [vmem:[#allocation3 + $0x10] sm:$0xff]  ;;  %v8741_v33 = vld [vmem:[#allocation3] sm:$0xff]  ;;  %v8751_v36 = vld [vmem:[#allocation3 + $0x18] sm:$0xff] }
 0x55d   : > { %2719 = vrot.lane.b32.xlu1 %v8739_v55, %s7205_s25  ;;  %2715 = vrot.lane.b32.xlu0 %v8741_v33, %s7205_s25  ;;  %v8747_v4 = vld [vmem:[#allocation3 + $0x20] sm:$0xff]  ;;  %v8753_v1 = vld [vmem:[#allocation3 + $0x8] sm:$0xff]  ;;  %v8763_v20 = vld [vmem:[#allocation3 + $0x38] sm:$0xff] }
 0x55e   : > { %2723 = vrot.lane.b32.xlu2 %v8747_v4, %s7205_s25  ;;  %v8755_v18 = vld [vmem:[#allocation3 + $0x28] sm:$0xff]  ;;  %v8765_v21 = vld [vmem:[#allocation3 + $0x30] sm:$0xff]  ;;  %v8773_v25 = vld [vmem:[#allocation3 + $0x40] sm:$0xff] }
 0x55f   : > { %v8771_v23 = vld [vmem:[#allocation3 + $0x48] sm:$0xff]  ;;  %v8779_v26 = vld [vmem:[#allocation3 + $0x58] sm:$0xff]  ;;  %v8781_v53 = vld [vmem:[#allocation3 + $0x50] sm:$0xff] }
 0x560   : > { %v8787_v45 = vld [vmem:[#allocation3 + $0x60] sm:$0xff]  ;;  %v8791_v38 = vld [vmem:[#allocation3 + $0x70] sm:$0xff]  ;;  %v8868_v31 = vld [vmem:[#allocation3 + $0x68] sm:$0xff] }
 0x561   : > { %v8799_v14 = vld [vmem:[#allocation3 + $0x80] sm:$0xff]  ;;  %v8814_v46 = vld [vmem:[#allocation3 + $0x90] sm:$0xff]  ;;  %v8873_v43 = vld [vmem:[#allocation3 + $0x78] sm:$0xff] }
 0x562   : > { %v8877_v8 = vld [vmem:[#allocation3 + $0x88] sm:$0xff]  ;;  %v8889_v10 = vld [vmem:[#allocation3 + $0xc0] sm:$0xff] }
 0x565   : > { %2721 = vrot.lane.b32.xlu1 %v8751_v36, %s7205_s25  ;;  %2717 = vrot.lane.b32.xlu0 %v8753_v1, %s7205_s25 }
 0x566   : > { %2725 = vrot.lane.b32.xlu2 %v8755_v18, %s7205_s25 }
 0x56d   : > { %2729 = vrot.lane.b32.xlu1 %v8763_v20, %s7205_s25  ;;  %2727 = vrot.lane.b32.xlu0 %v8765_v21, %s7205_s25 }
 0x575   : > { %2733 = vrot.lane.b32.xlu1 %v8771_v23, %s7205_s25  ;;  %2731 = vrot.lane.b32.xlu0 %v8773_v25, %s7205_s25 }
 0x57d   : > { %2737 = vrot.lane.b32.xlu1 %v8779_v26, %s7205_s25  ;;  %2735 = vrot.lane.b32.xlu0 %v8781_v53, %s7205_s25 }
 0x585   : > { %2739 = vrot.lane.b32.xlu1 %v8787_v45, %s7205_s25 }
 0x58d   : > { %2743 = vrot.lane.b32.xlu1 %v8791_v38, %s7205_s25 }
 0x595   : > { %2747 = vrot.lane.b32.xlu1 %v8799_v14, %s7205_s25 }
 0x59d   : > { %2751 = vrot.lane.b32.xlu1 %v8814_v46, %s7205_s25 }
 0x5b8   : > { %v8811_v2 = vpop.permute.xlu2 %2723 }
 0x5c0   : > { %v8830_v12 = vpop.permute.xlu2 %2725 }
 0x5cf   : > { %v8795_v6 = vpop.permute.xlu1 %2719  ;;  %v8797_v7 = vpop.permute.xlu0 %2715 }
 0x5d0   : > { %v2811_v48 = vmul.f32 %v8797_v7, %v8235_v17  ;;  %v2813_v13 = vmul.f32 %v8795_v6, %v8245_v22  ;;  %v8834_v22 = vld [vmem:[#allocation3 + $0xa0] sm:$0xff] }
 0x5d1   : > { %2755 = vrot.lane.b32.xlu1 %v8834_v22, %s7205_s25 }
 0x5d7   : > { %v8803_v28 = vpop.permute.xlu1 %2721  ;;  %v8805_v35 = vpop.permute.xlu0 %2717 }
 0x5d8   : > { %v2812_v61 = vmul.f32 %v8805_v35, %v8240_v19  ;;  %v2814_v17 = vmul.f32 %v8803_v28, %v8250_v24  ;;  %v2815_v24 = vmul.f32 %v8811_v2, %v8255_v27  ;;  %v8852_v27 = vld [vmem:[#allocation3 + $0xb0] sm:$0xff] }
 0x5d9   : > { %2759 = vrot.lane.b32.xlu1 %v8852_v27, %s7205_s25 }
 0x5da   : > { %v2843_v11 = vpack.c.bf16 %v2812_v61, %v2811_v48  ;;  %v2844_v15 = vpack.c.bf16 %v2814_v17, %v2813_v13  ;;  %v8893_v48 = vld [vmem:[#allocation3 + $0xb8] sm:$0xff]  ;;  %v8897_v61 = vld [vmem:[#allocation3 + $0xd0] sm:$0xff]  ;;  %v8906_v17 = vld [vmem:[#allocation3 + $0xe0] sm:$0xff] }
 0x5dc   : > { %2880 = vrot.lane.b32.xlu2 %v2843_v11, %s7206_s18  ;;  %v8901_v11 = vld [vmem:[#allocation3 + $0xc8] sm:$0xff] }
 0x5df   : > { %v8822_v40 = vpop.permute.xlu1 %2729  ;;  %v8824_v19 = vpop.permute.xlu0 %2727 }
 0x5e0   : > { %v2818_v57 = vmul.f32 %v8822_v40, %v8270_v34  ;;  %v2817_v0 = vmul.f32 %v8824_v19, %v8265_v32  ;;  %v2816_v34 = vmul.f32 %v8830_v12, %v8260_v29  ;;  %v2859_v29 = vld [vmem:[%s10206_s5] sm:$0x3] }
 0x5e1   : > { %2763 = vrot.lane.b32.xlu1 %v8889_v10, %s7205_s25 }
 0x5e2   : > { %v2846_v41 = vpack.c.bf16 %v2818_v57, %v2817_v0  ;;  %v2845_v30 = vpack.c.bf16 %v2816_v34, %v2815_v24  ;;  %v8910_v57 = vld [vmem:[#allocation3 + $0xd8] sm:$0xff] }
 0x5e4   : > { %2882 = vrot.lane.b32.xlu2 %v2844_v15, %s7206_s18  ;;  %2886 = vrot.lane.b32.xlu0 %v2846_v41, %s7206_s18  ;;  %v8915_v41 = vld [vmem:[#allocation3 + $0xe8] sm:$0xff] }
 0x5e7   : > { %v8842_v32 = vpop.permute.xlu1 %2733  ;;  %v8844_v5 = vpop.permute.xlu0 %2731 }
 0x5e8   : > { %v2820_v51 = vmul.f32 %v8842_v32, %v8280_v39  ;;  %v2819_v9 = vmul.f32 %v8844_v5, %v8275_v37  ;;  %v2963_v39 = vsel %vm1926_vm6, %v2859_v29, 0 }
 0x5e9   : > { %2972 = vmatpush.bf16.msrb.mxu0 %v2963_v39  ;;  %6570 = vmatpush.bf16.msra.mxu1 %v2963_v39 }
 0x5ea   : > { %v2847_v3 = vpack.c.bf16 %v2820_v51, %v2819_v9  ;;  %2767 = vrot.lane.b32.xlu1 %v8897_v61, %s7205_s25 }
 0x5ec   : > { %2884 = vrot.lane.b32.xlu2 %v2845_v30, %s7206_s18  ;;  %2888 = vrot.lane.b32.xlu0 %v2847_v3, %s7206_s18 }
 0x5ef   : > { %v8860_v37 = vpop.permute.xlu1 %2737  ;;  %v8862_v50 = vpop.permute.xlu0 %2735 }
 0x5f0   : > { %v2822_v63 = vmul.f32 %v8860_v37, %v8290_v44  ;;  %v2821_v59 = vmul.f32 %v8862_v50, %v8285_v42  ;;  %v8881_v44 = vld [vmem:[#allocation3 + $0x98] sm:$0xff]  ;;  %v8885_v42 = vld [vmem:[#allocation3 + $0xa8] sm:$0xff] }
 0x5f2   : > { %v2848_v16 = vpack.c.bf16 %v2822_v63, %v2821_v59  ;;  %2771 = vrot.lane.b32.xlu1 %v8906_v17, %s7205_s25  ;;  %v8938_v59 = vld [vmem:[#allocation3 + $0xf0] sm:$0xff] }
 0x5f4   : > { %2741 = vrot.lane.b32.xlu2 %v8868_v31, %s7205_s25  ;;  %2890 = vrot.lane.b32.xlu0 %v2848_v16, %s7206_s18 }
 0x5f7   : > { %v8919_v24 = vpop.permute.xlu1 %2739 }
 0x5f8   : > { %v2823_v34 = vmul.f32 %v8919_v24, %v8295_v47 }
 0x5fa   : > { %2775 = vrot.lane.b32.xlu1 %v8938_v59, %s7205_s25 }
 0x5fc   : > { %2745 = vrot.lane.b32.xlu2 %v8873_v43, %s7205_s25 }
 0x5ff   : > { %v8927_v3 = vpop.permute.xlu1 %2743 }
 0x600   : > { %v2825_v29 = vmul.f32 %v8927_v3, %v8305_v52 }
 0x604   : > { %2749 = vrot.lane.b32.xlu2 %v8877_v8, %s7205_s25 }
 0x607   : > { %v8946_v16 = vpop.permute.xlu1 %2747 }
 0x60c   : > { %2753 = vrot.lane.b32.xlu2 %v8881_v44, %s7205_s25 }
 0x614   : > { %2757 = vrot.lane.b32.xlu2 %v8885_v42, %s7205_s25 }
 0x61c   : > { %2761 = vrot.lane.b32.xlu2 %v8893_v48, %s7205_s25 }
 0x624   : > { %2765 = vrot.lane.b32.xlu2 %v8901_v11, %s7205_s25 }
 0x62c   : > { %2769 = vrot.lane.b32.xlu2 %v8910_v57, %s7205_s25 }
 0x634   : > { %2773 = vrot.lane.b32.xlu2 %v8915_v41, %s7205_s25 }
 0x636   : > { %v2881_v13 = vpop.permute.xlu2 %2880 }
 0x637   : > { %6085 = vmatmul.msk.bf16.vlgmr.msrb.gmra.mxu0 %vm2912_vm7, %v2881_v13  ;;  %v2827_v13 = vmul.f32 %v8946_v16, %v8314_v56 }
 0x63e   : > { %v2883_v0 = vpop.permute.xlu2 %2882 }
 0x646   : > { %v2885_v15 = vpop.permute.xlu2 %2884 }
 0x647   : > { %6086 = vmatmul.msk.bf16.gmra.mxu0 %vm2912_vm7, %v2883_v0 }
 0x64e   : > { %v8923_v51 = vpop.permute.xlu2 %2741 }
 0x64f   : > { %v2824_v9 = vmul.f32 %v8923_v51, %v8300_v49  ;;  %v8940_v49 = vld [vmem:[#allocation3 + $0xf8] sm:$0xff] }
 0x650   : > { %2777 = vrot.lane.b32.xlu2 %v8940_v49, %s7205_s25 }
 0x651   : > { %v2849_v30 = vpack.c.bf16 %v2824_v9, %v2823_v34  ;;  %v8955_v34 = vpop.permute.xlu1 %2751 }
 0x652   : > { %10298 = vst [vmem:[#allocation47_spill] sm:$0xff] %v8955_v34 }
 0x653   : > { %2892 = vrot.lane.b32.xlu0 %v2849_v30, %s7206_s18  ;;  %v2829_v30 = vmul.f32 %v8955_v34, %v8322_v60 }
 0x656   : > { %v2887_v39 = vpop.permute.xlu0 %2886  ;;  %v8932_v63 = vpop.permute.xlu2 %2745 }
 0x657   : > { %6087 = vmatmul.msk.bf16.gmra.mxu0 %vm2912_vm7, %v2885_v15  ;;  %6088 = vmatmul.msk.bf16.vlgmr.msra.gmra.mxu1 %vm2912_vm7, %v2887_v39  ;;  %v2826_v47 = vmul.f32 %v8932_v63, %v8310_v54 }
 0x659   : > { %v2850_v52 = vpack.c.bf16 %v2826_v47, %v2825_v29  ;;  %v8965_v47 = vpop.permute.xlu1 %2755 }
 0x65a   : > { %10300 = vst [vmem:[#allocation53_spill] sm:$0xff] %v8965_v47 }
 0x65b   : > { %2894 = vrot.lane.b32.xlu0 %v2850_v52, %s7206_s18 }
 0x65e   : > { %v8951_v0 = vpop.permute.xlu2 %2749  ;;  %v2889_v9 = vpop.permute.xlu0 %2888 }
 0x65f   : > { %v2828_v54 = vmul.f32 %v8951_v0, %v8318_v58  ;;  %v10301_v58 = vld [vmem:[#allocation39_spill] sm:$0xff] }
 0x660   : > { %v2831_v52 = vmul.f32 %v8965_v47, %v10301_v58 }
 0x661   : > { %v2851_v15 = vpack.c.bf16 %v2828_v54, %v2827_v13  ;;  %v10303_v54 = vld [vmem:[#allocation40_spill] sm:$0xff]  ;;  %v8975_v34 = vpop.permute.xlu1 %2759 }
 0x662   : > { %10304 = vst [vmem:[#allocation40_spill] sm:$0xff] %v8975_v34 }
 0x663   : > { %2896 = vrot.lane.b32.xlu0 %v2851_v15, %s7206_s18 }
 0x666   : > { %v8960_v29 = vpop.permute.xlu2 %2753 }
 0x667   : > { %10299 = vst [vmem:[#allocation48_spill] sm:$0xff] %v8960_v29  ;;  %6089 = vmatmul.msk.bf16.gmra.mxu1 %vm2912_vm7, %v2889_v9  ;;  %v2830_v56 = vmul.f32 %v8960_v29, %v8326_v62  ;;  %v2891_v9 = vpop.permute.xlu0 %2890  ;;  %v10305_v62 = vld [vmem:[#allocation41_spill] sm:$0xff] }
 0x669   : > { %v2852_v39 = vpack.c.bf16 %v2830_v56, %v2829_v30  ;;  %v2833_v30 = vmul.f32 %v8975_v34, %v10305_v62 }
 0x66b   : > { %2898 = vrot.lane.b32.xlu0 %v2852_v39, %s7206_s18  ;;  %v10307_v39 = vld [vmem:[#allocation42_spill] sm:$0xff] }
 0x66e   : > { %v8970_v13 = vpop.permute.xlu2 %2757 }
 0x66f   : > { %10302 = vst [vmem:[#allocation39_spill] sm:$0xff] %v8970_v13  ;;  %v2832_v60 = vmul.f32 %v8970_v13, %v10303_v54  ;;  %v8985_v54 = vpop.permute.xlu1 %2763  ;;  %v10311_v13 = vld [vmem:[#allocation44_spill] sm:$0xff] }
 0x670   : > { %10308 = vst [vmem:[#allocation42_spill] sm:$0xff] %v8985_v54 }
 0x671   : > { %v2853_v15 = vpack.c.bf16 %v2832_v60, %v2831_v52  ;;  %v10309_v52 = vld [vmem:[#allocation43_spill] sm:$0xff] }
 0x672   : > { %v2835_v60 = vmul.f32 %v8985_v54, %v10309_v52 }
 0x673   : > { %2900 = vrot.lane.b32.xlu0 %v2853_v15, %s7206_s18 }
 0x676   : > { %v8980_v56 = vpop.permute.xlu2 %2761 }
 0x677   : > { %6090 = vmatmul.msk.bf16.gmra.mxu1 %vm2912_vm7, %v2891_v9  ;;  %10306 = vst [vmem:[#allocation41_spill] sm:$0xff] %v8980_v56  ;;  %v2834_v58 = vmul.f32 %v8980_v56, %v10307_v39  ;;  %v8994_v62 = vpop.permute.xlu1 %2767  ;;  %v10317_v56 = vld [vmem:[#allocation49_spill] sm:$0xff] }
 0x679   : > { %v2854_v47 = vpack.c.bf16 %v2834_v58, %v2833_v30  ;;  %v10312_v30 = vld [vmem:[#allocation45_spill] sm:$0xff]  ;;  %v10313_v58 = vld [vmem:[#allocation46_spill] sm:$0xff] }
 0x67a   : > { %v2837_v39 = vmul.f32 %v8994_v62, %v10312_v30 }
 0x67b   : > { %2902 = vrot.lane.b32.xlu0 %v2854_v47, %s7206_s18  ;;  %v3102_v47 = vld [vmem:[%s10208_s7] sm:$0xf] }
 0x67c   : > { %v3158_v54 = vsel %vm1888_vm4, %v3102_v47, 0 }
 0x67d   : > { %3167 = vmatpush.bf16.msra.mxu0 %v3158_v54  ;;  %6571 = vmatpush.bf16.msra.mxu2 %v3158_v54 }
 0x67e   : > { %v8989_v15 = vpop.permute.xlu2 %2765 }
 0x67f   : > { %10310 = vst [vmem:[#allocation43_spill] sm:$0xff] %v8989_v15  ;;  %v2836_v9 = vmul.f32 %v8989_v15, %v10311_v13  ;;  %v9011_v15 = vpop.permute.xlu1 %2771 }
 0x680   : > { %10316 = vst [vmem:[#allocation45_spill] sm:$0xff] %v9011_v15  ;;  %v2839_v30 = vmul.f32 %v9011_v15, %v10317_v56 }
 0x681   : > { %v2855_v29 = vpack.c.bf16 %v2836_v9, %v2835_v60  ;;  %v10315_v60 = vld [vmem:[#allocation50_spill] sm:$0xff] }
 0x683   : > { %2904 = vrot.lane.b32.xlu0 %v2855_v29, %s7206_s18 }
 0x686   : > { %v8996_v34 = vpop.permute.xlu2 %2769 }
 0x687   : > { %v2838_v52 = vmul.f32 %v8996_v34, %v10313_v58 }
 0x689   : > { %v2856_v13 = vpack.c.bf16 %v2838_v52, %v2837_v39  ;;  %v9020_v39 = vld [vmem:[#allocation12] ss:$0 sm:$0xff] }
 0x68b   : > { %2906 = vrot.lane.b32.xlu0 %v2856_v13, %s7206_s18 }
 0x68e   : > { %v9007_v29 = vpop.permute.xlu2 %2773 }
 0x68f   : > { %10314 = vst [vmem:[#allocation44_spill] sm:$0xff] %v9007_v29  ;;  %v2840_v9 = vmul.f32 %v9007_v29, %v10315_v60 }
 0x691   : > { %v2857_v47 = vpack.c.bf16 %v2840_v9, %v2839_v30 }
 0x693   : > { %3249 = vrot.lane.b32.xlu0 %v8741_v33, %s7207_s4  ;;  %2908 = vrot.lane.b32.xlu1 %v2857_v47, %s7206_s18 }
 0x69b   : > { %3255 = vrot.lane.b32.xlu0 %v8751_v36, %s7207_s4  ;;  %3251 = vrot.lane.b32.xlu1 %v8753_v1, %s7207_s4 }
 0x6a3   : > { %3261 = vrot.lane.b32.xlu0 %v8765_v21, %s7207_s4  ;;  %3257 = vrot.lane.b32.xlu1 %v8747_v4, %s7207_s4 }
 0x6ab   : > { %3267 = vrot.lane.b32.xlu0 %v8771_v23, %s7207_s4  ;;  %3263 = vrot.lane.b32.xlu1 %v8763_v20, %s7207_s4 }
 0x6b3   : > { %3273 = vrot.lane.b32.xlu0 %v8787_v45, %s7207_s4  ;;  %3269 = vrot.lane.b32.xlu1 %v8781_v53, %s7207_s4 }
 0x6b4   : > { %v2974_v54 = vpop.f32.mrf.mxu0 }
 0x6b5   : > { %v2975_v58 = vadd.f32 %v9020_v39, %v2974_v54  ;;  %v9036_v54 = vpop.permute.xlu2 %2777 }
 0x6b6   : > { %10318 = vst [vmem:[#allocation46_spill] sm:$0xff] %v9036_v54 }
 0x6b7   : > { %v3054_v13 = vmul.f32 %v2975_v58, %v8797_v7  ;;  %v10319_v7 = vld [vmem:[#allocation52_spill] sm:$0xff]  ;;  %v9042_v58 = vpop.permute.xlu1 %2775 }
 0x6bb   : > { %3279 = vrot.lane.b32.xlu0 %v8873_v43, %s7207_s4  ;;  %3275 = vrot.lane.b32.xlu1 %v8868_v31, %s7207_s4 }
 0x6bc   : > { %v2976_v56 = vpop.f32.mrf.mxu0 }
 0x6bd   : > { %v2977_v52 = vadd.f32 %v9020_v39, %v2976_v56 }
 0x6bf   : > { %v3055_v60 = vmul.f32 %v2977_v52, %v8805_v35  ;;  %v2842_v35 = vmul.f32 %v9036_v54, %v10319_v7  ;;  %v10320_v52 = vld [vmem:[#allocation51_spill] sm:$0xff] }
 0x6c1   : > { %v3086_v9 = vpack.c.bf16 %v3055_v60, %v3054_v13  ;;  %v2841_v13 = vmul.f32 %v9042_v58, %v10320_v52 }
 0x6c3   : > { %6101 = vmatmul.msk.bf16.vlgmr.msra.gmra.mxu0 %vm3107_vm8, %v3086_v9  ;;  %3285 = vrot.lane.b32.xlu0 %v8814_v46, %s7207_s4 }
 0x6c4   : > { %v2979_v30 = vpop.f32.mrf.mxu0  ;;  %3281 = vrot.lane.b32.xlu1 %v8799_v14, %s7207_s4 }
 0x6c5   : > { %v2893_v47 = vpop.permute.xlu0 %2892  ;;  %v2980_v56 = vadd.f32 %v9020_v39, %v2979_v30 }
 0x6c6   : > { %6091 = vmatmul.msk.bf16.gmra.mxu1 %vm2912_vm7, %v2893_v47  ;;  %v2858_v47 = vpack.c.bf16 %v2842_v35, %v2841_v13 }
 0x6c7   : > { %v3056_v29 = vmul.f32 %v2980_v56, %v8795_v6 }
 0x6c8   : > { %2910 = vrot.lane.b32.xlu2 %v2858_v47, %s7206_s18 }
 0x6cb   : > { %3545 = vrot.lane.b32.xlu0 %v8753_v1, %s7208_s1 }
 0x6cc   : > { %v2981_v60 = vpop.f32.mrf.mxu0  ;;  %3287 = vrot.lane.b32.xlu1 %v8881_v44, %s7207_s4 }
 0x6cd   : > { %v2982_v9 = vadd.f32 %v9020_v39, %v2981_v60  ;;  %v2895_v7 = vpop.permute.xlu0 %2894 }
 0x6cf   : > { %v3057_v15 = vmul.f32 %v2982_v9, %v8803_v28 }
 0x6d0   : > { %3253 = vrot.lane.b32.xlu2 %v8739_v55, %s7207_s4 }
 0x6d1   : > { %v3087_v30 = vpack.c.bf16 %v3057_v15, %v3056_v29 }
 0x6d3   : > { %6102 = vmatmul.msk.bf16.gmra.mxu0 %vm3107_vm8, %v3087_v30  ;;  %3547 = vrot.lane.b32.xlu0 %v8739_v55, %s7208_s1 }
 0x6d4   : > { %v2984_v52 = vpop.f32.mrf.mxu0  ;;  %v2989_v54 = vpop.f32.mrf.mxu1  ;;  %3289 = vrot.lane.b32.xlu1 %v8834_v22, %s7207_s4 }
 0x6d5   : > { %v2985_v6 = vadd.f32 %v9020_v39, %v2984_v52  ;;  %v2990_v28 = vadd.f32 %v9020_v39, %v2989_v54 }
 0x6d6   : > { %6092 = vmatmul.msk.bf16.gmra.mxu1 %vm2912_vm7, %v2895_v7  ;;  %v2897_v7 = vpop.permute.xlu0 %2896 }
 0x6d7   : > { %v3058_v13 = vmul.f32 %v2985_v6, %v8811_v2  ;;  %v3060_v60 = vmul.f32 %v2990_v28, %v8824_v19 }
 0x6d8   : > { %3259 = vrot.lane.b32.xlu2 %v8755_v18, %s7207_s4 }
 0x6db   : > { %3295 = vrot.lane.b32.xlu0 %v8893_v48, %s7207_s4 }
 0x6dc   : > { %v2986_v15 = vpop.f32.mrf.mxu0  ;;  %v2991_v29 = vpop.f32.mrf.mxu1  ;;  %3549 = vrot.lane.b32.xlu1 %v8751_v36, %s7208_s1 }
 0x6dd   : > { %v2987_v35 = vadd.f32 %v9020_v39, %v2986_v15  ;;  %v2992_v56 = vadd.f32 %v9020_v39, %v2991_v29 }
 0x6de   : > { %v2899_v15 = vpop.permute.xlu0 %2898 }
 0x6df   : > { %v3059_v9 = vmul.f32 %v2987_v35, %v8830_v12  ;;  %v3061_v47 = vmul.f32 %v2992_v56, %v8822_v40 }
 0x6e0   : > { %3265 = vrot.lane.b32.xlu2 %v8773_v25, %s7207_s4 }
 0x6e1   : > { %v3088_v54 = vpack.c.bf16 %v3059_v9, %v3058_v13  ;;  %v3089_v30 = vpack.c.bf16 %v3061_v47, %v3060_v60  ;;  %v6527_v47 = vld [vmem:[%s10212_s11 + $0x8] sm:$0xff] }
 0x6e2   : > { %3762 = vmatpush.bf16.msrb.mxu1 %v6527_v47 }
 0x6e3   : > { %6103 = vmatmul.msk.bf16.gmra.mxu0 %vm3107_vm8, %v3088_v54  ;;  %6104 = vmatmul.msk.bf16.vlgmr.msra.gmra.mxu2 %vm3107_vm8, %v3089_v30  ;;  %v6525_v54 = vld [vmem:[#allocation15] sm:$0xff] }
 0x6e4   : > { %v2994_v2 = vpop.f32.mrf.mxu1  ;;  %3297 = vrot.lane.b32.xlu0 %v8889_v10, %s7207_s4  ;;  %3551 = vrot.lane.b32.xlu1 %v8747_v4, %s7208_s1 }
 0x6e5   : > { %v2995_v40 = vadd.f32 %v9020_v39, %v2994_v2  ;;  %3461 = vmatpush.bf16.msrb.mxu0 %v6525_v54  ;;  %6572 = vmatpush.bf16.msra.mxu3 %v6525_v54 }
 0x6e6   : > { %6093 = vmatmul.msk.bf16.gmra.mxu1 %vm2912_vm7, %v2897_v7  ;;  %v2901_v9 = vpop.permute.xlu0 %2900 }
 0x6e7   : > { %v3062_v52 = vmul.f32 %v2995_v40, %v8844_v5  ;;  %v9166_v40 = vld [vmem:[#allocation13] ss:$0 sm:$0xff] }
 0x6e8   : > { %3271 = vrot.lane.b32.xlu2 %v8779_v26, %s7207_s4 }
 0x6ec   : > { %v2996_v19 = vpop.f32.mrf.mxu1  ;;  %3557 = vrot.lane.b32.xlu0 %v8763_v20, %s7208_s1  ;;  %3299 = vrot.lane.b32.xlu1 %v8901_v11, %s7207_s4 }
 0x6ed   : > { %v2997_v12 = vadd.f32 %v9020_v39, %v2996_v19 }
 0x6ef   : > { %v3063_v6 = vmul.f32 %v2997_v12, %v8842_v32 }
 0x6f0   : > { %3277 = vrot.lane.b32.xlu2 %v8791_v38, %s7207_s4 }
 0x6f1   : > { %v3090_v28 = vpack.c.bf16 %v3063_v6, %v3062_v52 }
 0x6f3   : > { %6105 = vmatmul.msk.bf16.gmra.mxu2 %vm3107_vm8, %v3090_v28 }
 0x6f4   : > { %v2999_v29 = vpop.f32.mrf.mxu1  ;;  %3559 = vrot.lane.b32.xlu0 %v8773_v25, %s7208_s1  ;;  %3301 = vrot.lane.b32.xlu1 %v8897_v61, %s7207_s4 }
 0x6f5   : > { %v3000_v32 = vadd.f32 %v9020_v39, %v2999_v29 }
 0x6f6   : > { %6094 = vmatmul.msk.bf16.gmra.mxu1 %vm2912_vm7, %v2899_v15 }
 0x6f7   : > { %v3064_v56 = vmul.f32 %v3000_v32, %v8862_v50 }
 0x6f8   : > { %3283 = vrot.lane.b32.xlu2 %v8877_v8, %s7207_s4 }
 0x6fc   : > { %v3001_v5 = vpop.f32.mrf.mxu1  ;;  %3307 = vrot.lane.b32.xlu0 %v8915_v41, %s7207_s4  ;;  %3561 = vrot.lane.b32.xlu1 %v8771_v23, %s7208_s1 }
 0x6fd   : > { %v3002_v35 = vadd.f32 %v9020_v39, %v3001_v5 }
 0x6ff   : > { %v3065_v13 = vmul.f32 %v3002_v35, %v8860_v37  ;;  %v2903_v37 = vpop.permute.xlu0 %2902 }
 0x700   : > { %3543 = vrot.lane.b32.xlu2 %v8741_v33, %s7208_s1 }
 0x701   : > { %v3091_v60 = vpack.c.bf16 %v3065_v13, %v3064_v56 }
 0x703   : > { %6106 = vmatmul.msk.bf16.gmra.mxu2 %vm3107_vm8, %v3091_v60 }
 0x704   : > { %3309 = vrot.lane.b32.xlu0 %v8938_v59, %s7207_s4  ;;  %3563 = vrot.lane.b32.xlu1 %v8781_v53, %s7208_s1 }
 0x705   : > { %v2909_v7 = vpop.permute.xlu1 %2908 }
 0x706   : > { %6095 = vmatmul.msk.bf16.gmra.mxu1 %vm2912_vm7, %v2901_v9 }
 0x707   : > { %v2905_v50 = vpop.permute.xlu0 %2904 }
 0x708   : > { %3291 = vrot.lane.b32.xlu2 %v8885_v42, %s7207_s4 }
 0x70c   : > { %3569 = vrot.lane.b32.xlu0 %v8868_v31, %s7208_s1  ;;  %3311 = vrot.lane.b32.xlu1 %v8940_v49, %s7207_s4 }
 0x70d   : > { %v3252_v28 = vpop.permute.xlu1 %3251 }
 0x70f   : > { %v2907_v30 = vpop.permute.xlu0 %2906 }
 0x710   : > { %3293 = vrot.lane.b32.xlu2 %v8852_v27, %s7207_s4 }
 0x714   : > { %3575 = vrot.lane.b32.xlu0 %v8799_v14, %s7208_s1  ;;  %3571 = vrot.lane.b32.xlu1 %v8791_v38, %s7208_s1 }
 0x716   : > { %6096 = vmatmul.msk.bf16.gmra.mxu1 %vm2912_vm7, %v2903_v37 }
 0x717   : > { %v3250_v52 = vpop.permute.xlu0 %3249 }
 0x718   : > { %3553 = vrot.lane.b32.xlu2 %v8755_v18, %s7208_s1 }
 0x71c   : > { %3577 = vrot.lane.b32.xlu1 %v8877_v8, %s7208_s1  ;;  %3847 = vrot.lane.b32.xlu0 %v8753_v1, %s7209_s30 }
 0x720   : > { %3555 = vrot.lane.b32.xlu2 %v8765_v21, %s7208_s1 }
 0x722   : > { %v2911_v60 = vpop.permute.xlu2 %2910 }
 0x724   : > { %3579 = vrot.lane.b32.xlu1 %v8814_v46, %s7208_s1  ;;  %3849 = vrot.lane.b32.xlu0 %v8739_v55, %s7209_s30 }
 0x726   : > { %6097 = vmatmul.msk.bf16.gmra.mxu1 %vm2912_vm7, %v2905_v50 }
 0x728   : > { %3303 = vrot.lane.b32.xlu2 %v8910_v57, %s7207_s4 }
 0x72c   : > { %3851 = vrot.lane.b32.xlu1 %v8751_v36, %s7209_s30  ;;  %3585 = vrot.lane.b32.xlu0 %v8885_v42, %s7208_s1 }
 0x730   : > { %3305 = vrot.lane.b32.xlu2 %v8906_v17, %s7207_s4 }
 0x734   : > { %3853 = vrot.lane.b32.xlu1 %v8747_v4, %s7209_s30  ;;  %3587 = vrot.lane.b32.xlu0 %v8852_v27, %s7208_s1 }
 0x736   : > { %6098 = vmatmul.msk.bf16.gmra.mxu1 %vm2912_vm7, %v2907_v30 }
 0x738   : > { %3565 = vrot.lane.b32.xlu2 %v8779_v26, %s7208_s1 }
 0x73c   : > { %3589 = vrot.lane.b32.xlu1 %v8893_v48, %s7208_s1  ;;  %3859 = vrot.lane.b32.xlu0 %v8763_v20, %s7209_s30 }
 0x740   : > { %v3169_v2 = vpop.f32.mrf.mxu0  ;;  %3567 = vrot.lane.b32.xlu2 %v8787_v45, %s7208_s1 }
 0x741   : > { %v3170_v12 = vadd.f32 %v9166_v40, %v3169_v2 }
 0x743   : > { %v3004_v19 = vpop.f32.mrf.mxu1  ;;  %v3345_v32 = vmul.f32 %v3250_v52, %v3170_v12 }
 0x744   : > { %v3005_v29 = vadd.f32 %v9020_v39, %v3004_v19  ;;  %v3256_v19 = vpop.permute.xlu0 %3255  ;;  %3591 = vrot.lane.b32.xlu1 %v8889_v10, %s7208_s1  ;;  %3861 = vrot.lane.b32.xlu0 %v8773_v25, %s7209_s30 }
 0x746   : > { %6099 = vmatmul.msk.bf16.gmra.mxu1 %vm2912_vm7, %v2909_v7  ;;  %v3066_v9 = vmul.f32 %v3005_v29, %v8919_v24  ;;  %v3254_v7 = vpop.permute.xlu2 %3253 }
 0x748   : > { %v3171_v6 = vpop.f32.mrf.mxu0  ;;  %3573 = vrot.lane.b32.xlu2 %v8873_v43, %s7208_s1 }
 0x749   : > { %v3172_v15 = vadd.f32 %v9166_v40, %v3171_v6 }
 0x74b   : > { %v3346_v5 = vmul.f32 %v3252_v28, %v3172_v15  ;;  %v3006_v35 = vpop.f32.mrf.mxu1 }
 0x74c   : > { %v3007_v56 = vadd.f32 %v9020_v39, %v3006_v35  ;;  %3863 = vrot.lane.b32.xlu1 %v8771_v23, %s7209_s30  ;;  %3597 = vrot.lane.b32.xlu0 %v8910_v57, %s7208_s1 }
 0x74d   : > { %v3377_v13 = vpack.c.bf16 %v3346_v5, %v3345_v32 }
 0x74e   : > { %v3067_v37 = vmul.f32 %v3007_v56, %v8923_v51 }
 0x74f   : > { %6121 = vmatmul.msk.bf16.vlgmr.msrb.gmra.mxu0 %vm3405_vm9, %v3377_v13  ;;  %v3258_v13 = vpop.permute.xlu1 %3257 }
 0x750   : > { %v3174_v50 = vpop.f32.mrf.mxu0  ;;  %v3092_v47 = vpack.c.bf16 %v3067_v37, %v3066_v9  ;;  %3845 = vrot.lane.b32.xlu2 %v8741_v33, %s7209_s30 }
 0x751   : > { %v3175_v30 = vadd.f32 %v9166_v40, %v3174_v50  ;;  %v3260_v50 = vpop.permute.xlu2 %3259 }
 0x752   : > { %6107 = vmatmul.msk.bf16.gmra.mxu2 %vm3107_vm8, %v3092_v47 }
 0x753   : > { %v3009_v54 = vpop.f32.mrf.mxu1  ;;  %v3347_v12 = vmul.f32 %v3254_v7, %v3175_v30 }
 0x754   : > { %v3010_v51 = vadd.f32 %v9020_v39, %v3009_v54  ;;  %3865 = vrot.lane.b32.xlu1 %v8781_v53, %s7209_s30  ;;  %3599 = vrot.lane.b32.xlu0 %v8906_v17, %s7208_s1 }
 0x756   : > { %6100 = vmatmul.msk.bf16.gmra.mxu1 %vm2912_vm7, %v2911_v60  ;;  %v3068_v29 = vmul.f32 %v3010_v51, %v8927_v3 }
 0x758   : > { %v3176_v2 = vpop.f32.mrf.mxu0  ;;  %3581 = vrot.lane.b32.xlu2 %v8881_v44, %s7208_s1 }
 0x759   : > { %v3177_v24 = vadd.f32 %v9166_v40, %v3176_v2 }
 0x75b   : > { %v3348_v52 = vmul.f32 %v3256_v19, %v3177_v24  ;;  %v3011_v6 = vpop.f32.mrf.mxu1  ;;  %v3262_v19 = vpop.permute.xlu0 %3261 }
 0x75c   : > { %v3012_v28 = vadd.f32 %v9020_v39, %v3011_v6  ;;  %v3264_v6 = vpop.permute.xlu1 %3263  ;;  %3601 = vrot.lane.b32.xlu1 %v8915_v41, %s7208_s1  ;;  %3871 = vrot.lane.b32.xlu0 %v8868_v31, %s7209_s30 }
 0x75d   : > { %v3378_v15 = vpack.c.bf16 %v3348_v52, %v3347_v12 }
 0x75e   : > { %v3069_v32 = vmul.f32 %v3012_v28, %v8932_v63 }
 0x75f   : > { %6122 = vmatmul.msk.bf16.gmra.mxu0 %vm3405_vm9, %v3378_v15 }
 0x760   : > { %v3179_v5 = vpop.f32.mrf.mxu0  ;;  %v3093_v35 = vpack.c.bf16 %v3069_v32, %v3068_v29  ;;  %3583 = vrot.lane.b32.xlu2 %v8834_v22, %s7208_s1 }
 0x761   : > { %v3180_v9 = vadd.f32 %v9166_v40, %v3179_v5 }
 0x762   : > { %6108 = vmatmul.msk.bf16.gmra.mxu2 %vm3107_vm8, %v3093_v35 }
 0x763   : > { %v3014_v56 = vpop.f32.mrf.mxu1  ;;  %v3349_v3 = vmul.f32 %v3258_v13, %v3180_v9  ;;  %v10321_v13 = vld [vmem:[#allocation47_spill] sm:$0xff]  ;;  %v10322_v9 = vld [vmem:[#allocation48_spill] sm:$0xff]  ;;  %v3268_v55 = vpop.permute.xlu0 %3267 }
 0x764   : > { %v3015_v54 = vadd.f32 %v9020_v39, %v3014_v56  ;;  %v3266_v56 = vpop.permute.xlu2 %3265  ;;  %3603 = vrot.lane.b32.xlu1 %v8938_v59, %s7208_s1  ;;  %3873 = vrot.lane.b32.xlu0 %v8791_v38, %s7209_s30 }
 0x766   : > { %v3184_v60 = vpop.f32.mrf.mxu2  ;;  %v3070_v51 = vmul.f32 %v3015_v54, %v8946_v16 }
 0x767   : > { %v3185_v2 = vadd.f32 %v9166_v40, %v3184_v60 }
 0x768   : > { %v3181_v37 = vpop.f32.mrf.mxu0  ;;  %3855 = vrot.lane.b32.xlu2 %v8755_v18, %s7209_s30 }
 0x769   : > { %v3182_v47 = vadd.f32 %v9166_v40, %v3181_v37  ;;  %v3351_v29 = vmul.f32 %v3262_v19, %v3185_v2 }
 0x76b   : > { %v3350_v30 = vmul.f32 %v3260_v50, %v3182_v47  ;;  %v3016_v63 = vpop.f32.mrf.mxu1 }
 0x76c   : > { %v3017_v7 = vadd.f32 %v9020_v39, %v3016_v63  ;;  %3875 = vrot.lane.b32.xlu1 %v8873_v43, %s7209_s30  ;;  %3879 = vrot.lane.b32.xlu0 %v8877_v8, %s7209_s30 }
 0x76d   : > { %v3379_v24 = vpack.c.bf16 %v3350_v30, %v3349_v3 }
 0x76e   : > { %v3071_v12 = vmul.f32 %v3017_v7, %v8951_v0  ;;  %v3186_v52 = vpop.f32.mrf.mxu2 }
 0x76f   : > { %v3187_v28 = vadd.f32 %v9166_v40, %v3186_v52  ;;  %6123 = vmatmul.msk.bf16.gmra.mxu0 %vm3405_vm9, %v3379_v24  ;;  %v10323_v52 = vld [vmem:[#allocation53_spill] sm:$0xff] }
 0x770   : > { %v3094_v15 = vpack.c.bf16 %v3071_v12, %v3070_v51  ;;  %v3270_v12 = vpop.permute.xlu1 %3269  ;;  %3857 = vrot.lane.b32.xlu2 %v8765_v21, %s7209_s30 }
 0x771   : > { %v3352_v32 = vmul.f32 %v3264_v6, %v3187_v28  ;;  %v10324_v28 = vld [vmem:[#allocation39_spill] sm:$0xff] }
 0x772   : > { %6109 = vmatmul.msk.bf16.gmra.mxu2 %vm3107_vm8, %v3094_v15 }
 0x773   : > { %v3380_v16 = vpack.c.bf16 %v3352_v32, %v3351_v29  ;;  %v3019_v0 = vpop.f32.mrf.mxu1  ;;  %v3272_v32 = vpop.permute.xlu2 %3271 }
 0x774   : > { %v3020_v36 = vadd.f32 %v9020_v39, %v3019_v0  ;;  %3881 = vrot.lane.b32.xlu1 %v8814_v46, %s7209_s30  ;;  %3885 = vrot.lane.b32.xlu0 %v8834_v22, %s7209_s30 }
 0x775   : > { %6124 = vmatmul.msk.bf16.vlgmr.msra.gmra.mxu3 %vm3405_vm9, %v3380_v16  ;;  %v6526_v16 = vld [vmem:[%s10212_s11] sm:$0xff] }
 0x776   : > { %v3189_v5 = vpop.f32.mrf.mxu2  ;;  %v3072_v60 = vmul.f32 %v3020_v36, %v10321_v13  ;;  %3763 = vmatpush.bf16.msrb.mxu1 %v6526_v16  ;;  %v10326_v13 = vld [vmem:[#allocation41_spill] sm:$0xff] }
 0x777   : > { %v3190_v35 = vadd.f32 %v9166_v40, %v3189_v5 }
 0x778   : > { %3593 = vrot.lane.b32.xlu2 %v8901_v11, %s7208_s1 }
 0x779   : > { %v3353_v54 = vmul.f32 %v3266_v56, %v3190_v35  ;;  %v10325_v35 = vld [vmem:[#allocation40_spill] sm:$0xff] }
 0x77b   : > { %v3021_v1 = vpop.f32.mrf.mxu1 }
 0x77c   : > { %v3022_v33 = vadd.f32 %v9020_v39, %v3021_v1  ;;  %3887 = vrot.lane.b32.xlu1 %v8885_v42, %s7209_s30  ;;  %3891 = vrot.lane.b32.xlu0 %v8893_v48, %s7209_s30 }
 0x77e   : > { %v3073_v37 = vmul.f32 %v3022_v33, %v10322_v9  ;;  %v3191_v50 = vpop.f32.mrf.mxu2 }
 0x77f   : > { %v3192_v47 = vadd.f32 %v9166_v40, %v3191_v50 }
 0x780   : > { %v3095_v4 = vpack.c.bf16 %v3073_v37, %v3072_v60  ;;  %3595 = vrot.lane.b32.xlu2 %v8897_v61, %s7208_s1 }
 0x781   : > { %v3354_v3 = vmul.f32 %v3268_v55, %v3192_v47  ;;  %v10327_v55 = vld [vmem:[#allocation42_spill] sm:$0xff] }
 0x782   : > { %6110 = vmatmul.msk.bf16.gmra.mxu2 %vm3107_vm8, %v3095_v4  ;;  %v10328_v4 = vld [vmem:[#allocation43_spill] sm:$0xff] }
 0x783   : > { %v3381_v30 = vpack.c.bf16 %v3354_v3, %v3353_v54  ;;  %v3024_v63 = vpop.f32.mrf.mxu1 }
 0x784   : > { %v3025_v2 = vadd.f32 %v9020_v39, %v3024_v63  ;;  %v3274_v63 = vpop.permute.xlu0 %3273  ;;  %3893 = vrot.lane.b32.xlu1 %v8889_v10, %s7209_s30  ;;  %3897 = vrot.lane.b32.xlu0 %v8897_v61, %s7209_s30 }
 0x785   : > { %6125 = vmatmul.msk.bf16.gmra.mxu3 %vm3405_vm9, %v3381_v30 }
 0x786   : > { %v3194_v7 = vpop.f32.mrf.mxu2  ;;  %v3074_v6 = vmul.f32 %v3025_v2, %v10323_v52 }
 0x787   : > { %v3195_v51 = vadd.f32 %v9166_v40, %v3194_v7  ;;  %v3276_v7 = vpop.permute.xlu1 %3275 }
 0x788   : > { %3867 = vrot.lane.b32.xlu2 %v8779_v26, %s7209_s30  ;;  %v6531_v26 = vld [vmem:[#allocation19 + $0x18] sm:$0xff] }
 0x789   : > { %v3355_v5 = vmul.f32 %v3270_v12, %v3195_v51  ;;  %4077 = vmatpush.bf16.msrb.mxu2 %v6531_v26  ;;  %v6530_v26 = vld [vmem:[#allocation19 + $0x10] sm:$0xff] }
 0x78b   : > { %v3026_v19 = vpop.f32.mrf.mxu1 }
 0x78c   : > { %v3027_v24 = vadd.f32 %v9020_v39, %v3026_v19  ;;  %v9296_v38 = vpop.permute.xlu0 %3279  ;;  %3899 = vrot.lane.b32.xlu1 %v8910_v57, %s7209_s30  ;;  %3903 = vrot.lane.b32.xlu0 %v8915_v41, %s7209_s30 }
 0x78d   : > { %4078 = vmatpush.bf16.msrb.mxu2 %v6530_v26 }
 0x78e   : > { %v3075_v15 = vmul.f32 %v3027_v24, %v10324_v28  ;;  %v3196_v29 = vpop.f32.mrf.mxu2  ;;  %v9294_v24 = vpop.permute.xlu2 %3277 }
 0x78f   : > { %v3197_v18 = vadd.f32 %v9166_v40, %v3196_v29  ;;  %v9321_v29 = vld [vmem:[#allocation16] ss:$0 sm:$0xff] }
 0x790   : > { %v3096_v0 = vpack.c.bf16 %v3075_v15, %v3074_v6  ;;  %3869 = vrot.lane.b32.xlu2 %v8787_v45, %s7209_s30  ;;  %v10329_v6 = vld [vmem:[#allocation45_spill] sm:$0xff]  ;;  %v10330_v15 = vld [vmem:[#allocation44_spill] sm:$0xff] }
 0x791   : > { %v3356_v36 = vmul.f32 %v3272_v32, %v3197_v18 }
 0x792   : > { %6111 = vmatmul.msk.bf16.gmra.mxu2 %vm3107_vm8, %v3096_v0 }
 0x793   : > { %v3382_v1 = vpack.c.bf16 %v3356_v36, %v3355_v5  ;;  %v3029_v33 = vpop.f32.mrf.mxu1 }
 0x794   : > { %v3030_v20 = vadd.f32 %v9020_v39, %v3029_v33  ;;  %v9316_v8 = vpop.permute.xlu0 %3285  ;;  %3905 = vrot.lane.b32.xlu1 %v8938_v59, %s7209_s30 }
 0x795   : > { %6126 = vmatmul.msk.bf16.gmra.mxu3 %vm3405_vm9, %v3382_v1 }
 0x796   : > { %v3076_v56 = vmul.f32 %v3030_v20, %v10325_v35 }
 0x798   : > { %3605 = vrot.lane.b32.xlu2 %v8940_v49, %s7208_s1 }
 0x79b   : > { %v3031_v23 = vpop.f32.mrf.mxu1 }
 0x79c   : > { %v3032_v21 = vadd.f32 %v9020_v39, %v3031_v23  ;;  %v3546_v5 = vpop.permute.xlu0 %3545 }
 0x79e   : > { %v3077_v60 = vmul.f32 %v3032_v21, %v10326_v13 }
 0x7a0   : > { %v3097_v9 = vpack.c.bf16 %v3077_v60, %v3076_v56  ;;  %3877 = vrot.lane.b32.xlu2 %v8799_v14, %s7209_s30  ;;  %v10331_v60 = vld [vmem:[#allocation46_spill] sm:$0xff] }
 0x7a2   : > { %6112 = vmatmul.msk.bf16.gmra.mxu2 %vm3107_vm8, %v3097_v9 }
 0x7a3   : > { %v3034_v25 = vpop.f32.mrf.mxu1 }
 0x7a4   : > { %v3035_v53 = vadd.f32 %v9020_v39, %v3034_v25 }
 0x7a6   : > { %v3078_v47 = vmul.f32 %v3035_v53, %v10327_v55 }
 0x7a8   : > { %3883 = vrot.lane.b32.xlu2 %v8881_v44, %s7209_s30 }
 0x7ab   : > { %v3036_v37 = vpop.f32.mrf.mxu1 }
 0x7ac   : > { %v3037_v50 = vadd.f32 %v9020_v39, %v3036_v37 }
 0x7ae   : > { %v3079_v54 = vmul.f32 %v3037_v50, %v10328_v4  ;;  %v3548_v50 = vpop.permute.xlu0 %3547 }
 0x7b0   : > { %v3098_v3 = vpack.c.bf16 %v3079_v54, %v3078_v47  ;;  %3889 = vrot.lane.b32.xlu2 %v8852_v27, %s7209_s30 }
 0x7b2   : > { %6113 = vmatmul.msk.bf16.gmra.mxu2 %vm3107_vm8, %v3098_v3 }
 0x7b3   : > { %v3039_v30 = vpop.f32.mrf.mxu1 }
 0x7b4   : > { %v3040_v31 = vadd.f32 %v9020_v39, %v3039_v30 }
 0x7b6   : > { %v3080_v2 = vmul.f32 %v3040_v31, %v8994_v62  ;;  %v9305_v62 = vpop.permute.xlu1 %3281 }
 0x7b8   : > { %3895 = vrot.lane.b32.xlu2 %v8901_v11, %s7209_s30 }
 0x7bb   : > { %v3041_v43 = vpop.f32.mrf.mxu1 }
 0x7bc   : > { %v3042_v45 = vadd.f32 %v9020_v39, %v3041_v43 }
 0x7be   : > { %v3081_v19 = vmul.f32 %v3042_v45, %v8996_v34  ;;  %v9309_v34 = vpop.permute.xlu2 %3283  ;;  %v9323_v16 = vpop.permute.xlu1 %3287 }
 0x7c0   : > { %v3099_v51 = vpack.c.bf16 %v3081_v19, %v3080_v2  ;;  %3901 = vrot.lane.b32.xlu2 %v8906_v17, %s7209_s30 }
 0x7c2   : > { %6114 = vmatmul.msk.bf16.gmra.mxu2 %vm3107_vm8, %v3099_v51 }
 0x7c3   : > { %v3044_v46 = vpop.f32.mrf.mxu1 }
 0x7c4   : > { %v3045_v14 = vadd.f32 %v9020_v39, %v3044_v46 }
 0x7c6   : > { %v3082_v28 = vmul.f32 %v3045_v14, %v10329_v6  ;;  %v3544_v10 = vpop.permute.xlu2 %3543  ;;  %v9341_v57 = vpop.permute.xlu1 %3289 }
 0x7c8   : > { %3907 = vrot.lane.b32.xlu2 %v8940_v49, %s7209_s30 }
 0x7cb   : > { %v3046_v42 = vpop.f32.mrf.mxu1 }
 0x7cc   : > { %v3047_v12 = vadd.f32 %v9020_v39, %v3046_v42  ;;  %v3463_v52 = vpop.f32.mrf.mxu0 }
 0x7cd   : > { %v3464_v44 = vadd.f32 %v9321_v29, %v3463_v52 }
 0x7ce   : > { %v3083_v22 = vmul.f32 %v3047_v12, %v10330_v15  ;;  %v9353_v37 = vpop.permute.xlu2 %3291  ;;  %v3550_v47 = vpop.permute.xlu1 %3549 }
 0x7cf   : > { %v3639_v33 = vmul.f32 %v3544_v10, %v3464_v44 }
 0x7d0   : > { %v3100_v32 = vpack.c.bf16 %v3083_v22, %v3082_v28 }
 0x7d2   : > { %6115 = vmatmul.msk.bf16.gmra.mxu2 %vm3107_vm8, %v3100_v32 }
 0x7d3   : > { %v3049_v18 = vpop.f32.mrf.mxu1 }
 0x7d4   : > { %v3465_v0 = vpop.f32.mrf.mxu0  ;;  %v3050_v48 = vadd.f32 %v9020_v39, %v3049_v18 }
 0x7d5   : > { %v3466_v36 = vadd.f32 %v9321_v29, %v3465_v0  ;;  %v3199_v1 = vpop.f32.mrf.mxu2 }
 0x7d6   : > { %v3200_v21 = vadd.f32 %v9166_v40, %v3199_v1  ;;  %v3084_v13 = vmul.f32 %v3050_v48, %v9042_v58  ;;  %v3552_v46 = vpop.permute.xlu1 %3551 }
 0x7d7   : > { %v3640_v20 = vmul.f32 %v3546_v5, %v3466_v36 }
 0x7d8   : > { %v3357_v59 = vmul.f32 %v3274_v63, %v3200_v21  ;;  %v9363_v63 = vpop.permute.xlu2 %3293 }
 0x7d9   : > { %v3671_v27 = vpack.c.bf16 %v3640_v20, %v3639_v33 }
 0x7db   : > { %v3051_v23 = vpop.f32.mrf.mxu1  ;;  %6145 = vmatmul.msk.bf16.vlgmr.msrb.gmra.mxu1 %vm3707_vm10, %v3671_v27 }
 0x7dc   : > { %v3052_v35 = vadd.f32 %v9020_v39, %v3051_v23  ;;  %v3468_v56 = vpop.f32.mrf.mxu0 }
 0x7dd   : > { %v3201_v61 = vpop.f32.mrf.mxu2  ;;  %v3469_v58 = vadd.f32 %v9321_v29, %v3468_v56 }
 0x7de   : > { %v3085_v11 = vmul.f32 %v3052_v35, %v10331_v60  ;;  %v3202_v9 = vadd.f32 %v9166_v40, %v3201_v61  ;;  %v9378_v10 = vpop.permute.xlu1 %3299 }
 0x7df   : > { %v3641_v3 = vmul.f32 %v3548_v50, %v3469_v58 }
 0x7e0   : > { %v3101_v25 = vpack.c.bf16 %v3085_v11, %v3084_v13  ;;  %v3358_v53 = vmul.f32 %v3276_v7, %v3202_v9  ;;  %v9366_v7 = vpop.permute.xlu0 %3295  ;;  %v3554_v52 = vpop.permute.xlu2 %3553 }
 0x7e2   : > { %6116 = vmatmul.msk.bf16.gmra.mxu2 %vm3107_vm8, %v3101_v25  ;;  %v3383_v39 = vpack.c.bf16 %v3358_v53, %v3357_v59 }
 0x7e4   : > { %v3470_v55 = vpop.f32.mrf.mxu0  ;;  %6127 = vmatmul.msk.bf16.gmra.mxu3 %vm3405_vm9, %v3383_v39 }
 0x7e5   : > { %v3471_v4 = vadd.f32 %v9321_v29, %v3470_v55  ;;  %v3204_v54 = vpop.f32.mrf.mxu2 }
 0x7e6   : > { %v3205_v17 = vadd.f32 %v9166_v40, %v3204_v54  ;;  %v9385_v56 = vpop.permute.xlu1 %3301 }
 0x7e7   : > { %v3642_v41 = vmul.f32 %v3550_v47, %v3471_v4 }
 0x7e8   : > { %v3359_v2 = vmul.f32 %v9294_v24, %v3205_v17  ;;  %v9373_v22 = vpop.permute.xlu0 %3297  ;;  %v3556_v27 = vpop.permute.xlu2 %3555 }
 0x7e9   : > { %v3672_v30 = vpack.c.bf16 %v3642_v41, %v3641_v3  ;;  %v6529_v41 = vld [vmem:[#allocation19 + $0x8] sm:$0xff] }
 0x7ea   : > { %4079 = vmatpush.bf16.msrb.mxu2 %v6529_v41 }
 0x7eb   : > { %6146 = vmatmul.msk.bf16.gmra.mxu1 %vm3707_vm10, %v3672_v30 }
 0x7ec   : > { %v3473_v31 = vpop.f32.mrf.mxu0 }
 0x7ed   : > { %v3206_v43 = vpop.f32.mrf.mxu2  ;;  %v3474_v49 = vadd.f32 %v9321_v29, %v3473_v31 }
 0x7ee   : > { %v3207_v45 = vadd.f32 %v9166_v40, %v3206_v43  ;;  %v3562_v53 = vpop.permute.xlu1 %3561 }
 0x7ef   : > { %v3643_v6 = vmul.f32 %v3552_v46, %v3474_v49 }
 0x7f0   : > { %v3360_v19 = vmul.f32 %v9296_v38, %v3207_v45  ;;  %v3558_v1 = vpop.permute.xlu0 %3557  ;;  %v9390_v60 = vpop.permute.xlu2 %3303 }
 0x7f2   : > { %v3384_v51 = vpack.c.bf16 %v3360_v19, %v3359_v2 }
 0x7f4   : > { %v3475_v14 = vpop.f32.mrf.mxu0  ;;  %6128 = vmatmul.msk.bf16.gmra.mxu3 %vm3405_vm9, %v3384_v51 }
 0x7f5   : > { %v3476_v42 = vadd.f32 %v9321_v29, %v3475_v14  ;;  %v3209_v12 = vpop.f32.mrf.mxu2 }
 0x7f6   : > { %v3210_v24 = vadd.f32 %v9166_v40, %v3209_v12  ;;  %v3564_v49 = vpop.permute.xlu1 %3563 }
 0x7f7   : > { %v3644_v28 = vmul.f32 %v3554_v52, %v3476_v42 }
 0x7f8   : > { %v3478_v15 = vpop.f32.mrf.mxu3  ;;  %v3361_v18 = vmul.f32 %v9305_v62, %v3210_v24  ;;  %v3560_v50 = vpop.permute.xlu0 %3559 }
 0x7f9   : > { %v3673_v32 = vpack.c.bf16 %v3644_v28, %v3643_v6  ;;  %v3479_v20 = vadd.f32 %v9321_v29, %v3478_v15  ;;  %v9397_v3 = vpop.permute.xlu2 %3305 }
 0x7fb   : > { %6147 = vmatmul.msk.bf16.gmra.mxu1 %vm3707_vm10, %v3673_v32  ;;  %v3645_v21 = vmul.f32 %v3556_v27, %v3479_v20  ;;  %v6528_v20 = vld [vmem:[#allocation19] sm:$0xff] }
 0x7fc   : > { %4080 = vmatpush.bf16.msrb.mxu2 %v6528_v20 }
 0x7fd   : > { %v3211_v38 = vpop.f32.mrf.mxu2 }
 0x7fe   : > { %v3212_v44 = vadd.f32 %v9166_v40, %v3211_v38 }
 0x800   : > { %v3362_v0 = vmul.f32 %v9309_v34, %v3212_v44  ;;  %v3480_v5 = vpop.f32.mrf.mxu3  ;;  %v3308_v24 = vpop.permute.xlu0 %3307 }
 0x801   : > { %v3481_v36 = vadd.f32 %v9321_v29, %v3480_v5  ;;  %v3566_v2 = vpop.permute.xlu2 %3565 }
 0x802   : > { %v3385_v33 = vpack.c.bf16 %v3362_v0, %v3361_v18 }
 0x803   : > { %v3646_v48 = vmul.f32 %v3558_v1, %v3481_v36 }
 0x804   : > { %6129 = vmatmul.msk.bf16.gmra.mxu3 %vm3405_vm9, %v3385_v33 }
 0x805   : > { %v3214_v23 = vpop.f32.mrf.mxu2  ;;  %v3674_v61 = vpack.c.bf16 %v3646_v48, %v3645_v21 }
 0x806   : > { %v3215_v62 = vadd.f32 %v9166_v40, %v3214_v23 }
 0x808   : > { %v3483_v35 = vpop.f32.mrf.mxu3  ;;  %v3363_v11 = vmul.f32 %v9316_v8, %v3215_v62  ;;  %v3310_v1 = vpop.permute.xlu0 %3309 }
 0x809   : > { %v3484_v58 = vadd.f32 %v9321_v29, %v3483_v35  ;;  %v3568_v48 = vpop.permute.xlu2 %3567 }
 0x80b   : > { %6148 = vmatmul.msk.bf16.gmra.mxu1 %vm3707_vm10, %v3674_v61  ;;  %v3647_v4 = vmul.f32 %v3560_v50, %v3484_v58 }
 0x80d   : > { %v3216_v34 = vpop.f32.mrf.mxu2 }
 0x80e   : > { %v3217_v13 = vadd.f32 %v9166_v40, %v3216_v34 }
 0x810   : > { %v3364_v9 = vmul.f32 %v9323_v16, %v3217_v13  ;;  %v3485_v59 = vpop.f32.mrf.mxu3  ;;  %v3570_v23 = vpop.permute.xlu0 %3569 }
 0x811   : > { %v3486_v25 = vadd.f32 %v9321_v29, %v3485_v59 }
 0x812   : > { %v3386_v39 = vpack.c.bf16 %v3364_v9, %v3363_v11  ;;  %v9431_v11 = vpop.permute.xlu2 %3573 }
 0x813   : > { %v3648_v55 = vmul.f32 %v3562_v53, %v3486_v25  ;;  %v9435_v53 = vld [vmem:[#allocation18] ss:$0 sm:$0xff] }
 0x814   : > { %6130 = vmatmul.msk.bf16.gmra.mxu3 %vm3405_vm9, %v3386_v39 }
 0x815   : > { %v3219_v47 = vpop.f32.mrf.mxu2  ;;  %v3675_v8 = vpack.c.bf16 %v3648_v55, %v3647_v4 }
 0x816   : > { %v3220_v16 = vadd.f32 %v9166_v40, %v3219_v47 }
 0x818   : > { %v3488_v54 = vpop.f32.mrf.mxu3  ;;  %v3365_v17 = vmul.f32 %v9341_v57, %v3220_v16  ;;  %v9433_v59 = vpop.permute.xlu0 %3575 }
 0x819   : > { %v3489_v51 = vadd.f32 %v9321_v29, %v3488_v54 }
 0x81a   : > { %v3846_v55 = vpop.permute.xlu2 %3845 }
 0x81b   : > { %6149 = vmatmul.msk.bf16.gmra.mxu1 %vm3707_vm10, %v3675_v8  ;;  %v3649_v42 = vmul.f32 %v3564_v49, %v3489_v51 }
 0x81d   : > { %v3221_v26 = vpop.f32.mrf.mxu2 }
 0x81e   : > { %v3222_v30 = vadd.f32 %v9166_v40, %v3221_v26 }
 0x820   : > { %v3366_v31 = vmul.f32 %v9353_v37, %v3222_v30  ;;  %v3490_v43 = vpop.f32.mrf.mxu3  ;;  %v3848_v41 = vpop.permute.xlu0 %3847 }
 0x821   : > { %v3491_v45 = vadd.f32 %v9321_v29, %v3490_v43 }
 0x822   : > { %v3387_v19 = vpack.c.bf16 %v3366_v31, %v3365_v17 }
 0x823   : > { %v3650_v46 = vmul.f32 %v3566_v2, %v3491_v45 }
 0x824   : > { %6131 = vmatmul.msk.bf16.gmra.mxu3 %vm3405_vm9, %v3387_v19  ;;  %v9449_v19 = vpop.permute.xlu2 %3581 }
 0x825   : > { %v3224_v14 = vpop.f32.mrf.mxu2  ;;  %v3676_v12 = vpack.c.bf16 %v3650_v46, %v3649_v42 }
 0x826   : > { %v3225_v57 = vadd.f32 %v9166_v40, %v3224_v14 }
 0x828   : > { %v3367_v6 = vmul.f32 %v9363_v63, %v3225_v57  ;;  %v6303_v63 = vld [vmem:[%s10216_s15 + $0xd8] sm:$0xf]  ;;  %v3850_v42 = vpop.permute.xlu0 %3849 }
 0x82b   : > { %6150 = vmatmul.msk.bf16.gmra.mxu1 %vm3707_vm10, %v3676_v12 }
 0x82d   : > { %v3226_v52 = vpop.f32.mrf.mxu2 }
 0x82e   : > { %v3227_v37 = vadd.f32 %v9166_v40, %v3226_v52 }
 0x830   : > { %v3368_v28 = vmul.f32 %v9366_v7, %v3227_v37  ;;  %v6563_v7 = vld [vmem:[%s10216_s15 + $0xf8] sm:$0xf0]  ;;  %v9467_v20 = vpop.permute.xlu0 %3585 }
 0x831   : > { %v6304_v33 = vor.u32 %v6563_v7, %v6303_v63  ;;  %v6267_v63 = vld [vmem:[%s10216_s15 + $0x90] sm:$0xf]  ;;  %v6554_v7 = vld [vmem:[%s10216_s15 + $0xb0] sm:$0xf0] }
 0x832   : > { %v3388_v15 = vpack.c.bf16 %v3368_v28, %v3367_v6 }
 0x833   : > { %4454 = vmatpush.bf16.msrb.mxu3 %v6304_v33 }
 0x834   : > { %6132 = vmatmul.msk.bf16.gmra.mxu3 %vm3405_vm9, %v3388_v15 }
 0x835   : > { %v3229_v32 = vpop.f32.mrf.mxu2 }
 0x836   : > { %v3230_v38 = vadd.f32 %v9166_v40, %v3229_v32 }
 0x838   : > { %v3369_v0 = vmul.f32 %v9373_v22, %v3230_v38  ;;  %v3312_v22 = vpop.permute.xlu1 %3311 }
 0x83d   : > { %v3231_v44 = vpop.f32.mrf.mxu2 }
 0x83e   : > { %v3232_v18 = vadd.f32 %v9166_v40, %v3231_v44 }
 0x840   : > { %v3370_v5 = vmul.f32 %v9378_v10, %v3232_v18  ;;  %v9428_v13 = vpop.permute.xlu1 %3571 }
 0x842   : > { %v3389_v36 = vpack.c.bf16 %v3370_v5, %v3369_v0  ;;  %v9458_v5 = vpop.permute.xlu2 %3583 }
 0x844   : > { %6133 = vmatmul.msk.bf16.gmra.mxu3 %vm3405_vm9, %v3389_v36 }
 0x845   : > { %v3234_v27 = vpop.f32.mrf.mxu2 }
 0x846   : > { %v3235_v10 = vadd.f32 %v9166_v40, %v3234_v27 }
 0x848   : > { %v3371_v61 = vmul.f32 %v9385_v56, %v3235_v10  ;;  %v9438_v58 = vpop.permute.xlu1 %3577 }
 0x84d   : > { %v3236_v21 = vpop.f32.mrf.mxu2 }
 0x84e   : > { %v3237_v35 = vadd.f32 %v9166_v40, %v3236_v21 }
 0x850   : > { %v3372_v62 = vmul.f32 %v9390_v60, %v3237_v35  ;;  %v9445_v43 = vpop.permute.xlu1 %3579  ;;  %v3856_v35 = vpop.permute.xlu2 %3855 }
 0x852   : > { %v3390_v34 = vpack.c.bf16 %v3372_v62, %v3371_v61 }
 0x854   : > { %6134 = vmatmul.msk.bf16.gmra.mxu3 %vm3405_vm9, %v3390_v34 }
 0x855   : > { %v3239_v9 = vpop.f32.mrf.mxu2 }
 0x856   : > { %v3240_v39 = vadd.f32 %v9166_v40, %v3239_v9 }
 0x858   : > { %v3765_v25 = vpop.f32.mrf.mxu1  ;;  %v3373_v47 = vmul.f32 %v9397_v3, %v3240_v39  ;;  %v3852_v28 = vpop.permute.xlu1 %3851 }
 0x859   : > { %v3766_v50 = vadd.f32 %v9435_v53, %v3765_v25 }
 0x85b   : > { %v3941_v26 = vmul.f32 %v3846_v55, %v3766_v50 }
 0x85d   : > { %v3241_v56 = vpop.f32.mrf.mxu2 }
 0x85e   : > { %v3242_v60 = vadd.f32 %v9166_v40, %v3241_v56 }
 0x860   : > { %v3374_v4 = vmul.f32 %v3308_v24, %v3242_v60  ;;  %v3767_v54 = vpop.f32.mrf.mxu1  ;;  %v9476_v60 = vpop.permute.xlu0 %3587 }
 0x861   : > { %v3768_v8 = vadd.f32 %v9435_v53, %v3767_v54  ;;  %v3858_v54 = vpop.permute.xlu2 %3857 }
 0x862   : > { %v3391_v16 = vpack.c.bf16 %v3374_v4, %v3373_v47 }
 0x863   : > { %v3942_v30 = vmul.f32 %v3848_v41, %v3768_v8 }
 0x864   : > { %6135 = vmatmul.msk.bf16.gmra.mxu3 %vm3405_vm9, %v3391_v16 }
 0x865   : > { %v3973_v17 = vpack.c.bf16 %v3942_v30, %v3941_v26  ;;  %v3244_v31 = vpop.f32.mrf.mxu2 }
 0x866   : > { %v3245_v3 = vadd.f32 %v9166_v40, %v3244_v31 }
 0x867   : > { %v3493_v45 = vpop.f32.mrf.mxu3  ;;  %6177 = vmatmul.msk.bf16.vlgmr.msrb.gmra.mxu2 %vm1627_vm0, %v3973_v17 }
 0x868   : > { %v3770_v2 = vpop.f32.mrf.mxu1  ;;  %v3494_v49 = vadd.f32 %v9321_v29, %v3493_v45  ;;  %v3375_v57 = vmul.f32 %v3310_v1, %v3245_v3  ;;  %v6268_v1 = vor.u32 %v6554_v7, %v6267_v63  ;;  %v3860_v16 = vpop.permute.xlu0 %3859  ;;  %v6231_v63 = vld [vmem:[%s10216_s15 + $0x48] sm:$0xf] }
 0x869   : > { %v3771_v14 = vadd.f32 %v9435_v53, %v3770_v2 }
 0x86a   : > { %v3651_v32 = vmul.f32 %v3568_v48, %v3494_v49  ;;  %4455 = vmatpush.bf16.msrb.mxu3 %v6268_v1  ;;  %v3854_v48 = vpop.permute.xlu1 %3853 }
 0x86b   : > { %v3943_v44 = vmul.f32 %v3850_v42, %v3771_v14  ;;  %v9491_v14 = vpop.permute.xlu2 %3593 }
 0x86d   : > { %v3246_v51 = vpop.f32.mrf.mxu2 }
 0x86e   : > { %v3247_v46 = vadd.f32 %v9166_v40, %v3246_v51 }
 0x86f   : > { %v3495_v12 = vpop.f32.mrf.mxu3 }
 0x870   : > { %v3376_v52 = vmul.f32 %v3312_v22, %v3247_v46  ;;  %v3496_v37 = vadd.f32 %v9321_v29, %v3495_v12  ;;  %v3772_v6 = vpop.f32.mrf.mxu1  ;;  %v3862_v12 = vpop.permute.xlu0 %3861 }
 0x871   : > { %v3773_v15 = vadd.f32 %v9435_v53, %v3772_v6 }
 0x872   : > { %v3392_v24 = vpack.c.bf16 %v3376_v52, %v3375_v57  ;;  %v3652_v38 = vmul.f32 %v3570_v23, %v3496_v37  ;;  %v9479_v47 = vpop.permute.xlu1 %3589 }
 0x873   : > { %v3944_v18 = vmul.f32 %v3852_v28, %v3773_v15 }
 0x874   : > { %v3677_v0 = vpack.c.bf16 %v3652_v38, %v3651_v32  ;;  %6136 = vmatmul.msk.bf16.gmra.mxu3 %vm3405_vm9, %v3392_v24 }
 0x875   : > { %v3974_v40 = vpack.c.bf16 %v3944_v18, %v3943_v44  ;;  %v9500_v18 = vpop.permute.xlu2 %3595 }
 0x876   : > { %6151 = vmatmul.msk.bf16.gmra.mxu1 %vm3707_vm10, %v3677_v0 }
 0x877   : > { %v3498_v36 = vpop.f32.mrf.mxu3  ;;  %6178 = vmatmul.msk.bf16.gmra.mxu2 %vm1627_vm0, %v3974_v40 }
 0x878   : > { %v3775_v33 = vpop.f32.mrf.mxu1  ;;  %v3499_v27 = vadd.f32 %v9321_v29, %v3498_v36 }
 0x879   : > { %v3776_v22 = vadd.f32 %v9435_v53, %v3775_v33 }
 0x87a   : > { %v3653_v62 = vmul.f32 %v9428_v13, %v3499_v27  ;;  %v9488_v51 = vpop.permute.xlu1 %3591 }
 0x87b   : > { %v3945_v9 = vmul.f32 %v3854_v48, %v3776_v22 }
 0x87d   : > { %v3868_v48 = vpop.permute.xlu2 %3867 }
 0x87f   : > { %v3500_v10 = vpop.f32.mrf.mxu3 }
 0x880   : > { %v3501_v23 = vadd.f32 %v9321_v29, %v3500_v10  ;;  %v3777_v21 = vpop.f32.mrf.mxu1 }
 0x881   : > { %v3778_v61 = vadd.f32 %v9435_v53, %v3777_v21 }
 0x882   : > { %v3654_v34 = vmul.f32 %v9431_v11, %v3501_v23  ;;  %v3864_v37 = vpop.permute.xlu1 %3863 }
 0x883   : > { %v3946_v25 = vmul.f32 %v3856_v35, %v3778_v61 }
 0x884   : > { %v3678_v39 = vpack.c.bf16 %v3654_v34, %v3653_v62 }
 0x885   : > { %v3975_v56 = vpack.c.bf16 %v3946_v25, %v3945_v9 }
 0x886   : > { %6152 = vmatmul.msk.bf16.gmra.mxu1 %vm3707_vm10, %v3678_v39 }
 0x887   : > { %v3503_v50 = vpop.f32.mrf.mxu3  ;;  %6179 = vmatmul.msk.bf16.gmra.mxu2 %vm1627_vm0, %v3975_v56 }
 0x888   : > { %v3780_v55 = vpop.f32.mrf.mxu1  ;;  %v3504_v4 = vadd.f32 %v9321_v29, %v3503_v50 }
 0x889   : > { %v3781_v13 = vadd.f32 %v9435_v53, %v3780_v55 }
 0x88a   : > { %v3655_v30 = vmul.f32 %v9433_v59, %v3504_v4  ;;  %v3866_v1 = vpop.permute.xlu1 %3865  ;;  %v6305_v4 = vld [vmem:[%s10216_s15 + $0xfc] sm:$0xf0] }
 0x88b   : > { %v3947_v31 = vmul.f32 %v3858_v54, %v3781_v13 }
 0x88f   : > { %v3505_v11 = vpop.f32.mrf.mxu3 }
 0x890   : > { %v3506_v41 = vadd.f32 %v9321_v29, %v3505_v11  ;;  %v3782_v8 = vpop.f32.mrf.mxu1 }
 0x891   : > { %v3783_v26 = vadd.f32 %v9435_v53, %v3782_v8  ;;  %v6233_v8 = vld [vmem:[%s10216_s15 + $0x6c] sm:$0xf0] }
 0x892   : > { %v3656_v17 = vmul.f32 %v9438_v58, %v3506_v41  ;;  %v6541_v41 = vld [vmem:[%s10216_s15 + $0x4c] sm:$0xf] }
 0x893   : > { %v3948_v45 = vmul.f32 %v3860_v16, %v3783_v26  ;;  %v6236_v26 = vor.u32 %v6541_v41, %v6233_v8 }
 0x894   : > { %v3679_v2 = vpack.c.bf16 %v3656_v17, %v3655_v30 }
 0x895   : > { %v3976_v3 = vpack.c.bf16 %v3948_v45, %v3947_v31  ;;  %v6195_v31 = vld [vmem:[%s10216_s15] sm:$0xf]  ;;  %v6536_v45 = vld [vmem:[%s10216_s15 + $0x20] sm:$0xf0] }
 0x896   : > { %6153 = vmatmul.msk.bf16.gmra.mxu1 %vm3707_vm10, %v3679_v2  ;;  %v6532_v2 = vld [vmem:[%s10216_s15 + $0x4] sm:$0xf] }
 0x897   : > { %v3508_v49 = vpop.f32.mrf.mxu3  ;;  %6180 = vmatmul.msk.bf16.gmra.mxu2 %vm1627_vm0, %v3976_v3 }
 0x898   : > { %v3785_v46 = vpop.f32.mrf.mxu1  ;;  %v3509_v42 = vadd.f32 %v9321_v29, %v3508_v49 }
 0x899   : > { %v3786_v59 = vadd.f32 %v9435_v53, %v3785_v46  ;;  %v6196_v46 = vor.u32 %v6536_v45, %v6195_v31 }
 0x89a   : > { %v3657_v28 = vmul.f32 %v9445_v43, %v3509_v42  ;;  %v6545_v43 = vld [vmem:[%s10216_s15 + $0x68] sm:$0xf0]  ;;  %v6197_v42 = vld [vmem:[%s10216_s15 + $0x24] sm:$0xf0] }
 0x89b   : > { %v3949_v32 = vmul.f32 %v3862_v12, %v3786_v59  ;;  %v6200_v59 = vor.u32 %v6532_v2, %v6197_v42 }
 0x89f   : > { %v3510_v58 = vpop.f32.mrf.mxu3 }
 0x8a0   : > { %v3511_v57 = vadd.f32 %v9321_v29, %v3510_v58  ;;  %v3787_v52 = vpop.f32.mrf.mxu1 }
 0x8a1   : > { %v3788_v6 = vadd.f32 %v9435_v53, %v3787_v52 }
 0x8a2   : > { %v3658_v15 = vmul.f32 %v9449_v19, %v3511_v57  ;;  %v6232_v19 = vor.u32 %v6545_v43, %v6231_v63  ;;  %v6239_v63 = vld [vmem:[%s10216_s15 + $0x50] sm:$0xf]  ;;  %v6546_v43 = vld [vmem:[%s10216_s15 + $0x70] sm:$0xf0] }
 0x8a3   : > { %v3950_v24 = vmul.f32 %v3864_v37, %v3788_v6  ;;  %v3598_v37 = vpop.permute.xlu0 %3597 }
 0x8a4   : > { %v3680_v38 = vpack.c.bf16 %v3658_v15, %v3657_v28  ;;  %4456 = vmatpush.bf16.msrb.mxu3 %v6232_v19  ;;  %v6311_v15 = vld [vmem:[%s10216_s15 + $0xe0] sm:$0xf]  ;;  %v6240_v19 = vor.u32 %v6546_v43, %v6239_v63 }
 0x8a5   : > { %v3977_v44 = vpack.c.bf16 %v3950_v24, %v3949_v32  ;;  %v6564_v32 = vld [vmem:[%s10216_s15 + $0x100] sm:$0xf0] }
 0x8a6   : > { %6154 = vmatmul.msk.bf16.gmra.mxu1 %vm3707_vm10, %v3680_v38  ;;  %v6312_v24 = vor.u32 %v6564_v32, %v6311_v15 }
 0x8a7   : > { %v3513_v0 = vpop.f32.mrf.mxu3  ;;  %6181 = vmatmul.msk.bf16.gmra.mxu2 %vm1627_vm0, %v3977_v44  ;;  %v6275_v44 = vld [vmem:[%s10216_s15 + $0x98] sm:$0xf] }
 0x8a8   : > { %v3790_v40 = vpop.f32.mrf.mxu1  ;;  %v3514_v7 = vadd.f32 %v9321_v29, %v3513_v0  ;;  %4457 = vmatpush.bf16.msrb.mxu3 %v6196_v46  ;;  %4632 = vmatpush.bf16.msra.mxu1 %v6312_v24  ;;  %v6560_v24 = vld [vmem:[%s10216_s15 + $0xe4] sm:$0xf] }
 0x8a9   : > { %v3791_v36 = vadd.f32 %v9435_v53, %v3790_v40 }
 0x8aa   : > { %v3659_v23 = vmul.f32 %v9458_v5, %v3514_v7 }
 0x8ab   : > { %v3951_v35 = vmul.f32 %v3866_v1, %v3791_v36  ;;  %v3600_v36 = vpop.permute.xlu0 %3599  ;;  %v9580_v1 = vld [vmem:[#allocation21] ss:$0 sm:$0xff] }
 0x8af   : > { %v3515_v33 = vpop.f32.mrf.mxu3 }
 0x8b0   : > { %v3516_v27 = vadd.f32 %v9321_v29, %v3515_v33  ;;  %v3792_v22 = vpop.f32.mrf.mxu1 }
 0x8b1   : > { %v3793_v10 = vadd.f32 %v9435_v53, %v3792_v22 }
 0x8b2   : > { %v3660_v21 = vmul.f32 %v9467_v20, %v3516_v27  ;;  %v6559_v20 = vld [vmem:[%s10216_s15 + $0xdc] sm:$0xf]  ;;  %v3602_v27 = vpop.permute.xlu1 %3601 }
 0x8b3   : > { %v3952_v61 = vmul.f32 %v3868_v48, %v3793_v10  ;;  %v6308_v13 = vor.u32 %v6559_v20, %v6305_v4  ;;  %v6203_v48 = vld [vmem:[%s10216_s15 + $0x8] sm:$0xf]  ;;  %v6537_v10 = vld [vmem:[%s10216_s15 + $0x28] sm:$0xf0]  ;;  %v3872_v4 = vpop.permute.xlu0 %3871 }
 0x8b4   : > { %v3681_v62 = vpack.c.bf16 %v3660_v21, %v3659_v23  ;;  %v6204_v23 = vor.u32 %v6537_v10, %v6203_v48 }
 0x8b5   : > { %v3978_v34 = vpack.c.bf16 %v3952_v61, %v3951_v35  ;;  %4543 = vmatpush.bf16.msra.mxu0 %v6308_v13 }
 0x8b6   : > { %6155 = vmatmul.msk.bf16.gmra.mxu1 %vm3707_vm10, %v3681_v62 }
 0x8b7   : > { %v3518_v9 = vpop.f32.mrf.mxu3  ;;  %6182 = vmatmul.msk.bf16.gmra.mxu2 %vm1627_vm0, %v3978_v34 }
 0x8b8   : > { %v3519_v25 = vadd.f32 %v9321_v29, %v3518_v9 }
 0x8ba   : > { %v3661_v50 = vmul.f32 %v9476_v60, %v3519_v25  ;;  %v6550_v60 = vld [vmem:[%s10216_s15 + $0x94] sm:$0xf] }
 0x8bb   : > { %v3874_v42 = vpop.permute.xlu0 %3873 }
 0x8bf   : > { %v3520_v39 = vpop.f32.mrf.mxu3 }
 0x8c0   : > { %v3521_v56 = vadd.f32 %v9321_v29, %v3520_v39 }
 0x8c2   : > { %v3662_v5 = vmul.f32 %v9479_v47, %v3521_v56  ;;  %v6269_v47 = vld [vmem:[%s10216_s15 + $0xb4] sm:$0xf0]  ;;  %v3870_v56 = vpop.permute.xlu2 %3869 }
 0x8c3   : > { %v6272_v11 = vor.u32 %v6550_v60, %v6269_v47  ;;  %v3604_v47 = vpop.permute.xlu1 %3603 }
 0x8c4   : > { %v3682_v55 = vpack.c.bf16 %v3662_v5, %v3661_v50 }
 0x8c5   : > { %4544 = vmatpush.bf16.msra.mxu0 %v6272_v11 }
 0x8c6   : > { %6156 = vmatmul.msk.bf16.gmra.mxu1 %vm3707_vm10, %v3682_v55 }
 0x8c7   : > { %v3523_v54 = vpop.f32.mrf.mxu3 }
 0x8c8   : > { %v3524_v16 = vadd.f32 %v9321_v29, %v3523_v54 }
 0x8c9   : > { %4545 = vmatpush.bf16.msra.mxu0 %v6236_v26 }
 0x8ca   : > { %v3663_v3 = vmul.f32 %v9488_v51, %v3524_v16  ;;  %v3606_v8 = vpop.permute.xlu2 %3605 }
 0x8cd   : > { %4546 = vmatpush.bf16.msra.mxu0 %v6200_v59 }
 0x8cf   : > { %v3525_v30 = vpop.f32.mrf.mxu3 }
 0x8d0   : > { %v3526_v17 = vadd.f32 %v9321_v29, %v3525_v30 }
 0x8d2   : > { %v3664_v49 = vmul.f32 %v9491_v14, %v3526_v17  ;;  %v3878_v43 = vpop.permute.xlu2 %3877 }
 0x8d4   : > { %v3683_v12 = vpack.c.bf16 %v3664_v49, %v3663_v3 }
 0x8d6   : > { %6157 = vmatmul.msk.bf16.gmra.mxu1 %vm3707_vm10, %v3683_v12 }
 0x8d7   : > { %v3528_v58 = vpop.f32.mrf.mxu3 }
 0x8d8   : > { %v3529_v57 = vadd.f32 %v9321_v29, %v3528_v58  ;;  %v3876_v58 = vpop.permute.xlu1 %3875 }
 0x8da   : > { %v3665_v14 = vmul.f32 %v9500_v18, %v3529_v57  ;;  %v6555_v18 = vld [vmem:[%s10216_s15 + $0xb8] sm:$0xf0] }
 0x8db   : > { %v6276_v0 = vor.u32 %v6555_v18, %v6275_v44  ;;  %v6319_v44 = vld [vmem:[%s10216_s15 + $0xe8] sm:$0xf] }
 0x8dd   : > { %4633 = vmatpush.bf16.msra.mxu1 %v6276_v0  ;;  %v6565_v0 = vld [vmem:[%s10216_s15 + $0x108] sm:$0xf0] }
 0x8df   : > { %v3530_v52 = vpop.f32.mrf.mxu3 }
 0x8e0   : > { %v3531_v51 = vadd.f32 %v9321_v29, %v3530_v52 }
 0x8e1   : > { %4634 = vmatpush.bf16.msra.mxu1 %v6240_v19 }
 0x8e2   : > { %v3666_v6 = vmul.f32 %v3598_v37, %v3531_v51 }
 0x8e4   : > { %v3684_v28 = vpack.c.bf16 %v3666_v6, %v3665_v14 }
 0x8e5   : > { %4635 = vmatpush.bf16.msra.mxu1 %v6204_v23 }
 0x8e6   : > { %6158 = vmatmul.msk.bf16.gmra.mxu1 %vm3707_vm10, %v3684_v28 }
 0x8e7   : > { %v3533_v38 = vpop.f32.mrf.mxu3 }
 0x8e8   : > { %v3534_v7 = vadd.f32 %v9321_v29, %v3533_v38  ;;  %v6313_v38 = vld [vmem:[%s10216_s15 + $0x104] sm:$0xf0] }
 0x8e9   : > { %v6316_v18 = vor.u32 %v6560_v24, %v6313_v38 }
 0x8ea   : > { %v4082_v40 = vpop.f32.mrf.mxu2  ;;  %v3667_v21 = vmul.f32 %v3600_v36, %v3534_v7  ;;  %v3880_v36 = vpop.permute.xlu0 %3879 }
 0x8eb   : > { %v4083_v62 = vadd.f32 %v9580_v1, %v4082_v40  ;;  %v6320_v40 = vor.u32 %v6565_v0, %v6319_v44  ;;  %4721 = vmatpush.bf16.msra.mxu2 %v6316_v18  ;;  %v6556_v44 = vld [vmem:[%s10216_s15 + $0xc0] sm:$0xf0] }
 0x8ed   : > { %4810 = vmatpush.bf16.msra.mxu3 %v6320_v40 }
 0x8ef   : > { %v3535_v33 = vpop.f32.mrf.mxu3 }
 0x8f0   : > { %v3536_v22 = vadd.f32 %v9321_v29, %v3535_v33 }
 0x8f2   : > { %v3668_v35 = vmul.f32 %v3602_v27, %v3536_v22  ;;  %v4084_v61 = vpop.f32.mrf.mxu2 }
 0x8f3   : > { %v4085_v34 = vadd.f32 %v9580_v1, %v4084_v61  ;;  %v3795_v9 = vpop.f32.mrf.mxu1 }
 0x8f4   : > { %v3685_v25 = vpack.c.bf16 %v3668_v35, %v3667_v21  ;;  %v3796_v5 = vadd.f32 %v9435_v53, %v3795_v9 }
 0x8f5   : > { %v9591_v39 = vpack.c.bf16 %v4085_v34, %v4083_v62  ;;  %v3882_v34 = vpop.permute.xlu1 %3881 }
 0x8f6   : > { %6159 = vmatmul.msk.bf16.gmra.mxu1 %vm3707_vm10, %v3685_v25  ;;  %v3953_v54 = vmul.f32 %v3870_v56, %v3796_v5  ;;  %v3884_v56 = vpop.permute.xlu2 %3883 }
 0x8f7   : > { %v3538_v50 = vpop.f32.mrf.mxu3  ;;  %6337 = vmatmul.msk.bf16.vlgmr.msrb.gmra.mxu3 %vm1627_vm0, %v9591_v39  ;;  %6353 = vmatmul.msk.bf16.vlgmr.msra.gmra.mxu0 %vm1627_vm0, %v9591_v39 }
 0x8f8   : > { %v3539_v60 = vadd.f32 %v9321_v29, %v3538_v50 }
 0x8fa   : > { %v4087_v55 = vpop.f32.mrf.mxu2  ;;  %v3669_v30 = vmul.f32 %v3604_v47, %v3539_v60 }
 0x8fb   : > { %v3797_v20 = vpop.f32.mrf.mxu1  ;;  %v4088_v45 = vadd.f32 %v9580_v1, %v4087_v55 }
 0x8fc   : > { %v3798_v13 = vadd.f32 %v9435_v53, %v3797_v20 }
 0x8fe   : > { %v3954_v11 = vmul.f32 %v3872_v4, %v3798_v13 }
 0x8ff   : > { %v3540_v41 = vpop.f32.mrf.mxu3 }
 0x900   : > { %v3979_v16 = vpack.c.bf16 %v3954_v11, %v3953_v54  ;;  %v3541_v26 = vadd.f32 %v9321_v29, %v3540_v41  ;;  %v3886_v41 = vpop.permute.xlu0 %3885 }
 0x902   : > { %v3670_v17 = vmul.f32 %v3606_v8, %v3541_v26  ;;  %v4089_v31 = vpop.f32.mrf.mxu2  ;;  %6183 = vmatmul.msk.bf16.gmra.mxu2 %vm1627_vm0, %v3979_v16  ;;  %v3888_v26 = vpop.permute.xlu1 %3887 }
 0x903   : > { %v4090_v2 = vadd.f32 %v9580_v1, %v4089_v31  ;;  %v3800_v3 = vpop.f32.mrf.mxu1 }
 0x904   : > { %v3686_v49 = vpack.c.bf16 %v3670_v17, %v3669_v30  ;;  %v3801_v29 = vadd.f32 %v9435_v53, %v3800_v3 }
 0x905   : > { %v9605_v46 = vpack.c.bf16 %v4090_v2, %v4088_v45 }
 0x906   : > { %6160 = vmatmul.msk.bf16.gmra.mxu1 %vm3707_vm10, %v3686_v49  ;;  %v3955_v52 = vmul.f32 %v3874_v42, %v3801_v29 }
 0x907   : > { %6338 = vmatmul.msk.bf16.gmra.mxu3 %vm1627_vm0, %v9605_v46  ;;  %6354 = vmatmul.msk.bf16.gmra.mxu0 %vm1627_vm0, %v9605_v46 }
 0x90a   : > { %v4092_v59 = vpop.f32.mrf.mxu2  ;;  %v3894_v40 = vpop.permute.xlu1 %3893 }
 0x90b   : > { %v3802_v12 = vpop.f32.mrf.mxu1  ;;  %v4093_v6 = vadd.f32 %v9580_v1, %v4092_v59 }
 0x90c   : > { %v3803_v57 = vadd.f32 %v9435_v53, %v3802_v12  ;;  %v3890_v12 = vpop.permute.xlu2 %3889 }
 0x90e   : > { %v3956_v37 = vmul.f32 %v3876_v58, %v3803_v57  ;;  %v3892_v57 = vpop.permute.xlu0 %3891 }
 0x910   : > { %v3980_v51 = vpack.c.bf16 %v3956_v37, %v3955_v52 }
 0x912   : > { %v4094_v14 = vpop.f32.mrf.mxu2  ;;  %6184 = vmatmul.msk.bf16.gmra.mxu2 %vm1627_vm0, %v3980_v51 }
 0x913   : > { %v4095_v28 = vadd.f32 %v9580_v1, %v4094_v14  ;;  %v3805_v15 = vpop.f32.mrf.mxu1 }
 0x914   : > { %v3806_v63 = vadd.f32 %v9435_v53, %v3805_v15  ;;  %v6283_v15 = vld [vmem:[%s10216_s15 + $0xa0] sm:$0xf] }
 0x915   : > { %v9617_v32 = vpack.c.bf16 %v4095_v28, %v4093_v6  ;;  %v6551_v6 = vld [vmem:[%s10216_s15 + $0x9c] sm:$0xf]  ;;  %v6277_v28 = vld [vmem:[%s10216_s15 + $0xbc] sm:$0xf0]  ;;  %v6284_v18 = vor.u32 %v6556_v44, %v6283_v15  ;;  %v6247_v44 = vld [vmem:[%s10216_s15 + $0x58] sm:$0xf] }
 0x916   : > { %6369 = vmatmul.msk.bf16.vlgmr.msra.gmra.mxu1 %vm1627_vm0, %v9591_v39  ;;  %v3957_v27 = vmul.f32 %v3878_v43, %v3806_v63  ;;  %v6280_v38 = vor.u32 %v6551_v6, %v6277_v28  ;;  %v3896_v43 = vpop.permute.xlu2 %3895 }
 0x917   : > { %6339 = vmatmul.msk.bf16.gmra.mxu3 %vm1627_vm0, %v9617_v32  ;;  %6355 = vmatmul.msk.bf16.gmra.mxu0 %vm1627_vm0, %v9617_v32 }
 0x918   : > { %4722 = vmatpush.bf16.msra.mxu2 %v6280_v38  ;;  %4811 = vmatpush.bf16.msra.mxu3 %v6284_v18  ;;  %v6547_v18 = vld [vmem:[%s10216_s15 + $0x78] sm:$0xf0] }
 0x91a   : > { %v4097_v19 = vpop.f32.mrf.mxu2 }
 0x91b   : > { %v3807_v7 = vpop.f32.mrf.mxu1  ;;  %v4098_v23 = vadd.f32 %v9580_v1, %v4097_v19 }
 0x91c   : > { %v3808_v33 = vadd.f32 %v9435_v53, %v3807_v7 }
 0x91e   : > { %v3958_v22 = vmul.f32 %v3880_v36, %v3808_v33 }
 0x920   : > { %v3981_v48 = vpack.c.bf16 %v3958_v22, %v3957_v27 }
 0x922   : > { %v4099_v10 = vpop.f32.mrf.mxu2  ;;  %6185 = vmatmul.msk.bf16.gmra.mxu2 %vm1627_vm0, %v3981_v48  ;;  %v3898_v48 = vpop.permute.xlu0 %3897 }
 0x923   : > { %v4100_v21 = vadd.f32 %v9580_v1, %v4099_v10  ;;  %v3810_v35 = vpop.f32.mrf.mxu1 }
 0x924   : > { %v3811_v62 = vadd.f32 %v9435_v53, %v3810_v35 }
 0x925   : > { %v9642_v61 = vpack.c.bf16 %v4100_v21, %v4098_v23  ;;  %v3900_v23 = vpop.permute.xlu1 %3899 }
 0x926   : > { %6370 = vmatmul.msk.bf16.gmra.mxu1 %vm1627_vm0, %v9605_v46  ;;  %v3959_v5 = vmul.f32 %v3882_v34, %v3811_v62 }
 0x927   : > { %6340 = vmatmul.msk.bf16.gmra.mxu3 %vm1627_vm0, %v9642_v61  ;;  %6356 = vmatmul.msk.bf16.gmra.mxu0 %vm1627_vm0, %v9642_v61 }
 0x92a   : > { %v4102_v9 = vpop.f32.mrf.mxu2 }
 0x92b   : > { %v3812_v25 = vpop.f32.mrf.mxu1  ;;  %v4103_v13 = vadd.f32 %v9580_v1, %v4102_v9 }
 0x92c   : > { %v3813_v50 = vadd.f32 %v9435_v53, %v3812_v25 }
 0x92e   : > { %v3960_v55 = vmul.f32 %v3884_v56, %v3813_v50  ;;  %v6542_v56 = vld [vmem:[%s10216_s15 + $0x54] sm:$0xf]  ;;  %v6241_v50 = vld [vmem:[%s10216_s15 + $0x74] sm:$0xf0] }
 0x930   : > { %v3982_v20 = vpack.c.bf16 %v3960_v55, %v3959_v5  ;;  %v3902_v55 = vpop.permute.xlu2 %3901 }
 0x932   : > { %v4104_v4 = vpop.f32.mrf.mxu2  ;;  %6186 = vmatmul.msk.bf16.gmra.mxu2 %vm1627_vm0, %v3982_v20 }
 0x933   : > { %v4105_v54 = vadd.f32 %v9580_v1, %v4104_v4  ;;  %v3815_v60 = vpop.f32.mrf.mxu1  ;;  %v6244_v4 = vor.u32 %v6542_v56, %v6241_v50 }
 0x934   : > { %v3816_v11 = vadd.f32 %v9435_v53, %v3815_v60 }
 0x935   : > { %v9655_v47 = vpack.c.bf16 %v4105_v54, %v4103_v13  ;;  %v3904_v54 = vpop.permute.xlu0 %3903  ;;  %4723 = vmatpush.bf16.msra.mxu2 %v6244_v4 }
 0x936   : > { %6371 = vmatmul.msk.bf16.gmra.mxu1 %vm1627_vm0, %v9617_v32  ;;  %v3961_v17 = vmul.f32 %v3886_v41, %v3816_v11  ;;  %v6533_v41 = vld [vmem:[%s10216_s15 + $0xc] sm:$0xf] }
 0x937   : > { %6341 = vmatmul.msk.bf16.gmra.mxu3 %vm1627_vm0, %v9655_v47  ;;  %6357 = vmatmul.msk.bf16.gmra.mxu0 %vm1627_vm0, %v9655_v47 }
 0x93a   : > { %v4107_v8 = vpop.f32.mrf.mxu2 }
 0x93b   : > { %v3817_v16 = vpop.f32.mrf.mxu1  ;;  %v4108_v3 = vadd.f32 %v9580_v1, %v4107_v8  ;;  %v6205_v8 = vld [vmem:[%s10216_s15 + $0x2c] sm:$0xf0] }
 0x93c   : > { %v3818_v30 = vadd.f32 %v9435_v53, %v3817_v16 }
 0x93e   : > { %v3962_v31 = vmul.f32 %v3888_v26, %v3818_v30  ;;  %v6208_v30 = vor.u32 %v6533_v41, %v6205_v8 }
 0x940   : > { %v3983_v45 = vpack.c.bf16 %v3962_v31, %v3961_v17  ;;  %4724 = vmatpush.bf16.msra.mxu2 %v6208_v30 }
 0x942   : > { %v4109_v2 = vpop.f32.mrf.mxu2  ;;  %6187 = vmatmul.msk.bf16.gmra.mxu2 %vm1627_vm0, %v3983_v45 }
 0x943   : > { %v4110_v49 = vadd.f32 %v9580_v1, %v4109_v2  ;;  %v3820_v29 = vpop.f32.mrf.mxu1 }
 0x944   : > { %v3821_v59 = vadd.f32 %v9435_v53, %v3820_v29  ;;  %v3906_v29 = vpop.permute.xlu1 %3905 }
 0x945   : > { %v9668_v42 = vpack.c.bf16 %v4110_v49, %v4108_v3 }
 0x946   : > { %6372 = vmatmul.msk.bf16.gmra.mxu1 %vm1627_vm0, %v9642_v61  ;;  %v3963_v37 = vmul.f32 %v3890_v12, %v3821_v59 }
 0x947   : > { %6342 = vmatmul.msk.bf16.gmra.mxu3 %vm1627_vm0, %v9668_v42  ;;  %6358 = vmatmul.msk.bf16.gmra.mxu0 %vm1627_vm0, %v9668_v42 }
 0x94b   : > { %v3822_v58 = vpop.f32.mrf.mxu1 }
 0x94c   : > { %v3823_v52 = vadd.f32 %v9435_v53, %v3822_v58  ;;  %v3908_v58 = vpop.permute.xlu2 %3907 }
 0x94e   : > { %v3964_v51 = vmul.f32 %v3892_v57, %v3823_v52 }
 0x950   : > { %v3984_v14 = vpack.c.bf16 %v3964_v51, %v3963_v37 }
 0x952   : > { %6188 = vmatmul.msk.bf16.gmra.mxu2 %vm1627_vm0, %v3984_v14 }
 0x953   : > { %v3825_v24 = vpop.f32.mrf.mxu1 }
 0x954   : > { %v3826_v0 = vadd.f32 %v9435_v53, %v3825_v24 }
 0x956   : > { %6373 = vmatmul.msk.bf16.gmra.mxu1 %vm1627_vm0, %v9655_v47  ;;  %v3965_v7 = vmul.f32 %v3894_v40, %v3826_v0  ;;  %v6248_v40 = vor.u32 %v6547_v18, %v6247_v44 }
 0x958   : > { %4812 = vmatpush.bf16.msra.mxu3 %v6248_v40 }
 0x95b   : > { %v3827_v63 = vpop.f32.mrf.mxu1 }
 0x95c   : > { %v3828_v19 = vadd.f32 %v9435_v53, %v3827_v63 }
 0x95e   : > { %v3966_v36 = vmul.f32 %v3896_v43, %v3828_v19 }
 0x960   : > { %v3985_v33 = vpack.c.bf16 %v3966_v36, %v3965_v7 }
 0x962   : > { %6189 = vmatmul.msk.bf16.gmra.mxu2 %vm1627_vm0, %v3985_v33 }
 0x963   : > { %v3830_v27 = vpop.f32.mrf.mxu1 }
 0x964   : > { %v3831_v22 = vadd.f32 %v9435_v53, %v3830_v27 }
 0x966   : > { %6374 = vmatmul.msk.bf16.gmra.mxu1 %vm1627_vm0, %v9668_v42  ;;  %v3967_v35 = vmul.f32 %v3898_v48, %v3831_v22 }
 0x96b   : > { %v3832_v10 = vpop.f32.mrf.mxu1 }
 0x96c   : > { %v3833_v21 = vadd.f32 %v9435_v53, %v3832_v10 }
 0x96e   : > { %v3968_v62 = vmul.f32 %v3900_v23, %v3833_v21 }
 0x970   : > { %v3986_v34 = vpack.c.bf16 %v3968_v62, %v3967_v35 }
 0x972   : > { %6190 = vmatmul.msk.bf16.gmra.mxu2 %vm1627_vm0, %v3986_v34 }
 0x973   : > { %v3835_v9 = vpop.f32.mrf.mxu1 }
 0x974   : > { %v4548_v25 = vpop.f32.mrf.mxu0  ;;  %v3836_v5 = vadd.f32 %v9435_v53, %v3835_v9 }
 0x975   : > { %5253 = vst [vmem:[#allocation4 + $0x80] sm:$0xff] %v4548_v25 }
 0x976   : > { %v3969_v16 = vmul.f32 %v3902_v55, %v3836_v5 }
 0x97a   : > { %v4459_v20 = vpop.f32.mrf.mxu3 }
 0x97b   : > { %5252 = vst [vmem:[#allocation4 + $0x78] sm:$0xff] %v4459_v20  ;;  %v3837_v13 = vpop.f32.mrf.mxu1 }
 0x97c   : > { %v3838_v60 = vadd.f32 %v9435_v53, %v3837_v13  ;;  %v4550_v11 = vpop.f32.mrf.mxu0 }
 0x97d   : > { %5256 = vst [vmem:[#allocation4 + $0x98] sm:$0xff] %v4550_v11 }
 0x97e   : > { %v3970_v26 = vmul.f32 %v3904_v54, %v3838_v60 }
 0x980   : > { %v3987_v17 = vpack.c.bf16 %v3970_v26, %v3969_v16 }
 0x982   : > { %6191 = vmatmul.msk.bf16.gmra.mxu2 %vm1627_vm0, %v3987_v17  ;;  %v4461_v31 = vpop.f32.mrf.mxu3 }
 0x983   : > { %5255 = vst [vmem:[#allocation4 + $0x90] sm:$0xff] %v4461_v31  ;;  %v3840_v45 = vpop.f32.mrf.mxu1 }
 0x984   : > { %v4553_v2 = vpop.f32.mrf.mxu0  ;;  %v3841_v49 = vadd.f32 %v9435_v53, %v3840_v45 }
 0x985   : > { %5259 = vst [vmem:[#allocation4 + $0xe0] sm:$0xff] %v4553_v2  ;;  %v4112_v3 = vpop.f32.mrf.mxu2 }
 0x986   : > { %v3971_v51 = vmul.f32 %v3906_v29, %v3841_v49  ;;  %v4113_v14 = vadd.f32 %v9580_v1, %v4112_v3 }
 0x98a   : > { %v4464_v59 = vpop.f32.mrf.mxu3 }
 0x98b   : > { %5258 = vst [vmem:[#allocation4 + $0xd8] sm:$0xff] %v4464_v59  ;;  %v3842_v12 = vpop.f32.mrf.mxu1 }
 0x98c   : > { %v3843_v57 = vadd.f32 %v9435_v53, %v3842_v12  ;;  %v4555_v52 = vpop.f32.mrf.mxu0 }
 0x98d   : > { %5262 = vst [vmem:[#allocation4 + $0xf8] sm:$0xff] %v4555_v52  ;;  %v4114_v37 = vpop.f32.mrf.mxu2  ;;  %v6211_v52 = vld [vmem:[%s10216_s15 + $0x10] sm:$0xf] }
 0x98e   : > { %v3972_v6 = vmul.f32 %v3908_v58, %v3843_v57  ;;  %v4115_v28 = vadd.f32 %v9580_v1, %v4114_v37  ;;  %v6538_v37 = vld [vmem:[%s10216_s15 + $0x30] sm:$0xf0] }
 0x990   : > { %v3988_v15 = vpack.c.bf16 %v3972_v6, %v3971_v51  ;;  %v9720_v24 = vpack.c.bf16 %v4115_v28, %v4113_v14  ;;  %v6212_v51 = vor.u32 %v6538_v37, %v6211_v52  ;;  %v6562_v52 = vld [vmem:[%s10216_s15 + $0xf4] sm:$0xf]  ;;  %v6329_v37 = vld [vmem:[%s10216_s15 + $0x114] sm:$0xf0] }
 0x992   : > { %6192 = vmatmul.msk.bf16.gmra.mxu2 %vm1627_vm0, %v3988_v15  ;;  %v4466_v38 = vpop.f32.mrf.mxu3  ;;  %6343 = vmatmul.msk.bf16.gmra.mxu3 %vm1627_vm0, %v9720_v24 }
 0x993   : > { %5261 = vst [vmem:[#allocation4 + $0xf0] sm:$0xff] %v4466_v38  ;;  %6359 = vmatmul.msk.bf16.gmra.mxu0 %vm1627_vm0, %v9720_v24  ;;  %6375 = vmatmul.msk.bf16.gmra.mxu1 %vm1627_vm0, %v9720_v24  ;;  %v4637_v53 = vpop.f32.mrf.mxu1 }
 0x994   : > { %5254 = vst [vmem:[#allocation4 + $0x88] sm:$0xff] %v4637_v53  ;;  %v4558_v0 = vpop.f32.mrf.mxu0  ;;  %4813 = vmatpush.bf16.msra.mxu3 %v6212_v51  ;;  %v6335_v51 = vld [vmem:[%s10216_s15 + $0xf8] sm:$0xf] }
 0x995   : > { %5265 = vst [vmem:[#allocation4 + $0x140] sm:$0xff] %v4558_v0  ;;  %v4117_v63 = vpop.f32.mrf.mxu2 }
 0x996   : > { %v4118_v33 = vadd.f32 %v9580_v1, %v4117_v63 }
 0x99a   : > { %v4469_v43 = vpop.f32.mrf.mxu3 }
 0x99b   : > { %5264 = vst [vmem:[#allocation4 + $0x138] sm:$0xff] %v4469_v43  ;;  %v4639_v19 = vpop.f32.mrf.mxu1 }
 0x99c   : > { %5257 = vst [vmem:[#allocation4 + $0xa0] sm:$0xff] %v4639_v19  ;;  %v4560_v7 = vpop.f32.mrf.mxu0 }
 0x99d   : > { %5268 = vst [vmem:[#allocation4 + $0x158] sm:$0xff] %v4560_v7  ;;  %v4119_v36 = vpop.f32.mrf.mxu2 }
 0x99e   : > { %v4120_v27 = vadd.f32 %v9580_v1, %v4119_v36 }
 0x9a0   : > { %v9737_v22 = vpack.c.bf16 %v4120_v27, %v4118_v33 }
 0x9a2   : > { %v4471_v48 = vpop.f32.mrf.mxu3  ;;  %6344 = vmatmul.msk.bf16.gmra.mxu3 %vm1627_vm0, %v9737_v22  ;;  %6385 = vmatmul.msk.bf16.vlgmr.msra.gmra.mxu2 %vm1627_vm0, %v9591_v39 }
 0x9a3   : > { %5267 = vst [vmem:[#allocation4 + $0x150] sm:$0xff] %v4471_v48  ;;  %6360 = vmatmul.msk.bf16.gmra.mxu0 %vm1627_vm0, %v9737_v22  ;;  %6376 = vmatmul.msk.bf16.gmra.mxu1 %vm1627_vm0, %v9737_v22  ;;  %v4642_v10 = vpop.f32.mrf.mxu1 }
 0x9a4   : > { %5260 = vst [vmem:[#allocation4 + $0xe8] sm:$0xff] %v4642_v10  ;;  %v4563_v23 = vpop.f32.mrf.mxu0  ;;  %v6561_v10 = vld [vmem:[%s10216_s15 + $0xec] sm:$0xf] }
 0x9a5   : > { %5271 = vst [vmem:[#allocation4 + $0x1a0] sm:$0xff] %v4563_v23  ;;  %v4122_v21 = vpop.f32.mrf.mxu2  ;;  %v6321_v23 = vld [vmem:[%s10216_s15 + $0x10c] sm:$0xf0] }
 0x9a6   : > { %v4123_v25 = vadd.f32 %v9580_v1, %v4122_v21  ;;  %v6327_v21 = vld [vmem:[%s10216_s15 + $0xf0] sm:$0xf] }
 0x9aa   : > { %v4474_v35 = vpop.f32.mrf.mxu3 }
 0x9ab   : > { %5270 = vst [vmem:[#allocation4 + $0x198] sm:$0xff] %v4474_v35  ;;  %v4644_v62 = vpop.f32.mrf.mxu1  ;;  %v6324_v35 = vor.u32 %v6561_v10, %v6321_v23 }
 0x9ac   : > { %5263 = vst [vmem:[#allocation4 + $0x100] sm:$0xff] %v4644_v62  ;;  %v4565_v34 = vpop.f32.mrf.mxu0  ;;  %v6566_v62 = vld [vmem:[%s10216_s15 + $0x110] sm:$0xf0] }
 0x9ad   : > { %5274 = vst [vmem:[#allocation4 + $0x1b8] sm:$0xff] %v4565_v34  ;;  %v4124_v9 = vpop.f32.mrf.mxu2  ;;  %v6328_v34 = vor.u32 %v6566_v62, %v6327_v21  ;;  %4899 = vmatpush.bf16.msrb.mxu0 %v6324_v35 }
 0x9ae   : > { %v4125_v56 = vadd.f32 %v9580_v1, %v4124_v9 }
 0x9af   : > { %4988 = vmatpush.bf16.msrb.mxu1 %v6328_v34 }
 0x9b0   : > { %v9749_v50 = vpack.c.bf16 %v4125_v56, %v4123_v25  ;;  %v6552_v25 = vld [vmem:[%s10216_s15 + $0xa4] sm:$0xf]  ;;  %v6285_v56 = vld [vmem:[%s10216_s15 + $0xc4] sm:$0xf0] }
 0x9b2   : > { %v4476_v5 = vpop.f32.mrf.mxu3  ;;  %6345 = vmatmul.msk.bf16.gmra.mxu3 %vm1627_vm0, %v9749_v50  ;;  %6386 = vmatmul.msk.bf16.gmra.mxu2 %vm1627_vm0, %v9605_v46 }
 0x9b3   : > { %5273 = vst [vmem:[#allocation4 + $0x1b0] sm:$0xff] %v4476_v5  ;;  %6361 = vmatmul.msk.bf16.gmra.mxu0 %vm1627_vm0, %v9749_v50  ;;  %6377 = vmatmul.msk.bf16.gmra.mxu1 %vm1627_vm0, %v9749_v50  ;;  %v4647_v55 = vpop.f32.mrf.mxu1  ;;  %v6291_v5 = vld [vmem:[%s10216_s15 + $0xa8] sm:$0xf] }
 0x9b4   : > { %5266 = vst [vmem:[#allocation4 + $0x148] sm:$0xff] %v4647_v55  ;;  %v4568_v20 = vpop.f32.mrf.mxu0  ;;  %v6288_v55 = vor.u32 %v6552_v25, %v6285_v56 }
 0x9b5   : > { %5277 = vst [vmem:[#allocation4 + $0x200] sm:$0xff] %v4568_v20  ;;  %v4127_v4 = vpop.f32.mrf.mxu2  ;;  %v6557_v20 = vld [vmem:[%s10216_s15 + $0xc8] sm:$0xf0] }
 0x9b6   : > { %v4128_v41 = vadd.f32 %v9580_v1, %v4127_v4  ;;  %v6292_v4 = vor.u32 %v6557_v20, %v6291_v5  ;;  %4900 = vmatpush.bf16.msrb.mxu0 %v6288_v55 }
 0x9b8   : > { %4989 = vmatpush.bf16.msrb.mxu1 %v6292_v4 }
 0x9ba   : > { %v4479_v13 = vpop.f32.mrf.mxu3 }
 0x9bb   : > { %5276 = vst [vmem:[#allocation4 + $0x1f8] sm:$0xff] %v4479_v13  ;;  %v4649_v54 = vpop.f32.mrf.mxu1  ;;  %v6543_v13 = vld [vmem:[%s10216_s15 + $0x5c] sm:$0xf] }
 0x9bc   : > { %5269 = vst [vmem:[#allocation4 + $0x160] sm:$0xff] %v4649_v54  ;;  %v4570_v60 = vpop.f32.mrf.mxu0  ;;  %v6249_v54 = vld [vmem:[%s10216_s15 + $0x7c] sm:$0xf0] }
 0x9bd   : > { %5280 = vst [vmem:[#allocation4 + $0x218] sm:$0xff] %v4570_v60  ;;  %v4129_v11 = vpop.f32.mrf.mxu2  ;;  %v6255_v60 = vld [vmem:[%s10216_s15 + $0x60] sm:$0xf] }
 0x9be   : > { %v4130_v8 = vadd.f32 %v9580_v1, %v4129_v11  ;;  %v6252_v11 = vor.u32 %v6543_v13, %v6249_v54 }
 0x9c0   : > { %v9761_v16 = vpack.c.bf16 %v4130_v8, %v4128_v41  ;;  %v6548_v41 = vld [vmem:[%s10216_s15 + $0x80] sm:$0xf0]  ;;  %4901 = vmatpush.bf16.msrb.mxu0 %v6252_v11 }
 0x9c1   : > { %v6256_v8 = vor.u32 %v6548_v41, %v6255_v60 }
 0x9c2   : > { %v4481_v26 = vpop.f32.mrf.mxu3  ;;  %6346 = vmatmul.msk.bf16.gmra.mxu3 %vm1627_vm0, %v9761_v16  ;;  %6387 = vmatmul.msk.bf16.gmra.mxu2 %vm1627_vm0, %v9617_v32 }
 0x9c3   : > { %5279 = vst [vmem:[#allocation4 + $0x210] sm:$0xff] %v4481_v26  ;;  %6362 = vmatmul.msk.bf16.gmra.mxu0 %vm1627_vm0, %v9761_v16  ;;  %6378 = vmatmul.msk.bf16.gmra.mxu1 %vm1627_vm0, %v9761_v16  ;;  %v4652_v30 = vpop.f32.mrf.mxu1 }
 0x9c4   : > { %5272 = vst [vmem:[#allocation4 + $0x1a8] sm:$0xff] %v4652_v30  ;;  %v4573_v17 = vpop.f32.mrf.mxu0  ;;  %4990 = vmatpush.bf16.msrb.mxu1 %v6256_v8 }
 0x9c5   : > { %5283 = vst [vmem:[#allocation4 + $0x260] sm:$0xff] %v4573_v17  ;;  %v4132_v31 = vpop.f32.mrf.mxu2 }
 0x9c6   : > { %v4133_v29 = vadd.f32 %v9580_v1, %v4132_v31  ;;  %v6534_v31 = vld [vmem:[%s10216_s15 + $0x14] sm:$0xf] }
 0x9ca   : > { %v4484_v45 = vpop.f32.mrf.mxu3 }
 0x9cb   : > { %5282 = vst [vmem:[#allocation4 + $0x258] sm:$0xff] %v4484_v45  ;;  %v4654_v2 = vpop.f32.mrf.mxu1  ;;  %v6213_v45 = vld [vmem:[%s10216_s15 + $0x34] sm:$0xf0] }
 0x9cc   : > { %5275 = vst [vmem:[#allocation4 + $0x1c0] sm:$0xff] %v4654_v2  ;;  %v4575_v3 = vpop.f32.mrf.mxu0  ;;  %v6219_v2 = vld [vmem:[%s10216_s15 + $0x18] sm:$0xf] }
 0x9cd   : > { %5286 = vst [vmem:[#allocation4 + $0x278] sm:$0xff] %v4575_v3  ;;  %v4134_v49 = vpop.f32.mrf.mxu2  ;;  %v6216_v3 = vor.u32 %v6534_v31, %v6213_v45  ;;  %v6553_v31 = vld [vmem:[%s10216_s15 + $0xac] sm:$0xf]  ;;  %v6293_v45 = vld [vmem:[%s10216_s15 + $0xcc] sm:$0xf0] }
 0x9ce   : > { %v4135_v59 = vadd.f32 %v9580_v1, %v4134_v49  ;;  %v6539_v49 = vld [vmem:[%s10216_s15 + $0x38] sm:$0xf0] }
 0x9cf   : > { %4902 = vmatpush.bf16.msrb.mxu0 %v6216_v3  ;;  %v6296_v3 = vor.u32 %v6553_v31, %v6293_v45 }
 0x9d0   : > { %v9773_v12 = vpack.c.bf16 %v4135_v59, %v4133_v29 }
 0x9d2   : > { %v4486_v58 = vpop.f32.mrf.mxu3  ;;  %6347 = vmatmul.msk.bf16.gmra.mxu3 %vm1627_vm0, %v9773_v12  ;;  %6388 = vmatmul.msk.bf16.gmra.mxu2 %vm1627_vm0, %v9642_v61 }
 0x9d3   : > { %5285 = vst [vmem:[#allocation4 + $0x270] sm:$0xff] %v4486_v58  ;;  %6363 = vmatmul.msk.bf16.gmra.mxu0 %vm1627_vm0, %v9773_v12  ;;  %6379 = vmatmul.msk.bf16.gmra.mxu1 %vm1627_vm0, %v9773_v12  ;;  %v4657_v57 = vpop.f32.mrf.mxu1 }
 0x9d4   : > { %5278 = vst [vmem:[#allocation4 + $0x208] sm:$0xff] %v4657_v57  ;;  %v6220_v57 = vor.u32 %v6539_v49, %v6219_v2  ;;  %v6299_v2 = vld [vmem:[%s10216_s15 + $0xb0] sm:$0xf]  ;;  %v6558_v49 = vld [vmem:[%s10216_s15 + $0xd0] sm:$0xf0] }
 0x9d5   : > { %v4137_v14 = vpop.f32.mrf.mxu2 }
 0x9d6   : > { %v4138_v15 = vadd.f32 %v9580_v1, %v4137_v14  ;;  %4991 = vmatpush.bf16.msrb.mxu1 %v6220_v57  ;;  %v6332_v14 = vor.u32 %v6562_v52, %v6329_v37  ;;  %v6300_v57 = vor.u32 %v6558_v49, %v6299_v2 }
 0x9d8   : > { %5077 = vmatpush.bf16.msrb.mxu2 %v6332_v14 }
 0x9db   : > { %v4659_v6 = vpop.f32.mrf.mxu1 }
 0x9dc   : > { %5281 = vst [vmem:[#allocation4 + $0x220] sm:$0xff] %v4659_v6  ;;  %v6567_v6 = vld [vmem:[%s10216_s15 + $0x118] sm:$0xf0]  ;;  %5078 = vmatpush.bf16.msrb.mxu2 %v6296_v3 }
 0x9dd   : > { %v4139_v28 = vpop.f32.mrf.mxu2 }
 0x9de   : > { %v4140_v38 = vadd.f32 %v9580_v1, %v4139_v28 }
 0x9e0   : > { %v9791_v53 = vpack.c.bf16 %v4140_v38, %v4138_v15  ;;  %v6336_v38 = vor.u32 %v6567_v6, %v6335_v51 }
 0x9e2   : > { %6348 = vmatmul.msk.bf16.gmra.mxu3 %vm1627_vm0, %v9791_v53  ;;  %6389 = vmatmul.msk.bf16.gmra.mxu2 %vm1627_vm0, %v9655_v47 }
 0x9e3   : > { %6364 = vmatmul.msk.bf16.gmra.mxu0 %vm1627_vm0, %v9791_v53  ;;  %6380 = vmatmul.msk.bf16.gmra.mxu1 %vm1627_vm0, %v9791_v53  ;;  %v4662_v44 = vpop.f32.mrf.mxu1 }
 0x9e4   : > { %5284 = vst [vmem:[#allocation4 + $0x268] sm:$0xff] %v4662_v44  ;;  %5166 = vmatpush.bf16.msrb.mxu3 %v6336_v38 }
 0x9e5   : > { %v4142_v18 = vpop.f32.mrf.mxu2 }
 0x9e6   : > { %v4143_v63 = vadd.f32 %v9580_v1, %v4142_v18 }
 0x9e8   : > { %5167 = vmatpush.bf16.msrb.mxu3 %v6300_v57 }
 0x9eb   : > { %v4664_v0 = vpop.f32.mrf.mxu1 }
 0x9ec   : > { %5287 = vst [vmem:[#allocation4 + $0x280] sm:$0xff] %v4664_v0 }
 0x9ed   : > { %v4144_v40 = vpop.f32.mrf.mxu2 }
 0x9ee   : > { %v4145_v43 = vadd.f32 %v9580_v1, %v4144_v40 }
 0x9f0   : > { %v9803_v19 = vpack.c.bf16 %v4145_v43, %v4143_v63 }
 0x9f2   : > { %6349 = vmatmul.msk.bf16.gmra.mxu3 %vm1627_vm0, %v9803_v19  ;;  %6390 = vmatmul.msk.bf16.gmra.mxu2 %vm1627_vm0, %v9668_v42 }
 0x9f3   : > { %6365 = vmatmul.msk.bf16.gmra.mxu0 %vm1627_vm0, %v9803_v19  ;;  %6381 = vmatmul.msk.bf16.gmra.mxu1 %vm1627_vm0, %v9803_v19 }
 0x9f5   : > { %v4147_v7 = vpop.f32.mrf.mxu2 }
 0x9f6   : > { %v4148_v33 = vadd.f32 %v9580_v1, %v4147_v7 }
 0x9fd   : > { %v4149_v36 = vpop.f32.mrf.mxu2 }
 0x9fe   : > { %v4150_v27 = vadd.f32 %v9580_v1, %v4149_v36 }
 0xa00   : > { %v9815_v48 = vpack.c.bf16 %v4150_v27, %v4148_v33 }
 0xa02   : > { %6350 = vmatmul.msk.bf16.gmra.mxu3 %vm1627_vm0, %v9815_v48  ;;  %6391 = vmatmul.msk.bf16.gmra.mxu2 %vm1627_vm0, %v9720_v24 }
 0xa03   : > { %6366 = vmatmul.msk.bf16.gmra.mxu0 %vm1627_vm0, %v9815_v48  ;;  %6382 = vmatmul.msk.bf16.gmra.mxu1 %vm1627_vm0, %v9815_v48 }
 0xa05   : > { %v4152_v9 = vpop.f32.mrf.mxu2 }
 0xa06   : > { %v4153_v30 = vadd.f32 %v9580_v1, %v4152_v9 }
 0xa0d   : > { %v4154_v26 = vpop.f32.mrf.mxu2 }
 0xa0e   : > { %v4155_v17 = vadd.f32 %v9580_v1, %v4154_v26 }
 0xa10   : > { %v9875_v29 = vpack.c.bf16 %v4155_v17, %v4153_v30  ;;  %v4578_v59 = vpop.f32.mrf.mxu0  ;;  %v4667_v58 = vpop.f32.mrf.mxu1 }
 0xa11   : > { %5289 = vst [vmem:[#allocation4 + $0x2c0] sm:$0xff] %v4578_v59 }
 0xa12   : > { %5290 = vst [vmem:[#allocation4 + $0x2c8] sm:$0xff] %v4667_v58  ;;  %6351 = vmatmul.msk.bf16.gmra.mxu3 %vm1627_vm0, %v9875_v29  ;;  %6392 = vmatmul.msk.bf16.gmra.mxu2 %vm1627_vm0, %v9737_v22 }
 0xa13   : > { %6367 = vmatmul.msk.bf16.gmra.mxu0 %vm1627_vm0, %v9875_v29  ;;  %6383 = vmatmul.msk.bf16.gmra.mxu1 %vm1627_vm0, %v9875_v29 }
 0xa15   : > { %v4157_v28 = vpop.f32.mrf.mxu2  ;;  %v4489_v15 = vpop.f32.mrf.mxu3 }
 0xa16   : > { %5288 = vst [vmem:[#allocation4 + $0x2b8] sm:$0xff] %v4489_v15  ;;  %v4158_v63 = vadd.f32 %v9580_v1, %v4157_v28 }
 0xa18   : > { %v4580_v44 = vpop.f32.mrf.mxu0  ;;  %v4669_v18 = vpop.f32.mrf.mxu1 }
 0xa19   : > { %5292 = vst [vmem:[#allocation4 + $0x2d8] sm:$0xff] %v4580_v44 }
 0xa1a   : > { %5293 = vst [vmem:[#allocation4 + $0x2e0] sm:$0xff] %v4669_v18 }
 0xa1d   : > { %v4159_v0 = vpop.f32.mrf.mxu2  ;;  %v4491_v40 = vpop.f32.mrf.mxu3 }
 0xa1e   : > { %v4160_v43 = vadd.f32 %v9580_v1, %v4159_v0  ;;  %5291 = vst [vmem:[#allocation4 + $0x2d0] sm:$0xff] %v4491_v40 }
 0xa20   : > { %v9899_v7 = vpack.c.bf16 %v4160_v43, %v4158_v63  ;;  %v4583_v36 = vpop.f32.mrf.mxu0  ;;  %v4672_v33 = vpop.f32.mrf.mxu1 }
 0xa21   : > { %5295 = vst [vmem:[#allocation4 + $0x320] sm:$0xff] %v4583_v36 }
 0xa22   : > { %5296 = vst [vmem:[#allocation4 + $0x328] sm:$0xff] %v4672_v33  ;;  %6352 = vmatmul.msk.bf16.gmra.mxu3 %vm1627_vm0, %v9899_v7  ;;  %6393 = vmatmul.msk.bf16.gmra.mxu2 %vm1627_vm0, %v9749_v50 }
 0xa23   : > { %6368 = vmatmul.msk.bf16.gmra.mxu0 %vm1627_vm0, %v9899_v7  ;;  %6384 = vmatmul.msk.bf16.gmra.mxu1 %vm1627_vm0, %v9899_v7 }
 0xa25   : > { %v4494_v1 = vpop.f32.mrf.mxu3  ;;  %v4726_v27 = vpop.f32.mrf.mxu2 }
 0xa26   : > { %5294 = vst [vmem:[#allocation4 + $0x318] sm:$0xff] %v4494_v1 }
 0xa27   : > { %5349 = vst [vmem:[#allocation5 + $0x78] sm:$0xff] %v4726_v27 }
 0xa28   : > { %v4585_v10 = vpop.f32.mrf.mxu0  ;;  %v4674_v23 = vpop.f32.mrf.mxu1 }
 0xa29   : > { %5298 = vst [vmem:[#allocation4 + $0x338] sm:$0xff] %v4585_v10  ;;  %v6544_v10 = vld [vmem:[%s10216_s15 + $0x64] sm:$0xf] }
 0xa2a   : > { %5299 = vst [vmem:[#allocation4 + $0x340] sm:$0xff] %v4674_v23  ;;  %v6257_v23 = vld [vmem:[%s10216_s15 + $0x84] sm:$0xf0] }
 0xa2d   : > { %v4496_v21 = vpop.f32.mrf.mxu3  ;;  %v4728_v35 = vpop.f32.mrf.mxu2 }
 0xa2e   : > { %5297 = vst [vmem:[#allocation4 + $0x330] sm:$0xff] %v4496_v21  ;;  %v6260_v21 = vor.u32 %v6544_v10, %v6257_v23 }
 0xa2f   : > { %5352 = vst [vmem:[#allocation5 + $0x90] sm:$0xff] %v4728_v35 }
 0xa30   : > { %v4588_v62 = vpop.f32.mrf.mxu0  ;;  %v4677_v34 = vpop.f32.mrf.mxu1  ;;  %5079 = vmatpush.bf16.msrb.mxu2 %v6260_v21 }
 0xa31   : > { %5301 = vst [vmem:[#allocation4 + $0x380] sm:$0xff] %v4588_v62 }
 0xa32   : > { %5302 = vst [vmem:[#allocation4 + $0x388] sm:$0xff] %v4677_v34  ;;  %6394 = vmatmul.msk.bf16.gmra.mxu2 %vm1627_vm0, %v9761_v16  ;;  %6401 = vmatmul.msk.bf16.vlgmr.msra.gmra.mxu3 %vm1627_vm0, %v9591_v39  ;;  %v6535_v34 = vld [vmem:[%s10216_s15 + $0x1c] sm:$0xf] }
 0xa33   : > { %6417 = vmatmul.msk.bf16.vlgmr.msrb.gmra.mxu0 %vm1627_vm0, %v9591_v39  ;;  %6433 = vmatmul.msk.bf16.vlgmr.msrb.gmra.mxu1 %vm1627_vm0, %v9591_v39 }
 0xa35   : > { %v4499_v9 = vpop.f32.mrf.mxu3  ;;  %v4731_v25 = vpop.f32.mrf.mxu2 }
 0xa36   : > { %5300 = vst [vmem:[#allocation4 + $0x378] sm:$0xff] %v4499_v9  ;;  %v6221_v9 = vld [vmem:[%s10216_s15 + $0x3c] sm:$0xf0] }
 0xa37   : > { %5355 = vst [vmem:[#allocation5 + $0xd8] sm:$0xff] %v4731_v25  ;;  %v6224_v25 = vor.u32 %v6535_v34, %v6221_v9  ;;  %v6227_v34 = vld [vmem:[%s10216_s15 + $0x20] sm:$0xf]  ;;  %v6540_v9 = vld [vmem:[%s10216_s15 + $0x40] sm:$0xf0] }
 0xa38   : > { %v4590_v56 = vpop.f32.mrf.mxu0  ;;  %v4679_v5 = vpop.f32.mrf.mxu1 }
 0xa39   : > { %5304 = vst [vmem:[#allocation4 + $0x398] sm:$0xff] %v4590_v56  ;;  %5080 = vmatpush.bf16.msrb.mxu2 %v6224_v25  ;;  %v6228_v25 = vor.u32 %v6540_v9, %v6227_v34 }
 0xa3a   : > { %5305 = vst [vmem:[#allocation4 + $0x3a0] sm:$0xff] %v4679_v5 }
 0xa3d   : > { %v4501_v55 = vpop.f32.mrf.mxu3  ;;  %v4733_v20 = vpop.f32.mrf.mxu2 }
 0xa3e   : > { %5303 = vst [vmem:[#allocation4 + $0x390] sm:$0xff] %v4501_v55 }
 0xa3f   : > { %5358 = vst [vmem:[#allocation5 + $0xf0] sm:$0xff] %v4733_v20 }
 0xa40   : > { %v4593_v4 = vpop.f32.mrf.mxu0  ;;  %v4682_v13 = vpop.f32.mrf.mxu1 }
 0xa41   : > { %5307 = vst [vmem:[#allocation4 + $0x3e0] sm:$0xff] %v4593_v4 }
 0xa42   : > { %5308 = vst [vmem:[#allocation4 + $0x3e8] sm:$0xff] %v4682_v13  ;;  %6395 = vmatmul.msk.bf16.gmra.mxu2 %vm1627_vm0, %v9773_v12  ;;  %6402 = vmatmul.msk.bf16.gmra.mxu3 %vm1627_vm0, %v9605_v46 }
 0xa43   : > { %6418 = vmatmul.msk.bf16.gmra.mxu0 %vm1627_vm0, %v9605_v46  ;;  %6434 = vmatmul.msk.bf16.gmra.mxu1 %vm1627_vm0, %v9605_v46 }
 0xa45   : > { %v4504_v54 = vpop.f32.mrf.mxu3  ;;  %v4736_v60 = vpop.f32.mrf.mxu2 }
 0xa46   : > { %5306 = vst [vmem:[#allocation4 + $0x3d8] sm:$0xff] %v4504_v54 }
 0xa47   : > { %5361 = vst [vmem:[#allocation5 + $0x138] sm:$0xff] %v4736_v60 }
 0xa48   : > { %v4595_v11 = vpop.f32.mrf.mxu0  ;;  %v4684_v41 = vpop.f32.mrf.mxu1 }
 0xa49   : > { %5310 = vst [vmem:[#allocation4 + $0x3f8] sm:$0xff] %v4595_v11 }
 0xa4a   : > { %5311 = vst [vmem:[#allocation4 + $0x400] sm:$0xff] %v4684_v41 }
 0xa4d   : > { %v4506_v8 = vpop.f32.mrf.mxu3  ;;  %v4738_v26 = vpop.f32.mrf.mxu2 }
 0xa4e   : > { %5309 = vst [vmem:[#allocation4 + $0x3f0] sm:$0xff] %v4506_v8  ;;  %v6263_v8 = vld [vmem:[%s10216_s15 + $0x68] sm:$0xf] }
 0xa4f   : > { %5364 = vst [vmem:[#allocation5 + $0x150] sm:$0xff] %v4738_v26  ;;  %v6549_v26 = vld [vmem:[%s10216_s15 + $0x88] sm:$0xf0] }
 0xa50   : > { %v4598_v30 = vpop.f32.mrf.mxu0  ;;  %v4687_v17 = vpop.f32.mrf.mxu1 }
 0xa51   : > { %5313 = vst [vmem:[#allocation4 + $0x440] sm:$0xff] %v4598_v30  ;;  %v6264_v30 = vor.u32 %v6549_v26, %v6263_v8 }
 0xa52   : > { %5314 = vst [vmem:[#allocation4 + $0x448] sm:$0xff] %v4687_v17  ;;  %6396 = vmatmul.msk.bf16.gmra.mxu2 %vm1627_vm0, %v9791_v53  ;;  %6403 = vmatmul.msk.bf16.gmra.mxu3 %vm1627_vm0, %v9617_v32 }
 0xa53   : > { %6419 = vmatmul.msk.bf16.gmra.mxu0 %vm1627_vm0, %v9617_v32  ;;  %6435 = vmatmul.msk.bf16.gmra.mxu1 %vm1627_vm0, %v9617_v32 }
 0xa54   : > { %5168 = vmatpush.bf16.msrb.mxu3 %v6264_v30 }
 0xa55   : > { %v4509_v59 = vpop.f32.mrf.mxu3  ;;  %v4741_v58 = vpop.f32.mrf.mxu2 }
 0xa56   : > { %5312 = vst [vmem:[#allocation4 + $0x438] sm:$0xff] %v4509_v59 }
 0xa57   : > { %5367 = vst [vmem:[#allocation5 + $0x198] sm:$0xff] %v4741_v58 }
 0xa58   : > { %v4600_v52 = vpop.f32.mrf.mxu0  ;;  %v4689_v37 = vpop.f32.mrf.mxu1  ;;  %5169 = vmatpush.bf16.msrb.mxu3 %v6228_v25 }
 0xa59   : > { %5316 = vst [vmem:[#allocation4 + $0x458] sm:$0xff] %v4600_v52 }
 0xa5a   : > { %5317 = vst [vmem:[#allocation4 + $0x460] sm:$0xff] %v4689_v37 }
 0xa5d   : > { %v4511_v51 = vpop.f32.mrf.mxu3  ;;  %v4743_v14 = vpop.f32.mrf.mxu2 }
 0xa5e   : > { %5315 = vst [vmem:[#allocation4 + $0x450] sm:$0xff] %v4511_v51 }
 0xa5f   : > { %5370 = vst [vmem:[#allocation5 + $0x1b0] sm:$0xff] %v4743_v14 }
 0xa60   : > { %v4603_v6 = vpop.f32.mrf.mxu0  ;;  %v4692_v28 = vpop.f32.mrf.mxu1 }
 0xa61   : > { %5319 = vst [vmem:[#allocation4 + $0x4a0] sm:$0xff] %v4603_v6 }
 0xa62   : > { %5320 = vst [vmem:[#allocation4 + $0x4a8] sm:$0xff] %v4692_v28  ;;  %6397 = vmatmul.msk.bf16.gmra.mxu2 %vm1627_vm0, %v9803_v19  ;;  %6404 = vmatmul.msk.bf16.gmra.mxu3 %vm1627_vm0, %v9642_v61 }
 0xa63   : > { %6420 = vmatmul.msk.bf16.gmra.mxu0 %vm1627_vm0, %v9642_v61  ;;  %6436 = vmatmul.msk.bf16.gmra.mxu1 %vm1627_vm0, %v9642_v61 }
 0xa65   : > { %v4514_v15 = vpop.f32.mrf.mxu3  ;;  %v4746_v38 = vpop.f32.mrf.mxu2 }
 0xa66   : > { %5318 = vst [vmem:[#allocation4 + $0x498] sm:$0xff] %v4514_v15 }
 0xa67   : > { %5373 = vst [vmem:[#allocation5 + $0x1f8] sm:$0xff] %v4746_v38 }
 0xa68   : > { %v4605_v44 = vpop.f32.mrf.mxu0  ;;  %v4694_v18 = vpop.f32.mrf.mxu1 }
 0xa69   : > { %5322 = vst [vmem:[#allocation4 + $0x4b8] sm:$0xff] %v4605_v44 }
 0xa6a   : > { %5323 = vst [vmem:[#allocation4 + $0x4c0] sm:$0xff] %v4694_v18 }
 0xa6d   : > { %v4516_v0 = vpop.f32.mrf.mxu3  ;;  %v4748_v40 = vpop.f32.mrf.mxu2 }
 0xa6e   : > { %5321 = vst [vmem:[#allocation4 + $0x4b0] sm:$0xff] %v4516_v0 }
 0xa6f   : > { %5376 = vst [vmem:[#allocation5 + $0x210] sm:$0xff] %v4748_v40 }
 0xa70   : > { %v4608_v63 = vpop.f32.mrf.mxu0  ;;  %v4697_v43 = vpop.f32.mrf.mxu1 }
 0xa71   : > { %5325 = vst [vmem:[#allocation4 + $0x500] sm:$0xff] %v4608_v63 }
 0xa72   : > { %5326 = vst [vmem:[#allocation4 + $0x508] sm:$0xff] %v4697_v43  ;;  %6398 = vmatmul.msk.bf16.gmra.mxu2 %vm1627_vm0, %v9815_v48  ;;  %6405 = vmatmul.msk.bf16.gmra.mxu3 %vm1627_vm0, %v9655_v47 }
 0xa73   : > { %6421 = vmatmul.msk.bf16.gmra.mxu0 %vm1627_vm0, %v9655_v47  ;;  %6437 = vmatmul.msk.bf16.gmra.mxu1 %vm1627_vm0, %v9655_v47 }
 0xa75   : > { %v4519_v36 = vpop.f32.mrf.mxu3  ;;  %v4751_v33 = vpop.f32.mrf.mxu2 }
 0xa76   : > { %5324 = vst [vmem:[#allocation4 + $0x4f8] sm:$0xff] %v4519_v36 }
 0xa77   : > { %5379 = vst [vmem:[#allocation5 + $0x258] sm:$0xff] %v4751_v33 }
 0xa78   : > { %v4610_v1 = vpop.f32.mrf.mxu0  ;;  %v4699_v27 = vpop.f32.mrf.mxu1 }
 0xa79   : > { %5328 = vst [vmem:[#allocation4 + $0x518] sm:$0xff] %v4610_v1 }
 0xa7a   : > { %5329 = vst [vmem:[#allocation4 + $0x520] sm:$0xff] %v4699_v27 }
 0xa7d   : > { %v4521_v35 = vpop.f32.mrf.mxu3  ;;  %v4753_v62 = vpop.f32.mrf.mxu2 }
 0xa7e   : > { %5327 = vst [vmem:[#allocation4 + $0x510] sm:$0xff] %v4521_v35 }
 0xa7f   : > { %5382 = vst [vmem:[#allocation5 + $0x270] sm:$0xff] %v4753_v62 }
 0xa80   : > { %v4613_v56 = vpop.f32.mrf.mxu0  ;;  %v4702_v5 = vpop.f32.mrf.mxu1 }
 0xa81   : > { %5331 = vst [vmem:[#allocation4 + $0x560] sm:$0xff] %v4613_v56 }
 0xa82   : > { %5332 = vst [vmem:[#allocation4 + $0x568] sm:$0xff] %v4702_v5  ;;  %6399 = vmatmul.msk.bf16.gmra.mxu2 %vm1627_vm0, %v9875_v29  ;;  %6406 = vmatmul.msk.bf16.gmra.mxu3 %vm1627_vm0, %v9668_v42 }
 0xa83   : > { %6422 = vmatmul.msk.bf16.gmra.mxu0 %vm1627_vm0, %v9668_v42  ;;  %6438 = vmatmul.msk.bf16.gmra.mxu1 %vm1627_vm0, %v9668_v42 }
 0xa85   : > { %v4524_v55 = vpop.f32.mrf.mxu3  ;;  %v4756_v20 = vpop.f32.mrf.mxu2 }
 0xa86   : > { %5330 = vst [vmem:[#allocation4 + $0x558] sm:$0xff] %v4524_v55 }
 0xa87   : > { %5385 = vst [vmem:[#allocation5 + $0x2b8] sm:$0xff] %v4756_v20 }
 0xa88   : > { %v4615_v4 = vpop.f32.mrf.mxu0  ;;  %v4704_v13 = vpop.f32.mrf.mxu1 }
 0xa89   : > { %5334 = vst [vmem:[#allocation4 + $0x578] sm:$0xff] %v4615_v4 }
 0xa8a   : > { %5335 = vst [vmem:[#allocation4 + $0x580] sm:$0xff] %v4704_v13 }
 0xa8d   : > { %v4526_v54 = vpop.f32.mrf.mxu3  ;;  %v4758_v60 = vpop.f32.mrf.mxu2 }
 0xa8e   : > { %5333 = vst [vmem:[#allocation4 + $0x570] sm:$0xff] %v4526_v54 }
 0xa8f   : > { %5388 = vst [vmem:[#allocation5 + $0x2d0] sm:$0xff] %v4758_v60 }
 0xa90   : > { %v4618_v11 = vpop.f32.mrf.mxu0  ;;  %v4707_v41 = vpop.f32.mrf.mxu1 }
 0xa91   : > { %5337 = vst [vmem:[#allocation4 + $0x5c0] sm:$0xff] %v4618_v11 }
 0xa92   : > { %5338 = vst [vmem:[#allocation4 + $0x5c8] sm:$0xff] %v4707_v41  ;;  %6400 = vmatmul.msk.bf16.gmra.mxu2 %vm1627_vm0, %v9899_v7  ;;  %6407 = vmatmul.msk.bf16.gmra.mxu3 %vm1627_vm0, %v9720_v24 }
 0xa93   : > { %6423 = vmatmul.msk.bf16.gmra.mxu0 %vm1627_vm0, %v9720_v24  ;;  %6439 = vmatmul.msk.bf16.gmra.mxu1 %vm1627_vm0, %v9720_v24 }
 0xa95   : > { %v4529_v17 = vpop.f32.mrf.mxu3  ;;  %v4761_v31 = vpop.f32.mrf.mxu2 }
 0xa96   : > { %5336 = vst [vmem:[#allocation4 + $0x5b8] sm:$0xff] %v4529_v17 }
 0xa97   : > { %5391 = vst [vmem:[#allocation5 + $0x318] sm:$0xff] %v4761_v31 }
 0xa98   : > { %v4620_v45 = vpop.f32.mrf.mxu0  ;;  %v4709_v2 = vpop.f32.mrf.mxu1 }
 0xa99   : > { %5340 = vst [vmem:[#allocation4 + $0x5d8] sm:$0xff] %v4620_v45 }
 0xa9a   : > { %5341 = vst [vmem:[#allocation4 + $0x5e0] sm:$0xff] %v4709_v2 }
 0xa9d   : > { %v4531_v3 = vpop.f32.mrf.mxu3  ;;  %v4763_v49 = vpop.f32.mrf.mxu2 }
 0xa9e   : > { %5339 = vst [vmem:[#allocation4 + $0x5d0] sm:$0xff] %v4531_v3 }
 0xa9f   : > { %5394 = vst [vmem:[#allocation5 + $0x330] sm:$0xff] %v4763_v49 }
 0xaa0   : > { %v4623_v59 = vpop.f32.mrf.mxu0  ;;  %v4712_v58 = vpop.f32.mrf.mxu1 }
 0xaa1   : > { %5343 = vst [vmem:[#allocation4 + $0x620] sm:$0xff] %v4623_v59 }
 0xaa2   : > { %5344 = vst [vmem:[#allocation4 + $0x628] sm:$0xff] %v4712_v58  ;;  %6408 = vmatmul.msk.bf16.gmra.mxu3 %vm1627_vm0, %v9737_v22  ;;  %6449 = vmatmul.msk.bf16.vlgmr.msrb.gmra.mxu2 %vm1627_vm0, %v9591_v39 }
 0xaa3   : > { %6424 = vmatmul.msk.bf16.gmra.mxu0 %vm1627_vm0, %v9737_v22  ;;  %6440 = vmatmul.msk.bf16.gmra.mxu1 %vm1627_vm0, %v9737_v22 }
 0xaa5   : > { %v4534_v57 = vpop.f32.mrf.mxu3  ;;  %v4766_v52 = vpop.f32.mrf.mxu2 }
 0xaa6   : > { %5342 = vst [vmem:[#allocation4 + $0x618] sm:$0xff] %v4534_v57 }
 0xaa7   : > { %5397 = vst [vmem:[#allocation5 + $0x378] sm:$0xff] %v4766_v52 }
 0xaa8   : > { %v4625_v37 = vpop.f32.mrf.mxu0  ;;  %v4714_v51 = vpop.f32.mrf.mxu1 }
 0xaa9   : > { %5346 = vst [vmem:[#allocation4 + $0x638] sm:$0xff] %v4625_v37 }
 0xaaa   : > { %5347 = vst [vmem:[#allocation4 + $0x640] sm:$0xff] %v4714_v51 }
 0xaad   : > { %v4536_v14 = vpop.f32.mrf.mxu3  ;;  %v4768_v6 = vpop.f32.mrf.mxu2 }
 0xaae   : > { %5345 = vst [vmem:[#allocation4 + $0x630] sm:$0xff] %v4536_v14 }
 0xaaf   : > { %5400 = vst [vmem:[#allocation5 + $0x390] sm:$0xff] %v4768_v6 }
 0xab0   : > { %v4904_v28 = vpop.f32.mrf.mxu0  ;;  %v4993_v15 = vpop.f32.mrf.mxu1 }
 0xab1   : > { %5351 = vst [vmem:[#allocation5 + $0x88] sm:$0xff] %v4904_v28 }
 0xab2   : > { %5446 = vst [vmem:[#allocation6 + $0x78] sm:$0xff] %v4993_v15  ;;  %6409 = vmatmul.msk.bf16.gmra.mxu3 %vm1627_vm0, %v9749_v50  ;;  %6450 = vmatmul.msk.bf16.gmra.mxu2 %vm1627_vm0, %v9605_v46 }
 0xab3   : > { %6425 = vmatmul.msk.bf16.gmra.mxu0 %vm1627_vm0, %v9749_v50  ;;  %6441 = vmatmul.msk.bf16.gmra.mxu1 %vm1627_vm0, %v9749_v50 }
 0xab5   : > { %v4771_v38 = vpop.f32.mrf.mxu2  ;;  %v4815_v44 = vpop.f32.mrf.mxu3 }
 0xab6   : > { %5403 = vst [vmem:[#allocation5 + $0x3d8] sm:$0xff] %v4771_v38 }
 0xab7   : > { %5350 = vst [vmem:[#allocation5 + $0x80] sm:$0xff] %v4815_v44 }
 0xab8   : > { %v4906_v18 = vpop.f32.mrf.mxu0  ;;  %v4995_v0 = vpop.f32.mrf.mxu1 }
 0xab9   : > { %5354 = vst [vmem:[#allocation5 + $0xa0] sm:$0xff] %v4906_v18 }
 0xaba   : > { %5449 = vst [vmem:[#allocation6 + $0x90] sm:$0xff] %v4995_v0 }
 0xabd   : > { %v4773_v40 = vpop.f32.mrf.mxu2  ;;  %v4817_v63 = vpop.f32.mrf.mxu3 }
 0xabe   : > { %5406 = vst [vmem:[#allocation5 + $0x3f0] sm:$0xff] %v4773_v40 }
 0xabf   : > { %5353 = vst [vmem:[#allocation5 + $0x98] sm:$0xff] %v4817_v63 }
 0xac0   : > { %v4909_v43 = vpop.f32.mrf.mxu0  ;;  %v4998_v36 = vpop.f32.mrf.mxu1 }
 0xac1   : > { %5357 = vst [vmem:[#allocation5 + $0xe8] sm:$0xff] %v4909_v43 }
 0xac2   : > { %5452 = vst [vmem:[#allocation6 + $0xd8] sm:$0xff] %v4998_v36  ;;  %6410 = vmatmul.msk.bf16.gmra.mxu3 %vm1627_vm0, %v9761_v16  ;;  %6451 = vmatmul.msk.bf16.gmra.mxu2 %vm1627_vm0, %v9617_v32 }
 0xac3   : > { %6426 = vmatmul.msk.bf16.gmra.mxu0 %vm1627_vm0, %v9761_v16  ;;  %6442 = vmatmul.msk.bf16.gmra.mxu1 %vm1627_vm0, %v9761_v16 }
 0xac5   : > { %v4776_v33 = vpop.f32.mrf.mxu2  ;;  %v4820_v1 = vpop.f32.mrf.mxu3 }
 0xac6   : > { %5409 = vst [vmem:[#allocation5 + $0x438] sm:$0xff] %v4776_v33 }
 0xac7   : > { %5356 = vst [vmem:[#allocation5 + $0xe0] sm:$0xff] %v4820_v1 }
 0xac8   : > { %v4911_v27 = vpop.f32.mrf.mxu0  ;;  %v5000_v10 = vpop.f32.mrf.mxu1 }
 0xac9   : > { %5360 = vst [vmem:[#allocation5 + $0x100] sm:$0xff] %v4911_v27 }
 0xaca   : > { %5455 = vst [vmem:[#allocation6 + $0xf0] sm:$0xff] %v5000_v10 }
 0xacd   : > { %v4778_v23 = vpop.f32.mrf.mxu2  ;;  %v4822_v21 = vpop.f32.mrf.mxu3 }
 0xace   : > { %5412 = vst [vmem:[#allocation5 + $0x450] sm:$0xff] %v4778_v23 }
 0xacf   : > { %5359 = vst [vmem:[#allocation5 + $0xf8] sm:$0xff] %v4822_v21 }
 0xad0   : > { %v4914_v35 = vpop.f32.mrf.mxu0  ;;  %v5003_v62 = vpop.f32.mrf.mxu1 }
 0xad1   : > { %5363 = vst [vmem:[#allocation5 + $0x148] sm:$0xff] %v4914_v35 }
 0xad2   : > { %5458 = vst [vmem:[#allocation6 + $0x138] sm:$0xff] %v5003_v62  ;;  %6411 = vmatmul.msk.bf16.gmra.mxu3 %vm1627_vm0, %v9773_v12  ;;  %6452 = vmatmul.msk.bf16.gmra.mxu2 %vm1627_vm0, %v9642_v61 }
 0xad3   : > { %6427 = vmatmul.msk.bf16.gmra.mxu0 %vm1627_vm0, %v9773_v12  ;;  %6443 = vmatmul.msk.bf16.gmra.mxu1 %vm1627_vm0, %v9773_v12 }
 0xad5   : > { %v4781_v56 = vpop.f32.mrf.mxu2  ;;  %v4825_v5 = vpop.f32.mrf.mxu3 }
 0xad6   : > { %5415 = vst [vmem:[#allocation5 + $0x498] sm:$0xff] %v4781_v56 }
 0xad7   : > { %5362 = vst [vmem:[#allocation5 + $0x140] sm:$0xff] %v4825_v5 }
 0xad8   : > { %v4916_v55 = vpop.f32.mrf.mxu0  ;;  %v5005_v20 = vpop.f32.mrf.mxu1 }
 0xad9   : > { %5366 = vst [vmem:[#allocation5 + $0x160] sm:$0xff] %v4916_v55 }
 0xada   : > { %5461 = vst [vmem:[#allocation6 + $0x150] sm:$0xff] %v5005_v20 }
 0xadd   : > { %v4783_v4 = vpop.f32.mrf.mxu2  ;;  %v4827_v13 = vpop.f32.mrf.mxu3 }
 0xade   : > { %5418 = vst [vmem:[#allocation5 + $0x4b0] sm:$0xff] %v4783_v4 }
 0xadf   : > { %5365 = vst [vmem:[#allocation5 + $0x158] sm:$0xff] %v4827_v13 }
 0xae0   : > { %v4919_v54 = vpop.f32.mrf.mxu0  ;;  %v5008_v60 = vpop.f32.mrf.mxu1 }
 0xae1   : > { %5369 = vst [vmem:[#allocation5 + $0x1a8] sm:$0xff] %v4919_v54 }
 0xae2   : > { %5464 = vst [vmem:[#allocation6 + $0x198] sm:$0xff] %v5008_v60  ;;  %6412 = vmatmul.msk.bf16.gmra.mxu3 %vm1627_vm0, %v9791_v53  ;;  %6453 = vmatmul.msk.bf16.gmra.mxu2 %vm1627_vm0, %v9655_v47 }
 0xae3   : > { %6428 = vmatmul.msk.bf16.gmra.mxu0 %vm1627_vm0, %v9791_v53  ;;  %6444 = vmatmul.msk.bf16.gmra.mxu1 %vm1627_vm0, %v9791_v53 }
 0xae5   : > { %v4786_v11 = vpop.f32.mrf.mxu2  ;;  %v4830_v41 = vpop.f32.mrf.mxu3 }
 0xae6   : > { %5421 = vst [vmem:[#allocation5 + $0x4f8] sm:$0xff] %v4786_v11 }
 0xae7   : > { %5368 = vst [vmem:[#allocation5 + $0x1a0] sm:$0xff] %v4830_v41 }
 0xae8   : > { %v4921_v8 = vpop.f32.mrf.mxu0  ;;  %v5010_v26 = vpop.f32.mrf.mxu1 }
 0xae9   : > { %5372 = vst [vmem:[#allocation5 + $0x1c0] sm:$0xff] %v4921_v8 }
 0xaea   : > { %5467 = vst [vmem:[#allocation6 + $0x1b0] sm:$0xff] %v5010_v26 }
 0xaed   : > { %v4788_v30 = vpop.f32.mrf.mxu2  ;;  %v4832_v17 = vpop.f32.mrf.mxu3 }
 0xaee   : > { %5424 = vst [vmem:[#allocation5 + $0x510] sm:$0xff] %v4788_v30 }
 0xaef   : > { %5371 = vst [vmem:[#allocation5 + $0x1b8] sm:$0xff] %v4832_v17 }
 0xaf0   : > { %v4924_v31 = vpop.f32.mrf.mxu0  ;;  %v5013_v45 = vpop.f32.mrf.mxu1 }
 0xaf1   : > { %5375 = vst [vmem:[#allocation5 + $0x208] sm:$0xff] %v4924_v31 }
 0xaf2   : > { %5470 = vst [vmem:[#allocation6 + $0x1f8] sm:$0xff] %v5013_v45  ;;  %6413 = vmatmul.msk.bf16.gmra.mxu3 %vm1627_vm0, %v9803_v19  ;;  %6454 = vmatmul.msk.bf16.gmra.mxu2 %vm1627_vm0, %v9668_v42 }
 0xaf3   : > { %6429 = vmatmul.msk.bf16.gmra.mxu0 %vm1627_vm0, %v9803_v19  ;;  %6445 = vmatmul.msk.bf16.gmra.mxu1 %vm1627_vm0, %v9803_v19 }
 0xaf5   : > { %v4791_v2 = vpop.f32.mrf.mxu2  ;;  %v4835_v3 = vpop.f32.mrf.mxu3 }
 0xaf6   : > { %5427 = vst [vmem:[#allocation5 + $0x558] sm:$0xff] %v4791_v2 }
 0xaf7   : > { %5374 = vst [vmem:[#allocation5 + $0x200] sm:$0xff] %v4835_v3 }
 0xaf8   : > { %v4926_v49 = vpop.f32.mrf.mxu0  ;;  %v5015_v59 = vpop.f32.mrf.mxu1 }
 0xaf9   : > { %5378 = vst [vmem:[#allocation5 + $0x220] sm:$0xff] %v4926_v49 }
 0xafa   : > { %5473 = vst [vmem:[#allocation6 + $0x210] sm:$0xff] %v5015_v59 }
 0xafd   : > { %v4793_v58 = vpop.f32.mrf.mxu2  ;;  %v4837_v57 = vpop.f32.mrf.mxu3 }
 0xafe   : > { %5430 = vst [vmem:[#allocation5 + $0x570] sm:$0xff] %v4793_v58 }
 0xaff   : > { %5377 = vst [vmem:[#allocation5 + $0x218] sm:$0xff] %v4837_v57 }
 0xb00   : > { %v4929_v52 = vpop.f32.mrf.mxu0  ;;  %v5018_v37 = vpop.f32.mrf.mxu1 }
 0xb01   : > { %5381 = vst [vmem:[#allocation5 + $0x268] sm:$0xff] %v4929_v52 }
 0xb02   : > { %5476 = vst [vmem:[#allocation6 + $0x258] sm:$0xff] %v5018_v37  ;;  %6414 = vmatmul.msk.bf16.gmra.mxu3 %vm1627_vm0, %v9815_v48  ;;  %6455 = vmatmul.msk.bf16.gmra.mxu2 %vm1627_vm0, %v9720_v24 }
 0xb03   : > { %6430 = vmatmul.msk.bf16.gmra.mxu0 %vm1627_vm0, %v9815_v48  ;;  %6446 = vmatmul.msk.bf16.gmra.mxu1 %vm1627_vm0, %v9815_v48 }
 0xb05   : > { %v4796_v51 = vpop.f32.mrf.mxu2  ;;  %v4840_v14 = vpop.f32.mrf.mxu3 }
 0xb06   : > { %5433 = vst [vmem:[#allocation5 + $0x5b8] sm:$0xff] %v4796_v51 }
 0xb07   : > { %5380 = vst [vmem:[#allocation5 + $0x260] sm:$0xff] %v4840_v14 }
 0xb08   : > { %v4931_v6 = vpop.f32.mrf.mxu0  ;;  %v5020_v28 = vpop.f32.mrf.mxu1 }
 0xb09   : > { %5384 = vst [vmem:[#allocation5 + $0x280] sm:$0xff] %v4931_v6 }
 0xb0a   : > { %5479 = vst [vmem:[#allocation6 + $0x270] sm:$0xff] %v5020_v28 }
 0xb0d   : > { %v4798_v15 = vpop.f32.mrf.mxu2  ;;  %v4842_v38 = vpop.f32.mrf.mxu3 }
 0xb0e   : > { %5436 = vst [vmem:[#allocation5 + $0x5d0] sm:$0xff] %v4798_v15 }
 0xb0f   : > { %5383 = vst [vmem:[#allocation5 + $0x278] sm:$0xff] %v4842_v38 }
 0xb10   : > { %v4934_v44 = vpop.f32.mrf.mxu0  ;;  %v5023_v18 = vpop.f32.mrf.mxu1 }
 0xb11   : > { %5387 = vst [vmem:[#allocation5 + $0x2c8] sm:$0xff] %v4934_v44 }
 0xb12   : > { %5482 = vst [vmem:[#allocation6 + $0x2b8] sm:$0xff] %v5023_v18  ;;  %6415 = vmatmul.msk.bf16.gmra.mxu3 %vm1627_vm0, %v9875_v29  ;;  %6456 = vmatmul.msk.bf16.gmra.mxu2 %vm1627_vm0, %v9737_v22 }
 0xb13   : > { %6431 = vmatmul.msk.bf16.gmra.mxu0 %vm1627_vm0, %v9875_v29  ;;  %6447 = vmatmul.msk.bf16.gmra.mxu1 %vm1627_vm0, %v9875_v29 }
 0xb15   : > { %v4801_v0 = vpop.f32.mrf.mxu2  ;;  %v4845_v40 = vpop.f32.mrf.mxu3 }
 0xb16   : > { %5439 = vst [vmem:[#allocation5 + $0x618] sm:$0xff] %v4801_v0 }
 0xb17   : > { %5386 = vst [vmem:[#allocation5 + $0x2c0] sm:$0xff] %v4845_v40 }
 0xb18   : > { %v4936_v63 = vpop.f32.mrf.mxu0  ;;  %v5025_v43 = vpop.f32.mrf.mxu1 }
 0xb19   : > { %5390 = vst [vmem:[#allocation5 + $0x2e0] sm:$0xff] %v4936_v63 }
 0xb1a   : > { %5485 = vst [vmem:[#allocation6 + $0x2d0] sm:$0xff] %v5025_v43 }
 0xb1d   : > { %v4803_v36 = vpop.f32.mrf.mxu2  ;;  %v4847_v33 = vpop.f32.mrf.mxu3 }
 0xb1e   : > { %5442 = vst [vmem:[#allocation5 + $0x630] sm:$0xff] %v4803_v36 }
 0xb1f   : > { %5389 = vst [vmem:[#allocation5 + $0x2d8] sm:$0xff] %v4847_v33 }
 0xb20   : > { %v4939_v1 = vpop.f32.mrf.mxu0  ;;  %v5028_v27 = vpop.f32.mrf.mxu1 }
 0xb21   : > { %5393 = vst [vmem:[#allocation5 + $0x328] sm:$0xff] %v4939_v1 }
 0xb22   : > { %5488 = vst [vmem:[#allocation6 + $0x318] sm:$0xff] %v5028_v27  ;;  %6416 = vmatmul.msk.bf16.gmra.mxu3 %vm1627_vm0, %v9899_v7  ;;  %6457 = vmatmul.msk.bf16.gmra.mxu2 %vm1627_vm0, %v9749_v50 }
 0xb23   : > { %6432 = vmatmul.msk.bf16.gmra.mxu0 %vm1627_vm0, %v9899_v7  ;;  %6448 = vmatmul.msk.bf16.gmra.mxu1 %vm1627_vm0, %v9899_v7 }
 0xb25   : > { %v4850_v10 = vpop.f32.mrf.mxu3  ;;  %v5082_v23 = vpop.f32.mrf.mxu2 }
 0xb26   : > { %5392 = vst [vmem:[#allocation5 + $0x320] sm:$0xff] %v4850_v10 }
 0xb27   : > { %5447 = vst [vmem:[#allocation6 + $0x80] sm:$0xff] %v5082_v23 }
 0xb28   : > { %v4941_v21 = vpop.f32.mrf.mxu0  ;;  %v5030_v35 = vpop.f32.mrf.mxu1 }
 0xb29   : > { %5396 = vst [vmem:[#allocation5 + $0x340] sm:$0xff] %v4941_v21 }
 0xb2a   : > { %5491 = vst [vmem:[#allocation6 + $0x330] sm:$0xff] %v5030_v35 }
 0xb2d   : > { %v4852_v62 = vpop.f32.mrf.mxu3  ;;  %v5084_v34 = vpop.f32.mrf.mxu2 }
 0xb2e   : > { %5395 = vst [vmem:[#allocation5 + $0x338] sm:$0xff] %v4852_v62 }
 0xb2f   : > { %5450 = vst [vmem:[#allocation6 + $0x98] sm:$0xff] %v5084_v34 }
 0xb30   : > { %v4944_v9 = vpop.f32.mrf.mxu0  ;;  %v5033_v25 = vpop.f32.mrf.mxu1 }
 0xb31   : > { %5399 = vst [vmem:[#allocation5 + $0x388] sm:$0xff] %v4944_v9 }
 0xb32   : > { %5494 = vst [vmem:[#allocation6 + $0x378] sm:$0xff] %v5033_v25  ;;  %6458 = vmatmul.msk.bf16.gmra.mxu2 %vm1627_vm0, %v9761_v16  ;;  %6465 = vmatmul.msk.bf16.vlgmr.msrb.gmra.mxu3 %vm1627_vm0, %v9591_v39 }
 0xb35   : > { %v4855_v56 = vpop.f32.mrf.mxu3  ;;  %v5087_v5 = vpop.f32.mrf.mxu2 }
 0xb36   : > { %5398 = vst [vmem:[#allocation5 + $0x380] sm:$0xff] %v4855_v56 }
 0xb37   : > { %5453 = vst [vmem:[#allocation6 + $0xe0] sm:$0xff] %v5087_v5 }
 0xb38   : > { %v4946_v55 = vpop.f32.mrf.mxu0  ;;  %v5035_v20 = vpop.f32.mrf.mxu1 }
 0xb39   : > { %5402 = vst [vmem:[#allocation5 + $0x3a0] sm:$0xff] %v4946_v55 }
 0xb3a   : > { %5497 = vst [vmem:[#allocation6 + $0x390] sm:$0xff] %v5035_v20 }
 0xb3d   : > { %v4857_v4 = vpop.f32.mrf.mxu3  ;;  %v5089_v13 = vpop.f32.mrf.mxu2 }
 0xb3e   : > { %5401 = vst [vmem:[#allocation5 + $0x398] sm:$0xff] %v4857_v4 }
 0xb3f   : > { %5456 = vst [vmem:[#allocation6 + $0xf8] sm:$0xff] %v5089_v13 }
 0xb40   : > { %v4949_v54 = vpop.f32.mrf.mxu0  ;;  %v5038_v60 = vpop.f32.mrf.mxu1 }
 0xb41   : > { %5405 = vst [vmem:[#allocation5 + $0x3e8] sm:$0xff] %v4949_v54 }
 0xb42   : > { %5500 = vst [vmem:[#allocation6 + $0x3d8] sm:$0xff] %v5038_v60  ;;  %6459 = vmatmul.msk.bf16.gmra.mxu2 %vm1627_vm0, %v9773_v12  ;;  %6466 = vmatmul.msk.bf16.gmra.mxu3 %vm1627_vm0, %v9605_v46 }
 0xb45   : > { %v4860_v39 = vpop.f32.mrf.mxu3  ;;  %v5092_v11 = vpop.f32.mrf.mxu2 }
 0xb46   : > { %5404 = vst [vmem:[#allocation5 + $0x3e0] sm:$0xff] %v4860_v39 }
 0xb47   : > { %5459 = vst [vmem:[#allocation6 + $0x140] sm:$0xff] %v5092_v11 }
 0xb48   : > { %v4951_v41 = vpop.f32.mrf.mxu0  ;;  %v5040_v8 = vpop.f32.mrf.mxu1 }
 0xb49   : > { %5408 = vst [vmem:[#allocation5 + $0x400] sm:$0xff] %v4951_v41 }
 0xb4a   : > { %5503 = vst [vmem:[#allocation6 + $0x3f0] sm:$0xff] %v5040_v8 }
 0xb4d   : > { %v4862_v26 = vpop.f32.mrf.mxu3  ;;  %v5094_v30 = vpop.f32.mrf.mxu2 }
 0xb4e   : > { %5407 = vst [vmem:[#allocation5 + $0x3f8] sm:$0xff] %v4862_v26 }
 0xb4f   : > { %5462 = vst [vmem:[#allocation6 + $0x158] sm:$0xff] %v5094_v30 }
 0xb50   : > { %v4954_v17 = vpop.f32.mrf.mxu0  ;;  %v5043_v31 = vpop.f32.mrf.mxu1 }
 0xb51   : > { %5411 = vst [vmem:[#allocation5 + $0x448] sm:$0xff] %v4954_v17 }
 0xb52   : > { %5506 = vst [vmem:[#allocation6 + $0x438] sm:$0xff] %v5043_v31  ;;  %6460 = vmatmul.msk.bf16.gmra.mxu2 %vm1627_vm0, %v9791_v53  ;;  %6467 = vmatmul.msk.bf16.gmra.mxu3 %vm1627_vm0, %v9617_v32 }
 0xb55   : > { %v4865_v46 = vpop.f32.mrf.mxu3  ;;  %v5097_v45 = vpop.f32.mrf.mxu2 }
 0xb56   : > { %5410 = vst [vmem:[#allocation5 + $0x440] sm:$0xff] %v4865_v46 }
 0xb57   : > { %5465 = vst [vmem:[#allocation6 + $0x1a0] sm:$0xff] %v5097_v45 }
 0xb58   : > { %v4956_v2 = vpop.f32.mrf.mxu0  ;;  %v5045_v3 = vpop.f32.mrf.mxu1 }
 0xb59   : > { %5414 = vst [vmem:[#allocation5 + $0x460] sm:$0xff] %v4956_v2 }
 0xb5a   : > { %5509 = vst [vmem:[#allocation6 + $0x450] sm:$0xff] %v5045_v3 }
 0xb5d   : > { %v4867_v49 = vpop.f32.mrf.mxu3  ;;  %v5099_v59 = vpop.f32.mrf.mxu2 }
 0xb5e   : > { %5413 = vst [vmem:[#allocation5 + $0x458] sm:$0xff] %v4867_v49 }
 0xb5f   : > { %5468 = vst [vmem:[#allocation6 + $0x1b8] sm:$0xff] %v5099_v59 }
 0xb60   : > { %v4959_v58 = vpop.f32.mrf.mxu0  ;;  %v5048_v57 = vpop.f32.mrf.mxu1 }
 0xb61   : > { %5417 = vst [vmem:[#allocation5 + $0x4a8] sm:$0xff] %v4959_v58 }
 0xb62   : > { %5512 = vst [vmem:[#allocation6 + $0x498] sm:$0xff] %v5048_v57  ;;  %6461 = vmatmul.msk.bf16.gmra.mxu2 %vm1627_vm0, %v9803_v19  ;;  %6468 = vmatmul.msk.bf16.gmra.mxu3 %vm1627_vm0, %v9642_v61 }
 0xb65   : > { %v4870_v32 = vpop.f32.mrf.mxu3  ;;  %v5102_v52 = vpop.f32.mrf.mxu2 }
 0xb66   : > { %5416 = vst [vmem:[#allocation5 + $0x4a0] sm:$0xff] %v4870_v32 }
 0xb67   : > { %5471 = vst [vmem:[#allocation6 + $0x200] sm:$0xff] %v5102_v52 }
 0xb68   : > { %v4961_v37 = vpop.f32.mrf.mxu0  ;;  %v5050_v51 = vpop.f32.mrf.mxu1 }
 0xb69   : > { %5420 = vst [vmem:[#allocation5 + $0x4c0] sm:$0xff] %v4961_v37 }
 0xb6a   : > { %5515 = vst [vmem:[#allocation6 + $0x4b0] sm:$0xff] %v5050_v51 }
 0xb6d   : > { %v4872_v14 = vpop.f32.mrf.mxu3  ;;  %v5104_v6 = vpop.f32.mrf.mxu2 }
 0xb6e   : > { %5419 = vst [vmem:[#allocation5 + $0x4b8] sm:$0xff] %v4872_v14 }
 0xb6f   : > { %5474 = vst [vmem:[#allocation6 + $0x218] sm:$0xff] %v5104_v6 }
 0xb70   : > { %v4964_v28 = vpop.f32.mrf.mxu0  ;;  %v5053_v15 = vpop.f32.mrf.mxu1 }
 0xb71   : > { %5423 = vst [vmem:[#allocation5 + $0x508] sm:$0xff] %v4964_v28 }
 0xb72   : > { %5518 = vst [vmem:[#allocation6 + $0x4f8] sm:$0xff] %v5053_v15  ;;  %6462 = vmatmul.msk.bf16.gmra.mxu2 %vm1627_vm0, %v9815_v48  ;;  %6469 = vmatmul.msk.bf16.gmra.mxu3 %vm1627_vm0, %v9655_v47 }
 0xb75   : > { %v4875_v61 = vpop.f32.mrf.mxu3  ;;  %v5107_v38 = vpop.f32.mrf.mxu2 }
 0xb76   : > { %5422 = vst [vmem:[#allocation5 + $0x500] sm:$0xff] %v4875_v61 }
 0xb77   : > { %5477 = vst [vmem:[#allocation6 + $0x260] sm:$0xff] %v5107_v38 }
 0xb78   : > { %v4966_v44 = vpop.f32.mrf.mxu0  ;;  %v5055_v18 = vpop.f32.mrf.mxu1 }
 0xb79   : > { %5426 = vst [vmem:[#allocation5 + $0x520] sm:$0xff] %v4966_v44 }
 0xb7a   : > { %5521 = vst [vmem:[#allocation6 + $0x510] sm:$0xff] %v5055_v18 }
 0xb7d   : > { %v4877_v0 = vpop.f32.mrf.mxu3  ;;  %v5109_v40 = vpop.f32.mrf.mxu2 }
 0xb7e   : > { %5425 = vst [vmem:[#allocation5 + $0x518] sm:$0xff] %v4877_v0 }
 0xb7f   : > { %5480 = vst [vmem:[#allocation6 + $0x278] sm:$0xff] %v5109_v40 }
 0xb80   : > { %v4969_v63 = vpop.f32.mrf.mxu0  ;;  %v5058_v43 = vpop.f32.mrf.mxu1 }
 0xb81   : > { %5429 = vst [vmem:[#allocation5 + $0x568] sm:$0xff] %v4969_v63 }
 0xb82   : > { %5524 = vst [vmem:[#allocation6 + $0x558] sm:$0xff] %v5058_v43  ;;  %6463 = vmatmul.msk.bf16.gmra.mxu2 %vm1627_vm0, %v9875_v29  ;;  %6470 = vmatmul.msk.bf16.gmra.mxu3 %vm1627_vm0, %v9668_v42 }
 0xb85   : > { %v4880_v47 = vpop.f32.mrf.mxu3  ;;  %v5112_v36 = vpop.f32.mrf.mxu2 }
 0xb86   : > { %5428 = vst [vmem:[#allocation5 + $0x560] sm:$0xff] %v4880_v47  ;;  %v10119_v47 = vld [vmem:[#allocation22] sm:$0x1] }
 0xb87   : > { %5483 = vst [vmem:[#allocation6 + $0x2c0] sm:$0xff] %v5112_v36  ;;  %v10121_v36 = vld [vmem:[#allocation24] sm:$0x1] }
 0xb88   : > { %v4971_v33 = vpop.f32.mrf.mxu0  ;;  %v5060_v1 = vpop.f32.mrf.mxu1 }
 0xb89   : > { %5432 = vst [vmem:[#allocation5 + $0x580] sm:$0xff] %v4971_v33 }
 0xb8a   : > { %5527 = vst [vmem:[#allocation6 + $0x570] sm:$0xff] %v5060_v1 }
 0xb8d   : > { %v4882_v27 = vpop.f32.mrf.mxu3  ;;  %v5114_v10 = vpop.f32.mrf.mxu2 }
 0xb8e   : > { %5431 = vst [vmem:[#allocation5 + $0x578] sm:$0xff] %v4882_v27 }
 0xb8f   : > { %5486 = vst [vmem:[#allocation6 + $0x2d8] sm:$0xff] %v5114_v10 }
 0xb90   : > { %v4974_v23 = vpop.f32.mrf.mxu0  ;;  %v5063_v21 = vpop.f32.mrf.mxu1 }
 0xb91   : > { %5435 = vst [vmem:[#allocation5 + $0x5c8] sm:$0xff] %v4974_v23 }
 0xb92   : > { %5530 = vst [vmem:[#allocation6 + $0x5b8] sm:$0xff] %v5063_v21  ;;  %6464 = vmatmul.msk.bf16.gmra.mxu2 %vm1627_vm0, %v9899_v7  ;;  %6471 = vmatmul.msk.bf16.gmra.mxu3 %vm1627_vm0, %v9720_v24 }
 0xb95   : > { %v4885_v42 = vpop.f32.mrf.mxu3  ;;  %v5117_v35 = vpop.f32.mrf.mxu2 }
 0xb96   : > { %5434 = vst [vmem:[#allocation5 + $0x5c0] sm:$0xff] %v4885_v42 }
 0xb97   : > { %5489 = vst [vmem:[#allocation6 + $0x320] sm:$0xff] %v5117_v35 }
 0xb98   : > { %v4976_v62 = vpop.f32.mrf.mxu0  ;;  %v5065_v34 = vpop.f32.mrf.mxu1 }
 0xb99   : > { %5438 = vst [vmem:[#allocation5 + $0x5e0] sm:$0xff] %v4976_v62 }
 0xb9a   : > { %5533 = vst [vmem:[#allocation6 + $0x5d0] sm:$0xff] %v5065_v34 }
 0xb9d   : > { %v4887_v9 = vpop.f32.mrf.mxu3  ;;  %v5119_v25 = vpop.f32.mrf.mxu2 }
 0xb9e   : > { %5437 = vst [vmem:[#allocation5 + $0x5d8] sm:$0xff] %v4887_v9 }
 0xb9f   : > { %5492 = vst [vmem:[#allocation6 + $0x338] sm:$0xff] %v5119_v25 }
 0xba0   : > { %v4979_v56 = vpop.f32.mrf.mxu0  ;;  %v5068_v5 = vpop.f32.mrf.mxu1 }
 0xba1   : > { %5441 = vst [vmem:[#allocation5 + $0x628] sm:$0xff] %v4979_v56 }
 0xba2   : > { %5536 = vst [vmem:[#allocation6 + $0x618] sm:$0xff] %v5068_v5  ;;  %6472 = vmatmul.msk.bf16.gmra.mxu3 %vm1627_vm0, %v9737_v22 }
 0xba5   : > { %v4890_v24 = vpop.f32.mrf.mxu3  ;;  %v5122_v55 = vpop.f32.mrf.mxu2 }
 0xba6   : > { %5440 = vst [vmem:[#allocation5 + $0x620] sm:$0xff] %v4890_v24 }
 0xba7   : > { %5495 = vst [vmem:[#allocation6 + $0x380] sm:$0xff] %v5122_v55 }
 0xba8   : > { %v4981_v20 = vpop.f32.mrf.mxu0  ;;  %v5070_v4 = vpop.f32.mrf.mxu1 }
 0xba9   : > { %5444 = vst [vmem:[#allocation5 + $0x640] sm:$0xff] %v4981_v20 }
 0xbaa   : > { %5539 = vst [vmem:[#allocation6 + $0x630] sm:$0xff] %v5070_v4 }
 0xbad   : > { %v4892_v13 = vpop.f32.mrf.mxu3  ;;  %v5124_v54 = vpop.f32.mrf.mxu2 }
 0xbae   : > { %5443 = vst [vmem:[#allocation5 + $0x638] sm:$0xff] %v4892_v13 }
 0xbaf   : > { %5498 = vst [vmem:[#allocation6 + $0x398] sm:$0xff] %v5124_v54 }
 0xbb2   : > { %6473 = vmatmul.msk.bf16.gmra.mxu3 %vm1627_vm0, %v9749_v50 }
 0xbb5   : > { %v5127_v60 = vpop.f32.mrf.mxu2  ;;  %v5171_v39 = vpop.f32.mrf.mxu3 }
 0xbb6   : > { %5501 = vst [vmem:[#allocation6 + $0x3e0] sm:$0xff] %v5127_v60 }
 0xbb7   : > { %5448 = vst [vmem:[#allocation6 + $0x88] sm:$0xff] %v5171_v39 }
 0xbbd   : > { %v5129_v22 = vpop.f32.mrf.mxu2  ;;  %v5173_v11 = vpop.f32.mrf.mxu3 }
 0xbbe   : > { %5504 = vst [vmem:[#allocation6 + $0x3f8] sm:$0xff] %v5129_v22 }
 0xbbf   : > { %5451 = vst [vmem:[#allocation6 + $0xa0] sm:$0xff] %v5173_v11 }
 0xbc2   : > { %6474 = vmatmul.msk.bf16.gmra.mxu3 %vm1627_vm0, %v9761_v16 }
 0xbc5   : > { %v5132_v41 = vpop.f32.mrf.mxu2  ;;  %v5176_v8 = vpop.f32.mrf.mxu3 }
 0xbc6   : > { %5507 = vst [vmem:[#allocation6 + $0x440] sm:$0xff] %v5132_v41 }
 0xbc7   : > { %5454 = vst [vmem:[#allocation6 + $0xe8] sm:$0xff] %v5176_v8 }
 0xbcd   : > { %v5134_v26 = vpop.f32.mrf.mxu2  ;;  %v5178_v30 = vpop.f32.mrf.mxu3 }
 0xbce   : > { %5510 = vst [vmem:[#allocation6 + $0x458] sm:$0xff] %v5134_v26 }
 0xbcf   : > { %5457 = vst [vmem:[#allocation6 + $0x100] sm:$0xff] %v5178_v30 }
 0xbd2   : > { %6475 = vmatmul.msk.bf16.gmra.mxu3 %vm1627_vm0, %v9773_v12 }
 0xbd5   : > { %v5137_v50 = vpop.f32.mrf.mxu2  ;;  %v5181_v17 = vpop.f32.mrf.mxu3 }
 0xbd6   : > { %5513 = vst [vmem:[#allocation6 + $0x4a0] sm:$0xff] %v5137_v50 }
 0xbd7   : > { %5460 = vst [vmem:[#allocation6 + $0x148] sm:$0xff] %v5181_v17 }
 0xbdd   : > { %v5139_v31 = vpop.f32.mrf.mxu2  ;;  %v5183_v46 = vpop.f32.mrf.mxu3 }
 0xbde   : > { %5516 = vst [vmem:[#allocation6 + $0x4b8] sm:$0xff] %v5139_v31 }
 0xbdf   : > { %5463 = vst [vmem:[#allocation6 + $0x160] sm:$0xff] %v5183_v46 }
 0xbe2   : > { %6476 = vmatmul.msk.bf16.gmra.mxu3 %vm1627_vm0, %v9791_v53 }
 0xbe5   : > { %v5142_v16 = vpop.f32.mrf.mxu2  ;;  %v5186_v45 = vpop.f32.mrf.mxu3 }
 0xbe6   : > { %5519 = vst [vmem:[#allocation6 + $0x500] sm:$0xff] %v5142_v16 }
 0xbe7   : > { %5466 = vst [vmem:[#allocation6 + $0x1a8] sm:$0xff] %v5186_v45 }
 0xbed   : > { %v5144_v2 = vpop.f32.mrf.mxu2  ;;  %v5188_v3 = vpop.f32.mrf.mxu3 }
 0xbee   : > { %5522 = vst [vmem:[#allocation6 + $0x518] sm:$0xff] %v5144_v2 }
 0xbef   : > { %5469 = vst [vmem:[#allocation6 + $0x1c0] sm:$0xff] %v5188_v3 }
 0xbf2   : > { %6477 = vmatmul.msk.bf16.gmra.mxu3 %vm1627_vm0, %v9803_v19 }
 0xbf5   : > { %v5147_v12 = vpop.f32.mrf.mxu2  ;;  %v5191_v49 = vpop.f32.mrf.mxu3 }
 0xbf6   : > { %5525 = vst [vmem:[#allocation6 + $0x560] sm:$0xff] %v5147_v12 }
 0xbf7   : > { %5472 = vst [vmem:[#allocation6 + $0x208] sm:$0xff] %v5191_v49 }
 0xbfd   : > { %v5149_v59 = vpop.f32.mrf.mxu2  ;;  %v5193_v58 = vpop.f32.mrf.mxu3 }
 0xbfe   : > { %5528 = vst [vmem:[#allocation6 + $0x578] sm:$0xff] %v5149_v59 }
 0xbff   : > { %5475 = vst [vmem:[#allocation6 + $0x220] sm:$0xff] %v5193_v58 }
 0xc02   : > { %6478 = vmatmul.msk.bf16.gmra.mxu3 %vm1627_vm0, %v9815_v48 }
 0xc05   : > { %v5152_v53 = vpop.f32.mrf.mxu2  ;;  %v5196_v57 = vpop.f32.mrf.mxu3 }
 0xc06   : > { %5531 = vst [vmem:[#allocation6 + $0x5c0] sm:$0xff] %v5152_v53 }
 0xc07   : > { %5478 = vst [vmem:[#allocation6 + $0x268] sm:$0xff] %v5196_v57 }
 0xc0d   : > { %v5154_v32 = vpop.f32.mrf.mxu2  ;;  %v5198_v52 = vpop.f32.mrf.mxu3 }
 0xc0e   : > { %5534 = vst [vmem:[#allocation6 + $0x5d8] sm:$0xff] %v5154_v32 }
 0xc0f   : > { %5481 = vst [vmem:[#allocation6 + $0x280] sm:$0xff] %v5198_v52 }
 0xc12   : > { %6479 = vmatmul.msk.bf16.gmra.mxu3 %vm1627_vm0, %v9875_v29 }
 0xc15   : > { %v5157_v19 = vpop.f32.mrf.mxu2  ;;  %v5201_v37 = vpop.f32.mrf.mxu3 }
 0xc16   : > { %5537 = vst [vmem:[#allocation6 + $0x620] sm:$0xff] %v5157_v19 }
 0xc17   : > { %5484 = vst [vmem:[#allocation6 + $0x2c8] sm:$0xff] %v5201_v37 }
 0xc1d   : > { %v5159_v51 = vpop.f32.mrf.mxu2  ;;  %v5203_v14 = vpop.f32.mrf.mxu3 }
 0xc1e   : > { %5540 = vst [vmem:[#allocation6 + $0x638] sm:$0xff] %v5159_v51 }
 0xc1f   : > { %5487 = vst [vmem:[#allocation6 + $0x2e0] sm:$0xff] %v5203_v14 }
 0xc22   : > { %6480 = vmatmul.msk.bf16.gmra.mxu3 %vm1627_vm0, %v9899_v7 }
 0xc25   : > { %v5206_v48 = vpop.f32.mrf.mxu3 }
 0xc26   : > { %5490 = vst [vmem:[#allocation6 + $0x328] sm:$0xff] %v5206_v48 }
 0xc2d   : > { %v5208_v6 = vpop.f32.mrf.mxu3 }
 0xc2e   : > { %5493 = vst [vmem:[#allocation6 + $0x340] sm:$0xff] %v5208_v6 }
 0xc35   : > { %v5211_v28 = vpop.f32.mrf.mxu3 }
 0xc36   : > { %5496 = vst [vmem:[#allocation6 + $0x388] sm:$0xff] %v5211_v28 }
 0xc3d   : > { %v5213_v15 = vpop.f32.mrf.mxu3 }
 0xc3e   : > { %5499 = vst [vmem:[#allocation6 + $0x3a0] sm:$0xff] %v5213_v15 }
 0xc45   : > { %v5216_v29 = vpop.f32.mrf.mxu3 }
 0xc46   : > { %5502 = vst [vmem:[#allocation6 + $0x3e8] sm:$0xff] %v5216_v29 }
 0xc4d   : > { %v5218_v61 = vpop.f32.mrf.mxu3 }
 0xc4e   : > { %5505 = vst [vmem:[#allocation6 + $0x400] sm:$0xff] %v5218_v61 }
 0xc55   : > { %v5221_v38 = vpop.f32.mrf.mxu3 }
 0xc56   : > { %5508 = vst [vmem:[#allocation6 + $0x448] sm:$0xff] %v5221_v38 }
 0xc5d   : > { %v5223_v44 = vpop.f32.mrf.mxu3 }
 0xc5e   : > { %5511 = vst [vmem:[#allocation6 + $0x460] sm:$0xff] %v5223_v44 }
 0xc65   : > { %v5226_v18 = vpop.f32.mrf.mxu3 }
 0xc66   : > { %5514 = vst [vmem:[#allocation6 + $0x4a8] sm:$0xff] %v5226_v18 }
 0xc6d   : > { %v5228_v0 = vpop.f32.mrf.mxu3 }
 0xc6e   : > { %5517 = vst [vmem:[#allocation6 + $0x4c0] sm:$0xff] %v5228_v0 }
 0xc75   : > { %v5231_v7 = vpop.f32.mrf.mxu3 }
 0xc76   : > { %5520 = vst [vmem:[#allocation6 + $0x508] sm:$0xff] %v5231_v7 }
 0xc7d   : > { %v5233_v40 = vpop.f32.mrf.mxu3 }
 0xc7e   : > { %5523 = vst [vmem:[#allocation6 + $0x520] sm:$0xff] %v5233_v40 }
 0xc85   : > { %v5236_v63 = vpop.f32.mrf.mxu3 }
 0xc86   : > { %5526 = vst [vmem:[#allocation6 + $0x568] sm:$0xff] %v5236_v63 }
 0xc8d   : > { %v5238_v43 = vpop.f32.mrf.mxu3 }
 0xc8e   : > { %5529 = vst [vmem:[#allocation6 + $0x580] sm:$0xff] %v5238_v43 }
 0xc95   : > { %v5241_v33 = vpop.f32.mrf.mxu3 }
 0xc96   : > { %5532 = vst [vmem:[#allocation6 + $0x5c8] sm:$0xff] %v5241_v33 }
 0xc9d   : > { %v5243_v1 = vpop.f32.mrf.mxu3 }
 0xc9e   : > { %5535 = vst [vmem:[#allocation6 + $0x5e0] sm:$0xff] %v5243_v1 }
 0xca5   : > { %v5246_v27 = vpop.f32.mrf.mxu3 }
 0xca6   : > { %5538 = vst [vmem:[#allocation6 + $0x628] sm:$0xff] %v5246_v27 }
 0xcad   : > { %v5248_v10 = vpop.f32.mrf.mxu3 }
 0xcae   : > { %5541 = vst [vmem:[#allocation6 + $0x640] sm:$0xff] %v5248_v10 }
 0xcaf LB: >> { %s6568_s8 = smul.u32 96, %s7189_s13  ;;  %v5669_v1 = vperm.slane %v10119_v47, 0  ;;  %s6498_s20 = sshll.u32 %s7189_s13, 4  ;;  %s7189_s13 = sphi %s10123_s13, %s5549_s13  }
 0xcb0   : >> { %s5696_s29 = scalar_lea.vmem %s732_s19, %s6498_s20 [#allocation25]  ;;  %s5549_s13 = sadd.s32 1, %s7189_s13  }
 0xcb1   : >> { %s5552_s21 = scalar_lea.vmem [#allocation4], %s6568_s8  ;;  %s10129_s4 = scalar_lea.vmem [#allocation5], %s6568_s8 }
 0xcb2   : >> { %v5553_v23 = vld [vmem:[%s5552_s21] sm:$0xff]  ;;  %v5556_v42 = vld [vmem:[%s5552_s21 + $0x28] sm:$0xff]  ;;  %v5558_v35 = vld [vmem:[%s5552_s21 + $0x38] sm:$0xff]  ;;  %s10137_s1 = scalar_lea.vmem [#allocation6], %s6568_s8  ;;  %p5546_p2 = scmp.ge.s32.totalorder %s5549_s13, 16  }
 0xcb3   : >> { %v5555_v21 = vld [vmem:[%s5552_s21 + $0x20] sm:$0xff]  ;;  %v5577_v34 = vrot.slane %v5556_v42, 2  ;;  %v5565_v25 = vrot.slane %v5558_v35, 1  ;;  %v6485_v5 = vld [vmem:[%s10129_s4 + $0x88] sm:$0xff]  ;;  %v5554_v24 = vld [vmem:[%s5552_s21 + $0x18] sm:$0xff]  ;;  %s6569_s30 = sshll.u32 (%p5546_p2), %s7328_s0, 8 }
 0xcb4   : >> { %v5564_v62 = vrot.slane %v5555_v21, 1  ;;  %v6484_v9 = vld [vmem:[%s10129_s4 + $0x80] sm:$0xff]  ;;  %v6487_v60 = vld [vmem:[%s10129_s4 + $0x98] sm:$0xff]  ;;  %v5617_v26 = vrot.slane %v6485_v5, 2  ;;  %v5557_v31 = vld [vmem:[%s5552_s21 + $0x30] sm:$0xff]  ;;  %s10332_s10 = sld [smem:[#allocation62_spill]] (%p5546_p2) }
 0xcb5   : >> { %v5559_v55 = vld [vmem:[%s5552_s21 + $0x40] sm:$0xff]  ;;  %v5605_v4 = vrot.slane %v6484_v9, 1  ;;  %v5606_v8 = vrot.slane %v6487_v60, 1  ;;  %v6483_v50 = vld [vmem:[%s10129_s4 + $0x78] sm:$0xff]  ;;  %v5572_v49 = vadd.f32 %v5565_v25, %v5557_v31  ;;  %v6493_v53 = vld [vmem:[%s10137_s1 + $0xe8] sm:$0xff]  ;;  %s5713_s18 = sshll.u32 (%p5546_p2), %s732_s19, 4  ;;  %s5714_s18 = int_to_ptr.vmem [resolvable:$true] %s5713_s18 }
 0xcb6   : >> { %v5570_v56 = vadd.f32 %v5564_v62, %v5553_v23  ;;  %v6482_v20 = vld [vmem:[%s10129_s4 + $0x60] sm:$0xff]  ;;  %v5566_v13 = vsel %vm1835_vm1, %v5564_v62, %v5565_v25  ;;  %v5578_v54 = vrot.slane %v5559_v55, 2  ;;  %v5560_v46 = vld [vmem:[%s5552_s21 + $0x58] sm:$0x1]  ;;  %v6486_v48 = vld [vmem:[%s10129_s4 + $0x90] sm:$0xff]  ;;  %v5657_v61 = vrot.slane %v6493_v53, 2 }
 0xcb7   : >> { %v6488_v39 = vld [vmem:[%s10129_s4 + $0xa0] sm:$0xff]  ;;  %v5571_v41 = vadd.f32 %v5566_v13, %v5554_v24  ;;  %v6495_v2 = vld [vmem:[%s10137_s1 + $0xf8] sm:$0xff]  ;;  %v5607_v12 = vsel %vm1835_vm1, %v5605_v4, %v5606_v8  ;;  %v5580_v59 = vrot.slane %v5560_v46, 2  ;;  %v6494_v21 = vld [vmem:[%s10137_s1 + $0xf0] sm:$0xff]  ;;  %v5675_v62 = vperm.slane %v10121_v36, 0  ;;  %s5701_s8 = scalar_lea.sflag (%p5546_p2), [#allocation9], %s730_s23 }
 0xcb8   : >> { %v5585_v22 = vadd.f32 %v5577_v34, %v5570_v56  ;;  %v6492_v11 = vld [vmem:[%s10137_s1 + $0xe0] sm:$0xff]  ;;  %v5579_v30 = vsel %vm1854_vm2, %v5577_v34, %v5578_v54  ;;  %v5618_v17 = vrot.slane %v6488_v39, 2  ;;  %v6489_v3 = vld [vmem:[%s10129_s4 + $0xb8] sm:$0x1]  ;;  %v5646_v51 = vrot.slane %v6495_v2, 1 }
 0xcb9   : >> { %v5586_v45 = vadd.f32 %v5579_v30, %v5571_v41  ;;  %v5645_v57 = vrot.slane %v6492_v11, 1  ;;  %v6496_v52 = vld [vmem:[%s10137_s1 + $0x100] sm:$0xff]  ;;  %v5581_v14 = vsel %vm1854_vm2, %v5578_v54, %v5580_v59  ;;  %v5620_v6 = vrot.slane %v6489_v3, 2  ;;  %v6491_v38 = vld [vmem:[%s10137_s1 + $0xd8] sm:$0xff] }
 0xcba   : >> { %v5600_v16 = vadd.f32 %v6482_v20, %v5585_v22  ;;  %v6490_v19 = vld [vmem:[%s10137_s1 + $0xc0] sm:$0xff]  ;;  %v5619_v37 = vsel %vm1854_vm2, %v5617_v26, %v5618_v17  ;;  %v5587_v29 = vadd.f32 %v5581_v14, %v5572_v49  ;;  %v5658_v44 = vrot.slane %v6496_v52, 2  ;;  %v6497_v40 = vld [vmem:[%s10137_s1 + $0x118] sm:$0x1]  ;;  %s5712_s25 = scalar_lea.hbm (%p5546_p2), %s10332_s10, %s6569_s30  ;;  %s7107_s1 = scalar_lea.hbm (%p5546_p2), %s10332_s10, 512 }
 0xcbb   : >> { %v5601_v32 = vadd.f32 %v6483_v50, %v5586_v45  ;;  %v5647_v63 = vsel %vm1835_vm1, %v5645_v57, %v5646_v51  ;;  %v5621_v43 = vsel %vm1854_vm2, %v5618_v17, %v5620_v6  ;;  %v5660_v42 = vrot.slane %v6497_v40, 2  ;;  %s5715_s27 = sshll.u32 (%p5546_p2), %s5712_s25, 4  ;;  %s5716_s27 = int_to_ptr.hbm [resolvable:$true] %s5715_s27 }
 0xcbc   : >> { %v5611_v58 = vadd.f32 %v5605_v4, %v5600_v16  ;;  %v5602_v7 = vadd.f32 %v6486_v48, %v5587_v29  ;;  %v5659_v23 = vsel %vm1854_vm2, %v5657_v61, %v5658_v44  ;;  %s7101_s21 = sshra.s32 (%p5546_p2), %s5716_s27, 4  ;;  %s7102_s21 = int_to_ptr.hbm [resolvable:$true] %s7101_s21 }
 0xcbd   : >> { %v5612_v15 = vadd.f32 %v5607_v12, %v5601_v32  ;;  %v5661_v24 = vsel %vm1854_vm2, %v5658_v44, %v5660_v42  ;;  %s7103_s13 = scalar_lea.hbm (%p5546_p2), %s7102_s21, 256  ;;  %p7108_p8 = scmp.lt.s32.totalorder (%p5546_p2), %s7102_s21, %s10332_s10 }
 0xcbe   : >> { %v5625_v28 = vadd.f32 %v5617_v26, %v5611_v58  ;;  %v5613_v10 = vadd.f32 %v5606_v8, %v5602_v7  ;;  %p7104_p3 = scmp.ne.s32.totalorder (%p5546_p2), %s7102_s21, %s7103_s13  ;;  %p7109_p9 = scmp.lt.s32.totalorder (%p5546_p2), %s7107_s1, %s7103_s13 }
 0xcbf   : >> { %v5626_v0 = vadd.f32 %v5619_v37, %v5612_v15 }
 0xcc0   : >> { %v5640_v18 = vadd.f32 %v6490_v19, %v5625_v28  ;;  %v5627_v9 = vadd.f32 %v5621_v43, %v5613_v10  ;;  %p7105_p4 = pnand (%p5546_p2), %p7104_p3, %p7345_p5  ;;  %p7110_p10 = por (%p5546_p2), %p7109_p9, %p7108_p8 }
 0xcc1   : >> { %v5641_v27 = vadd.f32 %v6491_v38, %v5626_v0 }
 0xcc2   : >> { %v5651_v33 = vadd.f32 %v5645_v57, %v5640_v18  ;;  %v5642_v5 = vadd.f32 %v6494_v21, %v5627_v9  ;;  %p7106_p7 = pneg (%p5546_p2), %p7105_p4 }
 0xcc3   : >> { %v5652_v34 = vadd.f32 %v5647_v63, %v5641_v27 }
 0xcc4   : >> { %v5665_v35 = vadd.f32 %v5657_v61, %v5651_v33  ;;  %v5653_v4 = vadd.f32 %v5646_v51, %v5642_v5  ;;  %p7111_p11 = pnand (%p5546_p2), %p7110_p10, %p7106_p7 }
 0xcc5   : >> { %v5666_v56 = vadd.f32 %v5659_v23, %v5652_v34 }
 0xcc6   : >> { %v5671_v25 = vmul.f32 %v5669_v1, %v5665_v35  ;;  %v5667_v60 = vadd.f32 %v5661_v24, %v5653_v4 }
 0xcc7   : >> { %v5672_v20 = vmul.f32 %v5669_v1, %v5666_v56 }
 0xcc8   : >> { %v5677_v55 = vadd.f32 %v5675_v62, %v5671_v25  ;;  %v5673_v11 = vmul.f32 %v5669_v1, %v5667_v60 }
 0xcc9   : >> { %v5678_v54 = vadd.f32 %v5675_v62, %v5672_v20 }
 0xcca   : >> { %v5680_v13 = vadd.f32 3.0, %v5677_v55  ;;  %v5679_v26 = vadd.f32 %v5675_v62, %v5673_v11 }
 0xccb   : >> { %v5681_v22 = vadd.f32 3.0, %v5678_v54 }
 0xccc   : >> { %v5683_v39 = vmax.f32 %v5680_v13, 0.0  ;;  %v5682_v17 = vadd.f32 3.0, %v5679_v26 }
 0xccd   : >> { %v5684_v8 = vmax.f32 %v5681_v22, 0.0 }
 0xcce   : >> { %v5686_v41 = vmin.f32 %v5683_v39, 6.0  ;;  %v5685_v16 = vmax.f32 %v5682_v17, 0.0 }
 0xccf   : >> { %v5687_v50 = vmin.f32 %v5684_v8, 6.0 }
 0xcd0   : >> { %v5689_v30 = vmul.f32 %v5686_v41, %v5677_v55  ;;  %v5688_v2 = vmin.f32 %v5685_v16, 6.0 }
 0xcd1   : >> { %v5690_v46 = vmul.f32 %v5687_v50, %v5678_v54 }
 0xcd2   : >> { %v5692_v31 = vmul.f32 0.16666667, %v5689_v30  ;;  %v5691_v3 = vmul.f32 %v5688_v2, %v5679_v26  ;;  %5548 = sbr.rel (!%p5546_p2) target bundleno = 3247 (0xcaf), region = 217 }
 0xcd3   : >> { %v5693_v45 = vmul.f32 0.16666667, %v5690_v46 }
 0xcd4   : >> { %5697 = vst [vmem:[%s5696_s29 - $0x7] sm:$0x80] %v5692_v31  ;;  %v5694_v12 = vmul.f32 0.16666667, %v5691_v3 }
 0xcd5   : >> { %5698 = vst [vmem:[%s5696_s29 + $0x1] sm:$0xff] %v5693_v45 }
 0xcd6   : >> { %5699 = vst [vmem:[%s5696_s29 + $0x9] sm:$0x7f] %v5694_v12 }
 0xcd7   : > { %7114 = shalt.err (!%p7111_p11)
}
 0xcd8   : > { %s7210_s23 = smov 128   ;;  %s7211_s24 = smov 8  }
 0xcd9   : > { %6617 = dma.vmem_to_hbm [thread:$0]  (%p7345_p5), %s5714_s18, 4096, %s5716_s27, %s5701_s8, %s7210_s23, %s7210_s23, %s7211_s24  }
 0xcda PF: > { %s10333_s19 = sld [smem:[#allocation35_spill]] }
 0xcdb   : > { %s10334_s30 = sld [smem:[#allocation33_spill]] }
 0xce0   : > { %p6679_p12 = scmp.ge.s32.totalorder %s10333_s19, 2 }
 0xce1   : > { %s5730_s26 = sand.u32 1, %s10334_s30  }
 0xce2   : > { %p6654_p13 = pnand %p6679_p12, %p7349_p6  ;;  %s5731_s25 = scalar_lea.sflag [#allocation9], %s5730_s26 }
 0xce4   : > { %p6655_p0 = pneg %p6654_p13 }
 0xce6   : > { %7164 = dma.done.wait (%p6655_p0), %s5731_s25, 4096  }
 0xce7   : > { %7166 = vsyncadd (%p6655_p0), %s5731_s25, 4294963200  ;;  %s10336_s30 = sld [smem:[#allocation36_spill]]  ;;  %s10339_s27 = smov %s7173_s28 }
 0xce8   : > { %s10337_s21 = sld [smem:[#allocation34_spill]] }
 0xce9   : > { %s10338_s29 = sld [smem:[#allocation37_spill]] }
 0xced   : > { %p34_p1 = scmp.ge.s32.totalorder %s10336_s30, 4  }
 0xcee   : > { %s10340_s28 = smov %s10337_s21 }
 0xcef   :  { %36 = sbr.rel (!%p34_p1) target bundleno = 19 (0x13), region = 228 }
 0xcf4   :  { %5737 = vsyncpa [#allocation8], 1 }
 0xcf5   :  { %5739 = vsyncpa [#allocation8 + $0x1], 1 }
 0xcf6   :  { %5740 = vsyncpa [#allocation11], 1 }
 0xcf7   :  { %5741 = vsyncpa [#allocation14], 1 }
 0xcf8   :  { %5742 = vsyncpa [#allocation17], 1 }
 0xcf9   :  { %5743 = vsyncpa [#allocation20], 1 }
 0xcfa   :  { %5744 = vsyncpa [#allocation23], 1 }
 0xcfb   :  { %5745 = vsyncpa [#allocation9], 1 }
 0xcfc   :  { %5747 = vsyncpa [#allocation9 + $0x1], 1 }

</bundles_post_ra>
